<compile_context>
chip_gen: v6e
topology: v6e:2x2x1
jax: 0.10.0
libtpu: 0.0.40
codegen_flags: <defaults>
</compile_context>

<pallas_src>
import functools

import jax
import jax.numpy as jnp
from jax.experimental import pallas as pl
from jax.experimental.pallas import tpu as pltpu

Z_DIM = 10  # BetaVAE_B default z_dim


def _round_up(x, m):
    return ((x + m - 1) // m) * m


# ----------------------- tiled GEMM + bias + activation ---------------------

def _gemm_kernel(x_ref, w_ref, b_ref, o_ref, *, act):
    y = jnp.dot(x_ref[...], w_ref[...], preferred_element_type=jnp.float32)
    y = y + b_ref[...]
    if act == "relu":
        y = jnp.maximum(y, 0.0)
    elif act == "sigmoid":
        y = jax.nn.sigmoid(y)
    o_ref[...] = y.astype(o_ref.dtype)


def matmul_bias_act(x, w, b, act="none", out_dtype=None, tm=512):
    """act(x @ w + b).  x: (M, K), w: (K, N), b: (1, N) f32."""
    M, K = x.shape
    N = w.shape[1]
    out_dtype = out_dtype if out_dtype is not None else x.dtype
    Mr = _round_up(M, 8)
    TM = Mr if Mr <= 1024 else tm          # single tile for small M, else 512-row tiles
    Mp = _round_up(M, TM)
    if Mp != M:
        x = jnp.pad(x, ((0, Mp - M), (0, 0)))
    out = pl.pallas_call(
        functools.partial(_gemm_kernel, act=act),
        grid=(Mp // TM,),
        in_specs=[
            pl.BlockSpec((TM, K), lambda i: (i, 0)),
            pl.BlockSpec((K, N), lambda i: (0, 0)),
            pl.BlockSpec((1, N), lambda i: (0, 0)),
        ],
        out_specs=pl.BlockSpec((TM, N), lambda i: (i, 0)),
        out_shape=jax.ShapeDtypeStruct((Mp, N), out_dtype),
        compiler_params=pltpu.CompilerParams(
            dimension_semantics=("parallel",),
            vmem_limit_bytes=32 * 1024 * 1024),
    )(x, w, b)
    return out[:M] if Mp != M else out


# ----------------------- fused fully-connected kernels ----------------------

def _enc_fc_kernel(h_ref, w0, b0, w1, b1, w2m, b2m, w2l, b2l, eps_ref,
                   mu_ref, logvar_ref, z_ref):
    h = jnp.dot(h_ref[...], w0[...], preferred_element_type=jnp.float32) + b0[...]
    h = jnp.maximum(h, 0.0)
    h = jnp.dot(h, w1[...], preferred_element_type=jnp.float32) + b1[...]
    h = jnp.maximum(h, 0.0)
    mu = jnp.dot(h, w2m[...], preferred_element_type=jnp.float32) + b2m[...]
    logvar = jnp.dot(h, w2l[...], preferred_element_type=jnp.float32) + b2l[...]
    mu_ref[...] = mu
    logvar_ref[...] = logvar
    # reparametrize: z = mu + exp(logvar / 2) * eps
    z_ref[...] = mu + jnp.exp(0.5 * logvar) * eps_ref[...]


def encoder_fc_reparam(h, p, eps):
    B = h.shape[0]
    zd = eps.shape[1]
    return pl.pallas_call(
        _enc_fc_kernel,
        out_shape=(jax.ShapeDtypeStruct((B, zd), jnp.float32),
                   jax.ShapeDtypeStruct((B, zd), jnp.float32),
                   jax.ShapeDtypeStruct((B, zd), jnp.float32)),
    )(h, p["ef0_w"], p["ef0_b"], p["ef1_w"], p["ef1_b"],
      p["ef2_w_mu"], p["ef2_b_mu"], p["ef2_w_lv"], p["ef2_b_lv"], eps)


def _dec_fc_kernel(z_ref, w0, b0, w1, b1, w2, b2, o_ref):
    h = jnp.dot(z_ref[...], w0[...], preferred_element_type=jnp.float32) + b0[...]
    h = jnp.maximum(h, 0.0)
    h = jnp.dot(h, w1[...], preferred_element_type=jnp.float32) + b1[...]
    h = jnp.maximum(h, 0.0)
    h = jnp.dot(h, w2[...], preferred_element_type=jnp.float32) + b2[...]
    o_ref[...] = jnp.maximum(h, 0.0)


def decoder_fc(z, p):
    B = z.shape[0]
    return pl.pallas_call(
        _dec_fc_kernel,
        out_shape=jax.ShapeDtypeStruct((B, 32 * 4 * 4), jnp.float32),
    )(z, p["df0_w"], p["df0_b"], p["df1_w"], p["df1_b"], p["df2_w"], p["df2_b"])


# ------------------------- conv / conv-transpose ----------------------------

def _im2col(xp, k, stride):
    """xp: already-padded NHWC -> (B*Ho*Wo, k*k*C), row order (kh, kw, c)."""
    B, Hp, Wp, C = xp.shape
    Ho = (Hp - k) // stride + 1
    Wo = (Wp - k) // stride + 1
    cols = []
    for kh in range(k):
        for kw in range(k):
            cols.append(jax.lax.slice(
                xp, (0, kh, kw, 0),
                (B, kh + stride * (Ho - 1) + 1, kw + stride * (Wo - 1) + 1, C),
                (1, stride, stride, 1)))
    patches = jnp.stack(cols, axis=3)                    # (B, Ho, Wo, k*k, C)
    return patches.reshape(B * Ho * Wo, k * k * C), (B, Ho, Wo)


def conv2d(x, w_mat, b, *, k, stride, pad, cout, act, out_dtype=None):
    """x: NHWC; w_mat: GEMM-ready (k*k*Cin, Cout), row order (kh, kw, cin)."""
    xp = jnp.pad(x, ((0, 0), (pad, pad), (pad, pad), (0, 0)))
    cols, (B, Ho, Wo) = _im2col(xp, k, stride)
    y = matmul_bias_act(cols, w_mat, b, act, out_dtype=out_dtype)
    return y.reshape(B, Ho, Wo, cout)


def conv_transpose2d_s2k4p1(x, w_big, b_big, *, cout, act, out_dtype=None):
    """ConvTranspose2d(Cin, Cout, 4, stride=2, pad=1) via 4-phase decomposition.

    x: NHWC (B, H, W, Cin).  w_big: (2*2*Cin, 4*Cout) phase-stacked weights
    (columns ordered (py, px, cout)).  Output: (B, 2H, 2W, Cout).
    """
    B, H, W, _ = x.shape
    xp = jnp.pad(x, ((0, 0), (1, 1), (1, 1), (0, 0)))
    cols, _ = _im2col(xp, 2, 1)                          # (B*(H+1)*(W+1), 4*Cin)
    y = matmul_bias_act(cols, w_big, b_big, act, out_dtype=out_dtype)
    y = y.reshape(B, H + 1, W + 1, 2, 2, cout)           # (.., py, px, cout)
    # out[b, 2m+py, 2n+px, c] = y[b, m+py, n+px, py, px, c]
    parts = [y[:, py:py + H, px:px + W, py, px, :]
             for py in (0, 1) for px in (0, 1)]
    parts = jnp.stack(parts, axis=3).reshape(B, H, W, 2, 2, cout)
    return parts.transpose(0, 1, 3, 2, 4, 5).reshape(B, 2 * H, 2 * W, cout)


# ------------------------------ parameters ----------------------------------

def init_params(key, z_dim=Z_DIM):
    keys = jax.random.split(key, 16)
    it = iter(keys)

    def conv_w(cout, cin, k):          # kaiming_normal_, fan_in = cin*k*k
        fan_in = cin * k * k
        return jax.random.normal(next(it), (cout, cin, k, k), jnp.float32) * jnp.sqrt(2.0 / fan_in)

    def convT_w(cin, cout, k):
        # TODO(synk): PyTorch keeps default ConvTranspose2d init (kaiming_uniform a=sqrt(5));
        # deterministic normal used here instead (synthetic weights).
        fan_in = cin * k * k
        return jax.random.normal(next(it), (cin, cout, k, k), jnp.float32) * jnp.sqrt(1.0 / fan_in)

    def lin_w(n_in, n_out):            # kaiming_normal_, fan_in = n_in
        return jax.random.normal(next(it), (n_in, n_out), jnp.float32) * jnp.sqrt(2.0 / n_in)

    p = {}
    # encoder
    p["ec0_w"] = conv_w(32, 3, 4);   p["ec0_b"] = jnp.zeros(32, jnp.float32)
    p["ec1_w"] = conv_w(32, 32, 4);  p["ec1_b"] = jnp.zeros(32, jnp.float32)
    p["ec2_w"] = conv_w(32, 32, 4);  p["ec2_b"] = jnp.zeros(32, jnp.float32)
    p["ec3_w"] = conv_w(32, 32, 4);  p["ec3_b"] = jnp.zeros(32, jnp.float32)
    p["ef0_w"] = lin_w(32 * 4 * 4, 256); p["ef0_b"] = jnp.zeros(256, jnp.float32)
    p["ef1_w"] = lin_w(256, 256);        p["ef1_b"] = jnp.zeros(256, jnp.float32)
    p["ef2_w"] = lin_w(256, 2 * z_dim);  p["ef2_b"] = jnp.zeros(2 * z_dim, jnp.float32)
    # decoder
    p["df0_w"] = lin_w(z_dim, 256);      p["df0_b"] = jnp.zeros(256, jnp.float32)
    p["df1_w"] = lin_w(256, 256);        p["df1_b"] = jnp.zeros(256, jnp.float32)
    p["df2_w"] = lin_w(256, 32 * 4 * 4); p["df2_b"] = jnp.zeros(32 * 4 * 4, jnp.float32)
    p["dc0_w"] = convT_w(32, 32, 4); p["dc0_b"] = jnp.zeros(32, jnp.float32)
    p["dc1_w"] = convT_w(32, 32, 4); p["dc1_b"] = jnp.zeros(32, jnp.float32)
    p["dc2_w"] = convT_w(32, 32, 4); p["dc2_b"] = jnp.zeros(32, jnp.float32)
    p["dc3_w"] = convT_w(32, 3, 4);  p["dc3_b"] = jnp.zeros(3, jnp.float32)
    return p


def _conv_w_mat(w, pad_cin_to=None):
    """PyTorch Conv2d weight (Cout, Cin, k, k) -> bf16 GEMM weight (k*k*Cin, Cout)."""
    cout, cin, k, _ = w.shape
    if pad_cin_to is not None and pad_cin_to > cin:
        w = jnp.pad(w, ((0, 0), (0, pad_cin_to - cin), (0, 0), (0, 0)))
        cin = pad_cin_to
    return jnp.transpose(w, (2, 3, 1, 0)).reshape(k * k * cin, cout).astype(jnp.bfloat16)


def _convT_phase_weight(w, b):
    """PyTorch ConvTranspose2d weight (Cin, Cout, 4, 4) -> phase-stacked GEMM weight.

    Returns (w_big, b_big): w_big (4*Cin, 4*Cout) bf16 with rows ordered
    (dy, dx, cin) and columns ordered (py, px, cout); b_big (1, 4*Cout) f32.
    Derivation (stride 2, pad 1): out[2m+py] uses kernel taps tmap[py] applied
    to the 2-window of the 1-padded input starting at m+py.
    """
    cin, cout = w.shape[0], w.shape[1]
    tmap = ((3, 1), (2, 0))            # tmap[phase][dy] -> original kernel index
    blocks = []
    for py in (0, 1):
        for px in (0, 1):
            taps = jnp.stack(
                [jnp.stack([w[:, :, tmap[py][dy], tmap[px][dx]] for dx in (0, 1)], axis=0)
                 for dy in (0, 1)], axis=0)              # (dy, dx, cin, cout)
            blocks.append(taps.reshape(4 * cin, cout))
    w_big = jnp.concatenate(blocks, axis=1).astype(jnp.bfloat16)   # (4*Cin, 4*Cout)
    b_big = jnp.tile(b, 4).reshape(1, 4 * cout).astype(jnp.float32)
    return w_big, b_big


def prepare_params(p, z_dim=Z_DIM):
    """One-time conversion of PyTorch-layout params into GEMM-ready operands
    (hoisted out of the jitted forward)."""
    prep = {}
    # encoder conv GEMM weights (bf16); ec0 gets Cin padded 3->8 so K = 128
    prep["ec0_w"] = _conv_w_mat(p["ec0_w"], pad_cin_to=8)
    prep["ec1_w"] = _conv_w_mat(p["ec1_w"])
    prep["ec2_w"] = _conv_w_mat(p["ec2_w"])
    prep["ec3_w"] = _conv_w_mat(p["ec3_w"])
    for n in ("ec0", "ec1", "ec2", "ec3"):
        prep[n + "_b"] = p[n + "_b"].reshape(1, -1).astype(jnp.float32)
    # FC weights stay f32 (tiny, VMEM-resident in the fused kernels)
    prep["ef0_w"] = p["ef0_w"]; prep["ef0_b"] = p["ef0_b"].reshape(1, -1)
    prep["ef1_w"] = p["ef1_w"]; prep["ef1_b"] = p["ef1_b"].reshape(1, -1)
    prep["ef2_w_mu"] = p["ef2_w"][:, :z_dim]
    prep["ef2_b_mu"] = p["ef2_b"][:z_dim].reshape(1, -1)
    prep["ef2_w_lv"] = p["ef2_w"][:, z_dim:]
    prep["ef2_b_lv"] = p["ef2_b"][z_dim:].reshape(1, -1)
    prep["df0_w"] = p["df0_w"]; prep["df0_b"] = p["df0_b"].reshape(1, -1)
    prep["df1_w"] = p["df1_w"]; prep["df1_b"] = p["df1_b"].reshape(1, -1)
    prep["df2_w"] = p["df2_w"]; prep["df2_b"] = p["df2_b"].reshape(1, -1)
    # decoder conv-transpose phase-stacked GEMM weights (bf16)
    for n in ("dc0", "dc1", "dc2", "dc3"):
        prep[n + "_w"], prep[n + "_b"] = _convT_phase_weight(p[n + "_w"], p[n + "_b"])
    return prep


# ------------------------------ forward pass ---------------------------------

def beta_vae_b_forward(p, x_nchw, eps):
    """BetaVAE_B.forward: returns (x_recon, mu, logvar) with PyTorch shapes
    (NCHW reconstruction, f32)."""
    x = jnp.transpose(x_nchw, (0, 2, 3, 1)).astype(jnp.bfloat16)     # NCHW -> NHWC
    x = jnp.pad(x, ((0, 0), (0, 0), (0, 0), (0, 5)))                 # Cin 3 -> 8
    # encoder convs (bf16 operands, f32 accumulation)
    h = conv2d(x, p["ec0_w"], p["ec0_b"], k=4, stride=2, pad=1, cout=32, act="relu")
    h = conv2d(h, p["ec1_w"], p["ec1_b"], k=4, stride=2, pad=1, cout=32, act="relu")
    h = conv2d(h, p["ec2_w"], p["ec2_b"], k=4, stride=2, pad=1, cout=32, act="relu")
    h = conv2d(h, p["ec3_w"], p["ec3_b"], k=4, stride=2, pad=1, cout=32, act="relu")
    # View((-1, 32*4*4)) flattens in NCHW order
    h = jnp.transpose(h, (0, 3, 1, 2)).reshape(-1, 32 * 4 * 4).astype(jnp.float32)
    # fused FC chain + reparametrize (single Pallas kernel)
    mu, logvar, z = encoder_fc_reparam(h, p, eps)
    # fused decoder FC chain (single Pallas kernel)
    d = decoder_fc(z, p)
    d = d.reshape(-1, 32, 4, 4)                                      # View((-1,32,4,4)) NCHW
    d = jnp.transpose(d, (0, 2, 3, 1)).astype(jnp.bfloat16)          # -> NHWC
    # decoder transposed convs via 4-phase GEMMs (no zero-dilated input)
    d = conv_transpose2d_s2k4p1(d, p["dc0_w"], p["dc0_b"], cout=32, act="relu")
    d = conv_transpose2d_s2k4p1(d, p["dc1_w"], p["dc1_b"], cout=32, act="relu")
    d = conv_transpose2d_s2k4p1(d, p["dc2_w"], p["dc2_b"], cout=32, act="relu")
    d = conv_transpose2d_s2k4p1(d, p["dc3_w"], p["dc3_b"], cout=3, act="sigmoid",
                                out_dtype=jnp.float32)
    x_recon = jnp.transpose(d, (0, 3, 1, 2))                         # NHWC -> NCHW
    return x_recon, mu, logvar


# ---------------------------------- main -------------------------------------

if __name__ == "__main__":
    key = jax.random.PRNGKey(0)
    k_par, k_x, k_eps = jax.random.split(key, 3)

    params = init_params(k_par)
    prep = prepare_params(params)          # one-time weight repacking (outside jit)

    # View((-1, 32*4*4)) after four stride-2 convs implies 3x64x64 inputs.
    B = 2
    x = jax.random.uniform(k_x, (B, 3, 64, 64), jnp.float32)
    eps = jax.random.normal(k_eps, (B, Z_DIM), jnp.float32)   # eps of reparametrize

    fwd = jax.jit(beta_vae_b_forward)
    x_recon, mu, logvar = fwd(prep, x, eps)
    jax.block_until_ready((x_recon, mu, logvar))

    assert x_recon.shape == x.shape
    assert mu.shape == (B, Z_DIM) and logvar.shape == (B, Z_DIM)
    assert bool(jnp.all(jnp.isfinite(x_recon)))
    assert bool(jnp.all(jnp.isfinite(mu))) and bool(jnp.all(jnp.isfinite(logvar)))
    assert bool(jnp.all((x_recon >= 0) & (x_recon <= 1)))
    print("KERNEL_OK")
</pallas_src>

<mosaic_0001>
module attributes {stable_mosaic.version = 11 : i64} {
  func.func @_gemm_kernel(%arg0: i32, %arg1: memref<512x128xbf16, #tpu.memory_space<vmem>>, %arg2: memref<128x32xbf16, #tpu.memory_space<vmem>>, %arg3: memref<1x32xf32, #tpu.memory_space<vmem>>, %arg4: memref<512x32xbf16, #tpu.memory_space<vmem>>) attributes {dimension_semantics = [#tpu.dimension_semantics<parallel>], iteration_bounds = array<i64: 4>, scalar_prefetch = 0 : i64, scratch_operands = 0 : i64, tpu.core_type = #tpu.core_type<tc>, window_params = [{transform_indices = @transform_0, window_bounds = array<i64: 512, 128>}, {pipeline_mode = #tpu.pipeline_mode<synchronous>, transform_indices = @transform_1, window_bounds = array<i64: 128, 32>}, {pipeline_mode = #tpu.pipeline_mode<synchronous>, transform_indices = @transform_2, window_bounds = array<i64: 1, 32>}, {transform_indices = @transform_3, window_bounds = array<i64: 512, 32>}]} {
    %c0 = arith.constant 0 : index
    %c0_0 = arith.constant 0 : index
    %0 = vector.load %arg1[%c0, %c0_0] : memref<512x128xbf16, #tpu.memory_space<vmem>>, vector<512x128xbf16>
    %c0_1 = arith.constant 0 : index
    %c0_2 = arith.constant 0 : index
    %1 = vector.load %arg2[%c0_1, %c0_2] : memref<128x32xbf16, #tpu.memory_space<vmem>>, vector<128x32xbf16>
    %cst = arith.constant dense<0.000000e+00> : vector<512x32xf32>
    %2 = tpu.matmul %0, %1, %cst {dimension_numbers = #tpu.dot_dimension_numbers<[1], [0], [0], [1], [0, 0, 1, 1], [], []>} : vector<512x128xbf16>, vector<128x32xbf16>, vector<512x32xf32> -> vector<512x32xf32>
    %c0_3 = arith.constant 0 : index
    %c0_4 = arith.constant 0 : index
    %3 = vector.load %arg3[%c0_3, %c0_4] : memref<1x32xf32, #tpu.memory_space<vmem>>, vector<1x32xf32>
    %4 = vector.broadcast %3 : vector<1x32xf32> to vector<512x32xf32>
    %5 = arith.addf %2, %4 : vector<512x32xf32>
    %cst_5 = arith.constant 0.000000e+00 : f32
    %6 = vector.broadcast %cst_5 : f32 to vector<512x32xf32>
    %7 = arith.maximumf %5, %6 : vector<512x32xf32>
    %8 = arith.truncf %7 : vector<512x32xf32> to vector<512x32xbf16>
    %c0_6 = arith.constant 0 : index
    %c0_7 = arith.constant 0 : index
    %9 = vector.load %arg4[%c0_6, %c0_7] : memref<512x32xbf16, #tpu.memory_space<vmem>>, vector<512x32xbf16>
    tpu.vector_store %arg4[%c0_6, %c0_7], %8 {strides = array<i32>} : memref<512x32xbf16, #tpu.memory_space<vmem>>, vector<512x32xbf16>,
    return
  }
  func.func @transform_0(%arg0: i32) -> (i32, i32) {
    %c0_i32 = arith.constant 0 : i32
    %c0_i32_0 = arith.constant 0 : i32
    return %arg0, %c0_i32 : i32, i32
  }
  func.func @transform_1(%arg0: i32) -> (i32, i32) {
    %c0_i32 = arith.constant 0 : i32
    %c0_i32_0 = arith.constant 0 : i32
    %c0_i32_1 = arith.constant 0 : i32
    return %c0_i32, %c0_i32_0 : i32, i32
  }
  func.func @transform_2(%arg0: i32) -> (i32, i32) {
    %c0_i32 = arith.constant 0 : i32
    %c0_i32_0 = arith.constant 0 : i32
    %c0_i32_1 = arith.constant 0 : i32
    return %c0_i32, %c0_i32_0 : i32, i32
  }
  func.func @transform_3(%arg0: i32) -> (i32, i32) {
    %c0_i32 = arith.constant 0 : i32
    %c0_i32_0 = arith.constant 0 : i32
    return %arg0, %c0_i32 : i32, i32
  }
}

module attributes {stable_mosaic.version = 11 : i64} {
  func.func @_gemm_kernel(%arg0: i32, %arg1: memref<512x512xbf16, #tpu.memory_space<vmem>>, %arg2: memref<512x32xbf16, #tpu.memory_space<vmem>>, %arg3: memref<1x32xf32, #tpu.memory_space<vmem>>, %arg4: memref<512x32xbf16, #tpu.memory_space<vmem>>) attributes {dimension_semantics = [#tpu.dimension_semantics<parallel>], iteration_bounds = array<i64: 1>, scalar_prefetch = 0 : i64, scratch_operands = 0 : i64, tpu.core_type = #tpu.core_type<tc>, window_params = [{transform_indices = @transform_0, window_bounds = array<i64: 512, 512>}, {pipeline_mode = #tpu.pipeline_mode<synchronous>, transform_indices = @transform_1, window_bounds = array<i64: 512, 32>}, {pipeline_mode = #tpu.pipeline_mode<synchronous>, transform_indices = @transform_2, window_bounds = array<i64: 1, 32>}, {transform_indices = @transform_3, window_bounds = array<i64: 512, 32>}]} {
    %c0 = arith.constant 0 : index
    %c0_0 = arith.constant 0 : index
    %0 = vector.load %arg1[%c0, %c0_0] : memref<512x512xbf16, #tpu.memory_space<vmem>>, vector<512x512xbf16>
    %c0_1 = arith.constant 0 : index
    %c0_2 = arith.constant 0 : index
    %1 = vector.load %arg2[%c0_1, %c0_2] : memref<512x32xbf16, #tpu.memory_space<vmem>>, vector<512x32xbf16>
    %cst = arith.constant dense<0.000000e+00> : vector<512x32xf32>
    %2 = tpu.matmul %0, %1, %cst {dimension_numbers = #tpu.dot_dimension_numbers<[1], [0], [0], [1], [0, 0, 1, 1], [], []>} : vector<512x512xbf16>, vector<512x32xbf16>, vector<512x32xf32> -> vector<512x32xf32>
    %c0_3 = arith.constant 0 : index
    %c0_4 = arith.constant 0 : index
    %3 = vector.load %arg3[%c0_3, %c0_4] : memref<1x32xf32, #tpu.memory_space<vmem>>, vector<1x32xf32>
    %4 = vector.broadcast %3 : vector<1x32xf32> to vector<512x32xf32>
    %5 = arith.addf %2, %4 : vector<512x32xf32>
    %cst_5 = arith.constant 0.000000e+00 : f32
    %6 = vector.broadcast %cst_5 : f32 to vector<512x32xf32>
    %7 = arith.maximumf %5, %6 : vector<512x32xf32>
    %8 = arith.truncf %7 : vector<512x32xf32> to vector<512x32xbf16>
    %c0_6 = arith.constant 0 : index
    %c0_7 = arith.constant 0 : index
    %9 = vector.load %arg4[%c0_6, %c0_7] : memref<512x32xbf16, #tpu.memory_space<vmem>>, vector<512x32xbf16>
    tpu.vector_store %arg4[%c0_6, %c0_7], %8 {strides = array<i32>} : memref<512x32xbf16, #tpu.memory_space<vmem>>, vector<512x32xbf16>,
    return
  }
  func.func @transform_0(%arg0: i32) -> (i32, i32) {
    %c0_i32 = arith.constant 0 : i32
    %c0_i32_0 = arith.constant 0 : i32
    return %arg0, %c0_i32 : i32, i32
  }
  func.func @transform_1(%arg0: i32) -> (i32, i32) {
    %c0_i32 = arith.constant 0 : i32
    %c0_i32_0 = arith.constant 0 : i32
    %c0_i32_1 = arith.constant 0 : i32
    return %c0_i32, %c0_i32_0 : i32, i32
  }
  func.func @transform_2(%arg0: i32) -> (i32, i32) {
    %c0_i32 = arith.constant 0 : i32
    %c0_i32_0 = arith.constant 0 : i32
    %c0_i32_1 = arith.constant 0 : i32
    return %c0_i32, %c0_i32_0 : i32, i32
  }
  func.func @transform_3(%arg0: i32) -> (i32, i32) {
    %c0_i32 = arith.constant 0 : i32
    %c0_i32_0 = arith.constant 0 : i32
    return %arg0, %c0_i32 : i32, i32
  }
}

module attributes {stable_mosaic.version = 11 : i64} {
  func.func @_gemm_kernel(%arg0: i32, %arg1: memref<128x512xbf16, #tpu.memory_space<vmem>>, %arg2: memref<512x32xbf16, #tpu.memory_space<vmem>>, %arg3: memref<1x32xf32, #tpu.memory_space<vmem>>, %arg4: memref<128x32xbf16, #tpu.memory_space<vmem>>) attributes {dimension_semantics = [#tpu.dimension_semantics<parallel>], iteration_bounds = array<i64: 1>, scalar_prefetch = 0 : i64, scratch_operands = 0 : i64, tpu.core_type = #tpu.core_type<tc>, window_params = [{transform_indices = @transform_0, window_bounds = array<i64: 128, 512>}, {pipeline_mode = #tpu.pipeline_mode<synchronous>, transform_indices = @transform_1, window_bounds = array<i64: 512, 32>}, {pipeline_mode = #tpu.pipeline_mode<synchronous>, transform_indices = @transform_2, window_bounds = array<i64: 1, 32>}, {transform_indices = @transform_3, window_bounds = array<i64: 128, 32>}]} {
    %c0 = arith.constant 0 : index
    %c0_0 = arith.constant 0 : index
    %0 = vector.load %arg1[%c0, %c0_0] : memref<128x512xbf16, #tpu.memory_space<vmem>>, vector<128x512xbf16>
    %c0_1 = arith.constant 0 : index
    %c0_2 = arith.constant 0 : index
    %1 = vector.load %arg2[%c0_1, %c0_2] : memref<512x32xbf16, #tpu.memory_space<vmem>>, vector<512x32xbf16>
    %cst = arith.constant dense<0.000000e+00> : vector<128x32xf32>
    %2 = tpu.matmul %0, %1, %cst {dimension_numbers = #tpu.dot_dimension_numbers<[1], [0], [0], [1], [0, 0, 1, 1], [], []>} : vector<128x512xbf16>, vector<512x32xbf16>, vector<128x32xf32> -> vector<128x32xf32>
    %c0_3 = arith.constant 0 : index
    %c0_4 = arith.constant 0 : index
    %3 = vector.load %arg3[%c0_3, %c0_4] : memref<1x32xf32, #tpu.memory_space<vmem>>, vector<1x32xf32>
    %4 = vector.broadcast %3 : vector<1x32xf32> to vector<128x32xf32>
    %5 = arith.addf %2, %4 : vector<128x32xf32>
    %cst_5 = arith.constant 0.000000e+00 : f32
    %6 = vector.broadcast %cst_5 : f32 to vector<128x32xf32>
    %7 = arith.maximumf %5, %6 : vector<128x32xf32>
    %8 = arith.truncf %7 : vector<128x32xf32> to vector<128x32xbf16>
    %c0_6 = arith.constant 0 : index
    %c0_7 = arith.constant 0 : index
    %9 = vector.load %arg4[%c0_6, %c0_7] : memref<128x32xbf16, #tpu.memory_space<vmem>>, vector<128x32xbf16>
    tpu.vector_store %arg4[%c0_6, %c0_7], %8 {strides = array<i32>} : memref<128x32xbf16, #tpu.memory_space<vmem>>, vector<128x32xbf16>,
    return
  }
  func.func @transform_0(%arg0: i32) -> (i32, i32) {
    %c0_i32 = arith.constant 0 : i32
    %c0_i32_0 = arith.constant 0 : i32
    return %arg0, %c0_i32 : i32, i32
  }
  func.func @transform_1(%arg0: i32) -> (i32, i32) {
    %c0_i32 = arith.constant 0 : i32
    %c0_i32_0 = arith.constant 0 : i32
    %c0_i32_1 = arith.constant 0 : i32
    return %c0_i32, %c0_i32_0 : i32, i32
  }
  func.func @transform_2(%arg0: i32) -> (i32, i32) {
    %c0_i32 = arith.constant 0 : i32
    %c0_i32_0 = arith.constant 0 : i32
    %c0_i32_1 = arith.constant 0 : i32
    return %c0_i32, %c0_i32_0 : i32, i32
  }
  func.func @transform_3(%arg0: i32) -> (i32, i32) {
    %c0_i32 = arith.constant 0 : i32
    %c0_i32_0 = arith.constant 0 : i32
    return %arg0, %c0_i32 : i32, i32
  }
}

module attributes {stable_mosaic.version = 11 : i64} {
  func.func @_gemm_kernel(%arg0: i32, %arg1: memref<32x512xbf16, #tpu.memory_space<vmem>>, %arg2: memref<512x32xbf16, #tpu.memory_space<vmem>>, %arg3: memref<1x32xf32, #tpu.memory_space<vmem>>, %arg4: memref<32x32xbf16, #tpu.memory_space<vmem>>) attributes {dimension_semantics = [#tpu.dimension_semantics<parallel>], iteration_bounds = array<i64: 1>, scalar_prefetch = 0 : i64, scratch_operands = 0 : i64, tpu.core_type = #tpu.core_type<tc>, window_params = [{transform_indices = @transform_0, window_bounds = array<i64: 32, 512>}, {pipeline_mode = #tpu.pipeline_mode<synchronous>, transform_indices = @transform_1, window_bounds = array<i64: 512, 32>}, {pipeline_mode = #tpu.pipeline_mode<synchronous>, transform_indices = @transform_2, window_bounds = array<i64: 1, 32>}, {transform_indices = @transform_3, window_bounds = array<i64: 32, 32>}]} {
    %c0 = arith.constant 0 : index
    %c0_0 = arith.constant 0 : index
    %0 = vector.load %arg1[%c0, %c0_0] : memref<32x512xbf16, #tpu.memory_space<vmem>>, vector<32x512xbf16>
    %c0_1 = arith.constant 0 : index
    %c0_2 = arith.constant 0 : index
    %1 = vector.load %arg2[%c0_1, %c0_2] : memref<512x32xbf16, #tpu.memory_space<vmem>>, vector<512x32xbf16>
    %cst = arith.constant dense<0.000000e+00> : vector<32x32xf32>
    %2 = tpu.matmul %0, %1, %cst {dimension_numbers = #tpu.dot_dimension_numbers<[1], [0], [0], [1], [0, 0, 1, 1], [], []>} : vector<32x512xbf16>, vector<512x32xbf16>, vector<32x32xf32> -> vector<32x32xf32>
    %c0_3 = arith.constant 0 : index
    %c0_4 = arith.constant 0 : index
    %3 = vector.load %arg3[%c0_3, %c0_4] : memref<1x32xf32, #tpu.memory_space<vmem>>, vector<1x32xf32>
    %4 = vector.broadcast %3 : vector<1x32xf32> to vector<32x32xf32>
    %5 = arith.addf %2, %4 : vector<32x32xf32>
    %cst_5 = arith.constant 0.000000e+00 : f32
    %6 = vector.broadcast %cst_5 : f32 to vector<32x32xf32>
    %7 = arith.maximumf %5, %6 : vector<32x32xf32>
    %8 = arith.truncf %7 : vector<32x32xf32> to vector<32x32xbf16>
    %c0_6 = arith.constant 0 : index
    %c0_7 = arith.constant 0 : index
    %9 = vector.load %arg4[%c0_6, %c0_7] : memref<32x32xbf16, #tpu.memory_space<vmem>>, vector<32x32xbf16>
    tpu.vector_store %arg4[%c0_6, %c0_7], %8 {strides = array<i32>} : memref<32x32xbf16, #tpu.memory_space<vmem>>, vector<32x32xbf16>,
    return
  }
  func.func @transform_0(%arg0: i32) -> (i32, i32) {
    %c0_i32 = arith.constant 0 : i32
    %c0_i32_0 = arith.constant 0 : i32
    return %arg0, %c0_i32 : i32, i32
  }
  func.func @transform_1(%arg0: i32) -> (i32, i32) {
    %c0_i32 = arith.constant 0 : i32
    %c0_i32_0 = arith.constant 0 : i32
    %c0_i32_1 = arith.constant 0 : i32
    return %c0_i32, %c0_i32_0 : i32, i32
  }
  func.func @transform_2(%arg0: i32) -> (i32, i32) {
    %c0_i32 = arith.constant 0 : i32
    %c0_i32_0 = arith.constant 0 : i32
    %c0_i32_1 = arith.constant 0 : i32
    return %c0_i32, %c0_i32_0 : i32, i32
  }
  func.func @transform_3(%arg0: i32) -> (i32, i32) {
    %c0_i32 = arith.constant 0 : i32
    %c0_i32_0 = arith.constant 0 : i32
    return %arg0, %c0_i32 : i32, i32
  }
}

module attributes {stable_mosaic.version = 11 : i64} {
  func.func @_dec_fc_kernel(%arg0: memref<2x10xf32, #tpu.memory_space<vmem>>, %arg1: memref<10x256xf32, #tpu.memory_space<vmem>>, %arg2: memref<1x256xf32, #tpu.memory_space<vmem>>, %arg3: memref<256x256xf32, #tpu.memory_space<vmem>>, %arg4: memref<1x256xf32, #tpu.memory_space<vmem>>, %arg5: memref<256x512xf32, #tpu.memory_space<vmem>>, %arg6: memref<1x512xf32, #tpu.memory_space<vmem>>, %arg7: memref<2x512xf32, #tpu.memory_space<vmem>>) attributes {dimension_semantics = [], scalar_prefetch = 0 : i64, scratch_operands = 0 : i64, tpu.core_type = #tpu.core_type<tc>} {
    %c0 = arith.constant 0 : index
    %c0_0 = arith.constant 0 : index
    %0 = vector.load %arg0[%c0, %c0_0] : memref<2x10xf32, #tpu.memory_space<vmem>>, vector<2x10xf32>
    %c0_1 = arith.constant 0 : index
    %c0_2 = arith.constant 0 : index
    %1 = vector.load %arg1[%c0_1, %c0_2] : memref<10x256xf32, #tpu.memory_space<vmem>>, vector<10x256xf32>
    %cst = arith.constant dense<0.000000e+00> : vector<2x256xf32>
    %2 = tpu.matmul %0, %1, %cst {dimension_numbers = #tpu.dot_dimension_numbers<[1], [0], [0], [1], [0, 0, 1, 1], [], []>} : vector<2x10xf32>, vector<10x256xf32>, vector<2x256xf32> -> vector<2x256xf32>
    %c0_3 = arith.constant 0 : index
    %c0_4 = arith.constant 0 : index
    %3 = vector.load %arg2[%c0_3, %c0_4] : memref<1x256xf32, #tpu.memory_space<vmem>>, vector<1x256xf32>
    %4 = vector.broadcast %3 : vector<1x256xf32> to vector<2x256xf32>
    %5 = arith.addf %2, %4 : vector<2x256xf32>
    %cst_5 = arith.constant 0.000000e+00 : f32
    %6 = vector.broadcast %cst_5 : f32 to vector<2x256xf32>
    %7 = arith.maximumf %5, %6 : vector<2x256xf32>
    %c0_6 = arith.constant 0 : index
    %c0_7 = arith.constant 0 : index
    %8 = vector.load %arg3[%c0_6, %c0_7] : memref<256x256xf32, #tpu.memory_space<vmem>>, vector<256x256xf32>
    %cst_8 = arith.constant dense<0.000000e+00> : vector<2x256xf32>
    %9 = tpu.matmul %7, %8, %cst_8 {dimension_numbers = #tpu.dot_dimension_numbers<[1], [0], [0], [1], [0, 0, 1, 1], [], []>} : vector<2x256xf32>, vector<256x256xf32>, vector<2x256xf32> -> vector<2x256xf32>
    %c0_9 = arith.constant 0 : index
    %c0_10 = arith.constant 0 : index
    %10 = vector.load %arg4[%c0_9, %c0_10] : memref<1x256xf32, #tpu.memory_space<vmem>>, vector<1x256xf32>
    %11 = vector.broadcast %10 : vector<1x256xf32> to vector<2x256xf32>
    %12 = arith.addf %9, %11 : vector<2x256xf32>
    %cst_11 = arith.constant 0.000000e+00 : f32
    %13 = vector.broadcast %cst_11 : f32 to vector<2x256xf32>
    %14 = arith.maximumf %12, %13 : vector<2x256xf32>
    %c0_12 = arith.constant 0 : index
    %c0_13 = arith.constant 0 : index
    %15 = vector.load %arg5[%c0_12, %c0_13] : memref<256x512xf32, #tpu.memory_space<vmem>>, vector<256x512xf32>
    %cst_14 = arith.constant dense<0.000000e+00> : vector<2x512xf32>
    %16 = tpu.matmul %14, %15, %cst_14 {dimension_numbers = #tpu.dot_dimension_numbers<[1], [0], [0], [1], [0, 0, 1, 1], [], []>} : vector<2x256xf32>, vector<256x512xf32>, vector<2x512xf32> -> vector<2x512xf32>
    %c0_15 = arith.constant 0 : index
    %c0_16 = arith.constant 0 : index
    %17 = vector.load %arg6[%c0_15, %c0_16] : memref<1x512xf32, #tpu.memory_space<vmem>>, vector<1x512xf32>
    %18 = vector.broadcast %17 : vector<1x512xf32> to vector<2x512xf32>
    %19 = arith.addf %16, %18 : vector<2x512xf32>
    %cst_17 = arith.constant 0.000000e+00 : f32
    %20 = vector.broadcast %cst_17 : f32 to vector<2x512xf32>
    %21 = arith.maximumf %19, %20 : vector<2x512xf32>
    %c0_18 = arith.constant 0 : index
    %c0_19 = arith.constant 0 : index
    %22 = vector.load %arg7[%c0_18, %c0_19] : memref<2x512xf32, #tpu.memory_space<vmem>>, vector<2x512xf32>
    tpu.vector_store %arg7[%c0_18, %c0_19], %21 {strides = array<i32>} : memref<2x512xf32, #tpu.memory_space<vmem>>, vector<2x512xf32>,
    return
  }
}

module attributes {stable_mosaic.version = 11 : i64} {
  func.func @_enc_fc_kernel(%arg0: memref<2x512xf32, #tpu.memory_space<vmem>>, %arg1: memref<512x256xf32, #tpu.memory_space<vmem>>, %arg2: memref<1x256xf32, #tpu.memory_space<vmem>>, %arg3: memref<256x256xf32, #tpu.memory_space<vmem>>, %arg4: memref<1x256xf32, #tpu.memory_space<vmem>>, %arg5: memref<256x10xf32, #tpu.memory_space<vmem>>, %arg6: memref<1x10xf32, #tpu.memory_space<vmem>>, %arg7: memref<256x10xf32, #tpu.memory_space<vmem>>, %arg8: memref<1x10xf32, #tpu.memory_space<vmem>>, %arg9: memref<2x10xf32, #tpu.memory_space<vmem>>, %arg10: memref<2x10xf32, #tpu.memory_space<vmem>>, %arg11: memref<2x10xf32, #tpu.memory_space<vmem>>, %arg12: memref<2x10xf32, #tpu.memory_space<vmem>>) attributes {dimension_semantics = [], scalar_prefetch = 0 : i64, scratch_operands = 0 : i64, tpu.core_type = #tpu.core_type<tc>} {
    %c0 = arith.constant 0 : index
    %c0_0 = arith.constant 0 : index
    %0 = vector.load %arg0[%c0, %c0_0] : memref<2x512xf32, #tpu.memory_space<vmem>>, vector<2x512xf32>
    %c0_1 = arith.constant 0 : index
    %c0_2 = arith.constant 0 : index
    %1 = vector.load %arg1[%c0_1, %c0_2] : memref<512x256xf32, #tpu.memory_space<vmem>>, vector<512x256xf32>
    %cst = arith.constant dense<0.000000e+00> : vector<2x256xf32>
    %2 = tpu.matmul %0, %1, %cst {dimension_numbers = #tpu.dot_dimension_numbers<[1], [0], [0], [1], [0, 0, 1, 1], [], []>} : vector<2x512xf32>, vector<512x256xf32>, vector<2x256xf32> -> vector<2x256xf32>
    %c0_3 = arith.constant 0 : index
    %c0_4 = arith.constant 0 : index
    %3 = vector.load %arg2[%c0_3, %c0_4] : memref<1x256xf32, #tpu.memory_space<vmem>>, vector<1x256xf32>
    %4 = vector.broadcast %3 : vector<1x256xf32> to vector<2x256xf32>
    %5 = arith.addf %2, %4 : vector<2x256xf32>
    %cst_5 = arith.constant 0.000000e+00 : f32
    %6 = vector.broadcast %cst_5 : f32 to vector<2x256xf32>
    %7 = arith.maximumf %5, %6 : vector<2x256xf32>
    %c0_6 = arith.constant 0 : index
    %c0_7 = arith.constant 0 : index
    %8 = vector.load %arg3[%c0_6, %c0_7] : memref<256x256xf32, #tpu.memory_space<vmem>>, vector<256x256xf32>
    %cst_8 = arith.constant dense<0.000000e+00> : vector<2x256xf32>
    %9 = tpu.matmul %7, %8, %cst_8 {dimension_numbers = #tpu.dot_dimension_numbers<[1], [0], [0], [1], [0, 0, 1, 1], [], []>} : vector<2x256xf32>, vector<256x256xf32>, vector<2x256xf32> -> vector<2x256xf32>
    %c0_9 = arith.constant 0 : index
    %c0_10 = arith.constant 0 : index
    %10 = vector.load %arg4[%c0_9, %c0_10] : memref<1x256xf32, #tpu.memory_space<vmem>>, vector<1x256xf32>
    %11 = vector.broadcast %10 : vector<1x256xf32> to vector<2x256xf32>
    %12 = arith.addf %9, %11 : vector<2x256xf32>
    %cst_11 = arith.constant 0.000000e+00 : f32
    %13 = vector.broadcast %cst_11 : f32 to vector<2x256xf32>
    %14 = arith.maximumf %12, %13 : vector<2x256xf32>
    %c0_12 = arith.constant 0 : index
    %c0_13 = arith.constant 0 : index
    %15 = vector.load %arg5[%c0_12, %c0_13] : memref<256x10xf32, #tpu.memory_space<vmem>>, vector<256x10xf32>
    %cst_14 = arith.constant dense<0.000000e+00> : vector<2x10xf32>
    %16 = tpu.matmul %14, %15, %cst_14 {dimension_numbers = #tpu.dot_dimension_numbers<[1], [0], [0], [1], [0, 0, 1, 1], [], []>} : vector<2x256xf32>, vector<256x10xf32>, vector<2x10xf32> -> vector<2x10xf32>
    %c0_15 = arith.constant 0 : index
    %c0_16 = arith.constant 0 : index
    %17 = vector.load %arg6[%c0_15, %c0_16] : memref<1x10xf32, #tpu.memory_space<vmem>>, vector<1x10xf32>
    %18 = vector.broadcast %17 : vector<1x10xf32> to vector<2x10xf32>
    %19 = arith.addf %16, %18 : vector<2x10xf32>
    %c0_17 = arith.constant 0 : index
    %c0_18 = arith.constant 0 : index
    %20 = vector.load %arg7[%c0_17, %c0_18] : memref<256x10xf32, #tpu.memory_space<vmem>>, vector<256x10xf32>
    %cst_19 = arith.constant dense<0.000000e+00> : vector<2x10xf32>
    %21 = tpu.matmul %14, %20, %cst_19 {dimension_numbers = #tpu.dot_dimension_numbers<[1], [0], [0], [1], [0, 0, 1, 1], [], []>} : vector<2x256xf32>, vector<256x10xf32>, vector<2x10xf32> -> vector<2x10xf32>
    %c0_20 = arith.constant 0 : index
    %c0_21 = arith.constant 0 : index
    %22 = vector.load %arg8[%c0_20, %c0_21] : memref<1x10xf32, #tpu.memory_space<vmem>>, vector<1x10xf32>
    %23 = vector.broadcast %22 : vector<1x10xf32> to vector<2x10xf32>
    %24 = arith.addf %21, %23 : vector<2x10xf32>
    %c0_22 = arith.constant 0 : index
    %c0_23 = arith.constant 0 : index
    %25 = vector.load %arg10[%c0_22, %c0_23] : memref<2x10xf32, #tpu.memory_space<vmem>>, vector<2x10xf32>
    tpu.vector_store %arg10[%c0_22, %c0_23], %19 {strides = array<i32>} : memref<2x10xf32, #tpu.memory_space<vmem>>, vector<2x10xf32>,
    %c0_24 = arith.constant 0 : index
    %c0_25 = arith.constant 0 : index
    %26 = vector.load %arg11[%c0_24, %c0_25] : memref<2x10xf32, #tpu.memory_space<vmem>>, vector<2x10xf32>
    tpu.vector_store %arg11[%c0_24, %c0_25], %24 {strides = array<i32>} : memref<2x10xf32, #tpu.memory_space<vmem>>, vector<2x10xf32>,
    %cst_26 = arith.constant 5.000000e-01 : f32
    %27 = vector.broadcast %cst_26 : f32 to vector<2x10xf32>
    %28 = arith.mulf %27, %24 : vector<2x10xf32>
    %29 = math.exp %28 : vector<2x10xf32>
    %c0_27 = arith.constant 0 : index
    %c0_28 = arith.constant 0 : index
    %30 = vector.load %arg9[%c0_27, %c0_28] : memref<2x10xf32, #tpu.memory_space<vmem>>, vector<2x10xf32>
    %31 = arith.mulf %29, %30 : vector<2x10xf32>
    %32 = arith.addf %19, %31 : vector<2x10xf32>
    %c0_29 = arith.constant 0 : index
    %c0_30 = arith.constant 0 : index
    %33 = vector.load %arg12[%c0_29, %c0_30] : memref<2x10xf32, #tpu.memory_space<vmem>>, vector<2x10xf32>
    tpu.vector_store %arg12[%c0_29, %c0_30], %32 {strides = array<i32>} : memref<2x10xf32, #tpu.memory_space<vmem>>, vector<2x10xf32>,
    return
  }
}

module attributes {stable_mosaic.version = 11 : i64} {
  func.func @_gemm_kernel(%arg0: i32, %arg1: memref<56x128xbf16, #tpu.memory_space<vmem>>, %arg2: memref<128x128xbf16, #tpu.memory_space<vmem>>, %arg3: memref<1x128xf32, #tpu.memory_space<vmem>>, %arg4: memref<56x128xbf16, #tpu.memory_space<vmem>>) attributes {dimension_semantics = [#tpu.dimension_semantics<parallel>], iteration_bounds = array<i64: 1>, scalar_prefetch = 0 : i64, scratch_operands = 0 : i64, tpu.core_type = #tpu.core_type<tc>, window_params = [{transform_indices = @transform_0, window_bounds = array<i64: 56, 128>}, {pipeline_mode = #tpu.pipeline_mode<synchronous>, transform_indices = @transform_1, window_bounds = array<i64: 128, 128>}, {pipeline_mode = #tpu.pipeline_mode<synchronous>, transform_indices = @transform_2, window_bounds = array<i64: 1, 128>}, {transform_indices = @transform_3, window_bounds = array<i64: 56, 128>}]} {
    %c0 = arith.constant 0 : index
    %c0_0 = arith.constant 0 : index
    %0 = vector.load %arg1[%c0, %c0_0] : memref<56x128xbf16, #tpu.memory_space<vmem>>, vector<56x128xbf16>
    %c0_1 = arith.constant 0 : index
    %c0_2 = arith.constant 0 : index
    %1 = vector.load %arg2[%c0_1, %c0_2] : memref<128x128xbf16, #tpu.memory_space<vmem>>, vector<128x128xbf16>
    %cst = arith.constant dense<0.000000e+00> : vector<56x128xf32>
    %2 = tpu.matmul %0, %1, %cst {dimension_numbers = #tpu.dot_dimension_numbers<[1], [0], [0], [1], [0, 0, 1, 1], [], []>} : vector<56x128xbf16>, vector<128x128xbf16>, vector<56x128xf32> -> vector<56x128xf32>
    %c0_3 = arith.constant 0 : index
    %c0_4 = arith.constant 0 : index
    %3 = vector.load %arg3[%c0_3, %c0_4] : memref<1x128xf32, #tpu.memory_space<vmem>>, vector<1x128xf32>
    %4 = vector.broadcast %3 : vector<1x128xf32> to vector<56x128xf32>
    %5 = arith.addf %2, %4 : vector<56x128xf32>
    %cst_5 = arith.constant 0.000000e+00 : f32
    %6 = vector.broadcast %cst_5 : f32 to vector<56x128xf32>
    %7 = arith.maximumf %5, %6 : vector<56x128xf32>
    %8 = arith.truncf %7 : vector<56x128xf32> to vector<56x128xbf16>
    %c0_6 = arith.constant 0 : index
    %c0_7 = arith.constant 0 : index
    %9 = vector.load %arg4[%c0_6, %c0_7] : memref<56x128xbf16, #tpu.memory_space<vmem>>, vector<56x128xbf16>
    tpu.vector_store %arg4[%c0_6, %c0_7], %8 {strides = array<i32>} : memref<56x128xbf16, #tpu.memory_space<vmem>>, vector<56x128xbf16>,
    return
  }
  func.func @transform_0(%arg0: i32) -> (i32, i32) {
    %c0_i32 = arith.constant 0 : i32
    %c0_i32_0 = arith.constant 0 : i32
    return %arg0, %c0_i32 : i32, i32
  }
  func.func @transform_1(%arg0: i32) -> (i32, i32) {
    %c0_i32 = arith.constant 0 : i32
    %c0_i32_0 = arith.constant 0 : i32
    %c0_i32_1 = arith.constant 0 : i32
    return %c0_i32, %c0_i32_0 : i32, i32
  }
  func.func @transform_2(%arg0: i32) -> (i32, i32) {
    %c0_i32 = arith.constant 0 : i32
    %c0_i32_0 = arith.constant 0 : i32
    %c0_i32_1 = arith.constant 0 : i32
    return %c0_i32, %c0_i32_0 : i32, i32
  }
  func.func @transform_3(%arg0: i32) -> (i32, i32) {
    %c0_i32 = arith.constant 0 : i32
    %c0_i32_0 = arith.constant 0 : i32
    return %arg0, %c0_i32 : i32, i32
  }
}

module attributes {stable_mosaic.version = 11 : i64} {
  func.func @_gemm_kernel(%arg0: i32, %arg1: memref<168x128xbf16, #tpu.memory_space<vmem>>, %arg2: memref<128x128xbf16, #tpu.memory_space<vmem>>, %arg3: memref<1x128xf32, #tpu.memory_space<vmem>>, %arg4: memref<168x128xbf16, #tpu.memory_space<vmem>>) attributes {dimension_semantics = [#tpu.dimension_semantics<parallel>], iteration_bounds = array<i64: 1>, scalar_prefetch = 0 : i64, scratch_operands = 0 : i64, tpu.core_type = #tpu.core_type<tc>, window_params = [{transform_indices = @transform_0, window_bounds = array<i64: 168, 128>}, {pipeline_mode = #tpu.pipeline_mode<synchronous>, transform_indices = @transform_1, window_bounds = array<i64: 128, 128>}, {pipeline_mode = #tpu.pipeline_mode<synchronous>, transform_indices = @transform_2, window_bounds = array<i64: 1, 128>}, {transform_indices = @transform_3, window_bounds = array<i64: 168, 128>}]} {
    %c0 = arith.constant 0 : index
    %c0_0 = arith.constant 0 : index
    %0 = vector.load %arg1[%c0, %c0_0] : memref<168x128xbf16, #tpu.memory_space<vmem>>, vector<168x128xbf16>
    %c0_1 = arith.constant 0 : index
    %c0_2 = arith.constant 0 : index
    %1 = vector.load %arg2[%c0_1, %c0_2] : memref<128x128xbf16, #tpu.memory_space<vmem>>, vector<128x128xbf16>
    %cst = arith.constant dense<0.000000e+00> : vector<168x128xf32>
    %2 = tpu.matmul %0, %1, %cst {dimension_numbers = #tpu.dot_dimension_numbers<[1], [0], [0], [1], [0, 0, 1, 1], [], []>} : vector<168x128xbf16>, vector<128x128xbf16>, vector<168x128xf32> -> vector<168x128xf32>
    %c0_3 = arith.constant 0 : index
    %c0_4 = arith.constant 0 : index
    %3 = vector.load %arg3[%c0_3, %c0_4] : memref<1x128xf32, #tpu.memory_space<vmem>>, vector<1x128xf32>
    %4 = vector.broadcast %3 : vector<1x128xf32> to vector<168x128xf32>
    %5 = arith.addf %2, %4 : vector<168x128xf32>
    %cst_5 = arith.constant 0.000000e+00 : f32
    %6 = vector.broadcast %cst_5 : f32 to vector<168x128xf32>
    %7 = arith.maximumf %5, %6 : vector<168x128xf32>
    %8 = arith.truncf %7 : vector<168x128xf32> to vector<168x128xbf16>
    %c0_6 = arith.constant 0 : index
    %c0_7 = arith.constant 0 : index
    %9 = vector.load %arg4[%c0_6, %c0_7] : memref<168x128xbf16, #tpu.memory_space<vmem>>, vector<168x128xbf16>
    tpu.vector_store %arg4[%c0_6, %c0_7], %8 {strides = array<i32>} : memref<168x128xbf16, #tpu.memory_space<vmem>>, vector<168x128xbf16>,
    return
  }
  func.func @transform_0(%arg0: i32) -> (i32, i32) {
    %c0_i32 = arith.constant 0 : i32
    %c0_i32_0 = arith.constant 0 : i32
    return %arg0, %c0_i32 : i32, i32
  }
  func.func @transform_1(%arg0: i32) -> (i32, i32) {
    %c0_i32 = arith.constant 0 : i32
    %c0_i32_0 = arith.constant 0 : i32
    %c0_i32_1 = arith.constant 0 : i32
    return %c0_i32, %c0_i32_0 : i32, i32
  }
  func.func @transform_2(%arg0: i32) -> (i32, i32) {
    %c0_i32 = arith.constant 0 : i32
    %c0_i32_0 = arith.constant 0 : i32
    %c0_i32_1 = arith.constant 0 : i32
    return %c0_i32, %c0_i32_0 : i32, i32
  }
  func.func @transform_3(%arg0: i32) -> (i32, i32) {
    %c0_i32 = arith.constant 0 : i32
    %c0_i32_0 = arith.constant 0 : i32
    return %arg0, %c0_i32 : i32, i32
  }
}

module attributes {stable_mosaic.version = 11 : i64} {
  func.func @_gemm_kernel(%arg0: i32, %arg1: memref<584x128xbf16, #tpu.memory_space<vmem>>, %arg2: memref<128x128xbf16, #tpu.memory_space<vmem>>, %arg3: memref<1x128xf32, #tpu.memory_space<vmem>>, %arg4: memref<584x128xbf16, #tpu.memory_space<vmem>>) attributes {dimension_semantics = [#tpu.dimension_semantics<parallel>], iteration_bounds = array<i64: 1>, scalar_prefetch = 0 : i64, scratch_operands = 0 : i64, tpu.core_type = #tpu.core_type<tc>, window_params = [{transform_indices = @transform_0, window_bounds = array<i64: 584, 128>}, {pipeline_mode = #tpu.pipeline_mode<synchronous>, transform_indices = @transform_1, window_bounds = array<i64: 128, 128>}, {pipeline_mode = #tpu.pipeline_mode<synchronous>, transform_indices = @transform_2, window_bounds = array<i64: 1, 128>}, {transform_indices = @transform_3, window_bounds = array<i64: 584, 128>}]} {
    %c0 = arith.constant 0 : index
    %c0_0 = arith.constant 0 : index
    %0 = vector.load %arg1[%c0, %c0_0] : memref<584x128xbf16, #tpu.memory_space<vmem>>, vector<584x128xbf16>
    %c0_1 = arith.constant 0 : index
    %c0_2 = arith.constant 0 : index
    %1 = vector.load %arg2[%c0_1, %c0_2] : memref<128x128xbf16, #tpu.memory_space<vmem>>, vector<128x128xbf16>
    %cst = arith.constant dense<0.000000e+00> : vector<584x128xf32>
    %2 = tpu.matmul %0, %1, %cst {dimension_numbers = #tpu.dot_dimension_numbers<[1], [0], [0], [1], [0, 0, 1, 1], [], []>} : vector<584x128xbf16>, vector<128x128xbf16>, vector<584x128xf32> -> vector<584x128xf32>
    %c0_3 = arith.constant 0 : index
    %c0_4 = arith.constant 0 : index
    %3 = vector.load %arg3[%c0_3, %c0_4] : memref<1x128xf32, #tpu.memory_space<vmem>>, vector<1x128xf32>
    %4 = vector.broadcast %3 : vector<1x128xf32> to vector<584x128xf32>
    %5 = arith.addf %2, %4 : vector<584x128xf32>
    %cst_5 = arith.constant 0.000000e+00 : f32
    %6 = vector.broadcast %cst_5 : f32 to vector<584x128xf32>
    %7 = arith.maximumf %5, %6 : vector<584x128xf32>
    %8 = arith.truncf %7 : vector<584x128xf32> to vector<584x128xbf16>
    %c0_6 = arith.constant 0 : index
    %c0_7 = arith.constant 0 : index
    %9 = vector.load %arg4[%c0_6, %c0_7] : memref<584x128xbf16, #tpu.memory_space<vmem>>, vector<584x128xbf16>
    tpu.vector_store %arg4[%c0_6, %c0_7], %8 {strides = array<i32>} : memref<584x128xbf16, #tpu.memory_space<vmem>>, vector<584x128xbf16>,
    return
  }
  func.func @transform_0(%arg0: i32) -> (i32, i32) {
    %c0_i32 = arith.constant 0 : i32
    %c0_i32_0 = arith.constant 0 : i32
    return %arg0, %c0_i32 : i32, i32
  }
  func.func @transform_1(%arg0: i32) -> (i32, i32) {
    %c0_i32 = arith.constant 0 : i32
    %c0_i32_0 = arith.constant 0 : i32
    %c0_i32_1 = arith.constant 0 : i32
    return %c0_i32, %c0_i32_0 : i32, i32
  }
  func.func @transform_2(%arg0: i32) -> (i32, i32) {
    %c0_i32 = arith.constant 0 : i32
    %c0_i32_0 = arith.constant 0 : i32
    %c0_i32_1 = arith.constant 0 : i32
    return %c0_i32, %c0_i32_0 : i32, i32
  }
  func.func @transform_3(%arg0: i32) -> (i32, i32) {
    %c0_i32 = arith.constant 0 : i32
    %c0_i32_0 = arith.constant 0 : i32
    return %arg0, %c0_i32 : i32, i32
  }
}

module attributes {stable_mosaic.version = 11 : i64} {
  func.func @_gemm_kernel(%arg0: i32, %arg1: memref<512x128xbf16, #tpu.memory_space<vmem>>, %arg2: memref<128x12xbf16, #tpu.memory_space<vmem>>, %arg3: memref<1x12xf32, #tpu.memory_space<vmem>>, %arg4: memref<512x12xf32, #tpu.memory_space<vmem>>) attributes {dimension_semantics = [#tpu.dimension_semantics<parallel>], iteration_bounds = array<i64: 5>, scalar_prefetch = 0 : i64, scratch_operands = 0 : i64, tpu.core_type = #tpu.core_type<tc>, window_params = [{transform_indices = @transform_0, window_bounds = array<i64: 512, 128>}, {pipeline_mode = #tpu.pipeline_mode<synchronous>, transform_indices = @transform_1, window_bounds = array<i64: 128, 12>}, {pipeline_mode = #tpu.pipeline_mode<synchronous>, transform_indices = @transform_2, window_bounds = array<i64: 1, 12>}, {transform_indices = @transform_3, window_bounds = array<i64: 512, 12>}]} {
    %c0 = arith.constant 0 : index
    %c0_0 = arith.constant 0 : index
    %0 = vector.load %arg1[%c0, %c0_0] : memref<512x128xbf16, #tpu.memory_space<vmem>>, vector<512x128xbf16>
    %c0_1 = arith.constant 0 : index
    %c0_2 = arith.constant 0 : index
    %1 = vector.load %arg2[%c0_1, %c0_2] : memref<128x12xbf16, #tpu.memory_space<vmem>>, vector<128x12xbf16>
    %cst = arith.constant dense<0.000000e+00> : vector<512x12xf32>
    %2 = tpu.matmul %0, %1, %cst {dimension_numbers = #tpu.dot_dimension_numbers<[1], [0], [0], [1], [0, 0, 1, 1], [], []>} : vector<512x128xbf16>, vector<128x12xbf16>, vector<512x12xf32> -> vector<512x12xf32>
    %c0_3 = arith.constant 0 : index
    %c0_4 = arith.constant 0 : index
    %3 = vector.load %arg3[%c0_3, %c0_4] : memref<1x12xf32, #tpu.memory_space<vmem>>, vector<1x12xf32>
    %4 = vector.broadcast %3 : vector<1x12xf32> to vector<512x12xf32>
    %5 = arith.addf %2, %4 : vector<512x12xf32>
    %6 = arith.negf %5 : vector<512x12xf32>
    %7 = math.exp %6 : vector<512x12xf32>
    %cst_5 = arith.constant 1.000000e+00 : f32
    %8 = vector.broadcast %cst_5 : f32 to vector<512x12xf32>
    %9 = arith.addf %8, %7 : vector<512x12xf32>
    %10 = arith.divf %8, %9 : vector<512x12xf32>
    %c0_6 = arith.constant 0 : index
    %c0_7 = arith.constant 0 : index
    %11 = vector.load %arg4[%c0_6, %c0_7] : memref<512x12xf32, #tpu.memory_space<vmem>>, vector<512x12xf32>
    tpu.vector_store %arg4[%c0_6, %c0_7], %10 {strides = array<i32>} : memref<512x12xf32, #tpu.memory_space<vmem>>, vector<512x12xf32>,
    return
  }
  func.func @transform_0(%arg0: i32) -> (i32, i32) {
    %c0_i32 = arith.constant 0 : i32
    %c0_i32_0 = arith.constant 0 : i32
    return %arg0, %c0_i32 : i32, i32
  }
  func.func @transform_1(%arg0: i32) -> (i32, i32) {
    %c0_i32 = arith.constant 0 : i32
    %c0_i32_0 = arith.constant 0 : i32
    %c0_i32_1 = arith.constant 0 : i32
    return %c0_i32, %c0_i32_0 : i32, i32
  }
  func.func @transform_2(%arg0: i32) -> (i32, i32) {
    %c0_i32 = arith.constant 0 : i32
    %c0_i32_0 = arith.constant 0 : i32
    %c0_i32_1 = arith.constant 0 : i32
    return %c0_i32, %c0_i32_0 : i32, i32
  }
  func.func @transform_3(%arg0: i32) -> (i32, i32) {
    %c0_i32 = arith.constant 0 : i32
    %c0_i32_0 = arith.constant 0 : i32
    return %arg0, %c0_i32 : i32, i32
  }
}

</mosaic_0001>

<bundles_post_ra>
// kernel: beta_vae_b_forward.10
= control target key start
LH: loop header
LB: loop body
LE: loop exit
PB: predicated region body
PF: predicated region fallthrough
CT: control target
= control target key end

     0   :  { %s1624_s12 = smov 0   ;;  %s1905_s0 = inlined_call_operand.vmem [shape: bf16[2048,128], index: 0, kind: input, shape index: {}]   ;;  %s1906_s1 = inlined_call_operand.vmem [shape: bf16[128,32], index: 1, kind: input, shape index: {}]   ;;  %s1907_s2 = inlined_call_operand.vmem [shape: f32[1,32], index: 2, kind: input, shape index: {}]   ;;  %s1908_s3 = inlined_call_operand.vmem [shape: bf16[2048,32], index: 3, kind: output, shape index: {}]  }
   0x1 LB: > { %s1232_s13 = sadd.s32 4294967295, %s1602_s12   ;;  %p1236_p0 = scmp.ge.s32.totalorder %s1602_s12, 1  ;;  %s1602_s12 = sphi %s1624_s12, %s13_s12  }
   0x2   : > { %p138_p1 = scmp.lt.s32.totalorder %s1602_s12, 5 }
   0x4   : > { %p139_p2 = pnand %p1236_p0, %p138_p1 }
   0x5   : > { %s1237_s16 = sshll.u32 (!%p139_p2), %s1232_s13, 6 }
   0x6   : > { %142 = sbr.rel (%p139_p2) target bundleno = 306 (0x132), region = 32  ;;  %p163_p3 = scmp.lt.s32.totalorder (!%p139_p2), %s1237_s16, 255 }
   0xb   : > { %v1556_v0 = vld [vmem:[%s1906_s1 + $0x38] sm:$0xff]   ;;  %v1557_v1 = vld [vmem:[%s1906_s1 + $0x30] sm:$0xff]   ;;  %s1910_s16 = smov (!%p163_p3, %s1237_s16), 255  ;;  %v1558_v2 = vld [vmem:[%s1906_s1 + $0x28] sm:$0xff]   ;;  %vm1111_vm0 = vcmask 257024  }
   0xc   : > { %1452 = vmatprep.subr.bf16.mxu0 %v1556_v0  ;;  %1532 = vmatprep.subr.bf16.mxu1 %v1556_v0  ;;  %s1238_s21 = sshll.u32 %s1910_s16, 2  ;;  %v1559_v3 = vld [vmem:[%s1906_s1 + $0x20] sm:$0xff]   ;;  %v1560_v6 = vld [vmem:[%s1906_s1 + $0x18] sm:$0xff]   ;;  %v1561_v7 = vld [vmem:[%s1906_s1 + $0x10] sm:$0xff]  }
   0xd   : > { %1453 = vmatpush3.bf16.msra.mxu0 %v1556_v0  ;;  %1540 = vmatpush3.bf16.msra.mxu1 %v1556_v0  ;;  %s1649_s24 = scalar_lea.vmem %s1905_s0, %s1238_s21  ;;  %v1562_v8 = vld [vmem:[%s1906_s1 + $0x8] sm:$0xff]   ;;  %v1563_v9 = vld [vmem:[%s1906_s1] sm:$0xff]   ;;  %s1712_s13 = scalar_lea.vmem %s1908_s3, %s1238_s21 }
   0xe   : > { %1454 = vmatprep.subr.bf16.mxu0 %v1557_v1  ;;  %1533 = vmatprep.subr.bf16.mxu1 %v1557_v1  ;;  %v1564_v4 = vld [vmem:[%s1649_s24] sm:$0xff]   ;;  %v1566_v10 = vld [vmem:[%s1649_s24 + $0x8] sm:$0xff]   ;;  %v1568_v12 = vld [vmem:[%s1649_s24 + $0x10] sm:$0xff]  }
   0xf   : > { %v1565_v5 = vld [vmem:[%s1649_s24 + $0x80] sm:$0xff]   ;;  %1468 = vmatprep.mubr.bf16.mxu0 %v1564_v4  ;;  %v1567_v11 = vld [vmem:[%s1649_s24 + $0x88] sm:$0xff]   ;;  %v1569_v13 = vld [vmem:[%s1649_s24 + $0x90] sm:$0xff]  }
  0x10   : > { %1500 = vmatprep.mubr.bf16.mxu1 %v1565_v5  ;;  %v1570_v14 = vld [vmem:[%s1649_s24 + $0x18] sm:$0xff]   ;;  %v1572_v16 = vld [vmem:[%s1649_s24 + $0x20] sm:$0xff]   ;;  %v1574_v18 = vld [vmem:[%s1649_s24 + $0x28] sm:$0xff]  }
  0x11   : > { %1455 = vmatpush3.bf16.msra.mxu0 %v1557_v1  ;;  %1541 = vmatpush3.bf16.msra.mxu1 %v1557_v1  ;;  %v1571_v15 = vld [vmem:[%s1649_s24 + $0x98] sm:$0xff]   ;;  %v1573_v17 = vld [vmem:[%s1649_s24 + $0xa0] sm:$0xff]   ;;  %v1575_v19 = vld [vmem:[%s1649_s24 + $0xa8] sm:$0xff]  }
  0x12   : > { %1456 = vmatprep.subr.bf16.mxu0 %v1558_v2  ;;  %1534 = vmatprep.subr.bf16.mxu1 %v1558_v2  ;;  %v1576_v20 = vld [vmem:[%s1649_s24 + $0x30] sm:$0xff]   ;;  %v1578_v22 = vld [vmem:[%s1649_s24 + $0x38] sm:$0xff]   ;;  %v1580_v24 = vld [vmem:[%s1649_s24 + $0x40] sm:$0xff]  }
  0x13   : > { %v1577_v21 = vld [vmem:[%s1649_s24 + $0xb0] sm:$0xff]   ;;  %v1579_v23 = vld [vmem:[%s1649_s24 + $0xb8] sm:$0xff]   ;;  %v1581_v25 = vld [vmem:[%s1649_s24 + $0xc0] sm:$0xff]  }
  0x14   : > { %v1582_v26 = vld [vmem:[%s1649_s24 + $0x48] sm:$0xff]   ;;  %v1584_v28 = vld [vmem:[%s1649_s24 + $0x50] sm:$0xff]   ;;  %v1586_v30 = vld [vmem:[%s1649_s24 + $0x58] sm:$0xff]  }
  0x15   : > { %1457 = vmatpush3.bf16.msra.mxu0 %v1558_v2  ;;  %1542 = vmatpush3.bf16.msra.mxu1 %v1558_v2  ;;  %v1583_v27 = vld [vmem:[%s1649_s24 + $0xc8] sm:$0xff]   ;;  %v1585_v29 = vld [vmem:[%s1649_s24 + $0xd0] sm:$0xff]   ;;  %v1587_v31 = vld [vmem:[%s1649_s24 + $0xd8] sm:$0xff]  }
  0x16   : > { %1458 = vmatprep.subr.bf16.mxu0 %v1559_v3  ;;  %1535 = vmatprep.subr.bf16.mxu1 %v1559_v3  ;;  %v1588_v32 = vld [vmem:[%s1649_s24 + $0x60] sm:$0xff]   ;;  %v1590_v34 = vld [vmem:[%s1649_s24 + $0x68] sm:$0xff]   ;;  %v1592_v36 = vld [vmem:[%s1649_s24 + $0x70] sm:$0xff]  }
  0x17   : > { %v1589_v33 = vld [vmem:[%s1649_s24 + $0xe0] sm:$0xff]   ;;  %v1591_v35 = vld [vmem:[%s1649_s24 + $0xe8] sm:$0xff]   ;;  %v1593_v37 = vld [vmem:[%s1649_s24 + $0xf0] sm:$0xff]  }
  0x18   : > { %v1594_v38 = vld [vmem:[%s1649_s24 + $0x78] sm:$0xff]   ;;  %v1701_v40 = vld [vmem:[%s1907_s2] ss:$0 sm:$0xff] }
  0x19   : > { %1459 = vmatpush3.bf16.msra.mxu0 %v1559_v3  ;;  %1543 = vmatpush3.bf16.msra.mxu1 %v1559_v3  ;;  %v1595_v39 = vld [vmem:[%s1649_s24 + $0xf8] sm:$0xff]  }
  0x1a   : > { %1460 = vmatprep.subr.bf16.mxu0 %v1560_v6  ;;  %1536 = vmatprep.subr.bf16.mxu1 %v1560_v6 }
  0x1d   : > { %1461 = vmatpush3.bf16.msra.mxu0 %v1560_v6  ;;  %1544 = vmatpush3.bf16.msra.mxu1 %v1560_v6 }
  0x1e   : > { %1462 = vmatprep.subr.bf16.mxu0 %v1561_v7  ;;  %1537 = vmatprep.subr.bf16.mxu1 %v1561_v7 }
  0x21   : > { %1463 = vmatpush3.bf16.msra.mxu0 %v1561_v7  ;;  %1545 = vmatpush3.bf16.msra.mxu1 %v1561_v7 }
  0x22   : > { %1464 = vmatprep.subr.bf16.mxu0 %v1562_v8  ;;  %1538 = vmatprep.subr.bf16.mxu1 %v1562_v8 }
  0x25   : > { %1465 = vmatpush3.bf16.msra.mxu0 %v1562_v8  ;;  %1546 = vmatpush3.bf16.msra.mxu1 %v1562_v8 }
  0x26   : > { %1466 = vmatprep.subr.bf16.mxu0 %v1563_v9  ;;  %1539 = vmatprep.subr.bf16.mxu1 %v1563_v9 }
  0x29   : > { %1467 = vmatpush3.bf16.msra.mxu0 %v1563_v9  ;;  %1547 = vmatpush3.bf16.msra.mxu1 %v1563_v9 }
  0x2c   : > { %1469 = vmatmul.mubr.bf16.vlgmr.msra.gmra.mxu0 %v1566_v10  ;;  %1501 = vmatmul.mubr.bf16.vlgmr.msra.gmra.mxu1 %v1567_v11 }
  0x2d   : > { %1472 = vmatprep.mubr.bf16.mxu0 %v1568_v12  ;;  %1504 = vmatprep.mubr.bf16.mxu1 %v1569_v13 }
  0x34   : > { %1473 = vmatmul.mubr.bf16.gmra.mxu0 %v1570_v14  ;;  %1505 = vmatmul.mubr.bf16.gmra.mxu1 %v1571_v15 }
  0x35   : > { %1476 = vmatprep.mubr.bf16.mxu0 %v1572_v16  ;;  %1508 = vmatprep.mubr.bf16.mxu1 %v1573_v17 }
  0x3c   : > { %1477 = vmatmul.mubr.bf16.gmra.mxu0 %v1574_v18  ;;  %1509 = vmatmul.mubr.bf16.gmra.mxu1 %v1575_v19 }
  0x3d   : > { %1480 = vmatprep.mubr.bf16.mxu0 %v1576_v20  ;;  %1512 = vmatprep.mubr.bf16.mxu1 %v1577_v21 }
  0x44   : > { %1481 = vmatmul.mubr.bf16.gmra.mxu0 %v1578_v22  ;;  %1513 = vmatmul.mubr.bf16.gmra.mxu1 %v1579_v23 }
  0x45   : > { %1484 = vmatprep.mubr.bf16.mxu0 %v1580_v24  ;;  %1516 = vmatprep.mubr.bf16.mxu1 %v1581_v25 }
  0x4c   : > { %1485 = vmatmul.mubr.bf16.gmra.mxu0 %v1582_v26  ;;  %1517 = vmatmul.mubr.bf16.gmra.mxu1 %v1583_v27 }
  0x4d   : > { %1488 = vmatprep.mubr.bf16.mxu0 %v1584_v28  ;;  %1520 = vmatprep.mubr.bf16.mxu1 %v1585_v29 }
  0x54   : > { %1489 = vmatmul.mubr.bf16.gmra.mxu0 %v1586_v30  ;;  %1521 = vmatmul.mubr.bf16.gmra.mxu1 %v1587_v31 }
  0x55   : > { %1492 = vmatprep.mubr.bf16.mxu0 %v1588_v32  ;;  %1524 = vmatprep.mubr.bf16.mxu1 %v1589_v33 }
  0x5c   : > { %1493 = vmatmul.mubr.bf16.gmra.mxu0 %v1590_v34  ;;  %1525 = vmatmul.mubr.bf16.gmra.mxu1 %v1591_v35 }
  0x5d   : > { %1496 = vmatprep.mubr.bf16.mxu0 %v1592_v36  ;;  %1528 = vmatprep.mubr.bf16.mxu1 %v1593_v37 }
  0x64   : > { %1497 = vmatmul.mubr.bf16.gmra.mxu0 %v1594_v38  ;;  %1529 = vmatmul.mubr.bf16.gmra.mxu1 %v1595_v39 }
  0xec   : > { %v1470_v41 = vpop.f32.mrf.mxu0  ;;  %v1502_v42 = vpop.f32.mrf.mxu1 }
  0xed   : > { %v545_v43 = vadd.f32 %v1470_v41, %v1701_v40  ;;  %v673_v44 = vadd.f32 %v1502_v42, %v1701_v40 }
  0xee   : > { %v536_v45 = vpop.f32.mrf.mxu0  ;;  %v664_v46 = vpop.f32.mrf.mxu1 }
  0xef   : > { %v793_v47 = vmax.f32 %v545_v43, 0.0  ;;  %v825_v48 = vmax.f32 %v673_v44, 0.0  ;;  %v537_v49 = vadd.f32 %v1701_v40, %v536_v45  ;;  %v665_v50 = vadd.f32 %v1701_v40, %v664_v46 }
  0xf0   : > { %v1471_v51 = vpop.f32.mrf.mxu0  ;;  %v1503_v52 = vpop.f32.mrf.mxu1 }
  0xf1   : > { %v1350_v53 = vpack.c.bf16 %v793_v47, %v793_v47  ;;  %v1382_v54 = vpack.c.bf16 %v825_v48, %v825_v48  ;;  %v791_v55 = vmax.f32 %v537_v49, 0.0  ;;  %v823_v56 = vmax.f32 %v665_v50, 0.0 }
  0xf2   : > { %v548_v57 = vadd.f32 %v1471_v51, %v1701_v40  ;;  %v676_v58 = vadd.f32 %v1503_v52, %v1701_v40  ;;  %v539_v59 = vpop.f32.mrf.mxu0  ;;  %v667_v60 = vpop.f32.mrf.mxu1 }
  0xf3   : > { %1114 = vst.msk [vmem:[%s1712_s13 + $0x8] sm:$0xf] %vm1111_vm0, %v1350_v53  ;;  %1146 = vst.msk [vmem:[%s1712_s13 + $0x88] sm:$0xf] %vm1111_vm0, %v1382_v54  ;;  %v1348_v61 = vpack.c.bf16 %v791_v55, %v791_v55  ;;  %v1380_v62 = vpack.c.bf16 %v823_v56, %v823_v56  ;;  %v540_v63 = vadd.f32 %v1701_v40, %v539_v59 }
  0xf4   : > { %v668_v0 = vadd.f32 %v1701_v40, %v667_v60  ;;  %v794_v1 = vmax.f32 %v548_v57, 0.0  ;;  %v826_v2 = vmax.f32 %v676_v58, 0.0  ;;  %v1474_v3 = vpop.f32.mrf.mxu0  ;;  %v1506_v4 = vpop.f32.mrf.mxu1 }
  0xf5   : > { %1112 = vst.msk [vmem:[%s1712_s13] sm:$0xf] %vm1111_vm0, %v1348_v61  ;;  %1144 = vst.msk [vmem:[%s1712_s13 + $0x80] sm:$0xf] %vm1111_vm0, %v1380_v62  ;;  %v792_v5 = vmax.f32 %v540_v63, 0.0  ;;  %v561_v7 = vadd.f32 %v1474_v3, %v1701_v40  ;;  %v689_v8 = vadd.f32 %v1506_v4, %v1701_v40 }
  0xf6   : > { %v824_v6 = vmax.f32 %v668_v0, 0.0  ;;  %v1351_v9 = vpack.c.bf16 %v794_v1, %v794_v1  ;;  %v1383_v10 = vpack.c.bf16 %v826_v2, %v826_v2  ;;  %v552_v11 = vpop.f32.mrf.mxu0  ;;  %v680_v12 = vpop.f32.mrf.mxu1 }
  0xf7   : > { %v1349_v13 = vpack.c.bf16 %v792_v5, %v792_v5  ;;  %v797_v15 = vmax.f32 %v561_v7, 0.0  ;;  %v829_v16 = vmax.f32 %v689_v8, 0.0  ;;  %v553_v17 = vadd.f32 %v1701_v40, %v552_v11 }
  0xf8   : > { %v1381_v14 = vpack.c.bf16 %v824_v6, %v824_v6  ;;  %1115 = vst.msk [vmem:[%s1712_s13 + $0xc] sm:$0xf] %vm1111_vm0, %v1351_v9  ;;  %1147 = vst.msk [vmem:[%s1712_s13 + $0x8c] sm:$0xf] %vm1111_vm0, %v1383_v10  ;;  %v681_v18 = vadd.f32 %v1701_v40, %v680_v12  ;;  %v1475_v19 = vpop.f32.mrf.mxu0  ;;  %v1507_v20 = vpop.f32.mrf.mxu1 }
  0xf9   : > { %1113 = vst.msk [vmem:[%s1712_s13 + $0x4] sm:$0xf] %vm1111_vm0, %v1349_v13  ;;  %v1354_v21 = vpack.c.bf16 %v797_v15, %v797_v15  ;;  %v1386_v22 = vpack.c.bf16 %v829_v16, %v829_v16  ;;  %v564_v23 = vadd.f32 %v1475_v19, %v1701_v40  ;;  %v692_v24 = vadd.f32 %v1507_v20, %v1701_v40 }
  0xfa   : > { %1145 = vst.msk [vmem:[%s1712_s13 + $0x84] sm:$0xf] %vm1111_vm0, %v1381_v14  ;;  %v795_v25 = vmax.f32 %v553_v17, 0.0  ;;  %v827_v26 = vmax.f32 %v681_v18, 0.0  ;;  %v555_v27 = vpop.f32.mrf.mxu0  ;;  %v683_v28 = vpop.f32.mrf.mxu1 }
  0xfb   : > { %1118 = vst.msk [vmem:[%s1712_s13 + $0x18] sm:$0xf] %vm1111_vm0, %v1354_v21  ;;  %1150 = vst.msk [vmem:[%s1712_s13 + $0x98] sm:$0xf] %vm1111_vm0, %v1386_v22  ;;  %v798_v29 = vmax.f32 %v564_v23, 0.0  ;;  %v830_v30 = vmax.f32 %v692_v24, 0.0  ;;  %v556_v31 = vadd.f32 %v1701_v40, %v555_v27  ;;  %v684_v32 = vadd.f32 %v1701_v40, %v683_v28 }
  0xfc   : > { %v1352_v33 = vpack.c.bf16 %v795_v25, %v795_v25  ;;  %v1384_v34 = vpack.c.bf16 %v827_v26, %v827_v26  ;;  %v1478_v35 = vpop.f32.mrf.mxu0  ;;  %v1510_v36 = vpop.f32.mrf.mxu1 }
  0xfd   : > { %v1355_v37 = vpack.c.bf16 %v798_v29, %v798_v29  ;;  %v1387_v38 = vpack.c.bf16 %v830_v30, %v830_v30  ;;  %v796_v39 = vmax.f32 %v556_v31, 0.0  ;;  %v828_v41 = vmax.f32 %v684_v32, 0.0 }
  0xfe   : > { %1116 = vst.msk [vmem:[%s1712_s13 + $0x10] sm:$0xf] %vm1111_vm0, %v1352_v33  ;;  %1148 = vst.msk [vmem:[%s1712_s13 + $0x90] sm:$0xf] %vm1111_vm0, %v1384_v34  ;;  %v577_v42 = vadd.f32 %v1478_v35, %v1701_v40  ;;  %v705_v43 = vadd.f32 %v1510_v36, %v1701_v40  ;;  %v568_v44 = vpop.f32.mrf.mxu0  ;;  %v696_v45 = vpop.f32.mrf.mxu1 }
  0xff   : > { %1119 = vst.msk [vmem:[%s1712_s13 + $0x1c] sm:$0xf] %vm1111_vm0, %v1355_v37  ;;  %1151 = vst.msk [vmem:[%s1712_s13 + $0x9c] sm:$0xf] %vm1111_vm0, %v1387_v38  ;;  %v1353_v46 = vpack.c.bf16 %v796_v39, %v796_v39  ;;  %v1385_v47 = vpack.c.bf16 %v828_v41, %v828_v41  ;;  %v569_v48 = vadd.f32 %v1701_v40, %v568_v44 }
 0x100   : > { %v697_v49 = vadd.f32 %v1701_v40, %v696_v45  ;;  %v801_v50 = vmax.f32 %v577_v42, 0.0  ;;  %v833_v51 = vmax.f32 %v705_v43, 0.0  ;;  %v1479_v52 = vpop.f32.mrf.mxu0  ;;  %v1511_v53 = vpop.f32.mrf.mxu1 }
 0x101   : > { %1117 = vst.msk [vmem:[%s1712_s13 + $0x14] sm:$0xf] %vm1111_vm0, %v1353_v46  ;;  %1149 = vst.msk [vmem:[%s1712_s13 + $0x94] sm:$0xf] %vm1111_vm0, %v1385_v47  ;;  %v799_v54 = vmax.f32 %v569_v48, 0.0  ;;  %v580_v56 = vadd.f32 %v1479_v52, %v1701_v40  ;;  %v708_v57 = vadd.f32 %v1511_v53, %v1701_v40 }
 0x102   : > { %v831_v55 = vmax.f32 %v697_v49, 0.0  ;;  %v1358_v58 = vpack.c.bf16 %v801_v50, %v801_v50  ;;  %v1390_v59 = vpack.c.bf16 %v833_v51, %v833_v51  ;;  %v571_v60 = vpop.f32.mrf.mxu0  ;;  %v699_v61 = vpop.f32.mrf.mxu1 }
 0x103   : > { %v1356_v62 = vpack.c.bf16 %v799_v54, %v799_v54  ;;  %v802_v0 = vmax.f32 %v580_v56, 0.0  ;;  %v834_v1 = vmax.f32 %v708_v57, 0.0  ;;  %v572_v2 = vadd.f32 %v1701_v40, %v571_v60 }
 0x104   : > { %v1388_v63 = vpack.c.bf16 %v831_v55, %v831_v55  ;;  %1122 = vst.msk [vmem:[%s1712_s13 + $0x28] sm:$0xf] %vm1111_vm0, %v1358_v58  ;;  %1154 = vst.msk [vmem:[%s1712_s13 + $0xa8] sm:$0xf] %vm1111_vm0, %v1390_v59  ;;  %v700_v3 = vadd.f32 %v1701_v40, %v699_v61  ;;  %v1482_v4 = vpop.f32.mrf.mxu0  ;;  %v1514_v5 = vpop.f32.mrf.mxu1 }
 0x105   : > { %1120 = vst.msk [vmem:[%s1712_s13 + $0x20] sm:$0xf] %vm1111_vm0, %v1356_v62  ;;  %v1359_v6 = vpack.c.bf16 %v802_v0, %v802_v0  ;;  %v1391_v7 = vpack.c.bf16 %v834_v1, %v834_v1  ;;  %v593_v8 = vadd.f32 %v1482_v4, %v1701_v40  ;;  %v721_v9 = vadd.f32 %v1514_v5, %v1701_v40 }
 0x106   : > { %1152 = vst.msk [vmem:[%s1712_s13 + $0xa0] sm:$0xf] %vm1111_vm0, %v1388_v63  ;;  %v800_v10 = vmax.f32 %v572_v2, 0.0  ;;  %v832_v11 = vmax.f32 %v700_v3, 0.0  ;;  %v584_v12 = vpop.f32.mrf.mxu0  ;;  %v712_v13 = vpop.f32.mrf.mxu1 }
 0x107   : > { %1123 = vst.msk [vmem:[%s1712_s13 + $0x2c] sm:$0xf] %vm1111_vm0, %v1359_v6  ;;  %1155 = vst.msk [vmem:[%s1712_s13 + $0xac] sm:$0xf] %vm1111_vm0, %v1391_v7  ;;  %v805_v14 = vmax.f32 %v593_v8, 0.0  ;;  %v837_v15 = vmax.f32 %v721_v9, 0.0  ;;  %v585_v16 = vadd.f32 %v1701_v40, %v584_v12  ;;  %v713_v17 = vadd.f32 %v1701_v40, %v712_v13 }
 0x108   : > { %v1357_v18 = vpack.c.bf16 %v800_v10, %v800_v10  ;;  %v1389_v19 = vpack.c.bf16 %v832_v11, %v832_v11  ;;  %v1483_v20 = vpop.f32.mrf.mxu0  ;;  %v1515_v21 = vpop.f32.mrf.mxu1 }
 0x109   : > { %v1362_v22 = vpack.c.bf16 %v805_v14, %v805_v14  ;;  %v1394_v23 = vpack.c.bf16 %v837_v15, %v837_v15  ;;  %v803_v24 = vmax.f32 %v585_v16, 0.0  ;;  %v835_v25 = vmax.f32 %v713_v17, 0.0 }
 0x10a   : > { %1121 = vst.msk [vmem:[%s1712_s13 + $0x24] sm:$0xf] %vm1111_vm0, %v1357_v18  ;;  %1153 = vst.msk [vmem:[%s1712_s13 + $0xa4] sm:$0xf] %vm1111_vm0, %v1389_v19  ;;  %v596_v26 = vadd.f32 %v1483_v20, %v1701_v40  ;;  %v724_v27 = vadd.f32 %v1515_v21, %v1701_v40  ;;  %v587_v28 = vpop.f32.mrf.mxu0  ;;  %v715_v29 = vpop.f32.mrf.mxu1 }
 0x10b   : > { %1126 = vst.msk [vmem:[%s1712_s13 + $0x38] sm:$0xf] %vm1111_vm0, %v1362_v22  ;;  %1158 = vst.msk [vmem:[%s1712_s13 + $0xb8] sm:$0xf] %vm1111_vm0, %v1394_v23  ;;  %v1360_v30 = vpack.c.bf16 %v803_v24, %v803_v24  ;;  %v1392_v31 = vpack.c.bf16 %v835_v25, %v835_v25  ;;  %v588_v32 = vadd.f32 %v1701_v40, %v587_v28 }
 0x10c   : > { %v716_v33 = vadd.f32 %v1701_v40, %v715_v29  ;;  %v806_v34 = vmax.f32 %v596_v26, 0.0  ;;  %v838_v35 = vmax.f32 %v724_v27, 0.0  ;;  %v1486_v36 = vpop.f32.mrf.mxu0  ;;  %v1518_v37 = vpop.f32.mrf.mxu1 }
 0x10d   : > { %1124 = vst.msk [vmem:[%s1712_s13 + $0x30] sm:$0xf] %vm1111_vm0, %v1360_v30  ;;  %1156 = vst.msk [vmem:[%s1712_s13 + $0xb0] sm:$0xf] %vm1111_vm0, %v1392_v31  ;;  %v804_v38 = vmax.f32 %v588_v32, 0.0  ;;  %v609_v41 = vadd.f32 %v1486_v36, %v1701_v40  ;;  %v737_v42 = vadd.f32 %v1518_v37, %v1701_v40 }
 0x10e   : > { %v836_v39 = vmax.f32 %v716_v33, 0.0  ;;  %v1363_v43 = vpack.c.bf16 %v806_v34, %v806_v34  ;;  %v1395_v44 = vpack.c.bf16 %v838_v35, %v838_v35  ;;  %v600_v45 = vpop.f32.mrf.mxu0  ;;  %v728_v46 = vpop.f32.mrf.mxu1 }
 0x10f   : > { %v1361_v47 = vpack.c.bf16 %v804_v38, %v804_v38  ;;  %v809_v49 = vmax.f32 %v609_v41, 0.0  ;;  %v841_v50 = vmax.f32 %v737_v42, 0.0  ;;  %v601_v51 = vadd.f32 %v1701_v40, %v600_v45 }
 0x110   : > { %v1393_v48 = vpack.c.bf16 %v836_v39, %v836_v39  ;;  %1127 = vst.msk [vmem:[%s1712_s13 + $0x3c] sm:$0xf] %vm1111_vm0, %v1363_v43  ;;  %1159 = vst.msk [vmem:[%s1712_s13 + $0xbc] sm:$0xf] %vm1111_vm0, %v1395_v44  ;;  %v729_v52 = vadd.f32 %v1701_v40, %v728_v46  ;;  %v1487_v53 = vpop.f32.mrf.mxu0  ;;  %v1519_v54 = vpop.f32.mrf.mxu1 }
 0x111   : > { %1125 = vst.msk [vmem:[%s1712_s13 + $0x34] sm:$0xf] %vm1111_vm0, %v1361_v47  ;;  %v1366_v55 = vpack.c.bf16 %v809_v49, %v809_v49  ;;  %v1398_v56 = vpack.c.bf16 %v841_v50, %v841_v50  ;;  %v612_v57 = vadd.f32 %v1487_v53, %v1701_v40  ;;  %v740_v58 = vadd.f32 %v1519_v54, %v1701_v40 }
 0x112   : > { %1157 = vst.msk [vmem:[%s1712_s13 + $0xb4] sm:$0xf] %vm1111_vm0, %v1393_v48  ;;  %v807_v59 = vmax.f32 %v601_v51, 0.0  ;;  %v839_v60 = vmax.f32 %v729_v52, 0.0  ;;  %v603_v61 = vpop.f32.mrf.mxu0  ;;  %v731_v62 = vpop.f32.mrf.mxu1 }
 0x113   : > { %1130 = vst.msk [vmem:[%s1712_s13 + $0x48] sm:$0xf] %vm1111_vm0, %v1366_v55  ;;  %1162 = vst.msk [vmem:[%s1712_s13 + $0xc8] sm:$0xf] %vm1111_vm0, %v1398_v56  ;;  %v810_v63 = vmax.f32 %v612_v57, 0.0  ;;  %v842_v0 = vmax.f32 %v740_v58, 0.0  ;;  %v604_v1 = vadd.f32 %v1701_v40, %v603_v61  ;;  %v732_v2 = vadd.f32 %v1701_v40, %v731_v62 }
 0x114   : > { %v1364_v3 = vpack.c.bf16 %v807_v59, %v807_v59  ;;  %v1396_v4 = vpack.c.bf16 %v839_v60, %v839_v60  ;;  %v1490_v5 = vpop.f32.mrf.mxu0  ;;  %v1522_v6 = vpop.f32.mrf.mxu1 }
 0x115   : > { %v1367_v7 = vpack.c.bf16 %v810_v63, %v810_v63  ;;  %v1399_v8 = vpack.c.bf16 %v842_v0, %v842_v0  ;;  %v808_v9 = vmax.f32 %v604_v1, 0.0  ;;  %v840_v10 = vmax.f32 %v732_v2, 0.0 }
 0x116   : > { %1128 = vst.msk [vmem:[%s1712_s13 + $0x40] sm:$0xf] %vm1111_vm0, %v1364_v3  ;;  %1160 = vst.msk [vmem:[%s1712_s13 + $0xc0] sm:$0xf] %vm1111_vm0, %v1396_v4  ;;  %v625_v11 = vadd.f32 %v1490_v5, %v1701_v40  ;;  %v753_v12 = vadd.f32 %v1522_v6, %v1701_v40  ;;  %v616_v13 = vpop.f32.mrf.mxu0  ;;  %v744_v14 = vpop.f32.mrf.mxu1 }
 0x117   : > { %1131 = vst.msk [vmem:[%s1712_s13 + $0x4c] sm:$0xf] %vm1111_vm0, %v1367_v7  ;;  %1163 = vst.msk [vmem:[%s1712_s13 + $0xcc] sm:$0xf] %vm1111_vm0, %v1399_v8  ;;  %v1365_v15 = vpack.c.bf16 %v808_v9, %v808_v9  ;;  %v1397_v16 = vpack.c.bf16 %v840_v10, %v840_v10  ;;  %v617_v17 = vadd.f32 %v1701_v40, %v616_v13 }
 0x118   : > { %v745_v18 = vadd.f32 %v1701_v40, %v744_v14  ;;  %v813_v19 = vmax.f32 %v625_v11, 0.0  ;;  %v845_v20 = vmax.f32 %v753_v12, 0.0  ;;  %v1491_v21 = vpop.f32.mrf.mxu0  ;;  %v1523_v22 = vpop.f32.mrf.mxu1 }
 0x119   : > { %1129 = vst.msk [vmem:[%s1712_s13 + $0x44] sm:$0xf] %vm1111_vm0, %v1365_v15  ;;  %1161 = vst.msk [vmem:[%s1712_s13 + $0xc4] sm:$0xf] %vm1111_vm0, %v1397_v16  ;;  %v811_v23 = vmax.f32 %v617_v17, 0.0  ;;  %v628_v25 = vadd.f32 %v1491_v21, %v1701_v40  ;;  %v756_v26 = vadd.f32 %v1523_v22, %v1701_v40 }
 0x11a   : > { %v843_v24 = vmax.f32 %v745_v18, 0.0  ;;  %v1370_v27 = vpack.c.bf16 %v813_v19, %v813_v19  ;;  %v1402_v28 = vpack.c.bf16 %v845_v20, %v845_v20  ;;  %v619_v29 = vpop.f32.mrf.mxu0  ;;  %v747_v30 = vpop.f32.mrf.mxu1 }
 0x11b   : > { %v1368_v31 = vpack.c.bf16 %v811_v23, %v811_v23  ;;  %v814_v33 = vmax.f32 %v628_v25, 0.0  ;;  %v846_v34 = vmax.f32 %v756_v26, 0.0  ;;  %v620_v35 = vadd.f32 %v1701_v40, %v619_v29 }
 0x11c   : > { %v1400_v32 = vpack.c.bf16 %v843_v24, %v843_v24  ;;  %1134 = vst.msk [vmem:[%s1712_s13 + $0x58] sm:$0xf] %vm1111_vm0, %v1370_v27  ;;  %1166 = vst.msk [vmem:[%s1712_s13 + $0xd8] sm:$0xf] %vm1111_vm0, %v1402_v28  ;;  %v748_v36 = vadd.f32 %v1701_v40, %v747_v30  ;;  %v1494_v37 = vpop.f32.mrf.mxu0  ;;  %v1526_v38 = vpop.f32.mrf.mxu1 }
 0x11d   : > { %1132 = vst.msk [vmem:[%s1712_s13 + $0x50] sm:$0xf] %vm1111_vm0, %v1368_v31  ;;  %v1371_v39 = vpack.c.bf16 %v814_v33, %v814_v33  ;;  %v1403_v41 = vpack.c.bf16 %v846_v34, %v846_v34  ;;  %v641_v42 = vadd.f32 %v1494_v37, %v1701_v40  ;;  %v769_v43 = vadd.f32 %v1526_v38, %v1701_v40 }
 0x11e   : > { %1164 = vst.msk [vmem:[%s1712_s13 + $0xd0] sm:$0xf] %vm1111_vm0, %v1400_v32  ;;  %v812_v44 = vmax.f32 %v620_v35, 0.0  ;;  %v844_v45 = vmax.f32 %v748_v36, 0.0  ;;  %v632_v46 = vpop.f32.mrf.mxu0  ;;  %v760_v47 = vpop.f32.mrf.mxu1 }
 0x11f   : > { %1135 = vst.msk [vmem:[%s1712_s13 + $0x5c] sm:$0xf] %vm1111_vm0, %v1371_v39  ;;  %1167 = vst.msk [vmem:[%s1712_s13 + $0xdc] sm:$0xf] %vm1111_vm0, %v1403_v41  ;;  %v817_v48 = vmax.f32 %v641_v42, 0.0  ;;  %v849_v49 = vmax.f32 %v769_v43, 0.0  ;;  %v633_v50 = vadd.f32 %v1701_v40, %v632_v46  ;;  %v761_v51 = vadd.f32 %v1701_v40, %v760_v47 }
 0x120   : > { %v1369_v52 = vpack.c.bf16 %v812_v44, %v812_v44  ;;  %v1401_v53 = vpack.c.bf16 %v844_v45, %v844_v45  ;;  %v1495_v54 = vpop.f32.mrf.mxu0  ;;  %v1527_v55 = vpop.f32.mrf.mxu1 }
 0x121   : > { %v1374_v56 = vpack.c.bf16 %v817_v48, %v817_v48  ;;  %v1406_v57 = vpack.c.bf16 %v849_v49, %v849_v49  ;;  %v815_v58 = vmax.f32 %v633_v50, 0.0  ;;  %v847_v59 = vmax.f32 %v761_v51, 0.0 }
 0x122   : > { %1133 = vst.msk [vmem:[%s1712_s13 + $0x54] sm:$0xf] %vm1111_vm0, %v1369_v52  ;;  %1165 = vst.msk [vmem:[%s1712_s13 + $0xd4] sm:$0xf] %vm1111_vm0, %v1401_v53  ;;  %v644_v60 = vadd.f32 %v1495_v54, %v1701_v40  ;;  %v772_v61 = vadd.f32 %v1527_v55, %v1701_v40  ;;  %v635_v62 = vpop.f32.mrf.mxu0  ;;  %v763_v63 = vpop.f32.mrf.mxu1 }
 0x123   : > { %1138 = vst.msk [vmem:[%s1712_s13 + $0x68] sm:$0xf] %vm1111_vm0, %v1374_v56  ;;  %1170 = vst.msk [vmem:[%s1712_s13 + $0xe8] sm:$0xf] %vm1111_vm0, %v1406_v57  ;;  %v1372_v0 = vpack.c.bf16 %v815_v58, %v815_v58  ;;  %v1404_v1 = vpack.c.bf16 %v847_v59, %v847_v59  ;;  %v636_v2 = vadd.f32 %v1701_v40, %v635_v62 }
 0x124   : > { %v764_v3 = vadd.f32 %v1701_v40, %v763_v63  ;;  %v818_v4 = vmax.f32 %v644_v60, 0.0  ;;  %v850_v5 = vmax.f32 %v772_v61, 0.0  ;;  %v1498_v6 = vpop.f32.mrf.mxu0  ;;  %v1530_v7 = vpop.f32.mrf.mxu1 }
 0x125   : > { %1136 = vst.msk [vmem:[%s1712_s13 + $0x60] sm:$0xf] %vm1111_vm0, %v1372_v0  ;;  %1168 = vst.msk [vmem:[%s1712_s13 + $0xe0] sm:$0xf] %vm1111_vm0, %v1404_v1  ;;  %v816_v8 = vmax.f32 %v636_v2, 0.0  ;;  %v657_v10 = vadd.f32 %v1498_v6, %v1701_v40  ;;  %v785_v11 = vadd.f32 %v1530_v7, %v1701_v40 }
 0x126   : > { %v848_v9 = vmax.f32 %v764_v3, 0.0  ;;  %v1375_v12 = vpack.c.bf16 %v818_v4, %v818_v4  ;;  %v1407_v13 = vpack.c.bf16 %v850_v5, %v850_v5  ;;  %v648_v14 = vpop.f32.mrf.mxu0  ;;  %v776_v15 = vpop.f32.mrf.mxu1 }
 0x127   : > { %v1373_v16 = vpack.c.bf16 %v816_v8, %v816_v8  ;;  %v821_v18 = vmax.f32 %v657_v10, 0.0  ;;  %v853_v19 = vmax.f32 %v785_v11, 0.0  ;;  %v649_v20 = vadd.f32 %v1701_v40, %v648_v14 }
 0x128   : > { %v1405_v17 = vpack.c.bf16 %v848_v9, %v848_v9  ;;  %1139 = vst.msk [vmem:[%s1712_s13 + $0x6c] sm:$0xf] %vm1111_vm0, %v1375_v12  ;;  %1171 = vst.msk [vmem:[%s1712_s13 + $0xec] sm:$0xf] %vm1111_vm0, %v1407_v13  ;;  %v777_v21 = vadd.f32 %v1701_v40, %v776_v15  ;;  %v1499_v22 = vpop.f32.mrf.mxu0  ;;  %v1531_v23 = vpop.f32.mrf.mxu1 }
 0x129   : > { %1137 = vst.msk [vmem:[%s1712_s13 + $0x64] sm:$0xf] %vm1111_vm0, %v1373_v16  ;;  %v1378_v24 = vpack.c.bf16 %v821_v18, %v821_v18  ;;  %v1410_v25 = vpack.c.bf16 %v853_v19, %v853_v19  ;;  %v660_v26 = vadd.f32 %v1499_v22, %v1701_v40  ;;  %v788_v27 = vadd.f32 %v1531_v23, %v1701_v40 }
 0x12a   : > { %1169 = vst.msk [vmem:[%s1712_s13 + $0xe4] sm:$0xf] %vm1111_vm0, %v1405_v17  ;;  %v819_v28 = vmax.f32 %v649_v20, 0.0  ;;  %v851_v29 = vmax.f32 %v777_v21, 0.0  ;;  %v651_v30 = vpop.f32.mrf.mxu0  ;;  %v779_v31 = vpop.f32.mrf.mxu1 }
 0x12b   : > { %1142 = vst.msk [vmem:[%s1712_s13 + $0x78] sm:$0xf] %vm1111_vm0, %v1378_v24  ;;  %1174 = vst.msk [vmem:[%s1712_s13 + $0xf8] sm:$0xf] %vm1111_vm0, %v1410_v25  ;;  %v822_v32 = vmax.f32 %v660_v26, 0.0  ;;  %v854_v33 = vmax.f32 %v788_v27, 0.0  ;;  %v652_v34 = vadd.f32 %v1701_v40, %v651_v30  ;;  %v780_v35 = vadd.f32 %v1701_v40, %v779_v31 }
 0x12c   : > { %v1376_v36 = vpack.c.bf16 %v819_v28, %v819_v28  ;;  %v1408_v37 = vpack.c.bf16 %v851_v29, %v851_v29 }
 0x12d   : > { %v1379_v38 = vpack.c.bf16 %v822_v32, %v822_v32  ;;  %v1411_v39 = vpack.c.bf16 %v854_v33, %v854_v33  ;;  %v820_v41 = vmax.f32 %v652_v34, 0.0  ;;  %v852_v42 = vmax.f32 %v780_v35, 0.0 }
 0x12e   : > { %1140 = vst.msk [vmem:[%s1712_s13 + $0x70] sm:$0xf] %vm1111_vm0, %v1376_v36  ;;  %1172 = vst.msk [vmem:[%s1712_s13 + $0xf0] sm:$0xf] %vm1111_vm0, %v1408_v37 }
 0x12f   : > { %1143 = vst.msk [vmem:[%s1712_s13 + $0x7c] sm:$0xf] %vm1111_vm0, %v1379_v38  ;;  %1175 = vst.msk [vmem:[%s1712_s13 + $0xfc] sm:$0xf] %vm1111_vm0, %v1411_v39  ;;  %v1377_v43 = vpack.c.bf16 %v820_v41, %v820_v41  ;;  %v1409_v44 = vpack.c.bf16 %v852_v42, %v852_v42 }
 0x131   : > { %1141 = vst.msk [vmem:[%s1712_s13 + $0x74] sm:$0xf] %vm1111_vm0, %v1377_v43  ;;  %1173 = vst.msk [vmem:[%s1712_s13 + $0xf4] sm:$0xf] %vm1111_vm0, %v1409_v44 }
 0x132 PF: > { %s13_s12 = sadd.s32 1, %s1602_s12  }
 0x133   : > { %p10_p4 = scmp.ge.s32.totalorder %s13_s12, 6  }
 0x135   :  { %12 = sbr.rel (!%p10_p4) target bundleno = 1 (0x1), region = 62 }

// kernel: beta_vae_b_forward.11
= control target key start
LH: loop header
LB: loop body
LE: loop exit
PB: predicated region body
PF: predicated region fallthrough
CT: control target
= control target key end

     0   :  { %v2524_v0 = vmov 0   ;;  %vm1944_vm0 = vcmask 257024   ;;  %s3399_s1 = inlined_call_operand.vmem [shape: bf16[512,32], index: 1, kind: input, shape index: {}]   ;;  %s3400_s0 = inlined_call_operand.vmem [shape: bf16[512,512], index: 0, kind: input, shape index: {}]   ;;  %s3401_s2 = inlined_call_operand.vmem [shape: f32[1,32], index: 2, kind: input, shape index: {}]   ;;  %s3402_s3 = inlined_call_operand.vmem [shape: bf16[512,32], index: 3, kind: output, shape index: {}]  }
   0x1   :  { %1046 = vmatprep.subr.bf16.mxu0 %v2524_v0  ;;  %1335 = vmatprep.subr.bf16.mxu1 %v2524_v0  ;;  %v2303_v1 = vld [vmem:[%s3399_s1 + $0x38] sm:$0xff]   ;;  %v2305_v3 = vld [vmem:[%s3399_s1 + $0x30] sm:$0xff]   ;;  %v2307_v5 = vld [vmem:[%s3399_s1 + $0x28] sm:$0xff]  }
   0x2   :  { %v2304_v2 = vld [vmem:[%s3399_s1 + $0xb8] sm:$0xff]   ;;  %1047 = vmatpush1.bf16.msra.mxu0 %v2303_v1  ;;  %v2306_v4 = vld [vmem:[%s3399_s1 + $0xb0] sm:$0xff]   ;;  %v2308_v6 = vld [vmem:[%s3399_s1 + $0xa8] sm:$0xff]  }
   0x3   :  { %1336 = vmatpush1.bf16.msra.mxu1 %v2304_v2  ;;  %1048 = vmatprep.subr.bf16.mxu0 %v2524_v0  ;;  %v2309_v7 = vld [vmem:[%s3399_s1 + $0x20] sm:$0xff]   ;;  %v2311_v9 = vld [vmem:[%s3399_s1 + $0x18] sm:$0xff]   ;;  %v2313_v11 = vld [vmem:[%s3399_s1 + $0x10] sm:$0xff]  }
   0x4   :  { %1337 = vmatprep.subr.bf16.mxu1 %v2524_v0  ;;  %v2310_v8 = vld [vmem:[%s3399_s1 + $0xa0] sm:$0xff]   ;;  %v2312_v10 = vld [vmem:[%s3399_s1 + $0x98] sm:$0xff]   ;;  %v2314_v12 = vld [vmem:[%s3399_s1 + $0x90] sm:$0xff]  }
   0x5   :  { %v2315_v13 = vld [vmem:[%s3399_s1 + $0x8] sm:$0xff]   ;;  %v2317_v15 = vld [vmem:[%s3399_s1] sm:$0xff]   ;;  %v2319_v17 = vld [vmem:[%s3399_s1 + $0x78] sm:$0xff]  }
   0x6   :  { %1049 = vmatpush1.bf16.msra.mxu0 %v2305_v3  ;;  %v2316_v14 = vld [vmem:[%s3399_s1 + $0x88] sm:$0xff]   ;;  %v2318_v16 = vld [vmem:[%s3399_s1 + $0x80] sm:$0xff]   ;;  %v2320_v18 = vld [vmem:[%s3399_s1 + $0xf8] sm:$0xff]  }
   0x7   :  { %1338 = vmatpush1.bf16.msra.mxu1 %v2306_v4  ;;  %1050 = vmatprep.subr.bf16.mxu0 %v2524_v0  ;;  %v2337_v19 = vld [vmem:[%s3400_s0 + $0x4] ss:$16 sps:$4 sm:$0xff]   ;;  %v2340_v21 = vld [vmem:[%s3400_s0 + $0xc] ss:$16 sps:$4 sm:$0xff]   ;;  %v2335_v35 = vld [vmem:[%s3400_s0] ss:$16 sps:$4 sm:$0xff]  }
   0x8   :  { %1339 = vmatprep.subr.bf16.mxu1 %v2524_v0  ;;  %v2321_v20 = vld [vmem:[%s3399_s1 + $0x70] sm:$0xff]   ;;  %1078 = vmatprep.mubr.bf16.mxu0 %v2337_v19  ;;  %v2323_v23 = vld [vmem:[%s3399_s1 + $0x68] sm:$0xff]   ;;  %v2325_v25 = vld [vmem:[%s3399_s1 + $0x60] sm:$0xff]  }
   0x9   :  { %v2322_v22 = vld [vmem:[%s3399_s1 + $0xf0] sm:$0xff]   ;;  %1367 = vmatprep.mubr.bf16.mxu1 %v2340_v21  ;;  %v2324_v24 = vld [vmem:[%s3399_s1 + $0xe8] sm:$0xff]   ;;  %v2326_v26 = vld [vmem:[%s3399_s1 + $0xe0] sm:$0xff]  }
   0xa   :  { %1051 = vmatpush1.bf16.msra.mxu0 %v2307_v5  ;;  %v2327_v27 = vld [vmem:[%s3399_s1 + $0x58] sm:$0xff]   ;;  %v2329_v29 = vld [vmem:[%s3399_s1 + $0x50] sm:$0xff]   ;;  %v2331_v31 = vld [vmem:[%s3399_s1 + $0x48] sm:$0xff]  }
   0xb   :  { %1340 = vmatpush1.bf16.msra.mxu1 %v2308_v6  ;;  %1052 = vmatprep.subr.bf16.mxu0 %v2524_v0  ;;  %v2328_v28 = vld [vmem:[%s3399_s1 + $0xd8] sm:$0xff]   ;;  %v2330_v30 = vld [vmem:[%s3399_s1 + $0xd0] sm:$0xff]   ;;  %v2332_v32 = vld [vmem:[%s3399_s1 + $0xc8] sm:$0xff]  }
   0xc   :  { %1341 = vmatprep.subr.bf16.mxu1 %v2524_v0  ;;  %v2333_v33 = vld [vmem:[%s3399_s1 + $0x40] sm:$0xff]   ;;  %v2338_v36 = vld [vmem:[%s3400_s0 + $0x8] ss:$16 sps:$4 sm:$0xff]   ;;  %v2343_v38 = vld [vmem:[%s3400_s0 + $0x2c] ss:$16 sps:$4 sm:$0xff]  }
   0xd   :  { %v2334_v34 = vld [vmem:[%s3399_s1 + $0xc0] sm:$0xff]   ;;  %v2346_v40 = vld [vmem:[%s3400_s0 + $0x28] ss:$16 sps:$4 sm:$0xff]   ;;  %v2349_v42 = vld [vmem:[%s3400_s0 + $0x4c] ss:$16 sps:$4 sm:$0xff]  }
   0xe   :  { %1053 = vmatpush1.bf16.msra.mxu0 %v2309_v7  ;;  %v2341_v37 = vld [vmem:[%s3400_s0 + $0x24] ss:$16 sps:$4 sm:$0xff]   ;;  %v2345_v39 = vld [vmem:[%s3400_s0 + $0x20] ss:$16 sps:$4 sm:$0xff]   ;;  %v2352_v44 = vld [vmem:[%s3400_s0 + $0x48] ss:$16 sps:$4 sm:$0xff]  }
   0xf   :  { %1342 = vmatpush1.bf16.msra.mxu1 %v2310_v8  ;;  %1054 = vmatprep.subr.bf16.mxu0 %v2524_v0  ;;  %v2347_v41 = vld [vmem:[%s3400_s0 + $0x44] ss:$16 sps:$4 sm:$0xff]   ;;  %v2351_v43 = vld [vmem:[%s3400_s0 + $0x40] ss:$16 sps:$4 sm:$0xff]   ;;  %v2355_v46 = vld [vmem:[%s3400_s0 + $0x6c] ss:$16 sps:$4 sm:$0xff]  }
  0x10   :  { %1343 = vmatprep.subr.bf16.mxu1 %v2524_v0  ;;  %v2353_v45 = vld [vmem:[%s3400_s0 + $0x64] ss:$16 sps:$4 sm:$0xff]   ;;  %v2357_v47 = vld [vmem:[%s3400_s0 + $0x60] ss:$16 sps:$4 sm:$0xff]   ;;  %v2358_v48 = vld [vmem:[%s3400_s0 + $0x68] ss:$16 sps:$4 sm:$0xff]  }
  0x11   :  { %v2359_v49 = vld [vmem:[%s3400_s0 + $0x84] ss:$16 sps:$4 sm:$0xff]   ;;  %v2361_v50 = vld [vmem:[%s3400_s0 + $0x8c] ss:$16 sps:$4 sm:$0xff]   ;;  %v2363_v51 = vld [vmem:[%s3400_s0 + $0x80] ss:$16 sps:$4 sm:$0xff]  }
  0x12   :  { %1055 = vmatpush1.bf16.msra.mxu0 %v2311_v9  ;;  %v2364_v52 = vld [vmem:[%s3400_s0 + $0x88] ss:$16 sps:$4 sm:$0xff]   ;;  %v2365_v53 = vld [vmem:[%s3400_s0 + $0xa4] ss:$16 sps:$4 sm:$0xff]   ;;  %v2367_v54 = vld [vmem:[%s3400_s0 + $0xac] ss:$16 sps:$4 sm:$0xff]  }
  0x13   :  { %1344 = vmatpush1.bf16.msra.mxu1 %v2312_v10  ;;  %1056 = vmatprep.subr.bf16.mxu0 %v2524_v0  ;;  %v2369_v55 = vld [vmem:[%s3400_s0 + $0xa0] ss:$16 sps:$4 sm:$0xff]   ;;  %v2370_v56 = vld [vmem:[%s3400_s0 + $0xa8] ss:$16 sps:$4 sm:$0xff]   ;;  %v2371_v57 = vld [vmem:[%s3400_s0 + $0xc4] ss:$16 sps:$4 sm:$0xff]  }
  0x14   :  { %1345 = vmatprep.subr.bf16.mxu1 %v2524_v0  ;;  %v2373_v58 = vld [vmem:[%s3400_s0 + $0xcc] ss:$16 sps:$4 sm:$0xff]   ;;  %v2375_v59 = vld [vmem:[%s3400_s0 + $0xc0] ss:$16 sps:$4 sm:$0xff]   ;;  %v2376_v60 = vld [vmem:[%s3400_s0 + $0xc8] ss:$16 sps:$4 sm:$0xff]  }
  0x15   :  { %v2377_v61 = vld [vmem:[%s3400_s0 + $0xe4] ss:$16 sps:$4 sm:$0xff]   ;;  %v2379_v62 = vld [vmem:[%s3400_s0 + $0xec] ss:$16 sps:$4 sm:$0xff]   ;;  %v2381_v63 = vld [vmem:[%s3400_s0 + $0xe0] ss:$16 sps:$4 sm:$0xff]  }
  0x16   :  { %1057 = vmatpush1.bf16.msra.mxu0 %v2313_v11  ;;  %v2383_v1 = vld [vmem:[%s3400_s0 + $0x104] ss:$16 sps:$4 sm:$0xff]   ;;  %v2385_v2 = vld [vmem:[%s3400_s0 + $0x10c] ss:$16 sps:$4 sm:$0xff]   ;;  %v2387_v3 = vld [vmem:[%s3400_s0 + $0x100] ss:$16 sps:$4 sm:$0xff]  }
  0x17   :  { %1346 = vmatpush1.bf16.msra.mxu1 %v2314_v12  ;;  %1058 = vmatprep.subr.bf16.mxu0 %v2524_v0  ;;  %v2388_v4 = vld [vmem:[%s3400_s0 + $0x108] ss:$16 sps:$4 sm:$0xff]   ;;  %v2389_v5 = vld [vmem:[%s3400_s0 + $0x124] ss:$16 sps:$4 sm:$0xff]   ;;  %v2391_v6 = vld [vmem:[%s3400_s0 + $0x12c] ss:$16 sps:$4 sm:$0xff]  }
  0x18   :  { %1347 = vmatprep.subr.bf16.mxu1 %v2524_v0  ;;  %v2393_v7 = vld [vmem:[%s3400_s0 + $0x120] ss:$16 sps:$4 sm:$0xff]   ;;  %v2394_v8 = vld [vmem:[%s3400_s0 + $0x128] ss:$16 sps:$4 sm:$0xff]   ;;  %v2395_v9 = vld [vmem:[%s3400_s0 + $0x144] ss:$16 sps:$4 sm:$0xff]  }
  0x19   :  { %v2397_v10 = vld [vmem:[%s3400_s0 + $0x14c] ss:$16 sps:$4 sm:$0xff]   ;;  %v2399_v11 = vld [vmem:[%s3400_s0 + $0x140] ss:$16 sps:$4 sm:$0xff]   ;;  %v2400_v12 = vld [vmem:[%s3400_s0 + $0x148] ss:$16 sps:$4 sm:$0xff]  }
  0x1a   :  { %1059 = vmatpush1.bf16.msra.mxu0 %v2315_v13  ;;  %v2401_v13 = vld [vmem:[%s3400_s0 + $0x164] ss:$16 sps:$4 sm:$0xff]   ;;  %v2411_v19 = vld [vmem:[%s3400_s0 + $0x180] ss:$16 sps:$4 sm:$0xff]  }
  0x1b   :  { %1348 = vmatpush1.bf16.msra.mxu1 %v2316_v14  ;;  %1060 = vmatprep.subr.bf16.mxu0 %v2524_v0  ;;  %v2403_v14 = vld [vmem:[%s3400_s0 + $0x16c] ss:$16 sps:$4 sm:$0xff]   ;;  %v2413_v21 = vld [vmem:[%s3400_s0 + $0x1a4] ss:$16 sps:$4 sm:$0xff]  }
  0x1c   :  { %1349 = vmatprep.subr.bf16.mxu1 %v2524_v0 }
  0x1e   :  { %1061 = vmatpush1.bf16.msra.mxu0 %v2317_v15  ;;  %v2405_v15 = vld [vmem:[%s3400_s0 + $0x160] ss:$16 sps:$4 sm:$0xff]  }
  0x1f   :  { %1350 = vmatpush1.bf16.msra.mxu1 %v2318_v16  ;;  %1062 = vmatprep.subr.bf16.mxu0 %v2524_v0  ;;  %v2406_v16 = vld [vmem:[%s3400_s0 + $0x168] ss:$16 sps:$4 sm:$0xff]  }
  0x20   :  { %1351 = vmatprep.subr.bf16.mxu1 %v2524_v0 }
  0x22   :  { %1063 = vmatpush2.bf16.msra.mxu0 %v2319_v17  ;;  %v2407_v17 = vld [vmem:[%s3400_s0 + $0x184] ss:$16 sps:$4 sm:$0xff]  }
  0x23   :  { %1352 = vmatpush2.bf16.msra.mxu1 %v2320_v18  ;;  %1064 = vmatprep.subr.bf16.mxu0 %v2524_v0  ;;  %v2409_v18 = vld [vmem:[%s3400_s0 + $0x18c] ss:$16 sps:$4 sm:$0xff]  }
  0x24   :  { %1353 = vmatprep.subr.bf16.mxu1 %v2524_v0 }
  0x26   :  { %1065 = vmatpush2.bf16.msra.mxu0 %v2321_v20  ;;  %v2412_v20 = vld [vmem:[%s3400_s0 + $0x188] ss:$16 sps:$4 sm:$0xff]  }
  0x27   :  { %1354 = vmatpush2.bf16.msra.mxu1 %v2322_v22  ;;  %1066 = vmatprep.subr.bf16.mxu0 %v2524_v0  ;;  %v2415_v22 = vld [vmem:[%s3400_s0 + $0x1ac] ss:$16 sps:$4 sm:$0xff]  }
  0x28   :  { %1355 = vmatprep.subr.bf16.mxu1 %v2524_v0 }
  0x2a   :  { %1067 = vmatpush2.bf16.msra.mxu0 %v2323_v23  ;;  %v2417_v23 = vld [vmem:[%s3400_s0 + $0x1a0] ss:$16 sps:$4 sm:$0xff]  }
  0x2b   :  { %1356 = vmatpush2.bf16.msra.mxu1 %v2324_v24  ;;  %1068 = vmatprep.subr.bf16.mxu0 %v2524_v0  ;;  %v2418_v24 = vld [vmem:[%s3400_s0 + $0x1a8] ss:$16 sps:$4 sm:$0xff]  }
  0x2c   :  { %1357 = vmatprep.subr.bf16.mxu1 %v2524_v0 }
  0x2e   :  { %1069 = vmatpush2.bf16.msra.mxu0 %v2325_v25  ;;  %v2419_v25 = vld [vmem:[%s3400_s0 + $0x1c4] ss:$16 sps:$4 sm:$0xff]  }
  0x2f   :  { %1358 = vmatpush2.bf16.msra.mxu1 %v2326_v26  ;;  %1070 = vmatprep.subr.bf16.mxu0 %v2524_v0  ;;  %v2421_v26 = vld [vmem:[%s3400_s0 + $0x1cc] ss:$16 sps:$4 sm:$0xff]  }
  0x30   :  { %1359 = vmatprep.subr.bf16.mxu1 %v2524_v0 }
  0x32   :  { %1071 = vmatpush2.bf16.msra.mxu0 %v2327_v27  ;;  %v2423_v27 = vld [vmem:[%s3400_s0 + $0x1c0] ss:$16 sps:$4 sm:$0xff]  }
  0x33   :  { %1360 = vmatpush2.bf16.msra.mxu1 %v2328_v28  ;;  %1072 = vmatprep.subr.bf16.mxu0 %v2524_v0  ;;  %v2424_v28 = vld [vmem:[%s3400_s0 + $0x1c8] ss:$16 sps:$4 sm:$0xff]  }
  0x34   :  { %1361 = vmatprep.subr.bf16.mxu1 %v2524_v0 }
  0x36   :  { %1073 = vmatpush2.bf16.msra.mxu0 %v2329_v29  ;;  %v2425_v29 = vld [vmem:[%s3400_s0 + $0x1e4] ss:$16 sps:$4 sm:$0xff]  }
  0x37   :  { %1362 = vmatpush2.bf16.msra.mxu1 %v2330_v30  ;;  %1074 = vmatprep.subr.bf16.mxu0 %v2524_v0  ;;  %v2427_v30 = vld [vmem:[%s3400_s0 + $0x1ec] ss:$16 sps:$4 sm:$0xff]  }
  0x38   :  { %1363 = vmatprep.subr.bf16.mxu1 %v2524_v0 }
  0x3a   :  { %1075 = vmatpush2.bf16.msra.mxu0 %v2331_v31  ;;  %v2429_v31 = vld [vmem:[%s3400_s0 + $0x1e0] ss:$16 sps:$4 sm:$0xff]  }
  0x3b   :  { %1364 = vmatpush2.bf16.msra.mxu1 %v2332_v32  ;;  %1076 = vmatprep.subr.bf16.mxu0 %v2524_v0  ;;  %v2430_v32 = vld [vmem:[%s3400_s0 + $0x1e8] ss:$16 sps:$4 sm:$0xff]  }
  0x3c   :  { %1365 = vmatprep.subr.bf16.mxu1 %v2524_v0  ;;  %v2382_v0 = vld [vmem:[%s3400_s0 + $0xe8] ss:$16 sps:$4 sm:$0xff]  }
  0x3e   :  { %1077 = vmatpush2.bf16.msra.mxu0 %v2333_v33  ;;  %v2431_v33 = vld [vmem:[%s3400_s0 + $0x204] ss:$16 sps:$4 sm:$0xff]  }
  0x3f   :  { %1366 = vmatpush2.bf16.msra.mxu1 %v2334_v34  ;;  %v2433_v34 = vld [vmem:[%s3400_s0 + $0x20c] ss:$16 sps:$4 sm:$0xff]  }
  0x41   :  { %1079 = vmatmul.mubr.bf16.vlgmr.msra.gmra.mxu0 %v2335_v35  ;;  %v2435_v35 = vld [vmem:[%s3400_s0 + $0x200] ss:$16 sps:$4 sm:$0xff]  }
  0x42   :  { %1368 = vmatmul.mubr.bf16.vlgmr.msra.gmra.mxu1 %v2338_v36  ;;  %1086 = vmatprep.mubr.bf16.mxu0 %v2341_v37  ;;  %v2436_v36 = vld [vmem:[%s3400_s0 + $0x208] ss:$16 sps:$4 sm:$0xff]   ;;  %v2437_v37 = vld [vmem:[%s3400_s0 + $0x224] ss:$16 sps:$4 sm:$0xff]  }
  0x43   :  { %1375 = vmatprep.mubr.bf16.mxu1 %v2343_v38  ;;  %v2439_v38 = vld [vmem:[%s3400_s0 + $0x22c] ss:$16 sps:$4 sm:$0xff]  }
  0x49   :  { %1087 = vmatmul.mubr.bf16.gmra.mxu0 %v2345_v39  ;;  %v2441_v39 = vld [vmem:[%s3400_s0 + $0x220] ss:$16 sps:$4 sm:$0xff]  }
  0x4a   :  { %1376 = vmatmul.mubr.bf16.gmra.mxu1 %v2346_v40  ;;  %1094 = vmatprep.mubr.bf16.mxu0 %v2347_v41  ;;  %v2442_v40 = vld [vmem:[%s3400_s0 + $0x228] ss:$16 sps:$4 sm:$0xff]   ;;  %v2443_v41 = vld [vmem:[%s3400_s0 + $0x244] ss:$16 sps:$4 sm:$0xff]  }
  0x4b   :  { %1383 = vmatprep.mubr.bf16.mxu1 %v2349_v42  ;;  %v2445_v42 = vld [vmem:[%s3400_s0 + $0x24c] ss:$16 sps:$4 sm:$0xff]  }
  0x51   :  { %1095 = vmatmul.mubr.bf16.gmra.mxu0 %v2351_v43  ;;  %v2447_v43 = vld [vmem:[%s3400_s0 + $0x240] ss:$16 sps:$4 sm:$0xff]  }
  0x52   :  { %1384 = vmatmul.mubr.bf16.gmra.mxu1 %v2352_v44  ;;  %1102 = vmatprep.mubr.bf16.mxu0 %v2353_v45  ;;  %v2448_v44 = vld [vmem:[%s3400_s0 + $0x248] ss:$16 sps:$4 sm:$0xff]   ;;  %v2449_v45 = vld [vmem:[%s3400_s0 + $0x264] ss:$16 sps:$4 sm:$0xff]  }
  0x53   :  { %1391 = vmatprep.mubr.bf16.mxu1 %v2355_v46  ;;  %v2451_v46 = vld [vmem:[%s3400_s0 + $0x26c] ss:$16 sps:$4 sm:$0xff]  }
  0x59   :  { %1103 = vmatmul.mubr.bf16.gmra.mxu0 %v2357_v47  ;;  %v2453_v47 = vld [vmem:[%s3400_s0 + $0x260] ss:$16 sps:$4 sm:$0xff]  }
  0x5a   :  { %1392 = vmatmul.mubr.bf16.gmra.mxu1 %v2358_v48  ;;  %1110 = vmatprep.mubr.bf16.mxu0 %v2359_v49  ;;  %v2454_v48 = vld [vmem:[%s3400_s0 + $0x268] ss:$16 sps:$4 sm:$0xff]   ;;  %v2455_v49 = vld [vmem:[%s3400_s0 + $0x284] ss:$16 sps:$4 sm:$0xff]  }
  0x5b   :  { %1399 = vmatprep.mubr.bf16.mxu1 %v2361_v50  ;;  %v2457_v50 = vld [vmem:[%s3400_s0 + $0x28c] ss:$16 sps:$4 sm:$0xff]  }
  0x61   :  { %1111 = vmatmul.mubr.bf16.gmra.mxu0 %v2363_v51  ;;  %v2459_v51 = vld [vmem:[%s3400_s0 + $0x280] ss:$16 sps:$4 sm:$0xff]  }
  0x62   :  { %1400 = vmatmul.mubr.bf16.gmra.mxu1 %v2364_v52  ;;  %1118 = vmatprep.mubr.bf16.mxu0 %v2365_v53  ;;  %v2460_v52 = vld [vmem:[%s3400_s0 + $0x288] ss:$16 sps:$4 sm:$0xff]   ;;  %v2461_v53 = vld [vmem:[%s3400_s0 + $0x2a4] ss:$16 sps:$4 sm:$0xff]  }
  0x63   :  { %1407 = vmatprep.mubr.bf16.mxu1 %v2367_v54  ;;  %v2463_v54 = vld [vmem:[%s3400_s0 + $0x2ac] ss:$16 sps:$4 sm:$0xff]  }
  0x69   :  { %1119 = vmatmul.mubr.bf16.gmra.mxu0 %v2369_v55  ;;  %v2465_v55 = vld [vmem:[%s3400_s0 + $0x2a0] ss:$16 sps:$4 sm:$0xff]  }
  0x6a   :  { %1408 = vmatmul.mubr.bf16.gmra.mxu1 %v2370_v56  ;;  %1126 = vmatprep.mubr.bf16.mxu0 %v2371_v57  ;;  %v2466_v56 = vld [vmem:[%s3400_s0 + $0x2a8] ss:$16 sps:$4 sm:$0xff]   ;;  %v2467_v57 = vld [vmem:[%s3400_s0 + $0x2c4] ss:$16 sps:$4 sm:$0xff]  }
  0x6b   :  { %1415 = vmatprep.mubr.bf16.mxu1 %v2373_v58  ;;  %v2469_v58 = vld [vmem:[%s3400_s0 + $0x2cc] ss:$16 sps:$4 sm:$0xff]  }
  0x71   :  { %1127 = vmatmul.mubr.bf16.gmra.mxu0 %v2375_v59  ;;  %v2471_v59 = vld [vmem:[%s3400_s0 + $0x2c0] ss:$16 sps:$4 sm:$0xff]  }
  0x72   :  { %1416 = vmatmul.mubr.bf16.gmra.mxu1 %v2376_v60  ;;  %1134 = vmatprep.mubr.bf16.mxu0 %v2377_v61  ;;  %v2472_v60 = vld [vmem:[%s3400_s0 + $0x2c8] ss:$16 sps:$4 sm:$0xff]   ;;  %v2473_v61 = vld [vmem:[%s3400_s0 + $0x2e4] ss:$16 sps:$4 sm:$0xff]  }
  0x73   :  { %1423 = vmatprep.mubr.bf16.mxu1 %v2379_v62  ;;  %v2475_v62 = vld [vmem:[%s3400_s0 + $0x2ec] ss:$16 sps:$4 sm:$0xff]  }
  0x79   :  { %1135 = vmatmul.mubr.bf16.gmra.mxu0 %v2381_v63  ;;  %v2477_v63 = vld [vmem:[%s3400_s0 + $0x2e0] ss:$16 sps:$4 sm:$0xff]  }
  0x7a   :  { %1424 = vmatmul.mubr.bf16.gmra.mxu1 %v2382_v0  ;;  %1142 = vmatprep.mubr.bf16.mxu0 %v2383_v1  ;;  %v2478_v0 = vld [vmem:[%s3400_s0 + $0x2e8] ss:$16 sps:$4 sm:$0xff]   ;;  %v2479_v1 = vld [vmem:[%s3400_s0 + $0x304] ss:$16 sps:$4 sm:$0xff]  }
  0x7b   :  { %1431 = vmatprep.mubr.bf16.mxu1 %v2385_v2  ;;  %v2481_v2 = vld [vmem:[%s3400_s0 + $0x30c] ss:$16 sps:$4 sm:$0xff]  }
  0x81   :  { %1143 = vmatmul.mubr.bf16.gmra.mxu0 %v2387_v3  ;;  %v112_v3 = vld [vmem:[%s3400_s0 + $0x308] sm:$0xff] }
  0x82   :  { %1432 = vmatmul.mubr.bf16.gmra.mxu1 %v2388_v4  ;;  %1150 = vmatprep.mubr.bf16.mxu0 %v2389_v5  ;;  %v114_v4 = vld [vmem:[%s3400_s0 + $0x318] sm:$0xff]  ;;  %v2483_v5 = vld [vmem:[%s3400_s0 + $0x300] ss:$16 sps:$4 sm:$0xff]  }
  0x83   :  { %1439 = vmatprep.mubr.bf16.mxu1 %v2391_v6  ;;  %v2112_v6 = vcombine.low %v112_v3, %v114_v4  ;;  %v2501_v4 = vld [vmem:[%s3400_s0 + $0x384] ss:$16 sps:$4 sm:$0xff]  }
  0x89   :  { %1151 = vmatmul.mubr.bf16.gmra.mxu0 %v2393_v7  ;;  %v2484_v7 = vld [vmem:[%s3400_s0 + $0x324] ss:$16 sps:$4 sm:$0xff]  }
  0x8a   :  { %1440 = vmatmul.mubr.bf16.gmra.mxu1 %v2394_v8  ;;  %1158 = vmatprep.mubr.bf16.mxu0 %v2395_v9  ;;  %v2982_v8 = vld [vmem:[%s3401_s2] ss:$0 sm:$0xff]  ;;  %v2486_v9 = vld [vmem:[%s3400_s0 + $0x32c] ss:$16 sps:$4 sm:$0xff]  }
  0x8b   :  { %1447 = vmatprep.mubr.bf16.mxu1 %v2397_v10 }
  0x91   :  { %1159 = vmatmul.mubr.bf16.gmra.mxu0 %v2399_v11 }
  0x92   :  { %1448 = vmatmul.mubr.bf16.gmra.mxu1 %v2400_v12  ;;  %1166 = vmatprep.mubr.bf16.mxu0 %v2401_v13 }
  0x93   :  { %1455 = vmatprep.mubr.bf16.mxu1 %v2403_v14  ;;  %v116_v14 = vld [vmem:[%s3400_s0 + $0x328] sm:$0xff] }
  0x99   :  { %1167 = vmatmul.mubr.bf16.gmra.mxu0 %v2405_v15  ;;  %v118_v15 = vld [vmem:[%s3400_s0 + $0x338] sm:$0xff] }
  0x9a   :  { %1456 = vmatmul.mubr.bf16.gmra.mxu1 %v2406_v16  ;;  %1174 = vmatprep.mubr.bf16.mxu0 %v2407_v17 }
  0x9b   :  { %1463 = vmatprep.mubr.bf16.mxu1 %v2409_v18 }
  0xa1   :  { %1175 = vmatmul.mubr.bf16.gmra.mxu0 %v2411_v19  ;;  %v2488_v19 = vld [vmem:[%s3400_s0 + $0x320] ss:$16 sps:$4 sm:$0xff]  }
  0xa2   :  { %1464 = vmatmul.mubr.bf16.gmra.mxu1 %v2412_v20  ;;  %1182 = vmatprep.mubr.bf16.mxu0 %v2413_v21 }
  0xa3   :  { %1471 = vmatprep.mubr.bf16.mxu1 %v2415_v22 }
  0xa9   :  { %1183 = vmatmul.mubr.bf16.gmra.mxu0 %v2417_v23  ;;  %v2116_v23 = vcombine.low %v116_v14, %v118_v15 }
  0xaa   :  { %1472 = vmatmul.mubr.bf16.gmra.mxu1 %v2418_v24  ;;  %1190 = vmatprep.mubr.bf16.mxu0 %v2419_v25  ;;  %v2489_v24 = vld [vmem:[%s3400_s0 + $0x344] ss:$16 sps:$4 sm:$0xff]  }
  0xab   :  { %1479 = vmatprep.mubr.bf16.mxu1 %v2421_v26  ;;  %v2491_v26 = vld [vmem:[%s3400_s0 + $0x34c] ss:$16 sps:$4 sm:$0xff]  }
  0xb1   :  { %1191 = vmatmul.mubr.bf16.gmra.mxu0 %v2423_v27 }
  0xb2   :  { %1480 = vmatmul.mubr.bf16.gmra.mxu1 %v2424_v28  ;;  %1198 = vmatprep.mubr.bf16.mxu0 %v2425_v29 }
  0xb3   :  { %1487 = vmatprep.mubr.bf16.mxu1 %v2427_v30 }
  0xb9   :  { %1199 = vmatmul.mubr.bf16.gmra.mxu0 %v2429_v31 }
  0xba   :  { %1488 = vmatmul.mubr.bf16.gmra.mxu1 %v2430_v32  ;;  %1206 = vmatprep.mubr.bf16.mxu0 %v2431_v33 }
  0xbb   :  { %1495 = vmatprep.mubr.bf16.mxu1 %v2433_v34 }
  0xc1   :  { %1207 = vmatmul.mubr.bf16.gmra.mxu0 %v2435_v35  ;;  %v120_v35 = vld [vmem:[%s3400_s0 + $0x348] sm:$0xff] }
  0xc2   :  { %1496 = vmatmul.mubr.bf16.gmra.mxu1 %v2436_v36  ;;  %1214 = vmatprep.mubr.bf16.mxu0 %v2437_v37  ;;  %v122_v36 = vld [vmem:[%s3400_s0 + $0x358] sm:$0xff] }
  0xc3   :  { %1503 = vmatprep.mubr.bf16.mxu1 %v2439_v38 }
  0xc9   :  { %1215 = vmatmul.mubr.bf16.gmra.mxu0 %v2441_v39 }
  0xca   :  { %1504 = vmatmul.mubr.bf16.gmra.mxu1 %v2442_v40  ;;  %1222 = vmatprep.mubr.bf16.mxu0 %v2443_v41  ;;  %v2493_v41 = vld [vmem:[%s3400_s0 + $0x340] ss:$16 sps:$4 sm:$0xff]  }
  0xcb   :  { %1511 = vmatprep.mubr.bf16.mxu1 %v2445_v42 }
  0xd1   :  { %1223 = vmatmul.mubr.bf16.gmra.mxu0 %v2447_v43 }
  0xd2   :  { %1512 = vmatmul.mubr.bf16.gmra.mxu1 %v2448_v44  ;;  %1230 = vmatprep.mubr.bf16.mxu0 %v2449_v45  ;;  %v2120_v45 = vcombine.low %v120_v35, %v122_v36 }
  0xd3   :  { %1519 = vmatprep.mubr.bf16.mxu1 %v2451_v46  ;;  %v2494_v46 = vld [vmem:[%s3400_s0 + $0x364] ss:$16 sps:$4 sm:$0xff]  }
  0xd9   :  { %1231 = vmatmul.mubr.bf16.gmra.mxu0 %v2453_v47 }
  0xda   :  { %1520 = vmatmul.mubr.bf16.gmra.mxu1 %v2454_v48  ;;  %1238 = vmatprep.mubr.bf16.mxu0 %v2455_v49  ;;  %v2496_v48 = vld [vmem:[%s3400_s0 + $0x36c] ss:$16 sps:$4 sm:$0xff]  }
  0xdb   :  { %1527 = vmatprep.mubr.bf16.mxu1 %v2457_v50 }
  0xe1   :  { %1239 = vmatmul.mubr.bf16.gmra.mxu0 %v2459_v51 }
  0xe2   :  { %1528 = vmatmul.mubr.bf16.gmra.mxu1 %v2460_v52  ;;  %1246 = vmatprep.mubr.bf16.mxu0 %v2461_v53 }
  0xe3   :  { %1535 = vmatprep.mubr.bf16.mxu1 %v2463_v54 }
  0xe9   :  { %1247 = vmatmul.mubr.bf16.gmra.mxu0 %v2465_v55 }
  0xea   :  { %1536 = vmatmul.mubr.bf16.gmra.mxu1 %v2466_v56  ;;  %1254 = vmatprep.mubr.bf16.mxu0 %v2467_v57  ;;  %v124_v57 = vld [vmem:[%s3400_s0 + $0x368] sm:$0xff] }
  0xeb   :  { %1543 = vmatprep.mubr.bf16.mxu1 %v2469_v58  ;;  %v126_v58 = vld [vmem:[%s3400_s0 + $0x378] sm:$0xff] }
  0xec   :  { %v2124_v3 = vcombine.low %v124_v57, %v126_v58 }
  0xf1   :  { %1255 = vmatmul.mubr.bf16.gmra.mxu0 %v2471_v59 }
  0xf2   :  { %1544 = vmatmul.mubr.bf16.gmra.mxu1 %v2472_v60  ;;  %1262 = vmatprep.mubr.bf16.mxu0 %v2473_v61 }
  0xf3   :  { %1551 = vmatprep.mubr.bf16.mxu1 %v2475_v62 }
  0xf9   :  { %1263 = vmatmul.mubr.bf16.gmra.mxu0 %v2477_v63  ;;  %v2498_v63 = vld [vmem:[%s3400_s0 + $0x360] ss:$16 sps:$4 sm:$0xff]  }
  0xfa   :  { %1552 = vmatmul.mubr.bf16.gmra.mxu1 %v2478_v0  ;;  %1270 = vmatprep.mubr.bf16.mxu0 %v2479_v1 }
  0xfb   :  { %1559 = vmatprep.mubr.bf16.mxu1 %v2481_v2 }
 0x101   :  { %v1080_v10 = vpop.f32.mrf.mxu0  ;;  %1271 = vmatmul.mubr.bf16.gmra.mxu0 %v2483_v5 }
 0x102   :  { %v1081_v11 = vadd.f32 %v2982_v8, %v1080_v10  ;;  %v1369_v12 = vpop.f32.mrf.mxu1  ;;  %1560 = vmatmul.mubr.bf16.gmra.mxu1 %v2112_v6  ;;  %1278 = vmatprep.mubr.bf16.mxu0 %v2484_v7  ;;  %v2504_v6 = vld [vmem:[%s3400_s0 + $0x38c] ss:$16 sps:$4 sm:$0xff]  }
 0x103   :  { %v1082_v13 = vpop.f32.mrf.mxu0  ;;  %1567 = vmatprep.mubr.bf16.mxu1 %v2486_v9 }
 0x104   :  { %v1370_v16 = vadd.f32 %v1369_v12, %v1081_v11  ;;  %v1371_v17 = vpop.f32.mrf.mxu1 }
 0x105   :  { %v1083_v18 = vpop.f32.mrf.mxu0 }
 0x106   :  { %v1624_v20 = vmax.f32 %v1370_v16, 0.0  ;;  %v1084_v21 = vadd.f32 %v2982_v8, %v1083_v18  ;;  %v1372_v22 = vpop.f32.mrf.mxu1 }
 0x107   :  { %v1085_v25 = vpop.f32.mrf.mxu0 }
 0x108   :  { %v2238_v27 = vpack.c.bf16 %v1624_v20, %v1624_v20  ;;  %v1373_v28 = vadd.f32 %v1372_v22, %v1084_v21  ;;  %v1374_v29 = vpop.f32.mrf.mxu1  ;;  %v2499_v20 = vld [vmem:[%s3400_s0 + $0x380] ss:$16 sps:$4 sm:$0xff]   ;;  %v2507_v25 = vld [vmem:[%s3400_s0 + $0x3a4] ss:$16 sps:$4 sm:$0xff]  }
 0x109   :  { %v1088_v30 = vpop.f32.mrf.mxu0  ;;  %1279 = vmatmul.mubr.bf16.gmra.mxu0 %v2488_v19 }
 0x10a   :  { %1945 = vst.msk [vmem:[%s3402_s3] sm:$0xf] %vm1944_vm0, %v2238_v27  ;;  %v1625_v31 = vmax.f32 %v1373_v28, 0.0  ;;  %v1089_v32 = vadd.f32 %v2982_v8, %v1088_v30  ;;  %v1377_v33 = vpop.f32.mrf.mxu1  ;;  %1568 = vmatmul.mubr.bf16.gmra.mxu1 %v2116_v23  ;;  %1286 = vmatprep.mubr.bf16.mxu0 %v2489_v24  ;;  %v2502_v24 = vld [vmem:[%s3400_s0 + $0x388] ss:$16 sps:$4 sm:$0xff]  }
 0x10b   :  { %v1090_v34 = vpop.f32.mrf.mxu0  ;;  %1575 = vmatprep.mubr.bf16.mxu1 %v2491_v26  ;;  %v2510_v27 = vld [vmem:[%s3400_s0 + $0x3ac] ss:$16 sps:$4 sm:$0xff]  }
 0x10c   :  { %v2239_v37 = vpack.c.bf16 %v1625_v31, %v1625_v31  ;;  %v1378_v38 = vadd.f32 %v1377_v33, %v1089_v32  ;;  %v1379_v39 = vpop.f32.mrf.mxu1 }
 0x10d   :  { %v1091_v40 = vpop.f32.mrf.mxu0 }
 0x10e   :  { %1946 = vst.msk [vmem:[%s3402_s3 + $0x4] sm:$0xf] %vm1944_vm0, %v2239_v37  ;;  %v1626_v42 = vmax.f32 %v1378_v38, 0.0  ;;  %v1092_v43 = vadd.f32 %v2982_v8, %v1091_v40  ;;  %v1380_v44 = vpop.f32.mrf.mxu1  ;;  %v2505_v40 = vld [vmem:[%s3400_s0 + $0x3a0] ss:$16 sps:$4 sm:$0xff]  }
 0x10f   :  { %v1093_v47 = vpop.f32.mrf.mxu0 }
 0x110   :  { %v2240_v49 = vpack.c.bf16 %v1626_v42, %v1626_v42  ;;  %v1381_v50 = vadd.f32 %v1380_v44, %v1092_v43  ;;  %v1382_v51 = vpop.f32.mrf.mxu1  ;;  %v2508_v44 = vld [vmem:[%s3400_s0 + $0x3a8] ss:$16 sps:$4 sm:$0xff]   ;;  %v2516_v47 = vld [vmem:[%s3400_s0 + $0x3cc] ss:$16 sps:$4 sm:$0xff]  }
 0x111   :  { %v1096_v52 = vpop.f32.mrf.mxu0  ;;  %1287 = vmatmul.mubr.bf16.gmra.mxu0 %v2493_v41 }
 0x112   :  { %1947 = vst.msk [vmem:[%s3402_s3 + $0x8] sm:$0xf] %vm1944_vm0, %v2240_v49  ;;  %v1627_v53 = vmax.f32 %v1381_v50, 0.0  ;;  %v1097_v54 = vadd.f32 %v2982_v8, %v1096_v52  ;;  %v1385_v55 = vpop.f32.mrf.mxu1  ;;  %1576 = vmatmul.mubr.bf16.gmra.mxu1 %v2120_v45  ;;  %1294 = vmatprep.mubr.bf16.mxu0 %v2494_v46  ;;  %v2513_v45 = vld [vmem:[%s3400_s0 + $0x3c4] ss:$16 sps:$4 sm:$0xff]  }
 0x113   :  { %v1098_v56 = vpop.f32.mrf.mxu0  ;;  %1583 = vmatprep.mubr.bf16.mxu1 %v2496_v48 }
 0x114   :  { %v2241_v59 = vpack.c.bf16 %v1627_v53, %v1627_v53  ;;  %v1386_v60 = vadd.f32 %v1385_v55, %v1097_v54  ;;  %v1387_v61 = vpop.f32.mrf.mxu1 }
 0x115   :  { %v1099_v62 = vpop.f32.mrf.mxu0 }
 0x116   :  { %1948 = vst.msk [vmem:[%s3402_s3 + $0xc] sm:$0xf] %vm1944_vm0, %v2241_v59  ;;  %v1628_v0 = vmax.f32 %v1386_v60, 0.0  ;;  %v1100_v1 = vadd.f32 %v2982_v8, %v1099_v62  ;;  %v1388_v2 = vpop.f32.mrf.mxu1  ;;  %v2511_v60 = vld [vmem:[%s3400_s0 + $0x3c0] ss:$16 sps:$4 sm:$0xff]  }
 0x117   :  { %v1101_v5 = vpop.f32.mrf.mxu0 }
 0x118   :  { %v2242_v7 = vpack.c.bf16 %v1628_v0, %v1628_v0  ;;  %v1389_v9 = vadd.f32 %v1388_v2, %v1100_v1  ;;  %v1390_v10 = vpop.f32.mrf.mxu1  ;;  %v2514_v0 = vld [vmem:[%s3400_s0 + $0x3c8] ss:$16 sps:$4 sm:$0xff]   ;;  %v2519_v1 = vld [vmem:[%s3400_s0 + $0x3e4] ss:$16 sps:$4 sm:$0xff]  }
 0x119   :  { %v1104_v11 = vpop.f32.mrf.mxu0  ;;  %1295 = vmatmul.mubr.bf16.gmra.mxu0 %v2498_v63 }
 0x11a   :  { %1949 = vst.msk [vmem:[%s3402_s3 + $0x10] sm:$0xf] %vm1944_vm0, %v2242_v7  ;;  %v1629_v12 = vmax.f32 %v1389_v9, 0.0  ;;  %v1105_v13 = vadd.f32 %v2982_v8, %v1104_v11  ;;  %v1393_v14 = vpop.f32.mrf.mxu1  ;;  %1584 = vmatmul.mubr.bf16.gmra.mxu1 %v2124_v3  ;;  %1302 = vmatprep.mubr.bf16.mxu0 %v2501_v4  ;;  %v2522_v3 = vld [vmem:[%s3400_s0 + $0x3ec] ss:$16 sps:$4 sm:$0xff]  }
 0x11b   :  { %v1106_v15 = vpop.f32.mrf.mxu0  ;;  %1591 = vmatprep.mubr.bf16.mxu1 %v2504_v6 }
 0x11c   :  { %v2243_v16 = vpack.c.bf16 %v1629_v12, %v1629_v12  ;;  %v1394_v17 = vadd.f32 %v1393_v14, %v1105_v13  ;;  %v1395_v18 = vpop.f32.mrf.mxu1 }
 0x11d   :  { %v1107_v19 = vpop.f32.mrf.mxu0 }
 0x11e   :  { %1950 = vst.msk [vmem:[%s3402_s3 + $0x14] sm:$0xf] %vm1944_vm0, %v2243_v16  ;;  %v1630_v21 = vmax.f32 %v1394_v17, 0.0  ;;  %v1108_v22 = vadd.f32 %v2982_v8, %v1107_v19  ;;  %v1396_v23 = vpop.f32.mrf.mxu1  ;;  %v2517_v17 = vld [vmem:[%s3400_s0 + $0x3e0] ss:$16 sps:$4 sm:$0xff]  }
 0x11f   :  { %v1109_v26 = vpop.f32.mrf.mxu0 }
 0x120   :  { %v2244_v28 = vpack.c.bf16 %v1630_v21, %v1630_v21  ;;  %v1397_v29 = vadd.f32 %v1396_v23, %v1108_v22  ;;  %v1398_v30 = vpop.f32.mrf.mxu1  ;;  %v2520_v21 = vld [vmem:[%s3400_s0 + $0x3e8] ss:$16 sps:$4 sm:$0xff]  }
 0x121   :  { %v1112_v31 = vpop.f32.mrf.mxu0  ;;  %1303 = vmatmul.mubr.bf16.gmra.mxu0 %v2499_v20 }
 0x122   :  { %1951 = vst.msk [vmem:[%s3402_s3 + $0x18] sm:$0xf] %vm1944_vm0, %v2244_v28  ;;  %v1631_v32 = vmax.f32 %v1397_v29, 0.0  ;;  %v1113_v33 = vadd.f32 %v2982_v8, %v1112_v31  ;;  %v1401_v34 = vpop.f32.mrf.mxu1  ;;  %1592 = vmatmul.mubr.bf16.gmra.mxu1 %v2502_v24  ;;  %1310 = vmatprep.mubr.bf16.mxu0 %v2507_v25 }
 0x123   :  { %v1114_v35 = vpop.f32.mrf.mxu0  ;;  %1599 = vmatprep.mubr.bf16.mxu1 %v2510_v27 }
 0x124   :  { %v2245_v36 = vpack.c.bf16 %v1631_v32, %v1631_v32  ;;  %v1402_v37 = vadd.f32 %v1401_v34, %v1113_v33  ;;  %v1403_v38 = vpop.f32.mrf.mxu1 }
 0x125   :  { %v1115_v39 = vpop.f32.mrf.mxu0 }
 0x126   :  { %1952 = vst.msk [vmem:[%s3402_s3 + $0x1c] sm:$0xf] %vm1944_vm0, %v2245_v36  ;;  %v1632_v41 = vmax.f32 %v1402_v37, 0.0  ;;  %v1116_v42 = vadd.f32 %v2982_v8, %v1115_v39  ;;  %v1404_v43 = vpop.f32.mrf.mxu1 }
 0x127   :  { %v1117_v46 = vpop.f32.mrf.mxu0 }
 0x128   :  { %v2246_v48 = vpack.c.bf16 %v1632_v41, %v1632_v41  ;;  %v1405_v49 = vadd.f32 %v1404_v43, %v1116_v42  ;;  %v1406_v50 = vpop.f32.mrf.mxu1 }
 0x129   :  { %v1120_v51 = vpop.f32.mrf.mxu0  ;;  %1311 = vmatmul.mubr.bf16.gmra.mxu0 %v2505_v40 }
 0x12a   :  { %1953 = vst.msk [vmem:[%s3402_s3 + $0x20] sm:$0xf] %vm1944_vm0, %v2246_v48  ;;  %v1633_v52 = vmax.f32 %v1405_v49, 0.0  ;;  %v1121_v53 = vadd.f32 %v2982_v8, %v1120_v51  ;;  %v1409_v54 = vpop.f32.mrf.mxu1  ;;  %1600 = vmatmul.mubr.bf16.gmra.mxu1 %v2508_v44  ;;  %1318 = vmatprep.mubr.bf16.mxu0 %v2513_v45 }
 0x12b   :  { %v1122_v55 = vpop.f32.mrf.mxu0  ;;  %1607 = vmatprep.mubr.bf16.mxu1 %v2516_v47 }
 0x12c   :  { %v2247_v56 = vpack.c.bf16 %v1633_v52, %v1633_v52  ;;  %v1410_v57 = vadd.f32 %v1409_v54, %v1121_v53  ;;  %v1411_v58 = vpop.f32.mrf.mxu1 }
 0x12d   :  { %v1123_v59 = vpop.f32.mrf.mxu0 }
 0x12e   :  { %1954 = vst.msk [vmem:[%s3402_s3 + $0x24] sm:$0xf] %vm1944_vm0, %v2247_v56  ;;  %v1634_v61 = vmax.f32 %v1410_v57, 0.0  ;;  %v1124_v62 = vadd.f32 %v2982_v8, %v1123_v59  ;;  %v1412_v63 = vpop.f32.mrf.mxu1 }
 0x12f   :  { %v1125_v2 = vpop.f32.mrf.mxu0 }
 0x130   :  { %v2248_v4 = vpack.c.bf16 %v1634_v61, %v1634_v61  ;;  %v1413_v5 = vadd.f32 %v1412_v63, %v1124_v62  ;;  %v1414_v6 = vpop.f32.mrf.mxu1 }
 0x131   :  { %v1128_v7 = vpop.f32.mrf.mxu0  ;;  %1319 = vmatmul.mubr.bf16.gmra.mxu0 %v2511_v60 }
 0x132   :  { %1955 = vst.msk [vmem:[%s3402_s3 + $0x28] sm:$0xf] %vm1944_vm0, %v2248_v4  ;;  %v1635_v9 = vmax.f32 %v1413_v5, 0.0  ;;  %v1129_v10 = vadd.f32 %v2982_v8, %v1128_v7  ;;  %v1417_v11 = vpop.f32.mrf.mxu1  ;;  %1608 = vmatmul.mubr.bf16.gmra.mxu1 %v2514_v0  ;;  %1326 = vmatprep.mubr.bf16.mxu0 %v2519_v1 }
 0x133   :  { %v1130_v12 = vpop.f32.mrf.mxu0  ;;  %1615 = vmatprep.mubr.bf16.mxu1 %v2522_v3 }
 0x134   :  { %v2249_v13 = vpack.c.bf16 %v1635_v9, %v1635_v9  ;;  %v1418_v14 = vadd.f32 %v1417_v11, %v1129_v10  ;;  %v1419_v15 = vpop.f32.mrf.mxu1 }
 0x135   :  { %v1131_v16 = vpop.f32.mrf.mxu0 }
 0x136   :  { %1956 = vst.msk [vmem:[%s3402_s3 + $0x2c] sm:$0xf] %vm1944_vm0, %v2249_v13  ;;  %v1636_v18 = vmax.f32 %v1418_v14, 0.0  ;;  %v1132_v19 = vadd.f32 %v2982_v8, %v1131_v16  ;;  %v1420_v20 = vpop.f32.mrf.mxu1 }
 0x137   :  { %v1133_v22 = vpop.f32.mrf.mxu0 }
 0x138   :  { %v2250_v23 = vpack.c.bf16 %v1636_v18, %v1636_v18  ;;  %v1421_v24 = vadd.f32 %v1420_v20, %v1132_v19  ;;  %v1422_v25 = vpop.f32.mrf.mxu1 }
 0x139   :  { %v1136_v26 = vpop.f32.mrf.mxu0  ;;  %1327 = vmatmul.mubr.bf16.gmra.mxu0 %v2517_v17 }
 0x13a   :  { %1957 = vst.msk [vmem:[%s3402_s3 + $0x30] sm:$0xf] %vm1944_vm0, %v2250_v23  ;;  %v1637_v27 = vmax.f32 %v1421_v24, 0.0  ;;  %v1137_v28 = vadd.f32 %v2982_v8, %v1136_v26  ;;  %v1425_v29 = vpop.f32.mrf.mxu1  ;;  %1616 = vmatmul.mubr.bf16.gmra.mxu1 %v2520_v21 }
 0x13b   :  { %v1138_v30 = vpop.f32.mrf.mxu0 }
 0x13c   :  { %v2251_v31 = vpack.c.bf16 %v1637_v27, %v1637_v27  ;;  %v1426_v32 = vadd.f32 %v1425_v29, %v1137_v28  ;;  %v1427_v33 = vpop.f32.mrf.mxu1 }
 0x13d   :  { %v1139_v34 = vpop.f32.mrf.mxu0 }
 0x13e   :  { %1958 = vst.msk [vmem:[%s3402_s3 + $0x34] sm:$0xf] %vm1944_vm0, %v2251_v31  ;;  %v1638_v35 = vmax.f32 %v1426_v32, 0.0  ;;  %v1140_v36 = vadd.f32 %v2982_v8, %v1139_v34  ;;  %v1428_v37 = vpop.f32.mrf.mxu1 }
 0x13f   :  { %v1141_v38 = vpop.f32.mrf.mxu0 }
 0x140   :  { %v2252_v39 = vpack.c.bf16 %v1638_v35, %v1638_v35  ;;  %v1429_v40 = vadd.f32 %v1428_v37, %v1140_v36  ;;  %v1430_v41 = vpop.f32.mrf.mxu1 }
 0x141   :  { %v1144_v42 = vpop.f32.mrf.mxu0 }
 0x142   :  { %1959 = vst.msk [vmem:[%s3402_s3 + $0x38] sm:$0xf] %vm1944_vm0, %v2252_v39  ;;  %v1639_v43 = vmax.f32 %v1429_v40, 0.0  ;;  %v1145_v44 = vadd.f32 %v2982_v8, %v1144_v42  ;;  %v1433_v45 = vpop.f32.mrf.mxu1 }
 0x143   :  { %v1146_v46 = vpop.f32.mrf.mxu0 }
 0x144   :  { %v2253_v47 = vpack.c.bf16 %v1639_v43, %v1639_v43  ;;  %v1434_v48 = vadd.f32 %v1433_v45, %v1145_v44  ;;  %v1435_v49 = vpop.f32.mrf.mxu1 }
 0x145   :  { %v1147_v50 = vpop.f32.mrf.mxu0 }
 0x146   :  { %1960 = vst.msk [vmem:[%s3402_s3 + $0x3c] sm:$0xf] %vm1944_vm0, %v2253_v47  ;;  %v1640_v51 = vmax.f32 %v1434_v48, 0.0  ;;  %v1148_v52 = vadd.f32 %v2982_v8, %v1147_v50  ;;  %v1436_v53 = vpop.f32.mrf.mxu1 }
 0x147   :  { %v1149_v54 = vpop.f32.mrf.mxu0 }
 0x148   :  { %v2254_v55 = vpack.c.bf16 %v1640_v51, %v1640_v51  ;;  %v1437_v56 = vadd.f32 %v1436_v53, %v1148_v52  ;;  %v1438_v57 = vpop.f32.mrf.mxu1 }
 0x149   :  { %v1152_v58 = vpop.f32.mrf.mxu0 }
 0x14a   :  { %1961 = vst.msk [vmem:[%s3402_s3 + $0x40] sm:$0xf] %vm1944_vm0, %v2254_v55  ;;  %v1641_v59 = vmax.f32 %v1437_v56, 0.0  ;;  %v1153_v60 = vadd.f32 %v2982_v8, %v1152_v58  ;;  %v1441_v61 = vpop.f32.mrf.mxu1 }
 0x14b   :  { %v1154_v62 = vpop.f32.mrf.mxu0 }
 0x14c   :  { %v2255_v63 = vpack.c.bf16 %v1641_v59, %v1641_v59  ;;  %v1442_v0 = vadd.f32 %v1441_v61, %v1153_v60  ;;  %v1443_v1 = vpop.f32.mrf.mxu1 }
 0x14d   :  { %v1155_v2 = vpop.f32.mrf.mxu0 }
 0x14e   :  { %1962 = vst.msk [vmem:[%s3402_s3 + $0x44] sm:$0xf] %vm1944_vm0, %v2255_v63  ;;  %v1642_v3 = vmax.f32 %v1442_v0, 0.0  ;;  %v1156_v4 = vadd.f32 %v2982_v8, %v1155_v2  ;;  %v1444_v5 = vpop.f32.mrf.mxu1 }
 0x14f   :  { %v1157_v6 = vpop.f32.mrf.mxu0 }
 0x150   :  { %v2256_v7 = vpack.c.bf16 %v1642_v3, %v1642_v3  ;;  %v1445_v9 = vadd.f32 %v1444_v5, %v1156_v4  ;;  %v1446_v10 = vpop.f32.mrf.mxu1 }
 0x151   :  { %v1160_v11 = vpop.f32.mrf.mxu0 }
 0x152   :  { %1963 = vst.msk [vmem:[%s3402_s3 + $0x48] sm:$0xf] %vm1944_vm0, %v2256_v7  ;;  %v1643_v12 = vmax.f32 %v1445_v9, 0.0  ;;  %v1161_v13 = vadd.f32 %v2982_v8, %v1160_v11  ;;  %v1449_v14 = vpop.f32.mrf.mxu1 }
 0x153   :  { %v1162_v15 = vpop.f32.mrf.mxu0 }
 0x154   :  { %v2257_v16 = vpack.c.bf16 %v1643_v12, %v1643_v12  ;;  %v1450_v17 = vadd.f32 %v1449_v14, %v1161_v13  ;;  %v1451_v18 = vpop.f32.mrf.mxu1 }
 0x155   :  { %v1163_v19 = vpop.f32.mrf.mxu0 }
 0x156   :  { %1964 = vst.msk [vmem:[%s3402_s3 + $0x4c] sm:$0xf] %vm1944_vm0, %v2257_v16  ;;  %v1644_v20 = vmax.f32 %v1450_v17, 0.0  ;;  %v1164_v21 = vadd.f32 %v2982_v8, %v1163_v19  ;;  %v1452_v22 = vpop.f32.mrf.mxu1 }
 0x157   :  { %v1165_v23 = vpop.f32.mrf.mxu0 }
 0x158   :  { %v2258_v24 = vpack.c.bf16 %v1644_v20, %v1644_v20  ;;  %v1453_v25 = vadd.f32 %v1452_v22, %v1164_v21  ;;  %v1454_v26 = vpop.f32.mrf.mxu1 }
 0x159   :  { %v1168_v27 = vpop.f32.mrf.mxu0 }
 0x15a   :  { %1965 = vst.msk [vmem:[%s3402_s3 + $0x50] sm:$0xf] %vm1944_vm0, %v2258_v24  ;;  %v1645_v28 = vmax.f32 %v1453_v25, 0.0  ;;  %v1169_v29 = vadd.f32 %v2982_v8, %v1168_v27  ;;  %v1457_v30 = vpop.f32.mrf.mxu1 }
 0x15b   :  { %v1170_v31 = vpop.f32.mrf.mxu0 }
 0x15c   :  { %v2259_v32 = vpack.c.bf16 %v1645_v28, %v1645_v28  ;;  %v1458_v33 = vadd.f32 %v1457_v30, %v1169_v29  ;;  %v1459_v34 = vpop.f32.mrf.mxu1 }
 0x15d   :  { %v1171_v35 = vpop.f32.mrf.mxu0 }
 0x15e   :  { %1966 = vst.msk [vmem:[%s3402_s3 + $0x54] sm:$0xf] %vm1944_vm0, %v2259_v32  ;;  %v1646_v36 = vmax.f32 %v1458_v33, 0.0  ;;  %v1172_v37 = vadd.f32 %v2982_v8, %v1171_v35  ;;  %v1460_v38 = vpop.f32.mrf.mxu1 }
 0x15f   :  { %v1173_v39 = vpop.f32.mrf.mxu0 }
 0x160   :  { %v2260_v40 = vpack.c.bf16 %v1646_v36, %v1646_v36  ;;  %v1461_v41 = vadd.f32 %v1460_v38, %v1172_v37  ;;  %v1462_v42 = vpop.f32.mrf.mxu1 }
 0x161   :  { %v1176_v43 = vpop.f32.mrf.mxu0 }
 0x162   :  { %1967 = vst.msk [vmem:[%s3402_s3 + $0x58] sm:$0xf] %vm1944_vm0, %v2260_v40  ;;  %v1647_v44 = vmax.f32 %v1461_v41, 0.0  ;;  %v1177_v45 = vadd.f32 %v2982_v8, %v1176_v43  ;;  %v1465_v46 = vpop.f32.mrf.mxu1 }
 0x163   :  { %v1178_v47 = vpop.f32.mrf.mxu0 }
 0x164   :  { %v2261_v48 = vpack.c.bf16 %v1647_v44, %v1647_v44  ;;  %v1466_v49 = vadd.f32 %v1465_v46, %v1177_v45  ;;  %v1467_v50 = vpop.f32.mrf.mxu1 }
 0x165   :  { %v1179_v51 = vpop.f32.mrf.mxu0 }
 0x166   :  { %1968 = vst.msk [vmem:[%s3402_s3 + $0x5c] sm:$0xf] %vm1944_vm0, %v2261_v48  ;;  %v1648_v52 = vmax.f32 %v1466_v49, 0.0  ;;  %v1180_v53 = vadd.f32 %v2982_v8, %v1179_v51  ;;  %v1468_v54 = vpop.f32.mrf.mxu1 }
 0x167   :  { %v1181_v55 = vpop.f32.mrf.mxu0 }
 0x168   :  { %v2262_v56 = vpack.c.bf16 %v1648_v52, %v1648_v52  ;;  %v1469_v57 = vadd.f32 %v1468_v54, %v1180_v53  ;;  %v1470_v58 = vpop.f32.mrf.mxu1 }
 0x169   :  { %v1184_v59 = vpop.f32.mrf.mxu0 }
 0x16a   :  { %1969 = vst.msk [vmem:[%s3402_s3 + $0x60] sm:$0xf] %vm1944_vm0, %v2262_v56  ;;  %v1649_v60 = vmax.f32 %v1469_v57, 0.0  ;;  %v1185_v61 = vadd.f32 %v2982_v8, %v1184_v59  ;;  %v1473_v62 = vpop.f32.mrf.mxu1 }
 0x16b   :  { %v1186_v63 = vpop.f32.mrf.mxu0 }
 0x16c   :  { %v2263_v0 = vpack.c.bf16 %v1649_v60, %v1649_v60  ;;  %v1474_v1 = vadd.f32 %v1473_v62, %v1185_v61  ;;  %v1475_v2 = vpop.f32.mrf.mxu1 }
 0x16d   :  { %v1187_v3 = vpop.f32.mrf.mxu0 }
 0x16e   :  { %1970 = vst.msk [vmem:[%s3402_s3 + $0x64] sm:$0xf] %vm1944_vm0, %v2263_v0  ;;  %v1650_v4 = vmax.f32 %v1474_v1, 0.0  ;;  %v1188_v5 = vadd.f32 %v2982_v8, %v1187_v3  ;;  %v1476_v6 = vpop.f32.mrf.mxu1 }
 0x16f   :  { %v1189_v7 = vpop.f32.mrf.mxu0 }
 0x170   :  { %v2264_v9 = vpack.c.bf16 %v1650_v4, %v1650_v4  ;;  %v1477_v10 = vadd.f32 %v1476_v6, %v1188_v5  ;;  %v1478_v11 = vpop.f32.mrf.mxu1 }
 0x171   :  { %v1192_v12 = vpop.f32.mrf.mxu0 }
 0x172   :  { %1971 = vst.msk [vmem:[%s3402_s3 + $0x68] sm:$0xf] %vm1944_vm0, %v2264_v9  ;;  %v1651_v13 = vmax.f32 %v1477_v10, 0.0  ;;  %v1193_v14 = vadd.f32 %v2982_v8, %v1192_v12  ;;  %v1481_v15 = vpop.f32.mrf.mxu1 }
 0x173   :  { %v1194_v16 = vpop.f32.mrf.mxu0 }
 0x174   :  { %v2265_v17 = vpack.c.bf16 %v1651_v13, %v1651_v13  ;;  %v1482_v18 = vadd.f32 %v1481_v15, %v1193_v14  ;;  %v1483_v19 = vpop.f32.mrf.mxu1 }
 0x175   :  { %v1195_v20 = vpop.f32.mrf.mxu0 }
 0x176   :  { %1972 = vst.msk [vmem:[%s3402_s3 + $0x6c] sm:$0xf] %vm1944_vm0, %v2265_v17  ;;  %v1652_v21 = vmax.f32 %v1482_v18, 0.0  ;;  %v1196_v22 = vadd.f32 %v2982_v8, %v1195_v20  ;;  %v1484_v23 = vpop.f32.mrf.mxu1 }
 0x177   :  { %v1197_v24 = vpop.f32.mrf.mxu0 }
 0x178   :  { %v2266_v25 = vpack.c.bf16 %v1652_v21, %v1652_v21  ;;  %v1485_v26 = vadd.f32 %v1484_v23, %v1196_v22  ;;  %v1486_v27 = vpop.f32.mrf.mxu1 }
 0x179   :  { %v1200_v28 = vpop.f32.mrf.mxu0 }
 0x17a   :  { %1973 = vst.msk [vmem:[%s3402_s3 + $0x70] sm:$0xf] %vm1944_vm0, %v2266_v25  ;;  %v1653_v29 = vmax.f32 %v1485_v26, 0.0  ;;  %v1201_v30 = vadd.f32 %v2982_v8, %v1200_v28  ;;  %v1489_v31 = vpop.f32.mrf.mxu1 }
 0x17b   :  { %v1202_v32 = vpop.f32.mrf.mxu0 }
 0x17c   :  { %v2267_v33 = vpack.c.bf16 %v1653_v29, %v1653_v29  ;;  %v1490_v34 = vadd.f32 %v1489_v31, %v1201_v30  ;;  %v1491_v35 = vpop.f32.mrf.mxu1 }
 0x17d   :  { %v1203_v36 = vpop.f32.mrf.mxu0 }
 0x17e   :  { %1974 = vst.msk [vmem:[%s3402_s3 + $0x74] sm:$0xf] %vm1944_vm0, %v2267_v33  ;;  %v1654_v37 = vmax.f32 %v1490_v34, 0.0  ;;  %v1204_v38 = vadd.f32 %v2982_v8, %v1203_v36  ;;  %v1492_v39 = vpop.f32.mrf.mxu1 }
 0x17f   :  { %v1205_v40 = vpop.f32.mrf.mxu0 }
 0x180   :  { %v2268_v41 = vpack.c.bf16 %v1654_v37, %v1654_v37  ;;  %v1493_v42 = vadd.f32 %v1492_v39, %v1204_v38  ;;  %v1494_v43 = vpop.f32.mrf.mxu1 }
 0x181   :  { %v1208_v44 = vpop.f32.mrf.mxu0 }
 0x182   :  { %1975 = vst.msk [vmem:[%s3402_s3 + $0x78] sm:$0xf] %vm1944_vm0, %v2268_v41  ;;  %v1655_v45 = vmax.f32 %v1493_v42, 0.0  ;;  %v1209_v46 = vadd.f32 %v2982_v8, %v1208_v44  ;;  %v1497_v47 = vpop.f32.mrf.mxu1 }
 0x183   :  { %v1210_v48 = vpop.f32.mrf.mxu0 }
 0x184   :  { %v2269_v49 = vpack.c.bf16 %v1655_v45, %v1655_v45  ;;  %v1498_v50 = vadd.f32 %v1497_v47, %v1209_v46  ;;  %v1499_v51 = vpop.f32.mrf.mxu1 }
 0x185   :  { %v1211_v52 = vpop.f32.mrf.mxu0 }
 0x186   :  { %1976 = vst.msk [vmem:[%s3402_s3 + $0x7c] sm:$0xf] %vm1944_vm0, %v2269_v49  ;;  %v1656_v53 = vmax.f32 %v1498_v50, 0.0  ;;  %v1212_v54 = vadd.f32 %v2982_v8, %v1211_v52  ;;  %v1500_v55 = vpop.f32.mrf.mxu1 }
 0x187   :  { %v1213_v56 = vpop.f32.mrf.mxu0 }
 0x188   :  { %v2270_v57 = vpack.c.bf16 %v1656_v53, %v1656_v53  ;;  %v1501_v58 = vadd.f32 %v1500_v55, %v1212_v54  ;;  %v1502_v59 = vpop.f32.mrf.mxu1 }
 0x189   :  { %v1216_v60 = vpop.f32.mrf.mxu0 }
 0x18a   :  { %1977 = vst.msk [vmem:[%s3402_s3 + $0x80] sm:$0xf] %vm1944_vm0, %v2270_v57  ;;  %v1657_v61 = vmax.f32 %v1501_v58, 0.0  ;;  %v1217_v62 = vadd.f32 %v2982_v8, %v1216_v60  ;;  %v1505_v63 = vpop.f32.mrf.mxu1 }
 0x18b   :  { %v1218_v0 = vpop.f32.mrf.mxu0 }
 0x18c   :  { %v2271_v1 = vpack.c.bf16 %v1657_v61, %v1657_v61  ;;  %v1506_v2 = vadd.f32 %v1505_v63, %v1217_v62  ;;  %v1507_v3 = vpop.f32.mrf.mxu1 }
 0x18d   :  { %v1219_v4 = vpop.f32.mrf.mxu0 }
 0x18e   :  { %1978 = vst.msk [vmem:[%s3402_s3 + $0x84] sm:$0xf] %vm1944_vm0, %v2271_v1  ;;  %v1658_v5 = vmax.f32 %v1506_v2, 0.0  ;;  %v1220_v6 = vadd.f32 %v2982_v8, %v1219_v4  ;;  %v1508_v7 = vpop.f32.mrf.mxu1 }
 0x18f   :  { %v1221_v9 = vpop.f32.mrf.mxu0 }
 0x190   :  { %v2272_v10 = vpack.c.bf16 %v1658_v5, %v1658_v5  ;;  %v1509_v11 = vadd.f32 %v1508_v7, %v1220_v6  ;;  %v1510_v12 = vpop.f32.mrf.mxu1 }
 0x191   :  { %v1224_v13 = vpop.f32.mrf.mxu0 }
 0x192   :  { %1979 = vst.msk [vmem:[%s3402_s3 + $0x88] sm:$0xf] %vm1944_vm0, %v2272_v10  ;;  %v1659_v14 = vmax.f32 %v1509_v11, 0.0  ;;  %v1225_v15 = vadd.f32 %v2982_v8, %v1224_v13  ;;  %v1513_v16 = vpop.f32.mrf.mxu1 }
 0x193   :  { %v1226_v17 = vpop.f32.mrf.mxu0 }
 0x194   :  { %v2273_v18 = vpack.c.bf16 %v1659_v14, %v1659_v14  ;;  %v1514_v19 = vadd.f32 %v1513_v16, %v1225_v15  ;;  %v1515_v20 = vpop.f32.mrf.mxu1 }
 0x195   :  { %v1227_v21 = vpop.f32.mrf.mxu0 }
 0x196   :  { %1980 = vst.msk [vmem:[%s3402_s3 + $0x8c] sm:$0xf] %vm1944_vm0, %v2273_v18  ;;  %v1660_v22 = vmax.f32 %v1514_v19, 0.0  ;;  %v1228_v23 = vadd.f32 %v2982_v8, %v1227_v21  ;;  %v1516_v24 = vpop.f32.mrf.mxu1 }
 0x197   :  { %v1229_v25 = vpop.f32.mrf.mxu0 }
 0x198   :  { %v2274_v26 = vpack.c.bf16 %v1660_v22, %v1660_v22  ;;  %v1517_v27 = vadd.f32 %v1516_v24, %v1228_v23  ;;  %v1518_v28 = vpop.f32.mrf.mxu1 }
 0x199   :  { %v1232_v29 = vpop.f32.mrf.mxu0 }
 0x19a   :  { %1981 = vst.msk [vmem:[%s3402_s3 + $0x90] sm:$0xf] %vm1944_vm0, %v2274_v26  ;;  %v1661_v30 = vmax.f32 %v1517_v27, 0.0  ;;  %v1233_v31 = vadd.f32 %v2982_v8, %v1232_v29  ;;  %v1521_v32 = vpop.f32.mrf.mxu1 }
 0x19b   :  { %v1234_v33 = vpop.f32.mrf.mxu0 }
 0x19c   :  { %v2275_v34 = vpack.c.bf16 %v1661_v30, %v1661_v30  ;;  %v1522_v35 = vadd.f32 %v1521_v32, %v1233_v31  ;;  %v1523_v36 = vpop.f32.mrf.mxu1 }
 0x19d   :  { %v1235_v37 = vpop.f32.mrf.mxu0 }
 0x19e   :  { %1982 = vst.msk [vmem:[%s3402_s3 + $0x94] sm:$0xf] %vm1944_vm0, %v2275_v34  ;;  %v1662_v38 = vmax.f32 %v1522_v35, 0.0  ;;  %v1236_v39 = vadd.f32 %v2982_v8, %v1235_v37  ;;  %v1524_v40 = vpop.f32.mrf.mxu1 }
 0x19f   :  { %v1237_v41 = vpop.f32.mrf.mxu0 }
 0x1a0   :  { %v2276_v42 = vpack.c.bf16 %v1662_v38, %v1662_v38  ;;  %v1525_v43 = vadd.f32 %v1524_v40, %v1236_v39  ;;  %v1526_v44 = vpop.f32.mrf.mxu1 }
 0x1a1   :  { %v1240_v45 = vpop.f32.mrf.mxu0 }
 0x1a2   :  { %1983 = vst.msk [vmem:[%s3402_s3 + $0x98] sm:$0xf] %vm1944_vm0, %v2276_v42  ;;  %v1663_v46 = vmax.f32 %v1525_v43, 0.0  ;;  %v1241_v47 = vadd.f32 %v2982_v8, %v1240_v45  ;;  %v1529_v48 = vpop.f32.mrf.mxu1 }
 0x1a3   :  { %v1242_v49 = vpop.f32.mrf.mxu0 }
 0x1a4   :  { %v2277_v50 = vpack.c.bf16 %v1663_v46, %v1663_v46  ;;  %v1530_v51 = vadd.f32 %v1529_v48, %v1241_v47  ;;  %v1531_v52 = vpop.f32.mrf.mxu1 }
 0x1a5   :  { %v1243_v53 = vpop.f32.mrf.mxu0 }
 0x1a6   :  { %1984 = vst.msk [vmem:[%s3402_s3 + $0x9c] sm:$0xf] %vm1944_vm0, %v2277_v50  ;;  %v1664_v54 = vmax.f32 %v1530_v51, 0.0  ;;  %v1244_v55 = vadd.f32 %v2982_v8, %v1243_v53  ;;  %v1532_v56 = vpop.f32.mrf.mxu1 }
 0x1a7   :  { %v1245_v57 = vpop.f32.mrf.mxu0 }
 0x1a8   :  { %v2278_v58 = vpack.c.bf16 %v1664_v54, %v1664_v54  ;;  %v1533_v59 = vadd.f32 %v1532_v56, %v1244_v55  ;;  %v1534_v60 = vpop.f32.mrf.mxu1 }
 0x1a9   :  { %v1248_v61 = vpop.f32.mrf.mxu0 }
 0x1aa   :  { %1985 = vst.msk [vmem:[%s3402_s3 + $0xa0] sm:$0xf] %vm1944_vm0, %v2278_v58  ;;  %v1665_v62 = vmax.f32 %v1533_v59, 0.0  ;;  %v1249_v63 = vadd.f32 %v2982_v8, %v1248_v61  ;;  %v1537_v0 = vpop.f32.mrf.mxu1 }
 0x1ab   :  { %v1250_v1 = vpop.f32.mrf.mxu0 }
 0x1ac   :  { %v2279_v2 = vpack.c.bf16 %v1665_v62, %v1665_v62  ;;  %v1538_v3 = vadd.f32 %v1537_v0, %v1249_v63  ;;  %v1539_v4 = vpop.f32.mrf.mxu1  ;;  %v3323_v0 = vld [vmem:[%s3401_s2] ss:$0 sm:$0xff] }
 0x1ad   :  { %v1251_v5 = vpop.f32.mrf.mxu0 }
 0x1ae   :  { %1986 = vst.msk [vmem:[%s3402_s3 + $0xa4] sm:$0xf] %vm1944_vm0, %v2279_v2  ;;  %v1666_v6 = vmax.f32 %v1538_v3, 0.0  ;;  %v1252_v7 = vadd.f32 %v2982_v8, %v1251_v5  ;;  %v1540_v9 = vpop.f32.mrf.mxu1 }
 0x1af   :  { %v1253_v10 = vpop.f32.mrf.mxu0 }
 0x1b0   :  { %v2280_v11 = vpack.c.bf16 %v1666_v6, %v1666_v6  ;;  %v1541_v12 = vadd.f32 %v1540_v9, %v1252_v7  ;;  %v1542_v13 = vpop.f32.mrf.mxu1 }
 0x1b1   :  { %v1256_v14 = vpop.f32.mrf.mxu0 }
 0x1b2   :  { %1987 = vst.msk [vmem:[%s3402_s3 + $0xa8] sm:$0xf] %vm1944_vm0, %v2280_v11  ;;  %v1667_v15 = vmax.f32 %v1541_v12, 0.0  ;;  %v1257_v16 = vadd.f32 %v2982_v8, %v1256_v14  ;;  %v1545_v17 = vpop.f32.mrf.mxu1 }
 0x1b3   :  { %v1258_v18 = vpop.f32.mrf.mxu0 }
 0x1b4   :  { %v2281_v19 = vpack.c.bf16 %v1667_v15, %v1667_v15  ;;  %v1546_v20 = vadd.f32 %v1545_v17, %v1257_v16  ;;  %v1547_v21 = vpop.f32.mrf.mxu1 }
 0x1b5   :  { %v1259_v22 = vpop.f32.mrf.mxu0 }
 0x1b6   :  { %1988 = vst.msk [vmem:[%s3402_s3 + $0xac] sm:$0xf] %vm1944_vm0, %v2281_v19  ;;  %v1668_v23 = vmax.f32 %v1546_v20, 0.0  ;;  %v1260_v24 = vadd.f32 %v2982_v8, %v1259_v22  ;;  %v1548_v25 = vpop.f32.mrf.mxu1 }
 0x1b7   :  { %v1261_v26 = vpop.f32.mrf.mxu0 }
 0x1b8   :  { %v2282_v27 = vpack.c.bf16 %v1668_v23, %v1668_v23  ;;  %v1549_v28 = vadd.f32 %v1548_v25, %v1260_v24  ;;  %v1550_v29 = vpop.f32.mrf.mxu1 }
 0x1b9   :  { %v1264_v30 = vpop.f32.mrf.mxu0 }
 0x1ba   :  { %1989 = vst.msk [vmem:[%s3402_s3 + $0xb0] sm:$0xf] %vm1944_vm0, %v2282_v27  ;;  %v1669_v31 = vmax.f32 %v1549_v28, 0.0  ;;  %v1265_v32 = vadd.f32 %v2982_v8, %v1264_v30  ;;  %v1553_v33 = vpop.f32.mrf.mxu1 }
 0x1bb   :  { %v1266_v34 = vpop.f32.mrf.mxu0 }
 0x1bc   :  { %v2283_v35 = vpack.c.bf16 %v1669_v31, %v1669_v31  ;;  %v1554_v36 = vadd.f32 %v1553_v33, %v1265_v32  ;;  %v1555_v37 = vpop.f32.mrf.mxu1 }
 0x1bd   :  { %v1267_v38 = vpop.f32.mrf.mxu0 }
 0x1be   :  { %1990 = vst.msk [vmem:[%s3402_s3 + $0xb4] sm:$0xf] %vm1944_vm0, %v2283_v35  ;;  %v1670_v39 = vmax.f32 %v1554_v36, 0.0  ;;  %v1268_v40 = vadd.f32 %v2982_v8, %v1267_v38  ;;  %v1556_v41 = vpop.f32.mrf.mxu1 }
 0x1bf   :  { %v1269_v42 = vpop.f32.mrf.mxu0 }
 0x1c0   :  { %v2284_v43 = vpack.c.bf16 %v1670_v39, %v1670_v39  ;;  %v1557_v44 = vadd.f32 %v1556_v41, %v1268_v40  ;;  %v1558_v45 = vpop.f32.mrf.mxu1 }
 0x1c1   :  { %v1272_v46 = vpop.f32.mrf.mxu0 }
 0x1c2   :  { %1991 = vst.msk [vmem:[%s3402_s3 + $0xb8] sm:$0xf] %vm1944_vm0, %v2284_v43  ;;  %v1671_v47 = vmax.f32 %v1557_v44, 0.0  ;;  %v1273_v48 = vadd.f32 %v2982_v8, %v1272_v46  ;;  %v1561_v49 = vpop.f32.mrf.mxu1 }
 0x1c3   :  { %v1274_v50 = vpop.f32.mrf.mxu0 }
 0x1c4   :  { %v2285_v51 = vpack.c.bf16 %v1671_v47, %v1671_v47  ;;  %v1562_v52 = vadd.f32 %v1561_v49, %v1273_v48  ;;  %v1563_v53 = vpop.f32.mrf.mxu1 }
 0x1c5   :  { %v1275_v54 = vpop.f32.mrf.mxu0 }
 0x1c6   :  { %1992 = vst.msk [vmem:[%s3402_s3 + $0xbc] sm:$0xf] %vm1944_vm0, %v2285_v51  ;;  %v1672_v55 = vmax.f32 %v1562_v52, 0.0  ;;  %v1276_v56 = vadd.f32 %v2982_v8, %v1275_v54  ;;  %v1564_v57 = vpop.f32.mrf.mxu1 }
 0x1c7   :  { %v1277_v58 = vpop.f32.mrf.mxu0 }
 0x1c8   :  { %v2286_v59 = vpack.c.bf16 %v1672_v55, %v1672_v55  ;;  %v1565_v60 = vadd.f32 %v1564_v57, %v1276_v56  ;;  %v1566_v61 = vpop.f32.mrf.mxu1 }
 0x1c9   :  { %v1280_v62 = vpop.f32.mrf.mxu0 }
 0x1ca   :  { %1993 = vst.msk [vmem:[%s3402_s3 + $0xc0] sm:$0xf] %vm1944_vm0, %v2286_v59  ;;  %v1673_v63 = vmax.f32 %v1565_v60, 0.0  ;;  %v1281_v1 = vadd.f32 %v3323_v0, %v1280_v62  ;;  %v1569_v8 = vpop.f32.mrf.mxu1 }
 0x1cb   :  { %v1282_v2 = vpop.f32.mrf.mxu0 }
 0x1cc   :  { %v2287_v3 = vpack.c.bf16 %v1673_v63, %v1673_v63  ;;  %v1570_v4 = vadd.f32 %v1569_v8, %v1281_v1  ;;  %v1571_v5 = vpop.f32.mrf.mxu1 }
 0x1cd   :  { %v1283_v6 = vpop.f32.mrf.mxu0 }
 0x1ce   :  { %1994 = vst.msk [vmem:[%s3402_s3 + $0xc4] sm:$0xf] %vm1944_vm0, %v2287_v3  ;;  %v1674_v7 = vmax.f32 %v1570_v4, 0.0  ;;  %v1284_v9 = vadd.f32 %v3323_v0, %v1283_v6  ;;  %v1572_v10 = vpop.f32.mrf.mxu1 }
 0x1cf   :  { %v1285_v11 = vpop.f32.mrf.mxu0 }
 0x1d0   :  { %v2288_v12 = vpack.c.bf16 %v1674_v7, %v1674_v7  ;;  %v1573_v13 = vadd.f32 %v1572_v10, %v1284_v9  ;;  %v1574_v14 = vpop.f32.mrf.mxu1 }
 0x1d1   :  { %v1288_v15 = vpop.f32.mrf.mxu0 }
 0x1d2   :  { %1995 = vst.msk [vmem:[%s3402_s3 + $0xc8] sm:$0xf] %vm1944_vm0, %v2288_v12  ;;  %v1675_v16 = vmax.f32 %v1573_v13, 0.0  ;;  %v1289_v17 = vadd.f32 %v3323_v0, %v1288_v15  ;;  %v1577_v18 = vpop.f32.mrf.mxu1 }
 0x1d3   :  { %v1290_v19 = vpop.f32.mrf.mxu0 }
 0x1d4   :  { %v2289_v20 = vpack.c.bf16 %v1675_v16, %v1675_v16  ;;  %v1578_v21 = vadd.f32 %v1577_v18, %v1289_v17  ;;  %v1579_v22 = vpop.f32.mrf.mxu1 }
 0x1d5   :  { %v1291_v23 = vpop.f32.mrf.mxu0 }
 0x1d6   :  { %1996 = vst.msk [vmem:[%s3402_s3 + $0xcc] sm:$0xf] %vm1944_vm0, %v2289_v20  ;;  %v1676_v24 = vmax.f32 %v1578_v21, 0.0  ;;  %v1292_v25 = vadd.f32 %v3323_v0, %v1291_v23  ;;  %v1580_v26 = vpop.f32.mrf.mxu1 }
 0x1d7   :  { %v1293_v27 = vpop.f32.mrf.mxu0 }
 0x1d8   :  { %v2290_v28 = vpack.c.bf16 %v1676_v24, %v1676_v24  ;;  %v1581_v29 = vadd.f32 %v1580_v26, %v1292_v25  ;;  %v1582_v30 = vpop.f32.mrf.mxu1 }
 0x1d9   :  { %v1296_v31 = vpop.f32.mrf.mxu0 }
 0x1da   :  { %1997 = vst.msk [vmem:[%s3402_s3 + $0xd0] sm:$0xf] %vm1944_vm0, %v2290_v28  ;;  %v1677_v32 = vmax.f32 %v1581_v29, 0.0  ;;  %v1297_v33 = vadd.f32 %v3323_v0, %v1296_v31  ;;  %v1585_v34 = vpop.f32.mrf.mxu1 }
 0x1db   :  { %v1298_v35 = vpop.f32.mrf.mxu0 }
 0x1dc   :  { %v2291_v36 = vpack.c.bf16 %v1677_v32, %v1677_v32  ;;  %v1586_v37 = vadd.f32 %v1585_v34, %v1297_v33  ;;  %v1587_v38 = vpop.f32.mrf.mxu1 }
 0x1dd   :  { %v1299_v39 = vpop.f32.mrf.mxu0 }
 0x1de   :  { %1998 = vst.msk [vmem:[%s3402_s3 + $0xd4] sm:$0xf] %vm1944_vm0, %v2291_v36  ;;  %v1678_v40 = vmax.f32 %v1586_v37, 0.0  ;;  %v1300_v41 = vadd.f32 %v3323_v0, %v1299_v39  ;;  %v1588_v42 = vpop.f32.mrf.mxu1 }
 0x1df   :  { %v1301_v43 = vpop.f32.mrf.mxu0 }
 0x1e0   :  { %v2292_v44 = vpack.c.bf16 %v1678_v40, %v1678_v40  ;;  %v1589_v45 = vadd.f32 %v1588_v42, %v1300_v41  ;;  %v1590_v46 = vpop.f32.mrf.mxu1 }
 0x1e1   :  { %v1304_v47 = vpop.f32.mrf.mxu0 }
 0x1e2   :  { %1999 = vst.msk [vmem:[%s3402_s3 + $0xd8] sm:$0xf] %vm1944_vm0, %v2292_v44  ;;  %v1679_v48 = vmax.f32 %v1589_v45, 0.0  ;;  %v1305_v49 = vadd.f32 %v3323_v0, %v1304_v47  ;;  %v1593_v50 = vpop.f32.mrf.mxu1 }
 0x1e3   :  { %v1306_v51 = vpop.f32.mrf.mxu0 }
 0x1e4   :  { %v2293_v52 = vpack.c.bf16 %v1679_v48, %v1679_v48  ;;  %v1594_v53 = vadd.f32 %v1593_v50, %v1305_v49  ;;  %v1595_v54 = vpop.f32.mrf.mxu1 }
 0x1e5   :  { %v1307_v55 = vpop.f32.mrf.mxu0 }
 0x1e6   :  { %2000 = vst.msk [vmem:[%s3402_s3 + $0xdc] sm:$0xf] %vm1944_vm0, %v2293_v52  ;;  %v1680_v56 = vmax.f32 %v1594_v53, 0.0  ;;  %v1308_v57 = vadd.f32 %v3323_v0, %v1307_v55  ;;  %v1596_v58 = vpop.f32.mrf.mxu1 }
 0x1e7   :  { %v1309_v59 = vpop.f32.mrf.mxu0 }
 0x1e8   :  { %v2294_v60 = vpack.c.bf16 %v1680_v56, %v1680_v56  ;;  %v1597_v61 = vadd.f32 %v1596_v58, %v1308_v57  ;;  %v1598_v62 = vpop.f32.mrf.mxu1 }
 0x1e9   :  { %v1312_v63 = vpop.f32.mrf.mxu0 }
 0x1ea   :  { %2001 = vst.msk [vmem:[%s3402_s3 + $0xe0] sm:$0xf] %vm1944_vm0, %v2294_v60  ;;  %v1681_v1 = vmax.f32 %v1597_v61, 0.0  ;;  %v1313_v8 = vadd.f32 %v3323_v0, %v1312_v63  ;;  %v1601_v2 = vpop.f32.mrf.mxu1 }
 0x1eb   :  { %v1314_v3 = vpop.f32.mrf.mxu0 }
 0x1ec   :  { %v2295_v4 = vpack.c.bf16 %v1681_v1, %v1681_v1  ;;  %v1602_v5 = vadd.f32 %v1601_v2, %v1313_v8  ;;  %v1603_v6 = vpop.f32.mrf.mxu1 }
 0x1ed   :  { %v1315_v7 = vpop.f32.mrf.mxu0 }
 0x1ee   :  { %2002 = vst.msk [vmem:[%s3402_s3 + $0xe4] sm:$0xf] %vm1944_vm0, %v2295_v4  ;;  %v1682_v9 = vmax.f32 %v1602_v5, 0.0  ;;  %v1316_v10 = vadd.f32 %v3323_v0, %v1315_v7  ;;  %v1604_v11 = vpop.f32.mrf.mxu1 }
 0x1ef   :  { %v1317_v12 = vpop.f32.mrf.mxu0 }
 0x1f0   :  { %v2296_v13 = vpack.c.bf16 %v1682_v9, %v1682_v9  ;;  %v1605_v14 = vadd.f32 %v1604_v11, %v1316_v10  ;;  %v1606_v15 = vpop.f32.mrf.mxu1 }
 0x1f1   :  { %v1320_v16 = vpop.f32.mrf.mxu0 }
 0x1f2   :  { %2003 = vst.msk [vmem:[%s3402_s3 + $0xe8] sm:$0xf] %vm1944_vm0, %v2296_v13  ;;  %v1683_v17 = vmax.f32 %v1605_v14, 0.0  ;;  %v1321_v18 = vadd.f32 %v3323_v0, %v1320_v16  ;;  %v1609_v19 = vpop.f32.mrf.mxu1 }
 0x1f3   :  { %v1322_v20 = vpop.f32.mrf.mxu0 }
 0x1f4   :  { %v2297_v21 = vpack.c.bf16 %v1683_v17, %v1683_v17  ;;  %v1610_v22 = vadd.f32 %v1609_v19, %v1321_v18  ;;  %v1611_v23 = vpop.f32.mrf.mxu1 }
 0x1f5   :  { %v1323_v24 = vpop.f32.mrf.mxu0 }
 0x1f6   :  { %2004 = vst.msk [vmem:[%s3402_s3 + $0xec] sm:$0xf] %vm1944_vm0, %v2297_v21  ;;  %v1684_v25 = vmax.f32 %v1610_v22, 0.0  ;;  %v1324_v26 = vadd.f32 %v3323_v0, %v1323_v24  ;;  %v1612_v27 = vpop.f32.mrf.mxu1 }
 0x1f7   :  { %v1325_v28 = vpop.f32.mrf.mxu0 }
 0x1f8   :  { %v2298_v29 = vpack.c.bf16 %v1684_v25, %v1684_v25  ;;  %v1613_v30 = vadd.f32 %v1612_v27, %v1324_v26  ;;  %v1614_v31 = vpop.f32.mrf.mxu1 }
 0x1f9   :  { %v1328_v32 = vpop.f32.mrf.mxu0 }
 0x1fa   :  { %2005 = vst.msk [vmem:[%s3402_s3 + $0xf0] sm:$0xf] %vm1944_vm0, %v2298_v29  ;;  %v1685_v33 = vmax.f32 %v1613_v30, 0.0  ;;  %v1329_v34 = vadd.f32 %v3323_v0, %v1328_v32  ;;  %v1617_v35 = vpop.f32.mrf.mxu1 }
 0x1fb   :  { %v1330_v36 = vpop.f32.mrf.mxu0 }
 0x1fc   :  { %v2299_v37 = vpack.c.bf16 %v1685_v33, %v1685_v33  ;;  %v1618_v38 = vadd.f32 %v1617_v35, %v1329_v34  ;;  %v1619_v39 = vpop.f32.mrf.mxu1 }
 0x1fd   :  { %v1331_v40 = vpop.f32.mrf.mxu0 }
 0x1fe   :  { %2006 = vst.msk [vmem:[%s3402_s3 + $0xf4] sm:$0xf] %vm1944_vm0, %v2299_v37  ;;  %v1686_v41 = vmax.f32 %v1618_v38, 0.0  ;;  %v1332_v42 = vadd.f32 %v3323_v0, %v1331_v40  ;;  %v1620_v43 = vpop.f32.mrf.mxu1 }
 0x1ff   :  { %v1333_v44 = vpop.f32.mrf.mxu0 }
 0x200   :  { %v2300_v45 = vpack.c.bf16 %v1686_v41, %v1686_v41  ;;  %v1621_v46 = vadd.f32 %v1620_v43, %v1332_v42  ;;  %v1622_v47 = vpop.f32.mrf.mxu1 }
 0x202   :  { %2007 = vst.msk [vmem:[%s3402_s3 + $0xf8] sm:$0xf] %vm1944_vm0, %v2300_v45  ;;  %v1687_v48 = vmax.f32 %v1621_v46, 0.0 }
 0x204   :  { %v2301_v49 = vpack.c.bf16 %v1687_v48, %v1687_v48 }
 0x206   :  { %2008 = vst.msk [vmem:[%s3402_s3 + $0xfc] sm:$0xf] %vm1944_vm0, %v2301_v49 }

// kernel: beta_vae_b_forward.12
= control target key start
LH: loop header
LB: loop body
LE: loop exit
PB: predicated region body
PF: predicated region fallthrough
CT: control target
= control target key end

     0   :  { %vm744_vm0 = vcmask 257024   ;;  %s1367_s1 = inlined_call_operand.vmem [shape: bf16[512,32], index: 1, kind: input, shape index: {}]   ;;  %s1368_s0 = inlined_call_operand.vmem [shape: bf16[128,512], index: 0, kind: input, shape index: {}]   ;;  %s1369_s2 = inlined_call_operand.vmem [shape: f32[1,32], index: 2, kind: input, shape index: {}]   ;;  %s1370_s3 = inlined_call_operand.vmem [shape: bf16[128,32], index: 3, kind: output, shape index: {}]  }
   0x1   :  { %v990_v0 = vld [vmem:[%s1367_s1 + $0x78] sm:$0xff]   ;;  %v994_v4 = vld [vmem:[%s1367_s1 + $0x70] sm:$0xff]   ;;  %v998_v8 = vld [vmem:[%s1367_s1 + $0x68] sm:$0xff]  }
   0x2   :  { %v991_v1 = vld [vmem:[%s1367_s1 + $0xf8] sm:$0xff]   ;;  %862 = vmatprep.subr.bf16.mxu0 %v990_v0  ;;  %v995_v5 = vld [vmem:[%s1367_s1 + $0xf0] sm:$0xff]   ;;  %v999_v9 = vld [vmem:[%s1367_s1 + $0xe8] sm:$0xff]  }
   0x3   :  { %v992_v2 = vld [vmem:[%s1367_s1 + $0x38] sm:$0xff]   ;;  %926 = vmatprep.subr.bf16.mxu1 %v991_v1  ;;  %v996_v6 = vld [vmem:[%s1367_s1 + $0x30] sm:$0xff]   ;;  %v1000_v10 = vld [vmem:[%s1367_s1 + $0x28] sm:$0xff]  }
   0x4   :  { %v993_v3 = vld [vmem:[%s1367_s1 + $0xb8] sm:$0xff]   ;;  %863 = vmatpush3.bf16.msra.mxu0 %v992_v2  ;;  %v997_v7 = vld [vmem:[%s1367_s1 + $0xb0] sm:$0xff]   ;;  %v1001_v11 = vld [vmem:[%s1367_s1 + $0xa8] sm:$0xff]  }
   0x5   :  { %927 = vmatpush3.bf16.msra.mxu1 %v993_v3  ;;  %864 = vmatprep.subr.bf16.mxu0 %v994_v4  ;;  %v1002_v12 = vld [vmem:[%s1367_s1 + $0x60] sm:$0xff]   ;;  %v1006_v16 = vld [vmem:[%s1367_s1 + $0x58] sm:$0xff]   ;;  %v1010_v20 = vld [vmem:[%s1367_s1 + $0x50] sm:$0xff]  }
   0x6   :  { %928 = vmatprep.subr.bf16.mxu1 %v995_v5  ;;  %v1003_v13 = vld [vmem:[%s1367_s1 + $0xe0] sm:$0xff]   ;;  %v1007_v17 = vld [vmem:[%s1367_s1 + $0xd8] sm:$0xff]   ;;  %v1011_v21 = vld [vmem:[%s1367_s1 + $0xd0] sm:$0xff]  }
   0x7   :  { %v1004_v14 = vld [vmem:[%s1367_s1 + $0x20] sm:$0xff]   ;;  %v1008_v18 = vld [vmem:[%s1367_s1 + $0x18] sm:$0xff]   ;;  %v1012_v22 = vld [vmem:[%s1367_s1 + $0x10] sm:$0xff]  }
   0x8   :  { %865 = vmatpush3.bf16.msra.mxu0 %v996_v6  ;;  %v1005_v15 = vld [vmem:[%s1367_s1 + $0xa0] sm:$0xff]   ;;  %v1009_v19 = vld [vmem:[%s1367_s1 + $0x98] sm:$0xff]   ;;  %v1013_v23 = vld [vmem:[%s1367_s1 + $0x90] sm:$0xff]  }
   0x9   :  { %929 = vmatpush3.bf16.msra.mxu1 %v997_v7  ;;  %866 = vmatprep.subr.bf16.mxu0 %v998_v8  ;;  %v1014_v24 = vld [vmem:[%s1367_s1 + $0x48] sm:$0xff]   ;;  %v1018_v28 = vld [vmem:[%s1367_s1 + $0x40] sm:$0xff]  }
   0xa   :  { %930 = vmatprep.subr.bf16.mxu1 %v999_v9  ;;  %v1015_v25 = vld [vmem:[%s1367_s1 + $0xc8] sm:$0xff]   ;;  %v1019_v29 = vld [vmem:[%s1367_s1 + $0xc0] sm:$0xff]  }
   0xb   :  { %v1016_v26 = vld [vmem:[%s1367_s1 + $0x8] sm:$0xff]   ;;  %v1020_v30 = vld [vmem:[%s1367_s1] sm:$0xff]  }
   0xc   :  { %867 = vmatpush3.bf16.msra.mxu0 %v1000_v10  ;;  %v1017_v27 = vld [vmem:[%s1367_s1 + $0x88] sm:$0xff]   ;;  %v1021_v31 = vld [vmem:[%s1367_s1 + $0x80] sm:$0xff]  }
   0xd   :  { %931 = vmatpush3.bf16.msra.mxu1 %v1001_v11  ;;  %868 = vmatprep.subr.bf16.mxu0 %v1002_v12  ;;  %v1022_v32 = vld [vmem:[%s1368_s0] ss:$16 sps:$4 sm:$0xff]   ;;  %v1024_v33 = vld [vmem:[%s1368_s0 + $0x4] ss:$16 sps:$4 sm:$0xff]   ;;  %v1025_v34 = vld [vmem:[%s1368_s0 + $0x8] ss:$16 sps:$4 sm:$0xff]  }
   0xe   :  { %932 = vmatprep.subr.bf16.mxu1 %v1003_v13  ;;  %v1027_v35 = vld [vmem:[%s1368_s0 + $0xc] ss:$16 sps:$4 sm:$0xff]   ;;  %502 = vmatprep.mubr.bf16.mxu0 %v1024_v33  ;;  %v1028_v36 = vld [vmem:[%s1368_s0 + $0x24] ss:$16 sps:$4 sm:$0xff]   ;;  %v1032_v38 = vld [vmem:[%s1368_s0 + $0x20] ss:$16 sps:$4 sm:$0xff]  }
   0xf   :  { %599 = vmatprep.mubr.bf16.mxu1 %v1027_v35  ;;  %v1030_v37 = vld [vmem:[%s1368_s0 + $0x2c] ss:$16 sps:$4 sm:$0xff]   ;;  %v1033_v39 = vld [vmem:[%s1368_s0 + $0x28] ss:$16 sps:$4 sm:$0xff]   ;;  %v1034_v40 = vld [vmem:[%s1368_s0 + $0x44] ss:$16 sps:$4 sm:$0xff]  }
  0x10   :  { %869 = vmatpush3.bf16.msra.mxu0 %v1004_v14  ;;  %v1036_v41 = vld [vmem:[%s1368_s0 + $0x4c] ss:$16 sps:$4 sm:$0xff]   ;;  %v1038_v42 = vld [vmem:[%s1368_s0 + $0x40] ss:$16 sps:$4 sm:$0xff]   ;;  %v1039_v43 = vld [vmem:[%s1368_s0 + $0x48] ss:$16 sps:$4 sm:$0xff]  }
  0x11   :  { %933 = vmatpush3.bf16.msra.mxu1 %v1005_v15  ;;  %870 = vmatprep.subr.bf16.mxu0 %v1006_v16  ;;  %v1040_v44 = vld [vmem:[%s1368_s0 + $0x64] ss:$16 sps:$4 sm:$0xff]   ;;  %v1042_v45 = vld [vmem:[%s1368_s0 + $0x6c] ss:$16 sps:$4 sm:$0xff]   ;;  %v1044_v46 = vld [vmem:[%s1368_s0 + $0x60] ss:$16 sps:$4 sm:$0xff]  }
  0x12   :  { %934 = vmatprep.subr.bf16.mxu1 %v1007_v17  ;;  %v1045_v47 = vld [vmem:[%s1368_s0 + $0x68] ss:$16 sps:$4 sm:$0xff]   ;;  %v1046_v48 = vld [vmem:[%s1368_s0 + $0x84] ss:$16 sps:$4 sm:$0xff]   ;;  %v1048_v49 = vld [vmem:[%s1368_s0 + $0x8c] ss:$16 sps:$4 sm:$0xff]  }
  0x13   :  { %v1050_v50 = vld [vmem:[%s1368_s0 + $0x80] ss:$16 sps:$4 sm:$0xff]   ;;  %v1051_v51 = vld [vmem:[%s1368_s0 + $0x88] ss:$16 sps:$4 sm:$0xff]   ;;  %v1052_v52 = vld [vmem:[%s1368_s0 + $0xa4] ss:$16 sps:$4 sm:$0xff]  }
  0x14   :  { %871 = vmatpush3.bf16.msra.mxu0 %v1008_v18  ;;  %v1054_v53 = vld [vmem:[%s1368_s0 + $0xac] ss:$16 sps:$4 sm:$0xff]   ;;  %v1056_v54 = vld [vmem:[%s1368_s0 + $0xa0] ss:$16 sps:$4 sm:$0xff]   ;;  %v1057_v55 = vld [vmem:[%s1368_s0 + $0xa8] ss:$16 sps:$4 sm:$0xff]  }
  0x15   :  { %935 = vmatpush3.bf16.msra.mxu1 %v1009_v19  ;;  %872 = vmatprep.subr.bf16.mxu0 %v1010_v20  ;;  %v1058_v56 = vld [vmem:[%s1368_s0 + $0xc4] ss:$16 sps:$4 sm:$0xff]   ;;  %v1060_v57 = vld [vmem:[%s1368_s0 + $0xcc] ss:$16 sps:$4 sm:$0xff]   ;;  %v1062_v58 = vld [vmem:[%s1368_s0 + $0xc0] ss:$16 sps:$4 sm:$0xff]  }
  0x16   :  { %936 = vmatprep.subr.bf16.mxu1 %v1011_v21  ;;  %v1063_v59 = vld [vmem:[%s1368_s0 + $0xc8] ss:$16 sps:$4 sm:$0xff]   ;;  %v1064_v60 = vld [vmem:[%s1368_s0 + $0xe4] ss:$16 sps:$4 sm:$0xff]   ;;  %v1066_v61 = vld [vmem:[%s1368_s0 + $0xec] ss:$16 sps:$4 sm:$0xff]  }
  0x17   :  { %v1068_v62 = vld [vmem:[%s1368_s0 + $0xe0] ss:$16 sps:$4 sm:$0xff]   ;;  %v1069_v63 = vld [vmem:[%s1368_s0 + $0xe8] ss:$16 sps:$4 sm:$0xff]  }
  0x18   :  { %873 = vmatpush3.bf16.msra.mxu0 %v1012_v22  ;;  %v1285_v2 = vld [vmem:[%s1369_s2] ss:$0 sm:$0xff] }
  0x19   :  { %937 = vmatpush3.bf16.msra.mxu1 %v1013_v23  ;;  %874 = vmatprep.subr.bf16.mxu0 %v1014_v24 }
  0x1a   :  { %938 = vmatprep.subr.bf16.mxu1 %v1015_v25 }
  0x1c   :  { %875 = vmatpush3.bf16.msra.mxu0 %v1016_v26 }
  0x1d   :  { %939 = vmatpush3.bf16.msra.mxu1 %v1017_v27  ;;  %876 = vmatprep.subr.bf16.mxu0 %v1018_v28 }
  0x1e   :  { %940 = vmatprep.subr.bf16.mxu1 %v1019_v29 }
  0x20   :  { %877 = vmatpush3.bf16.msra.mxu0 %v1020_v30 }
  0x21   :  { %941 = vmatpush3.bf16.msra.mxu1 %v1021_v31 }
  0x23   :  { %503 = vmatmul.mubr.bf16.vlgmr.msra.gmra.mxu0 %v1022_v32 }
  0x24   :  { %600 = vmatmul.mubr.bf16.vlgmr.msra.gmra.mxu1 %v1025_v34  ;;  %510 = vmatprep.mubr.bf16.mxu0 %v1028_v36 }
  0x25   :  { %607 = vmatprep.mubr.bf16.mxu1 %v1030_v37 }
  0x2b   :  { %511 = vmatmul.mubr.bf16.gmra.mxu0 %v1032_v38 }
  0x2c   :  { %608 = vmatmul.mubr.bf16.gmra.mxu1 %v1033_v39  ;;  %518 = vmatprep.mubr.bf16.mxu0 %v1034_v40 }
  0x2d   :  { %615 = vmatprep.mubr.bf16.mxu1 %v1036_v41 }
  0x33   :  { %519 = vmatmul.mubr.bf16.gmra.mxu0 %v1038_v42 }
  0x34   :  { %616 = vmatmul.mubr.bf16.gmra.mxu1 %v1039_v43  ;;  %526 = vmatprep.mubr.bf16.mxu0 %v1040_v44 }
  0x35   :  { %623 = vmatprep.mubr.bf16.mxu1 %v1042_v45 }
  0x3b   :  { %527 = vmatmul.mubr.bf16.gmra.mxu0 %v1044_v46 }
  0x3c   :  { %624 = vmatmul.mubr.bf16.gmra.mxu1 %v1045_v47  ;;  %534 = vmatprep.mubr.bf16.mxu0 %v1046_v48 }
  0x3d   :  { %631 = vmatprep.mubr.bf16.mxu1 %v1048_v49 }
  0x43   :  { %535 = vmatmul.mubr.bf16.gmra.mxu0 %v1050_v50 }
  0x44   :  { %632 = vmatmul.mubr.bf16.gmra.mxu1 %v1051_v51  ;;  %542 = vmatprep.mubr.bf16.mxu0 %v1052_v52 }
  0x45   :  { %639 = vmatprep.mubr.bf16.mxu1 %v1054_v53 }
  0x4b   :  { %543 = vmatmul.mubr.bf16.gmra.mxu0 %v1056_v54 }
  0x4c   :  { %640 = vmatmul.mubr.bf16.gmra.mxu1 %v1057_v55  ;;  %550 = vmatprep.mubr.bf16.mxu0 %v1058_v56 }
  0x4d   :  { %647 = vmatprep.mubr.bf16.mxu1 %v1060_v57 }
  0x53   :  { %551 = vmatmul.mubr.bf16.gmra.mxu0 %v1062_v58 }
  0x54   :  { %648 = vmatmul.mubr.bf16.gmra.mxu1 %v1063_v59  ;;  %558 = vmatprep.mubr.bf16.mxu0 %v1064_v60 }
  0x55   :  { %655 = vmatprep.mubr.bf16.mxu1 %v1066_v61 }
  0x5b   :  { %559 = vmatmul.mubr.bf16.gmra.mxu0 %v1068_v62 }
  0x5c   :  { %656 = vmatmul.mubr.bf16.gmra.mxu1 %v1069_v63 }
  0xe3   :  { %v878_v0 = vpop.f32.mrf.mxu0 }
  0xe4   :  { %v942_v1 = vpop.f32.mrf.mxu1 }
  0xe5   :  { %v879_v3 = vpop.f32.mrf.mxu0 }
  0xe6   :  { %v880_v4 = vadd.f32 %v879_v3, %v878_v0  ;;  %v943_v5 = vpop.f32.mrf.mxu1 }
  0xe7   :  { %v881_v6 = vpop.f32.mrf.mxu0  ;;  %v944_v8 = vadd.f32 %v943_v5, %v942_v1 }
  0xe8   :  { %v505_v7 = vadd.f32 %v880_v4, %v1285_v2  ;;  %v945_v9 = vpop.f32.mrf.mxu1 }
  0xe9   :  { %v882_v10 = vpop.f32.mrf.mxu0 }
  0xea   :  { %v602_v11 = vadd.f32 %v944_v8, %v505_v7  ;;  %v883_v12 = vadd.f32 %v882_v10, %v881_v6  ;;  %v946_v13 = vpop.f32.mrf.mxu1 }
  0xeb   :  { %v884_v14 = vpop.f32.mrf.mxu0  ;;  %v947_v17 = vadd.f32 %v946_v13, %v945_v9 }
  0xec   :  { %v664_v15 = vmax.f32 %v602_v11, 0.0  ;;  %v508_v16 = vadd.f32 %v883_v12, %v1285_v2  ;;  %v948_v18 = vpop.f32.mrf.mxu1 }
  0xed   :  { %v885_v19 = vpop.f32.mrf.mxu0 }
  0xee   :  { %v846_v20 = vpack.c.bf16 %v664_v15, %v664_v15  ;;  %v605_v21 = vadd.f32 %v947_v17, %v508_v16  ;;  %v886_v22 = vadd.f32 %v885_v19, %v884_v14  ;;  %v949_v23 = vpop.f32.mrf.mxu1 }
  0xef   :  { %v887_v24 = vpop.f32.mrf.mxu0  ;;  %v950_v27 = vadd.f32 %v949_v23, %v948_v18 }
  0xf0   :  { %745 = vst.msk [vmem:[%s1370_s3] sm:$0xf] %vm744_vm0, %v846_v20  ;;  %v665_v25 = vmax.f32 %v605_v21, 0.0  ;;  %v513_v26 = vadd.f32 %v886_v22, %v1285_v2  ;;  %v951_v28 = vpop.f32.mrf.mxu1 }
  0xf1   :  { %v888_v29 = vpop.f32.mrf.mxu0 }
  0xf2   :  { %v847_v30 = vpack.c.bf16 %v665_v25, %v665_v25  ;;  %v610_v31 = vadd.f32 %v950_v27, %v513_v26  ;;  %v889_v32 = vadd.f32 %v888_v29, %v887_v24  ;;  %v952_v33 = vpop.f32.mrf.mxu1 }
  0xf3   :  { %v890_v34 = vpop.f32.mrf.mxu0  ;;  %v953_v37 = vadd.f32 %v952_v33, %v951_v28 }
  0xf4   :  { %746 = vst.msk [vmem:[%s1370_s3 + $0x4] sm:$0xf] %vm744_vm0, %v847_v30  ;;  %v666_v35 = vmax.f32 %v610_v31, 0.0  ;;  %v516_v36 = vadd.f32 %v889_v32, %v1285_v2  ;;  %v954_v38 = vpop.f32.mrf.mxu1 }
  0xf5   :  { %v891_v39 = vpop.f32.mrf.mxu0 }
  0xf6   :  { %v848_v40 = vpack.c.bf16 %v666_v35, %v666_v35  ;;  %v613_v41 = vadd.f32 %v953_v37, %v516_v36  ;;  %v892_v42 = vadd.f32 %v891_v39, %v890_v34  ;;  %v955_v43 = vpop.f32.mrf.mxu1 }
  0xf7   :  { %v893_v44 = vpop.f32.mrf.mxu0  ;;  %v956_v47 = vadd.f32 %v955_v43, %v954_v38 }
  0xf8   :  { %747 = vst.msk [vmem:[%s1370_s3 + $0x8] sm:$0xf] %vm744_vm0, %v848_v40  ;;  %v667_v45 = vmax.f32 %v613_v41, 0.0  ;;  %v521_v46 = vadd.f32 %v892_v42, %v1285_v2  ;;  %v957_v48 = vpop.f32.mrf.mxu1 }
  0xf9   :  { %v894_v49 = vpop.f32.mrf.mxu0 }
  0xfa   :  { %v849_v50 = vpack.c.bf16 %v667_v45, %v667_v45  ;;  %v618_v51 = vadd.f32 %v956_v47, %v521_v46  ;;  %v895_v52 = vadd.f32 %v894_v49, %v893_v44  ;;  %v958_v53 = vpop.f32.mrf.mxu1 }
  0xfb   :  { %v896_v54 = vpop.f32.mrf.mxu0  ;;  %v959_v57 = vadd.f32 %v958_v53, %v957_v48 }
  0xfc   :  { %748 = vst.msk [vmem:[%s1370_s3 + $0xc] sm:$0xf] %vm744_vm0, %v849_v50  ;;  %v668_v55 = vmax.f32 %v618_v51, 0.0  ;;  %v524_v56 = vadd.f32 %v895_v52, %v1285_v2  ;;  %v960_v58 = vpop.f32.mrf.mxu1 }
  0xfd   :  { %v897_v59 = vpop.f32.mrf.mxu0 }
  0xfe   :  { %v850_v60 = vpack.c.bf16 %v668_v55, %v668_v55  ;;  %v621_v61 = vadd.f32 %v959_v57, %v524_v56  ;;  %v898_v62 = vadd.f32 %v897_v59, %v896_v54  ;;  %v961_v63 = vpop.f32.mrf.mxu1 }
  0xff   :  { %v899_v0 = vpop.f32.mrf.mxu0  ;;  %v962_v4 = vadd.f32 %v961_v63, %v960_v58 }
 0x100   :  { %749 = vst.msk [vmem:[%s1370_s3 + $0x10] sm:$0xf] %vm744_vm0, %v850_v60  ;;  %v669_v1 = vmax.f32 %v621_v61, 0.0  ;;  %v529_v3 = vadd.f32 %v898_v62, %v1285_v2  ;;  %v963_v5 = vpop.f32.mrf.mxu1 }
 0x101   :  { %v900_v6 = vpop.f32.mrf.mxu0 }
 0x102   :  { %v851_v7 = vpack.c.bf16 %v669_v1, %v669_v1  ;;  %v626_v8 = vadd.f32 %v962_v4, %v529_v3  ;;  %v901_v9 = vadd.f32 %v900_v6, %v899_v0  ;;  %v964_v10 = vpop.f32.mrf.mxu1 }
 0x103   :  { %v902_v11 = vpop.f32.mrf.mxu0  ;;  %v965_v14 = vadd.f32 %v964_v10, %v963_v5 }
 0x104   :  { %750 = vst.msk [vmem:[%s1370_s3 + $0x14] sm:$0xf] %vm744_vm0, %v851_v7  ;;  %v670_v12 = vmax.f32 %v626_v8, 0.0  ;;  %v532_v13 = vadd.f32 %v901_v9, %v1285_v2  ;;  %v966_v15 = vpop.f32.mrf.mxu1 }
 0x105   :  { %v903_v16 = vpop.f32.mrf.mxu0 }
 0x106   :  { %v852_v17 = vpack.c.bf16 %v670_v12, %v670_v12  ;;  %v629_v18 = vadd.f32 %v965_v14, %v532_v13  ;;  %v904_v19 = vadd.f32 %v903_v16, %v902_v11  ;;  %v967_v20 = vpop.f32.mrf.mxu1 }
 0x107   :  { %v905_v21 = vpop.f32.mrf.mxu0  ;;  %v968_v24 = vadd.f32 %v967_v20, %v966_v15 }
 0x108   :  { %751 = vst.msk [vmem:[%s1370_s3 + $0x18] sm:$0xf] %vm744_vm0, %v852_v17  ;;  %v671_v22 = vmax.f32 %v629_v18, 0.0  ;;  %v537_v23 = vadd.f32 %v904_v19, %v1285_v2  ;;  %v969_v25 = vpop.f32.mrf.mxu1 }
 0x109   :  { %v906_v26 = vpop.f32.mrf.mxu0 }
 0x10a   :  { %v853_v27 = vpack.c.bf16 %v671_v22, %v671_v22  ;;  %v634_v28 = vadd.f32 %v968_v24, %v537_v23  ;;  %v907_v29 = vadd.f32 %v906_v26, %v905_v21  ;;  %v970_v30 = vpop.f32.mrf.mxu1 }
 0x10b   :  { %v908_v31 = vpop.f32.mrf.mxu0  ;;  %v971_v34 = vadd.f32 %v970_v30, %v969_v25 }
 0x10c   :  { %752 = vst.msk [vmem:[%s1370_s3 + $0x1c] sm:$0xf] %vm744_vm0, %v853_v27  ;;  %v672_v32 = vmax.f32 %v634_v28, 0.0  ;;  %v540_v33 = vadd.f32 %v907_v29, %v1285_v2  ;;  %v972_v35 = vpop.f32.mrf.mxu1 }
 0x10d   :  { %v909_v36 = vpop.f32.mrf.mxu0 }
 0x10e   :  { %v854_v37 = vpack.c.bf16 %v672_v32, %v672_v32  ;;  %v637_v38 = vadd.f32 %v971_v34, %v540_v33  ;;  %v910_v39 = vadd.f32 %v909_v36, %v908_v31  ;;  %v973_v40 = vpop.f32.mrf.mxu1 }
 0x10f   :  { %v911_v41 = vpop.f32.mrf.mxu0  ;;  %v974_v44 = vadd.f32 %v973_v40, %v972_v35 }
 0x110   :  { %753 = vst.msk [vmem:[%s1370_s3 + $0x20] sm:$0xf] %vm744_vm0, %v854_v37  ;;  %v673_v42 = vmax.f32 %v637_v38, 0.0  ;;  %v545_v43 = vadd.f32 %v910_v39, %v1285_v2  ;;  %v975_v45 = vpop.f32.mrf.mxu1 }
 0x111   :  { %v912_v46 = vpop.f32.mrf.mxu0 }
 0x112   :  { %v855_v47 = vpack.c.bf16 %v673_v42, %v673_v42  ;;  %v642_v48 = vadd.f32 %v974_v44, %v545_v43  ;;  %v913_v49 = vadd.f32 %v912_v46, %v911_v41  ;;  %v976_v50 = vpop.f32.mrf.mxu1 }
 0x113   :  { %v914_v51 = vpop.f32.mrf.mxu0  ;;  %v977_v54 = vadd.f32 %v976_v50, %v975_v45 }
 0x114   :  { %754 = vst.msk [vmem:[%s1370_s3 + $0x24] sm:$0xf] %vm744_vm0, %v855_v47  ;;  %v674_v52 = vmax.f32 %v642_v48, 0.0  ;;  %v548_v53 = vadd.f32 %v913_v49, %v1285_v2  ;;  %v978_v55 = vpop.f32.mrf.mxu1 }
 0x115   :  { %v915_v56 = vpop.f32.mrf.mxu0 }
 0x116   :  { %v856_v57 = vpack.c.bf16 %v674_v52, %v674_v52  ;;  %v645_v58 = vadd.f32 %v977_v54, %v548_v53  ;;  %v916_v59 = vadd.f32 %v915_v56, %v914_v51  ;;  %v979_v60 = vpop.f32.mrf.mxu1 }
 0x117   :  { %v917_v61 = vpop.f32.mrf.mxu0  ;;  %v980_v0 = vadd.f32 %v979_v60, %v978_v55 }
 0x118   :  { %755 = vst.msk [vmem:[%s1370_s3 + $0x28] sm:$0xf] %vm744_vm0, %v856_v57  ;;  %v675_v62 = vmax.f32 %v645_v58, 0.0  ;;  %v553_v63 = vadd.f32 %v916_v59, %v1285_v2  ;;  %v981_v1 = vpop.f32.mrf.mxu1 }
 0x119   :  { %v918_v3 = vpop.f32.mrf.mxu0 }
 0x11a   :  { %v857_v4 = vpack.c.bf16 %v675_v62, %v675_v62  ;;  %v650_v5 = vadd.f32 %v980_v0, %v553_v63  ;;  %v919_v6 = vadd.f32 %v918_v3, %v917_v61  ;;  %v982_v7 = vpop.f32.mrf.mxu1 }
 0x11b   :  { %v920_v8 = vpop.f32.mrf.mxu0  ;;  %v983_v11 = vadd.f32 %v982_v7, %v981_v1 }
 0x11c   :  { %756 = vst.msk [vmem:[%s1370_s3 + $0x2c] sm:$0xf] %vm744_vm0, %v857_v4  ;;  %v676_v9 = vmax.f32 %v650_v5, 0.0  ;;  %v556_v10 = vadd.f32 %v919_v6, %v1285_v2  ;;  %v984_v12 = vpop.f32.mrf.mxu1 }
 0x11d   :  { %v921_v13 = vpop.f32.mrf.mxu0 }
 0x11e   :  { %v858_v14 = vpack.c.bf16 %v676_v9, %v676_v9  ;;  %v653_v15 = vadd.f32 %v983_v11, %v556_v10  ;;  %v922_v16 = vadd.f32 %v921_v13, %v920_v8  ;;  %v985_v17 = vpop.f32.mrf.mxu1 }
 0x11f   :  { %v923_v18 = vpop.f32.mrf.mxu0  ;;  %v986_v21 = vadd.f32 %v985_v17, %v984_v12 }
 0x120   :  { %757 = vst.msk [vmem:[%s1370_s3 + $0x30] sm:$0xf] %vm744_vm0, %v858_v14  ;;  %v677_v19 = vmax.f32 %v653_v15, 0.0  ;;  %v561_v20 = vadd.f32 %v922_v16, %v1285_v2  ;;  %v987_v22 = vpop.f32.mrf.mxu1 }
 0x121   :  { %v924_v23 = vpop.f32.mrf.mxu0 }
 0x122   :  { %v859_v24 = vpack.c.bf16 %v677_v19, %v677_v19  ;;  %v658_v25 = vadd.f32 %v986_v21, %v561_v20  ;;  %v925_v26 = vadd.f32 %v924_v23, %v923_v18  ;;  %v988_v27 = vpop.f32.mrf.mxu1 }
 0x123   :  { %v989_v30 = vadd.f32 %v988_v27, %v987_v22 }
 0x124   :  { %758 = vst.msk [vmem:[%s1370_s3 + $0x34] sm:$0xf] %vm744_vm0, %v859_v24  ;;  %v678_v28 = vmax.f32 %v658_v25, 0.0  ;;  %v564_v29 = vadd.f32 %v925_v26, %v1285_v2 }
 0x126   :  { %v860_v31 = vpack.c.bf16 %v678_v28, %v678_v28  ;;  %v661_v32 = vadd.f32 %v989_v30, %v564_v29 }
 0x128   :  { %759 = vst.msk [vmem:[%s1370_s3 + $0x38] sm:$0xf] %vm744_vm0, %v860_v31  ;;  %v679_v33 = vmax.f32 %v661_v32, 0.0 }
 0x12a   :  { %v861_v34 = vpack.c.bf16 %v679_v33, %v679_v33 }
 0x12c   :  { %760 = vst.msk [vmem:[%s1370_s3 + $0x3c] sm:$0xf] %vm744_vm0, %v861_v34 }

// kernel: beta_vae_b_forward.13
= control target key start
LH: loop header
LB: loop body
LE: loop exit
PB: predicated region body
PF: predicated region fallthrough
CT: control target
= control target key end

     0   :  { %vm444_vm0 = vcmask 257024   ;;  %s761_s1 = inlined_call_operand.vmem [shape: bf16[512,32], index: 1, kind: input, shape index: {}]   ;;  %s762_s0 = inlined_call_operand.vmem [shape: bf16[32,512], index: 0, kind: input, shape index: {}]   ;;  %s763_s2 = inlined_call_operand.vmem [shape: f32[1,32], index: 2, kind: input, shape index: {}]   ;;  %s764_s3 = inlined_call_operand.vmem [shape: bf16[32,32], index: 3, kind: output, shape index: {}]  }
   0x1   :  { %v558_v0 = vld [vmem:[%s761_s1 + $0x78] sm:$0xff]   ;;  %v562_v4 = vld [vmem:[%s761_s1 + $0x70] sm:$0xff]   ;;  %v566_v8 = vld [vmem:[%s761_s1 + $0x68] sm:$0xff]  }
   0x2   :  { %v559_v1 = vld [vmem:[%s761_s1 + $0xf8] sm:$0xff]   ;;  %502 = vmatprep.subr.bf16.mxu0 %v558_v0  ;;  %v563_v5 = vld [vmem:[%s761_s1 + $0xf0] sm:$0xff]   ;;  %v567_v9 = vld [vmem:[%s761_s1 + $0xe8] sm:$0xff]  }
   0x3   :  { %v560_v2 = vld [vmem:[%s761_s1 + $0x38] sm:$0xff]   ;;  %530 = vmatprep.subr.bf16.mxu1 %v559_v1  ;;  %v564_v6 = vld [vmem:[%s761_s1 + $0x30] sm:$0xff]   ;;  %v568_v10 = vld [vmem:[%s761_s1 + $0x28] sm:$0xff]  }
   0x4   :  { %v561_v3 = vld [vmem:[%s761_s1 + $0xb8] sm:$0xff]   ;;  %503 = vmatpush3.bf16.msra.mxu0 %v560_v2  ;;  %v565_v7 = vld [vmem:[%s761_s1 + $0xb0] sm:$0xff]   ;;  %v569_v11 = vld [vmem:[%s761_s1 + $0xa8] sm:$0xff]  }
   0x5   :  { %531 = vmatpush3.bf16.msra.mxu1 %v561_v3  ;;  %504 = vmatprep.subr.bf16.mxu0 %v562_v4  ;;  %v570_v12 = vld [vmem:[%s761_s1 + $0x60] sm:$0xff]   ;;  %v574_v16 = vld [vmem:[%s761_s1 + $0x58] sm:$0xff]   ;;  %v578_v20 = vld [vmem:[%s761_s1 + $0x50] sm:$0xff]  }
   0x6   :  { %532 = vmatprep.subr.bf16.mxu1 %v563_v5  ;;  %v571_v13 = vld [vmem:[%s761_s1 + $0xe0] sm:$0xff]   ;;  %v575_v17 = vld [vmem:[%s761_s1 + $0xd8] sm:$0xff]   ;;  %v579_v21 = vld [vmem:[%s761_s1 + $0xd0] sm:$0xff]  }
   0x7   :  { %v572_v14 = vld [vmem:[%s761_s1 + $0x20] sm:$0xff]   ;;  %v576_v18 = vld [vmem:[%s761_s1 + $0x18] sm:$0xff]   ;;  %v580_v22 = vld [vmem:[%s761_s1 + $0x10] sm:$0xff]  }
   0x8   :  { %505 = vmatpush3.bf16.msra.mxu0 %v564_v6  ;;  %v573_v15 = vld [vmem:[%s761_s1 + $0xa0] sm:$0xff]   ;;  %v577_v19 = vld [vmem:[%s761_s1 + $0x98] sm:$0xff]   ;;  %v581_v23 = vld [vmem:[%s761_s1 + $0x90] sm:$0xff]  }
   0x9   :  { %533 = vmatpush3.bf16.msra.mxu1 %v565_v7  ;;  %506 = vmatprep.subr.bf16.mxu0 %v566_v8  ;;  %v582_v24 = vld [vmem:[%s761_s1 + $0x48] sm:$0xff]   ;;  %v586_v28 = vld [vmem:[%s761_s1 + $0x40] sm:$0xff]  }
   0xa   :  { %534 = vmatprep.subr.bf16.mxu1 %v567_v9  ;;  %v583_v25 = vld [vmem:[%s761_s1 + $0xc8] sm:$0xff]   ;;  %v587_v29 = vld [vmem:[%s761_s1 + $0xc0] sm:$0xff]  }
   0xb   :  { %v584_v26 = vld [vmem:[%s761_s1 + $0x8] sm:$0xff]   ;;  %v588_v30 = vld [vmem:[%s761_s1] sm:$0xff]  }
   0xc   :  { %507 = vmatpush3.bf16.msra.mxu0 %v568_v10  ;;  %v585_v27 = vld [vmem:[%s761_s1 + $0x88] sm:$0xff]   ;;  %v589_v31 = vld [vmem:[%s761_s1 + $0x80] sm:$0xff]  }
   0xd   :  { %535 = vmatpush3.bf16.msra.mxu1 %v569_v11  ;;  %508 = vmatprep.subr.bf16.mxu0 %v570_v12  ;;  %v590_v32 = vld [vmem:[%s762_s0] ss:$16 sps:$4 sm:$0xff]   ;;  %v592_v33 = vld [vmem:[%s762_s0 + $0x4] ss:$16 sps:$4 sm:$0xff]   ;;  %v593_v34 = vld [vmem:[%s762_s0 + $0x8] ss:$16 sps:$4 sm:$0xff]  }
   0xe   :  { %536 = vmatprep.subr.bf16.mxu1 %v571_v13  ;;  %v595_v35 = vld [vmem:[%s762_s0 + $0xc] ss:$16 sps:$4 sm:$0xff]   ;;  %358 = vmatprep.mubr.bf16.mxu0 %v592_v33  ;;  %v596_v36 = vld [vmem:[%s762_s0 + $0x24] ss:$16 sps:$4 sm:$0xff]   ;;  %v600_v38 = vld [vmem:[%s762_s0 + $0x20] ss:$16 sps:$4 sm:$0xff]  }
   0xf   :  { %407 = vmatprep.mubr.bf16.mxu1 %v595_v35  ;;  %v598_v37 = vld [vmem:[%s762_s0 + $0x2c] ss:$16 sps:$4 sm:$0xff]   ;;  %v601_v39 = vld [vmem:[%s762_s0 + $0x28] ss:$16 sps:$4 sm:$0xff]   ;;  %v453_v42 = vld [vmem:[%s763_s2] ss:$0 sm:$0xff] }
  0x10   :  { %509 = vmatpush3.bf16.msra.mxu0 %v572_v14 }
  0x11   :  { %537 = vmatpush3.bf16.msra.mxu1 %v573_v15  ;;  %510 = vmatprep.subr.bf16.mxu0 %v574_v16 }
  0x12   :  { %538 = vmatprep.subr.bf16.mxu1 %v575_v17 }
  0x14   :  { %511 = vmatpush3.bf16.msra.mxu0 %v576_v18 }
  0x15   :  { %539 = vmatpush3.bf16.msra.mxu1 %v577_v19  ;;  %512 = vmatprep.subr.bf16.mxu0 %v578_v20 }
  0x16   :  { %540 = vmatprep.subr.bf16.mxu1 %v579_v21 }
  0x18   :  { %513 = vmatpush3.bf16.msra.mxu0 %v580_v22 }
  0x19   :  { %541 = vmatpush3.bf16.msra.mxu1 %v581_v23  ;;  %514 = vmatprep.subr.bf16.mxu0 %v582_v24 }
  0x1a   :  { %542 = vmatprep.subr.bf16.mxu1 %v583_v25 }
  0x1c   :  { %515 = vmatpush3.bf16.msra.mxu0 %v584_v26 }
  0x1d   :  { %543 = vmatpush3.bf16.msra.mxu1 %v585_v27  ;;  %516 = vmatprep.subr.bf16.mxu0 %v586_v28 }
  0x1e   :  { %544 = vmatprep.subr.bf16.mxu1 %v587_v29 }
  0x20   :  { %517 = vmatpush3.bf16.msra.mxu0 %v588_v30 }
  0x21   :  { %545 = vmatpush3.bf16.msra.mxu1 %v589_v31 }
  0x23   :  { %359 = vmatmul.mubr.bf16.vlgmr.msra.gmra.mxu0 %v590_v32 }
  0x24   :  { %408 = vmatmul.mubr.bf16.vlgmr.msra.gmra.mxu1 %v593_v34  ;;  %366 = vmatprep.mubr.bf16.mxu0 %v596_v36 }
  0x25   :  { %415 = vmatprep.mubr.bf16.mxu1 %v598_v37 }
  0x2b   :  { %367 = vmatmul.mubr.bf16.gmra.mxu0 %v600_v38 }
  0x2c   :  { %416 = vmatmul.mubr.bf16.gmra.mxu1 %v601_v39 }
  0xe3   :  { %v518_v40 = vpop.f32.mrf.mxu0 }
  0xe4   :  { %v546_v41 = vpop.f32.mrf.mxu1 }
  0xe5   :  { %v519_v43 = vpop.f32.mrf.mxu0 }
  0xe6   :  { %v520_v44 = vadd.f32 %v519_v43, %v518_v40  ;;  %v547_v45 = vpop.f32.mrf.mxu1 }
  0xe7   :  { %v521_v46 = vpop.f32.mrf.mxu0  ;;  %v548_v48 = vadd.f32 %v547_v45, %v546_v41 }
  0xe8   :  { %v361_v47 = vadd.f32 %v520_v44, %v453_v42  ;;  %v549_v49 = vpop.f32.mrf.mxu1 }
  0xe9   :  { %v522_v50 = vpop.f32.mrf.mxu0 }
  0xea   :  { %v410_v51 = vadd.f32 %v548_v48, %v361_v47  ;;  %v523_v52 = vadd.f32 %v522_v50, %v521_v46  ;;  %v550_v53 = vpop.f32.mrf.mxu1 }
  0xeb   :  { %v524_v54 = vpop.f32.mrf.mxu0  ;;  %v551_v57 = vadd.f32 %v550_v53, %v549_v49 }
  0xec   :  { %v424_v55 = vmax.f32 %v410_v51, 0.0  ;;  %v364_v56 = vadd.f32 %v523_v52, %v453_v42  ;;  %v552_v58 = vpop.f32.mrf.mxu1 }
  0xed   :  { %v525_v59 = vpop.f32.mrf.mxu0 }
  0xee   :  { %v498_v60 = vpack.c.bf16 %v424_v55, %v424_v55  ;;  %v413_v61 = vadd.f32 %v551_v57, %v364_v56  ;;  %v526_v62 = vadd.f32 %v525_v59, %v524_v54  ;;  %v553_v63 = vpop.f32.mrf.mxu1 }
  0xef   :  { %v527_v0 = vpop.f32.mrf.mxu0  ;;  %v554_v3 = vadd.f32 %v553_v63, %v552_v58 }
  0xf0   :  { %445 = vst.msk [vmem:[%s764_s3] sm:$0xf] %vm444_vm0, %v498_v60  ;;  %v425_v1 = vmax.f32 %v413_v61, 0.0  ;;  %v369_v2 = vadd.f32 %v526_v62, %v453_v42  ;;  %v555_v4 = vpop.f32.mrf.mxu1 }
  0xf1   :  { %v528_v5 = vpop.f32.mrf.mxu0 }
  0xf2   :  { %v499_v6 = vpack.c.bf16 %v425_v1, %v425_v1  ;;  %v418_v7 = vadd.f32 %v554_v3, %v369_v2  ;;  %v529_v8 = vadd.f32 %v528_v5, %v527_v0  ;;  %v556_v9 = vpop.f32.mrf.mxu1 }
  0xf3   :  { %v557_v12 = vadd.f32 %v556_v9, %v555_v4 }
  0xf4   :  { %446 = vst.msk [vmem:[%s764_s3 + $0x4] sm:$0xf] %vm444_vm0, %v499_v6  ;;  %v426_v10 = vmax.f32 %v418_v7, 0.0  ;;  %v372_v11 = vadd.f32 %v529_v8, %v453_v42 }
  0xf6   :  { %v500_v13 = vpack.c.bf16 %v426_v10, %v426_v10  ;;  %v421_v14 = vadd.f32 %v557_v12, %v372_v11 }
  0xf8   :  { %447 = vst.msk [vmem:[%s764_s3 + $0x8] sm:$0xf] %vm444_vm0, %v500_v13  ;;  %v427_v15 = vmax.f32 %v421_v14, 0.0 }
  0xfa   :  { %v501_v16 = vpack.c.bf16 %v427_v15, %v427_v15 }
  0xfc   :  { %448 = vst.msk [vmem:[%s764_s3 + $0xc] sm:$0xf] %vm444_vm0, %v501_v16 }

// kernel: beta_vae_b_forward.15
= control target key start
LH: loop header
LB: loop body
LE: loop exit
PB: predicated region body
PF: predicated region fallthrough
CT: control target
= control target key end

     0   :  { %vm47_vm0 = vcmask 1041408   ;;  %v604_v3 = vmov 0.0   ;;  %vm43_vm1 = vcmask 80896   ;;  %s1266_s1 = inlined_call_operand.vmem [shape: f32[10,256], index: 1, kind: input, shape index: {}]   ;;  %s1267_s0 = inlined_call_operand.vmem [shape: f32[2,10], index: 0, kind: input, shape index: {}]   ;;  %s1268_s3 = inlined_call_operand.vmem [shape: f32[256,256], index: 3, kind: input, shape index: {}]   ;;  %s1269_s5 = inlined_call_operand.vmem [shape: f32[256,512], index: 5, kind: input, shape index: {}]   ;;  %s1270_s2 = inlined_call_operand.vmem [shape: f32[1,256], index: 2, kind: input, shape index: {}]   ;;  %s1271_s4 = inlined_call_operand.vmem [shape: f32[1,256], index: 4, kind: input, shape index: {}]   ;;  %s1272_s6 = inlined_call_operand.vmem [shape: f32[1,512], index: 6, kind: input, shape index: {}]   ;;  %s1273_s7 = inlined_call_operand.vmem [shape: f32[2,512], index: 7, kind: output, shape index: {}]  }
   0x1   :  { %v30_v0 = vld [vmem:[%s1266_s1 + $0x18] sm:$0x3]  ;;  %v29_v1 = vld [vmem:[%s1266_s1 + $0x10] sm:$0x3]  ;;  %v28_v2 = vld [vmem:[%s1266_s1 + $0x8] sm:$0xff]  ;;  %118 = vmatprep.mubr.f32.mxu0 %v604_v3 }
   0x2   :  { %599 = vmatprep.subr.msk.mxu0 %vm47_vm0, %v30_v0  ;;  %v27_v4 = vld [vmem:[%s1266_s1] sm:$0xff]  ;;  %v158_v6 = vld [vmem:[%s1268_s3 + $0xf8] sm:$0xff]  ;;  %v157_v7 = vld [vmem:[%s1268_s3 + $0xf0] sm:$0xff] }
   0x3   :  { %v26_v5 = vld [vmem:[%s1267_s0] sm:$0x3]  ;;  %600 = vmatpush1.msk.msra.mxu0 %vm47_vm0, %v29_v1  ;;  %203 = vmatprep.subr.mxu1 %v158_v6  ;;  %v156_v8 = vld [vmem:[%s1268_s3 + $0xe8] sm:$0xff]  ;;  %v154_v10 = vld [vmem:[%s1268_s3 + $0xd8] sm:$0xff] }
   0x4   :  { %v155_v9 = vld [vmem:[%s1268_s3 + $0xe0] sm:$0xff]  ;;  %84 = vmatprep.subr.mxu0 %v28_v2  ;;  %204 = vmatpush1.msra.mxu1 %v157_v7  ;;  %v153_v11 = vld [vmem:[%s1268_s3 + $0xd0] sm:$0xff]  ;;  %v152_v12 = vld [vmem:[%s1268_s3 + $0xc8] sm:$0xff] }
   0x5   :  { %85 = vmatpush1.msra.mxu0 %v27_v4  ;;  %205 = vmatprep.subr.mxu1 %v156_v8  ;;  %v151_v13 = vld [vmem:[%s1268_s3 + $0xc0] sm:$0xff]  ;;  %v150_v14 = vld [vmem:[%s1268_s3 + $0xb8] sm:$0xff]  ;;  %v149_v15 = vld [vmem:[%s1268_s3 + $0xb0] sm:$0xff] }
   0x6   :  { %601 = vmatmul.mubr.msk.f32.vlgmr.msra.gmra.mxu0 %vm43_vm1, %v26_v5  ;;  %206 = vmatpush1.msra.mxu1 %v155_v9  ;;  %v148_v16 = vld [vmem:[%s1268_s3 + $0xa8] sm:$0xff]  ;;  %v147_v17 = vld [vmem:[%s1268_s3 + $0xa0] sm:$0xff]  ;;  %v146_v18 = vld [vmem:[%s1268_s3 + $0x98] sm:$0xff] }
   0x7   :  { %207 = vmatprep.subr.mxu1 %v154_v10  ;;  %v145_v19 = vld [vmem:[%s1268_s3 + $0x90] sm:$0xff]  ;;  %v144_v20 = vld [vmem:[%s1268_s3 + $0x88] sm:$0xff]  ;;  %v143_v21 = vld [vmem:[%s1268_s3 + $0x80] sm:$0xff] }
   0x8   :  { %208 = vmatpush1.msra.mxu1 %v153_v11  ;;  %v142_v22 = vld [vmem:[%s1268_s3 + $0x78] sm:$0xff]  ;;  %v141_v23 = vld [vmem:[%s1268_s3 + $0x70] sm:$0xff]  ;;  %v140_v24 = vld [vmem:[%s1268_s3 + $0x68] sm:$0xff] }
   0x9   :  { %209 = vmatprep.subr.mxu1 %v152_v12  ;;  %v139_v25 = vld [vmem:[%s1268_s3 + $0x60] sm:$0xff]  ;;  %v138_v26 = vld [vmem:[%s1268_s3 + $0x58] sm:$0xff]  ;;  %v137_v27 = vld [vmem:[%s1268_s3 + $0x50] sm:$0xff] }
   0xa   :  { %210 = vmatpush1.msra.mxu1 %v151_v13  ;;  %v136_v28 = vld [vmem:[%s1268_s3 + $0x48] sm:$0xff]  ;;  %v135_v29 = vld [vmem:[%s1268_s3 + $0x40] sm:$0xff]  ;;  %v134_v30 = vld [vmem:[%s1268_s3 + $0x38] sm:$0xff] }
   0xb   :  { %211 = vmatprep.subr.mxu1 %v150_v14  ;;  %v133_v31 = vld [vmem:[%s1268_s3 + $0x30] sm:$0xff]  ;;  %v132_v32 = vld [vmem:[%s1268_s3 + $0x28] sm:$0xff]  ;;  %v131_v33 = vld [vmem:[%s1268_s3 + $0x20] sm:$0xff] }
   0xc   :  { %212 = vmatpush1.msra.mxu1 %v149_v15  ;;  %v130_v34 = vld [vmem:[%s1268_s3 + $0x18] sm:$0xff]  ;;  %v129_v35 = vld [vmem:[%s1268_s3 + $0x10] sm:$0xff]  ;;  %v128_v36 = vld [vmem:[%s1268_s3 + $0x8] sm:$0xff] }
   0xd   :  { %213 = vmatprep.subr.mxu1 %v148_v16  ;;  %v127_v37 = vld [vmem:[%s1268_s3] sm:$0xff]  ;;  %v190_v38 = vld [vmem:[%s1268_s3 + $0x1f8] sm:$0xff]  ;;  %v189_v39 = vld [vmem:[%s1268_s3 + $0x1f0] sm:$0xff] }
   0xe   :  { %214 = vmatpush1.msra.mxu1 %v147_v17  ;;  %v188_v40 = vld [vmem:[%s1268_s3 + $0x1e8] sm:$0xff]  ;;  %v187_v41 = vld [vmem:[%s1268_s3 + $0x1e0] sm:$0xff]  ;;  %v186_v42 = vld [vmem:[%s1268_s3 + $0x1d8] sm:$0xff] }
   0xf   :  { %215 = vmatprep.subr.mxu1 %v146_v18  ;;  %v185_v43 = vld [vmem:[%s1268_s3 + $0x1d0] sm:$0xff]  ;;  %v184_v44 = vld [vmem:[%s1268_s3 + $0x1c8] sm:$0xff]  ;;  %v183_v45 = vld [vmem:[%s1268_s3 + $0x1c0] sm:$0xff] }
  0x10   :  { %216 = vmatpush1.msra.mxu1 %v145_v19  ;;  %v182_v46 = vld [vmem:[%s1268_s3 + $0x1b8] sm:$0xff]  ;;  %v181_v47 = vld [vmem:[%s1268_s3 + $0x1b0] sm:$0xff]  ;;  %v180_v48 = vld [vmem:[%s1268_s3 + $0x1a8] sm:$0xff] }
  0x11   :  { %217 = vmatprep.subr.mxu1 %v144_v20  ;;  %v179_v49 = vld [vmem:[%s1268_s3 + $0x1a0] sm:$0xff]  ;;  %v178_v50 = vld [vmem:[%s1268_s3 + $0x198] sm:$0xff]  ;;  %v177_v51 = vld [vmem:[%s1268_s3 + $0x190] sm:$0xff] }
  0x12   :  { %218 = vmatpush1.msra.mxu1 %v143_v21  ;;  %v176_v52 = vld [vmem:[%s1268_s3 + $0x188] sm:$0xff]  ;;  %v175_v53 = vld [vmem:[%s1268_s3 + $0x180] sm:$0xff]  ;;  %v174_v54 = vld [vmem:[%s1268_s3 + $0x178] sm:$0xff] }
  0x13   :  { %219 = vmatprep.subr.mxu1 %v142_v22  ;;  %v173_v55 = vld [vmem:[%s1268_s3 + $0x170] sm:$0xff]  ;;  %v172_v56 = vld [vmem:[%s1268_s3 + $0x168] sm:$0xff]  ;;  %v171_v57 = vld [vmem:[%s1268_s3 + $0x160] sm:$0xff] }
  0x14   :  { %220 = vmatpush1.msra.mxu1 %v141_v23  ;;  %v170_v58 = vld [vmem:[%s1268_s3 + $0x158] sm:$0xff]  ;;  %v169_v59 = vld [vmem:[%s1268_s3 + $0x150] sm:$0xff]  ;;  %v168_v60 = vld [vmem:[%s1268_s3 + $0x148] sm:$0xff] }
  0x15   :  { %221 = vmatprep.subr.mxu1 %v140_v24  ;;  %v167_v61 = vld [vmem:[%s1268_s3 + $0x140] sm:$0xff]  ;;  %v166_v62 = vld [vmem:[%s1268_s3 + $0x138] sm:$0xff]  ;;  %v165_v63 = vld [vmem:[%s1268_s3 + $0x130] sm:$0xff] }
  0x16   :  { %222 = vmatpush1.msra.mxu1 %v139_v25  ;;  %v164_v0 = vld [vmem:[%s1268_s3 + $0x128] sm:$0xff]  ;;  %v163_v1 = vld [vmem:[%s1268_s3 + $0x120] sm:$0xff]  ;;  %v162_v2 = vld [vmem:[%s1268_s3 + $0x118] sm:$0xff] }
  0x17   :  { %223 = vmatprep.subr.mxu1 %v138_v26  ;;  %v161_v3 = vld [vmem:[%s1268_s3 + $0x110] sm:$0xff]  ;;  %v160_v4 = vld [vmem:[%s1268_s3 + $0x108] sm:$0xff]  ;;  %v159_v5 = vld [vmem:[%s1268_s3 + $0x100] sm:$0xff] }
  0x18   :  { %224 = vmatpush1.msra.mxu1 %v137_v27  ;;  %v337_v6 = vld [vmem:[%s1269_s5 + $0x1e8] sm:$0xff]  ;;  %v339_v7 = vld [vmem:[%s1269_s5 + $0x1f8] sm:$0xff]  ;;  %v336_v8 = vld [vmem:[%s1269_s5 + $0x1e0] sm:$0xff] }
  0x19   :  { %225 = vmatprep.subr.mxu1 %v136_v28  ;;  %426 = vmatprep.subr.mxu0 %v337_v6  ;;  %v333_v9 = vld [vmem:[%s1269_s5 + $0x1c8] sm:$0xff]  ;;  %v332_v10 = vld [vmem:[%s1269_s5 + $0x1c0] sm:$0xff] }
  0x1a   :  { %226 = vmatpush1.msra.mxu1 %v135_v29  ;;  %427 = vmatpush1.msra.mxu0 %v336_v8  ;;  %v329_v11 = vld [vmem:[%s1269_s5 + $0x1a8] sm:$0xff]  ;;  %v328_v12 = vld [vmem:[%s1269_s5 + $0x1a0] sm:$0xff] }
  0x1b   :  { %227 = vmatprep.subr.mxu1 %v134_v30  ;;  %428 = vmatprep.subr.mxu0 %v333_v9  ;;  %v325_v13 = vld [vmem:[%s1269_s5 + $0x188] sm:$0xff]  ;;  %v324_v14 = vld [vmem:[%s1269_s5 + $0x180] sm:$0xff] }
  0x1c   :  { %228 = vmatpush1.msra.mxu1 %v133_v31  ;;  %429 = vmatpush1.msra.mxu0 %v332_v10  ;;  %v321_v15 = vld [vmem:[%s1269_s5 + $0x168] sm:$0xff]  ;;  %v320_v16 = vld [vmem:[%s1269_s5 + $0x160] sm:$0xff] }
  0x1d   :  { %229 = vmatprep.subr.mxu1 %v132_v32  ;;  %430 = vmatprep.subr.mxu0 %v329_v11  ;;  %v317_v17 = vld [vmem:[%s1269_s5 + $0x148] sm:$0xff]  ;;  %v316_v18 = vld [vmem:[%s1269_s5 + $0x140] sm:$0xff] }
  0x1e   :  { %230 = vmatpush1.msra.mxu1 %v131_v33  ;;  %431 = vmatpush1.msra.mxu0 %v328_v12  ;;  %v313_v19 = vld [vmem:[%s1269_s5 + $0x128] sm:$0xff]  ;;  %v312_v20 = vld [vmem:[%s1269_s5 + $0x120] sm:$0xff]  ;;  %v338_v12 = vld [vmem:[%s1269_s5 + $0x1f0] sm:$0xff] }
  0x1f   :  { %231 = vmatprep.subr.mxu1 %v130_v34  ;;  %432 = vmatprep.subr.mxu0 %v325_v13  ;;  %v309_v21 = vld [vmem:[%s1269_s5 + $0x108] sm:$0xff]  ;;  %v308_v22 = vld [vmem:[%s1269_s5 + $0x100] sm:$0xff]  ;;  %v335_v13 = vld [vmem:[%s1269_s5 + $0x1d8] sm:$0xff] }
  0x20   :  { %232 = vmatpush1.msra.mxu1 %v129_v35  ;;  %433 = vmatpush1.msra.mxu0 %v324_v14  ;;  %v305_v23 = vld [vmem:[%s1269_s5 + $0xe8] sm:$0xff]  ;;  %v304_v24 = vld [vmem:[%s1269_s5 + $0xe0] sm:$0xff]  ;;  %v334_v14 = vld [vmem:[%s1269_s5 + $0x1d0] sm:$0xff] }
  0x21   :  { %233 = vmatprep.subr.mxu1 %v128_v36  ;;  %434 = vmatprep.subr.mxu0 %v321_v15  ;;  %v301_v25 = vld [vmem:[%s1269_s5 + $0xc8] sm:$0xff]  ;;  %v300_v26 = vld [vmem:[%s1269_s5 + $0xc0] sm:$0xff]  ;;  %v331_v15 = vld [vmem:[%s1269_s5 + $0x1b8] sm:$0xff] }
  0x22   :  { %234 = vmatpush1.msra.mxu1 %v127_v37  ;;  %435 = vmatpush1.msra.mxu0 %v320_v16  ;;  %v297_v27 = vld [vmem:[%s1269_s5 + $0xa8] sm:$0xff]  ;;  %v296_v28 = vld [vmem:[%s1269_s5 + $0xa0] sm:$0xff]  ;;  %v330_v16 = vld [vmem:[%s1269_s5 + $0x1b0] sm:$0xff] }
  0x23   :  { %235 = vmatprep.subr.mxu1 %v190_v38  ;;  %436 = vmatprep.subr.mxu0 %v317_v17  ;;  %v293_v29 = vld [vmem:[%s1269_s5 + $0x88] sm:$0xff]  ;;  %v292_v30 = vld [vmem:[%s1269_s5 + $0x80] sm:$0xff]  ;;  %v327_v17 = vld [vmem:[%s1269_s5 + $0x198] sm:$0xff] }
  0x24   :  { %236 = vmatpush2.msra.mxu1 %v189_v39  ;;  %437 = vmatpush1.msra.mxu0 %v316_v18  ;;  %v289_v31 = vld [vmem:[%s1269_s5 + $0x68] sm:$0xff]  ;;  %v288_v32 = vld [vmem:[%s1269_s5 + $0x60] sm:$0xff]  ;;  %v326_v18 = vld [vmem:[%s1269_s5 + $0x190] sm:$0xff] }
  0x25   :  { %237 = vmatprep.subr.mxu1 %v188_v40  ;;  %438 = vmatprep.subr.mxu0 %v313_v19  ;;  %v285_v33 = vld [vmem:[%s1269_s5 + $0x48] sm:$0xff]  ;;  %v284_v34 = vld [vmem:[%s1269_s5 + $0x40] sm:$0xff]  ;;  %v323_v19 = vld [vmem:[%s1269_s5 + $0x178] sm:$0xff] }
  0x26   :  { %238 = vmatpush2.msra.mxu1 %v187_v41  ;;  %439 = vmatpush1.msra.mxu0 %v312_v20  ;;  %v281_v35 = vld [vmem:[%s1269_s5 + $0x28] sm:$0xff]  ;;  %v280_v36 = vld [vmem:[%s1269_s5 + $0x20] sm:$0xff]  ;;  %v322_v20 = vld [vmem:[%s1269_s5 + $0x170] sm:$0xff] }
  0x27   :  { %239 = vmatprep.subr.mxu1 %v186_v42  ;;  %440 = vmatprep.subr.mxu0 %v309_v21  ;;  %v277_v37 = vld [vmem:[%s1269_s5 + $0x8] sm:$0xff]  ;;  %v276_v38 = vld [vmem:[%s1269_s5] sm:$0xff]  ;;  %v319_v21 = vld [vmem:[%s1269_s5 + $0x158] sm:$0xff] }
  0x28   :  { %240 = vmatpush2.msra.mxu1 %v185_v43  ;;  %441 = vmatpush1.msra.mxu0 %v308_v22  ;;  %v401_v39 = vld [vmem:[%s1269_s5 + $0x3e8] sm:$0xff]  ;;  %v400_v40 = vld [vmem:[%s1269_s5 + $0x3e0] sm:$0xff]  ;;  %v318_v22 = vld [vmem:[%s1269_s5 + $0x150] sm:$0xff] }
  0x29   :  { %241 = vmatprep.subr.mxu1 %v184_v44  ;;  %442 = vmatprep.subr.mxu0 %v305_v23  ;;  %v397_v41 = vld [vmem:[%s1269_s5 + $0x3c8] sm:$0xff]  ;;  %v396_v42 = vld [vmem:[%s1269_s5 + $0x3c0] sm:$0xff]  ;;  %v315_v23 = vld [vmem:[%s1269_s5 + $0x138] sm:$0xff] }
  0x2a   :  { %242 = vmatpush2.msra.mxu1 %v183_v45  ;;  %443 = vmatpush1.msra.mxu0 %v304_v24  ;;  %v393_v43 = vld [vmem:[%s1269_s5 + $0x3a8] sm:$0xff]  ;;  %v392_v44 = vld [vmem:[%s1269_s5 + $0x3a0] sm:$0xff]  ;;  %v314_v24 = vld [vmem:[%s1269_s5 + $0x130] sm:$0xff] }
  0x2b   :  { %243 = vmatprep.subr.mxu1 %v182_v46  ;;  %444 = vmatprep.subr.mxu0 %v301_v25  ;;  %v389_v45 = vld [vmem:[%s1269_s5 + $0x388] sm:$0xff]  ;;  %v388_v46 = vld [vmem:[%s1269_s5 + $0x380] sm:$0xff]  ;;  %v311_v25 = vld [vmem:[%s1269_s5 + $0x118] sm:$0xff] }
  0x2c   :  { %244 = vmatpush2.msra.mxu1 %v181_v47  ;;  %445 = vmatpush1.msra.mxu0 %v300_v26  ;;  %v385_v47 = vld [vmem:[%s1269_s5 + $0x368] sm:$0xff]  ;;  %v310_v26 = vld [vmem:[%s1269_s5 + $0x110] sm:$0xff] }
  0x2d   :  { %245 = vmatprep.subr.mxu1 %v180_v48  ;;  %446 = vmatprep.subr.mxu0 %v297_v27  ;;  %v384_v48 = vld [vmem:[%s1269_s5 + $0x360] sm:$0xff]  ;;  %v307_v27 = vld [vmem:[%s1269_s5 + $0xf8] sm:$0xff] }
  0x2e   :  { %246 = vmatpush2.msra.mxu1 %v179_v49  ;;  %447 = vmatpush1.msra.mxu0 %v296_v28  ;;  %v381_v49 = vld [vmem:[%s1269_s5 + $0x348] sm:$0xff]  ;;  %v306_v28 = vld [vmem:[%s1269_s5 + $0xf0] sm:$0xff] }
  0x2f   :  { %247 = vmatprep.subr.mxu1 %v178_v50  ;;  %448 = vmatprep.subr.mxu0 %v293_v29  ;;  %v380_v50 = vld [vmem:[%s1269_s5 + $0x340] sm:$0xff]  ;;  %v303_v29 = vld [vmem:[%s1269_s5 + $0xd8] sm:$0xff] }
  0x30   :  { %248 = vmatpush2.msra.mxu1 %v177_v51  ;;  %449 = vmatpush1.msra.mxu0 %v292_v30  ;;  %v377_v51 = vld [vmem:[%s1269_s5 + $0x328] sm:$0xff]  ;;  %v302_v30 = vld [vmem:[%s1269_s5 + $0xd0] sm:$0xff] }
  0x31   :  { %249 = vmatprep.subr.mxu1 %v176_v52  ;;  %450 = vmatprep.subr.mxu0 %v289_v31  ;;  %v376_v52 = vld [vmem:[%s1269_s5 + $0x320] sm:$0xff]  ;;  %v299_v31 = vld [vmem:[%s1269_s5 + $0xb8] sm:$0xff] }
  0x32   :  { %250 = vmatpush2.msra.mxu1 %v175_v53  ;;  %451 = vmatpush1.msra.mxu0 %v288_v32  ;;  %v373_v53 = vld [vmem:[%s1269_s5 + $0x308] sm:$0xff]  ;;  %v298_v32 = vld [vmem:[%s1269_s5 + $0xb0] sm:$0xff] }
  0x33   :  { %251 = vmatprep.subr.mxu1 %v174_v54  ;;  %452 = vmatprep.subr.mxu0 %v285_v33  ;;  %v372_v54 = vld [vmem:[%s1269_s5 + $0x300] sm:$0xff]  ;;  %v295_v33 = vld [vmem:[%s1269_s5 + $0x98] sm:$0xff] }
  0x34   :  { %252 = vmatpush2.msra.mxu1 %v173_v55  ;;  %453 = vmatpush1.msra.mxu0 %v284_v34  ;;  %v369_v55 = vld [vmem:[%s1269_s5 + $0x2e8] sm:$0xff]  ;;  %v294_v34 = vld [vmem:[%s1269_s5 + $0x90] sm:$0xff] }
  0x35   :  { %253 = vmatprep.subr.mxu1 %v172_v56  ;;  %454 = vmatprep.subr.mxu0 %v281_v35  ;;  %v368_v56 = vld [vmem:[%s1269_s5 + $0x2e0] sm:$0xff]  ;;  %v291_v35 = vld [vmem:[%s1269_s5 + $0x78] sm:$0xff] }
  0x36   :  { %254 = vmatpush2.msra.mxu1 %v171_v57  ;;  %455 = vmatpush1.msra.mxu0 %v280_v36  ;;  %v365_v57 = vld [vmem:[%s1269_s5 + $0x2c8] sm:$0xff]  ;;  %v290_v36 = vld [vmem:[%s1269_s5 + $0x70] sm:$0xff] }
  0x37   :  { %255 = vmatprep.subr.mxu1 %v170_v58  ;;  %456 = vmatprep.subr.mxu0 %v277_v37  ;;  %v364_v58 = vld [vmem:[%s1269_s5 + $0x2c0] sm:$0xff]  ;;  %v287_v37 = vld [vmem:[%s1269_s5 + $0x58] sm:$0xff] }
  0x38   :  { %256 = vmatpush2.msra.mxu1 %v169_v59  ;;  %457 = vmatpush1.msra.mxu0 %v276_v38  ;;  %v361_v59 = vld [vmem:[%s1269_s5 + $0x2a8] sm:$0xff]  ;;  %v286_v38 = vld [vmem:[%s1269_s5 + $0x50] sm:$0xff] }
  0x39   :  { %257 = vmatprep.subr.mxu1 %v168_v60  ;;  %458 = vmatprep.subr.mxu0 %v401_v39  ;;  %v360_v60 = vld [vmem:[%s1269_s5 + $0x2a0] sm:$0xff]  ;;  %v283_v39 = vld [vmem:[%s1269_s5 + $0x38] sm:$0xff] }
  0x3a   :  { %258 = vmatpush2.msra.mxu1 %v167_v61  ;;  %459 = vmatpush2.msra.mxu0 %v400_v40  ;;  %v357_v61 = vld [vmem:[%s1269_s5 + $0x288] sm:$0xff]  ;;  %v282_v40 = vld [vmem:[%s1269_s5 + $0x30] sm:$0xff] }
  0x3b   :  { %259 = vmatprep.subr.mxu1 %v166_v62  ;;  %460 = vmatprep.subr.mxu0 %v397_v41  ;;  %v356_v62 = vld [vmem:[%s1269_s5 + $0x280] sm:$0xff]  ;;  %v279_v41 = vld [vmem:[%s1269_s5 + $0x18] sm:$0xff] }
  0x3c   :  { %260 = vmatpush2.msra.mxu1 %v165_v63  ;;  %461 = vmatpush2.msra.mxu0 %v396_v42  ;;  %v33_v63 = vlaneseq  ;;  %v278_v42 = vld [vmem:[%s1269_s5 + $0x10] sm:$0xff] }
  0x3d   :  { %261 = vmatprep.subr.mxu1 %v164_v0  ;;  %462 = vmatprep.subr.mxu0 %v393_v43  ;;  %v403_v43 = vld [vmem:[%s1269_s5 + $0x3f8] sm:$0xff] }
  0x3e   :  { %262 = vmatpush2.msra.mxu1 %v163_v1  ;;  %463 = vmatpush2.msra.mxu0 %v392_v44  ;;  %v1024_v0 = vshrl.u32 %v33_v63, 7  ;;  %v402_v44 = vld [vmem:[%s1269_s5 + $0x3f0] sm:$0xff]  ;;  %v363_v63 = vld [vmem:[%s1269_s5 + $0x2b8] sm:$0xff] }
  0x3f   :  { %263 = vmatprep.subr.mxu1 %v162_v2  ;;  %464 = vmatprep.subr.mxu0 %v389_v45  ;;  %v31_v2 = vld [vmem:[%s1270_s2] sm:$0x3]  ;;  %v399_v45 = vld [vmem:[%s1269_s5 + $0x3d8] sm:$0xff] }
  0x40   :  { %264 = vmatpush2.msra.mxu1 %v161_v3  ;;  %465 = vmatpush2.msra.mxu0 %v388_v46  ;;  %v1027_v1 = vsub.s32 0, %v1024_v0  ;;  %v1033_v3 = vsub.s32 1, %v1024_v0  ;;  %v398_v46 = vld [vmem:[%s1269_s5 + $0x3d0] sm:$0xff] }
  0x41   :  { %265 = vmatprep.subr.mxu1 %v160_v4  ;;  %466 = vmatprep.subr.mxu0 %v385_v47  ;;  %v395_v47 = vld [vmem:[%s1269_s5 + $0x3b8] sm:$0xff] }
  0x42   :  { %266 = vmatpush2.msra.mxu1 %v159_v5  ;;  %467 = vmatpush2.msra.mxu0 %v384_v48  ;;  %v36_v4 = vrot.slane %v31_v2, %v1027_v1  ;;  %v40_v5 = vrot.slane %v31_v2, %v1033_v3  ;;  %v394_v48 = vld [vmem:[%s1269_s5 + $0x3b0] sm:$0xff] }
  0x43   :  { %497 = vmatprep.subr.mxu1 %v339_v7  ;;  %468 = vmatprep.subr.mxu0 %v381_v49  ;;  %v391_v49 = vld [vmem:[%s1269_s5 + $0x398] sm:$0xff]  ;;  %v362_v2 = vld [vmem:[%s1269_s5 + $0x2b0] sm:$0xff] }
  0x44   :  { %469 = vmatpush2.msra.mxu0 %v380_v50  ;;  %v390_v50 = vld [vmem:[%s1269_s5 + $0x390] sm:$0xff] }
  0x45   :  { %470 = vmatprep.subr.mxu0 %v377_v51  ;;  %v387_v51 = vld [vmem:[%s1269_s5 + $0x378] sm:$0xff] }
  0x46   :  { %471 = vmatpush2.msra.mxu0 %v376_v52  ;;  %v386_v52 = vld [vmem:[%s1269_s5 + $0x370] sm:$0xff] }
  0x47   :  { %472 = vmatprep.subr.mxu0 %v373_v53  ;;  %v383_v53 = vld [vmem:[%s1269_s5 + $0x358] sm:$0xff] }
  0x48   :  { %473 = vmatpush2.msra.mxu0 %v372_v54  ;;  %v382_v54 = vld [vmem:[%s1269_s5 + $0x350] sm:$0xff] }
  0x49   :  { %474 = vmatprep.subr.mxu0 %v369_v55  ;;  %v379_v55 = vld [vmem:[%s1269_s5 + $0x338] sm:$0xff] }
  0x4a   :  { %475 = vmatpush2.msra.mxu0 %v368_v56  ;;  %v378_v56 = vld [vmem:[%s1269_s5 + $0x330] sm:$0xff] }
  0x4b   :  { %476 = vmatprep.subr.mxu0 %v365_v57  ;;  %v375_v57 = vld [vmem:[%s1269_s5 + $0x318] sm:$0xff] }
  0x4c   :  { %477 = vmatpush2.msra.mxu0 %v364_v58  ;;  %v374_v58 = vld [vmem:[%s1269_s5 + $0x310] sm:$0xff] }
  0x4d   :  { %478 = vmatprep.subr.mxu0 %v361_v59  ;;  %v371_v59 = vld [vmem:[%s1269_s5 + $0x2f8] sm:$0xff] }
  0x4e   :  { %479 = vmatpush2.msra.mxu0 %v360_v60  ;;  %v370_v60 = vld [vmem:[%s1269_s5 + $0x2f0] sm:$0xff] }
  0x4f   :  { %480 = vmatprep.subr.mxu0 %v357_v61  ;;  %v367_v61 = vld [vmem:[%s1269_s5 + $0x2d8] sm:$0xff] }
  0x50   :  { %481 = vmatpush2.msra.mxu0 %v356_v62  ;;  %v366_v62 = vld [vmem:[%s1269_s5 + $0x2d0] sm:$0xff] }
  0xc6   :  { %v120_v6 = vpop.f32.mrf.mxu0 }
  0xc7   :  { %v121_v7 = vadd.f32 %v120_v6, %v36_v4  ;;  %v359_v4 = vld [vmem:[%s1269_s5 + $0x298] sm:$0xff]  ;;  %v353_v6 = vld [vmem:[%s1269_s5 + $0x268] sm:$0xff] }
  0xc8   :  { %v122_v8 = vpop.f32.mrf.mxu0  ;;  %482 = vmatprep.subr.mxu0 %v353_v6 }
  0xc9   :  { %v123_v9 = vadd.f32 %v122_v8, %v40_v5  ;;  %v125_v11 = vmax.f32 %v121_v7, 0.0  ;;  %v358_v5 = vld [vmem:[%s1269_s5 + $0x290] sm:$0xff]  ;;  %v355_v7 = vld [vmem:[%s1269_s5 + $0x278] sm:$0xff]  ;;  %v352_v8 = vld [vmem:[%s1269_s5 + $0x260] sm:$0xff] }
  0xca   :  { %483 = vmatpush2.msra.mxu0 %v352_v8 }
  0xcb   :  { %v126_v10 = vmax.f32 %v123_v9, 0.0  ;;  %v354_v9 = vld [vmem:[%s1269_s5 + $0x270] sm:$0xff] }
  0xcd   :  { %267 = vmatprep.mubr.f32.mxu1 %v126_v10  ;;  %v349_v10 = vld [vmem:[%s1269_s5 + $0x248] sm:$0xff] }
  0xce   :  { %268 = vmatmul.mubr.f32.vlgmr.msra.gmra.mxu1 %v125_v11  ;;  %v351_v11 = vld [vmem:[%s1269_s5 + $0x258] sm:$0xff]  ;;  %484 = vmatprep.subr.mxu0 %v349_v10 }
  0xcf   :  { %498 = vmatpush1.msra.mxu1 %v338_v12  ;;  %v348_v12 = vld [vmem:[%s1269_s5 + $0x240] sm:$0xff] }
  0xd0   :  { %499 = vmatprep.subr.mxu1 %v335_v13  ;;  %v350_v13 = vld [vmem:[%s1269_s5 + $0x250] sm:$0xff]  ;;  %485 = vmatpush2.msra.mxu0 %v348_v12 }
  0xd1   :  { %500 = vmatpush1.msra.mxu1 %v334_v14  ;;  %v345_v14 = vld [vmem:[%s1269_s5 + $0x228] sm:$0xff] }
  0xd2   :  { %501 = vmatprep.subr.mxu1 %v331_v15  ;;  %v347_v15 = vld [vmem:[%s1269_s5 + $0x238] sm:$0xff]  ;;  %486 = vmatprep.subr.mxu0 %v345_v14 }
  0xd3   :  { %502 = vmatpush1.msra.mxu1 %v330_v16  ;;  %v344_v16 = vld [vmem:[%s1269_s5 + $0x220] sm:$0xff] }
  0xd4   :  { %503 = vmatprep.subr.mxu1 %v327_v17  ;;  %v346_v17 = vld [vmem:[%s1269_s5 + $0x230] sm:$0xff]  ;;  %487 = vmatpush2.msra.mxu0 %v344_v16 }
  0xd5   :  { %504 = vmatpush1.msra.mxu1 %v326_v18  ;;  %v341_v18 = vld [vmem:[%s1269_s5 + $0x208] sm:$0xff] }
  0xd6   :  { %505 = vmatprep.subr.mxu1 %v323_v19  ;;  %v343_v19 = vld [vmem:[%s1269_s5 + $0x218] sm:$0xff]  ;;  %488 = vmatprep.subr.mxu0 %v341_v18 }
  0xd7   :  { %506 = vmatpush1.msra.mxu1 %v322_v20  ;;  %v340_v20 = vld [vmem:[%s1269_s5 + $0x200] sm:$0xff] }
  0xd8   :  { %507 = vmatprep.subr.mxu1 %v319_v21  ;;  %v342_v21 = vld [vmem:[%s1269_s5 + $0x210] sm:$0xff]  ;;  %489 = vmatpush2.msra.mxu0 %v340_v20 }
  0xd9   :  { %508 = vmatpush1.msra.mxu1 %v318_v22  ;;  %v191_v22 = vld [vmem:[%s1271_s4] sm:$0x3] }
  0xda   :  { %509 = vmatprep.subr.mxu1 %v315_v23  ;;  %v196_v23 = vrot.slane %v191_v22, %v1027_v1 }
  0xdb   :  { %510 = vmatpush1.msra.mxu1 %v314_v24  ;;  %v200_v24 = vrot.slane %v191_v22, %v1033_v3 }
  0xdc   :  { %511 = vmatprep.subr.mxu1 %v311_v25 }
  0xdd   :  { %512 = vmatpush1.msra.mxu1 %v310_v26 }
  0xde   :  { %513 = vmatprep.subr.mxu1 %v307_v27 }
  0xdf   :  { %514 = vmatpush1.msra.mxu1 %v306_v28 }
  0xe0   :  { %515 = vmatprep.subr.mxu1 %v303_v29 }
  0xe1   :  { %516 = vmatpush1.msra.mxu1 %v302_v30 }
  0xe2   :  { %517 = vmatprep.subr.mxu1 %v299_v31  ;;  %v416_v31 = vsub.s32 2, %v1024_v0 }
  0xe3   :  { %518 = vmatpush1.msra.mxu1 %v298_v32  ;;  %v404_v32 = vld [vmem:[%s1272_s6] sm:$0xf] }
  0xe4   :  { %519 = vmatprep.subr.mxu1 %v295_v33  ;;  %v420_v33 = vsub.s32 3, %v1024_v0 }
  0xe5   :  { %520 = vmatpush1.msra.mxu1 %v294_v34  ;;  %v605_v34 = vmov 1983009808  }
  0xe6   :  { %521 = vmatprep.subr.mxu1 %v291_v35  ;;  %v579_v35 = vunpack.c.l.s4 %v605_v34 }
  0xe7   :  { %522 = vmatpush1.msra.mxu1 %v290_v36  ;;  %v409_v36 = vrot.slane %v404_v32, %v1027_v1 }
  0xe8   :  { %523 = vmatprep.subr.mxu1 %v287_v37  ;;  %v417_v37 = vrot.slane %v404_v32, %v416_v31 }
  0xe9   :  { %524 = vmatpush1.msra.mxu1 %v286_v38  ;;  %v413_v38 = vrot.slane %v404_v32, %v1033_v3 }
  0xea   :  { %525 = vmatprep.subr.mxu1 %v283_v39  ;;  %v421_v39 = vrot.slane %v404_v32, %v420_v33 }
  0xeb   :  { %526 = vmatpush1.msra.mxu1 %v282_v40 }
  0xec   :  { %527 = vmatprep.subr.mxu1 %v279_v41 }
  0xed   :  { %528 = vmatpush1.msra.mxu1 %v278_v42  ;;  %v580_v42 = vunpack.c.0.s8 %v579_v35 }
  0xee   :  { %529 = vmatprep.subr.mxu1 %v403_v43 }
  0xef   :  { %530 = vmatpush2.msra.mxu1 %v402_v44 }
  0xf0   :  { %531 = vmatprep.subr.mxu1 %v399_v45 }
  0xf1   :  { %532 = vmatpush2.msra.mxu1 %v398_v46 }
  0xf2   :  { %533 = vmatprep.subr.mxu1 %v395_v47 }
  0xf3   :  { %534 = vmatpush2.msra.mxu1 %v394_v48 }
  0xf4   :  { %535 = vmatprep.subr.mxu1 %v391_v49  ;;  %v583_v49 = vsub.s32 %v580_v42, %v1024_v0 }
  0xf5   :  { %536 = vmatpush2.msra.mxu1 %v390_v50 }
  0xf6   :  { %537 = vmatprep.subr.mxu1 %v387_v51 }
  0xf7   :  { %538 = vmatpush2.msra.mxu1 %v386_v52 }
  0xf8   :  { %539 = vmatprep.subr.mxu1 %v383_v53 }
  0xf9   :  { %540 = vmatpush2.msra.mxu1 %v382_v54 }
  0xfa   :  { %541 = vmatprep.subr.mxu1 %v379_v55 }
  0xfb   :  { %542 = vmatpush2.msra.mxu1 %v378_v56 }
  0xfc   :  { %543 = vmatprep.subr.mxu1 %v375_v57 }
  0xfd   :  { %544 = vmatpush2.msra.mxu1 %v374_v58 }
  0xfe   :  { %545 = vmatprep.subr.mxu1 %v371_v59 }
  0xff   :  { %546 = vmatpush2.msra.mxu1 %v370_v60 }
 0x100   :  { %547 = vmatprep.subr.mxu1 %v367_v61 }
 0x101   :  { %548 = vmatpush2.msra.mxu1 %v366_v62 }
 0x102   :  { %549 = vmatprep.subr.mxu1 %v363_v63 }
 0x103   :  { %550 = vmatpush2.msra.mxu1 %v362_v2 }
 0x104   :  { %551 = vmatprep.subr.mxu1 %v359_v4 }
 0x105   :  { %552 = vmatpush2.msra.mxu1 %v358_v5 }
 0x106   :  { %553 = vmatprep.subr.mxu1 %v355_v7 }
 0x107   :  { %554 = vmatpush2.msra.mxu1 %v354_v9 }
 0x108   :  { %555 = vmatprep.subr.mxu1 %v351_v11 }
 0x109   :  { %556 = vmatpush2.msra.mxu1 %v350_v13 }
 0x10a   :  { %557 = vmatprep.subr.mxu1 %v347_v15 }
 0x10b   :  { %558 = vmatpush2.msra.mxu1 %v346_v17 }
 0x10c   :  { %559 = vmatprep.subr.mxu1 %v343_v19 }
 0x10d   :  { %560 = vmatpush2.msra.mxu1 %v342_v21 }
 0x18e   :  { %v269_v25 = vpop.f32.mrf.mxu1 }
 0x18f   :  { %v270_v26 = vadd.f32 %v269_v25, %v196_v23 }
 0x190   :  { %v271_v27 = vpop.f32.mrf.mxu1 }
 0x191   :  { %v272_v28 = vadd.f32 %v271_v27, %v200_v24  ;;  %v274_v30 = vmax.f32 %v270_v26, 0.0 }
 0x193   :  { %v275_v29 = vmax.f32 %v272_v28, 0.0 }
 0x195   :  { %490 = vmatprep.mubr.f32.mxu0 %v275_v29  ;;  %561 = vmatprep.mubr.f32.mxu1 %v275_v29 }
 0x196   :  { %491 = vmatmul.mubr.f32.vlgmr.msra.gmra.mxu0 %v274_v30  ;;  %562 = vmatmul.mubr.f32.vlgmr.msra.gmra.mxu1 %v274_v30 }
 0x256   :  { %v492_v40 = vpop.f32.mrf.mxu0  ;;  %v563_v41 = vpop.f32.mrf.mxu1 }
 0x257   :  { %v493_v43 = vadd.f32 %v492_v40, %v409_v36  ;;  %v564_v44 = vadd.f32 %v563_v41, %v417_v37 }
 0x258   :  { %v494_v45 = vpop.f32.mrf.mxu0  ;;  %v565_v46 = vpop.f32.mrf.mxu1 }
 0x259   :  { %v495_v47 = vadd.f32 %v494_v45, %v413_v38  ;;  %v566_v48 = vadd.f32 %v565_v46, %v421_v39  ;;  %v568_v50 = vmax.f32 %v493_v43, 0.0  ;;  %v570_v51 = vmax.f32 %v564_v44, 0.0 }
 0x25b   :  { %v569_v52 = vmax.f32 %v495_v47, 0.0  ;;  %v571_v53 = vmax.f32 %v566_v48, 0.0 }
 0x25d   :  { %v576_v1 = vcombine.low %v568_v50, %v569_v52  ;;  %v577_v54 = vcombine.low %v570_v51, %v571_v53 }
 0x25f   :  { %v584_v55 = vrot.slane %v576_v1, %v583_v49  ;;  %v591_v3 = vrot.slane %v577_v54, %v583_v49 }
 0x261   :  { %v592_v56 = vcombine.low %v584_v55, %v591_v3 }
 0x263   :  { %594 = vst [vmem:[%s1273_s7] sm:$0xff] %v592_v56 }

// kernel: beta_vae_b_forward.14
= control target key start
LH: loop header
LB: loop body
LE: loop exit
PB: predicated region body
PF: predicated region fallthrough
CT: control target
= control target key end

     0   :  { %18 = vsyncpa [#allocation3], 0  ;;  %s1756_s0 = inlined_call_operand.vmem [shape: f32[2,512], index: 0, kind: input, shape index: {}]   ;;  %s1757_s1 = inlined_call_operand.vmem [shape: f32[512,256], index: 1, kind: input, shape index: {}]   ;;  %s1758_s2 = inlined_call_operand.vmem [shape: f32[1,256], index: 2, kind: input, shape index: {}]   ;;  %s1759_s3 = inlined_call_operand.vmem [shape: f32[256,256], index: 3, kind: input, shape index: {}]   ;;  %s1760_s4 = inlined_call_operand.vmem [shape: f32[1,256], index: 4, kind: input, shape index: {}]   ;;  %s1761_s5 = inlined_call_operand.vmem [shape: f32[256,10], index: 5, kind: input, shape index: {}]   ;;  %s1762_s6 = inlined_call_operand.vmem [shape: f32[1,10], index: 6, kind: input, shape index: {}]   ;;  %s1763_s7 = inlined_call_operand.vmem [shape: f32[256,10], index: 7, kind: input, shape index: {}]   ;;  %s1764_s8 = inlined_call_operand.vmem [shape: f32[1,10], index: 8, kind: input, shape index: {}]   ;;  %s1765_s9 = inlined_call_operand.vmem [shape: f32[2,10], index: 9, kind: input, shape index: {}]   ;;  %s1766_s10 = inlined_call_operand.hbm [shape: f32[2,10], index: 10, kind: output, shape index: {0}]   ;;  %s1767_s11 = inlined_call_operand.hbm [shape: f32[2,10], index: 11, kind: output, shape index: {1}]   ;;  %s1768_s12 = inlined_call_operand.vmem [shape: f32[2,10], index: 12, kind: output, shape index: {2}]  }
   0x1   :  { %v72_v0 = vld [vmem:[%s1757_s1 + $0xf8] sm:$0xff]  ;;  %v71_v2 = vld [vmem:[%s1757_s1 + $0xf0] sm:$0xff]  ;;  %v70_v4 = vld [vmem:[%s1757_s1 + $0xe8] sm:$0xff] }
   0x2   :  { %v136_v1 = vld [vmem:[%s1757_s1 + $0x2f8] sm:$0xff]  ;;  %203 = vmatprep.subr.mxu0 %v72_v0  ;;  %v135_v3 = vld [vmem:[%s1757_s1 + $0x2f0] sm:$0xff]  ;;  %v134_v5 = vld [vmem:[%s1757_s1 + $0x2e8] sm:$0xff] }
   0x3   :  { %274 = vmatprep.subr.mxu1 %v136_v1  ;;  %204 = vmatpush1.msra.mxu0 %v71_v2  ;;  %v69_v6 = vld [vmem:[%s1757_s1 + $0xe0] sm:$0xff]  ;;  %v68_v8 = vld [vmem:[%s1757_s1 + $0xd8] sm:$0xff]  ;;  %v67_v10 = vld [vmem:[%s1757_s1 + $0xd0] sm:$0xff] }
   0x4   :  { %275 = vmatpush1.msra.mxu1 %v135_v3  ;;  %v133_v7 = vld [vmem:[%s1757_s1 + $0x2e0] sm:$0xff]  ;;  %205 = vmatprep.subr.mxu0 %v70_v4  ;;  %v132_v9 = vld [vmem:[%s1757_s1 + $0x2d8] sm:$0xff]  ;;  %v131_v11 = vld [vmem:[%s1757_s1 + $0x2d0] sm:$0xff] }
   0x5   :  { %276 = vmatprep.subr.mxu1 %v134_v5  ;;  %206 = vmatpush1.msra.mxu0 %v69_v6  ;;  %v66_v12 = vld [vmem:[%s1757_s1 + $0xc8] sm:$0xff]  ;;  %v65_v14 = vld [vmem:[%s1757_s1 + $0xc0] sm:$0xff]  ;;  %v64_v16 = vld [vmem:[%s1757_s1 + $0xb8] sm:$0xff] }
   0x6   :  { %277 = vmatpush1.msra.mxu1 %v133_v7  ;;  %v130_v13 = vld [vmem:[%s1757_s1 + $0x2c8] sm:$0xff]  ;;  %207 = vmatprep.subr.mxu0 %v68_v8  ;;  %v129_v15 = vld [vmem:[%s1757_s1 + $0x2c0] sm:$0xff]  ;;  %v128_v17 = vld [vmem:[%s1757_s1 + $0x2b8] sm:$0xff] }
   0x7   :  { %278 = vmatprep.subr.mxu1 %v132_v9  ;;  %208 = vmatpush1.msra.mxu0 %v67_v10  ;;  %v63_v18 = vld [vmem:[%s1757_s1 + $0xb0] sm:$0xff]  ;;  %v62_v20 = vld [vmem:[%s1757_s1 + $0xa8] sm:$0xff]  ;;  %v61_v22 = vld [vmem:[%s1757_s1 + $0xa0] sm:$0xff] }
   0x8   :  { %279 = vmatpush1.msra.mxu1 %v131_v11  ;;  %209 = vmatprep.subr.mxu0 %v66_v12  ;;  %v127_v19 = vld [vmem:[%s1757_s1 + $0x2b0] sm:$0xff]  ;;  %v126_v21 = vld [vmem:[%s1757_s1 + $0x2a8] sm:$0xff]  ;;  %v125_v23 = vld [vmem:[%s1757_s1 + $0x2a0] sm:$0xff] }
   0x9   :  { %280 = vmatprep.subr.mxu1 %v130_v13  ;;  %210 = vmatpush1.msra.mxu0 %v65_v14  ;;  %v60_v24 = vld [vmem:[%s1757_s1 + $0x98] sm:$0xff]  ;;  %v59_v26 = vld [vmem:[%s1757_s1 + $0x90] sm:$0xff]  ;;  %v58_v28 = vld [vmem:[%s1757_s1 + $0x88] sm:$0xff] }
   0xa   :  { %281 = vmatpush1.msra.mxu1 %v129_v15  ;;  %211 = vmatprep.subr.mxu0 %v64_v16  ;;  %v124_v25 = vld [vmem:[%s1757_s1 + $0x298] sm:$0xff]  ;;  %v123_v27 = vld [vmem:[%s1757_s1 + $0x290] sm:$0xff]  ;;  %v122_v29 = vld [vmem:[%s1757_s1 + $0x288] sm:$0xff] }
   0xb   :  { %282 = vmatprep.subr.mxu1 %v128_v17  ;;  %212 = vmatpush1.msra.mxu0 %v63_v18  ;;  %v57_v30 = vld [vmem:[%s1757_s1 + $0x80] sm:$0xff]  ;;  %v56_v32 = vld [vmem:[%s1757_s1 + $0x78] sm:$0xff]  ;;  %v55_v34 = vld [vmem:[%s1757_s1 + $0x70] sm:$0xff] }
   0xc   :  { %283 = vmatpush1.msra.mxu1 %v127_v19  ;;  %213 = vmatprep.subr.mxu0 %v62_v20  ;;  %v121_v31 = vld [vmem:[%s1757_s1 + $0x280] sm:$0xff]  ;;  %v120_v33 = vld [vmem:[%s1757_s1 + $0x278] sm:$0xff]  ;;  %v119_v35 = vld [vmem:[%s1757_s1 + $0x270] sm:$0xff] }
   0xd   :  { %284 = vmatprep.subr.mxu1 %v126_v21  ;;  %214 = vmatpush1.msra.mxu0 %v61_v22  ;;  %v54_v36 = vld [vmem:[%s1757_s1 + $0x68] sm:$0xff]  ;;  %v53_v38 = vld [vmem:[%s1757_s1 + $0x60] sm:$0xff]  ;;  %v52_v40 = vld [vmem:[%s1757_s1 + $0x58] sm:$0xff] }
   0xe   :  { %285 = vmatpush1.msra.mxu1 %v125_v23  ;;  %215 = vmatprep.subr.mxu0 %v60_v24  ;;  %v118_v37 = vld [vmem:[%s1757_s1 + $0x268] sm:$0xff]  ;;  %v117_v39 = vld [vmem:[%s1757_s1 + $0x260] sm:$0xff]  ;;  %v116_v41 = vld [vmem:[%s1757_s1 + $0x258] sm:$0xff] }
   0xf   :  { %286 = vmatprep.subr.mxu1 %v124_v25  ;;  %216 = vmatpush1.msra.mxu0 %v59_v26  ;;  %v51_v42 = vld [vmem:[%s1757_s1 + $0x50] sm:$0xff]  ;;  %v50_v44 = vld [vmem:[%s1757_s1 + $0x48] sm:$0xff]  ;;  %v49_v46 = vld [vmem:[%s1757_s1 + $0x40] sm:$0xff] }
  0x10   :  { %287 = vmatpush1.msra.mxu1 %v123_v27  ;;  %217 = vmatprep.subr.mxu0 %v58_v28  ;;  %v115_v43 = vld [vmem:[%s1757_s1 + $0x250] sm:$0xff]  ;;  %v114_v45 = vld [vmem:[%s1757_s1 + $0x248] sm:$0xff]  ;;  %v113_v47 = vld [vmem:[%s1757_s1 + $0x240] sm:$0xff] }
  0x11   :  { %288 = vmatprep.subr.mxu1 %v122_v29  ;;  %218 = vmatpush1.msra.mxu0 %v57_v30  ;;  %v48_v48 = vld [vmem:[%s1757_s1 + $0x38] sm:$0xff]  ;;  %v47_v50 = vld [vmem:[%s1757_s1 + $0x30] sm:$0xff]  ;;  %v46_v52 = vld [vmem:[%s1757_s1 + $0x28] sm:$0xff]  ;;  %v171_v30 = vlaneseq }
  0x12   :  { %289 = vmatpush1.msra.mxu1 %v121_v31  ;;  %219 = vmatprep.subr.mxu0 %v56_v32  ;;  %v112_v49 = vld [vmem:[%s1757_s1 + $0x238] sm:$0xff]  ;;  %v111_v51 = vld [vmem:[%s1757_s1 + $0x230] sm:$0xff]  ;;  %v110_v53 = vld [vmem:[%s1757_s1 + $0x228] sm:$0xff]  ;;  %v878_v31 = vmov 1983009808  }
  0x13   :  { %290 = vmatprep.subr.mxu1 %v120_v33  ;;  %220 = vmatpush1.msra.mxu0 %v55_v34  ;;  %v45_v54 = vld [vmem:[%s1757_s1 + $0x20] sm:$0xff]  ;;  %v44_v56 = vld [vmem:[%s1757_s1 + $0x18] sm:$0xff]  ;;  %v43_v58 = vld [vmem:[%s1757_s1 + $0x10] sm:$0xff]  ;;  %v184_v32 = vunpack.c.l.s4 %v878_v31 }
  0x14   :  { %291 = vmatpush1.msra.mxu1 %v119_v35  ;;  %221 = vmatprep.subr.mxu0 %v54_v36  ;;  %v109_v55 = vld [vmem:[%s1757_s1 + $0x220] sm:$0xff]  ;;  %v108_v57 = vld [vmem:[%s1757_s1 + $0x218] sm:$0xff]  ;;  %v107_v59 = vld [vmem:[%s1757_s1 + $0x210] sm:$0xff] }
  0x15   :  { %292 = vmatprep.subr.mxu1 %v118_v37  ;;  %222 = vmatpush1.msra.mxu0 %v53_v38  ;;  %v42_v60 = vld [vmem:[%s1757_s1 + $0x8] sm:$0xff]  ;;  %v41_v62 = vld [vmem:[%s1757_s1] sm:$0xff]  ;;  %v104_v0 = vld [vmem:[%s1757_s1 + $0x1f8] sm:$0xff] }
  0x16   :  { %293 = vmatpush1.msra.mxu1 %v117_v39  ;;  %223 = vmatprep.subr.mxu0 %v52_v40  ;;  %v106_v61 = vld [vmem:[%s1757_s1 + $0x208] sm:$0xff]  ;;  %v105_v63 = vld [vmem:[%s1757_s1 + $0x200] sm:$0xff]  ;;  %v168_v1 = vld [vmem:[%s1757_s1 + $0x3f8] sm:$0xff] }
  0x17   :  { %294 = vmatprep.subr.mxu1 %v116_v41  ;;  %224 = vmatpush1.msra.mxu0 %v51_v42  ;;  %v103_v2 = vld [vmem:[%s1757_s1 + $0x1f0] sm:$0xff]  ;;  %v102_v4 = vld [vmem:[%s1757_s1 + $0x1e8] sm:$0xff]  ;;  %v101_v6 = vld [vmem:[%s1757_s1 + $0x1e0] sm:$0xff]  ;;  %v1252_v41 = vshrl.u32 %v171_v30, 7  ;;  %v185_v42 = vunpack.c.0.s8 %v184_v32 }
  0x18   :  { %295 = vmatpush1.msra.mxu1 %v115_v43  ;;  %225 = vmatprep.subr.mxu0 %v50_v44  ;;  %v167_v3 = vld [vmem:[%s1757_s1 + $0x3f0] sm:$0xff]  ;;  %v166_v5 = vld [vmem:[%s1757_s1 + $0x3e8] sm:$0xff]  ;;  %v165_v7 = vld [vmem:[%s1757_s1 + $0x3e0] sm:$0xff] }
  0x19   :  { %296 = vmatprep.subr.mxu1 %v114_v45  ;;  %226 = vmatpush1.msra.mxu0 %v49_v46  ;;  %v100_v8 = vld [vmem:[%s1757_s1 + $0x1d8] sm:$0xff]  ;;  %v99_v10 = vld [vmem:[%s1757_s1 + $0x1d0] sm:$0xff]  ;;  %v98_v12 = vld [vmem:[%s1757_s1 + $0x1c8] sm:$0xff] }
  0x1a   :  { %297 = vmatpush1.msra.mxu1 %v113_v47  ;;  %227 = vmatprep.subr.mxu0 %v48_v48  ;;  %v164_v9 = vld [vmem:[%s1757_s1 + $0x3d8] sm:$0xff]  ;;  %v163_v11 = vld [vmem:[%s1757_s1 + $0x3d0] sm:$0xff]  ;;  %v162_v13 = vld [vmem:[%s1757_s1 + $0x3c8] sm:$0xff] }
  0x1b   :  { %298 = vmatprep.subr.mxu1 %v112_v49  ;;  %228 = vmatpush1.msra.mxu0 %v47_v50  ;;  %v97_v14 = vld [vmem:[%s1757_s1 + $0x1c0] sm:$0xff]  ;;  %v96_v16 = vld [vmem:[%s1757_s1 + $0x1b8] sm:$0xff]  ;;  %v95_v18 = vld [vmem:[%s1757_s1 + $0x1b0] sm:$0xff] }
  0x1c   :  { %299 = vmatpush1.msra.mxu1 %v111_v51  ;;  %229 = vmatprep.subr.mxu0 %v46_v52  ;;  %v161_v15 = vld [vmem:[%s1757_s1 + $0x3c0] sm:$0xff]  ;;  %v160_v17 = vld [vmem:[%s1757_s1 + $0x3b8] sm:$0xff]  ;;  %v159_v19 = vld [vmem:[%s1757_s1 + $0x3b0] sm:$0xff]  ;;  %v188_v52 = vsub.s32 %v185_v42, %v1252_v41 }
  0x1d   :  { %300 = vmatprep.subr.mxu1 %v110_v53  ;;  %230 = vmatpush1.msra.mxu0 %v45_v54  ;;  %v94_v20 = vld [vmem:[%s1757_s1 + $0x1a8] sm:$0xff]  ;;  %v93_v22 = vld [vmem:[%s1757_s1 + $0x1a0] sm:$0xff]  ;;  %v92_v24 = vld [vmem:[%s1757_s1 + $0x198] sm:$0xff] }
  0x1e   :  { %301 = vmatpush1.msra.mxu1 %v109_v55  ;;  %231 = vmatprep.subr.mxu0 %v44_v56  ;;  %v158_v21 = vld [vmem:[%s1757_s1 + $0x3a8] sm:$0xff]  ;;  %v157_v23 = vld [vmem:[%s1757_s1 + $0x3a0] sm:$0xff]  ;;  %v156_v25 = vld [vmem:[%s1757_s1 + $0x398] sm:$0xff] }
  0x1f   :  { %302 = vmatprep.subr.mxu1 %v108_v57  ;;  %232 = vmatpush1.msra.mxu0 %v43_v58  ;;  %v91_v26 = vld [vmem:[%s1757_s1 + $0x190] sm:$0xff]  ;;  %v90_v28 = vld [vmem:[%s1757_s1 + $0x188] sm:$0xff]  ;;  %v89_v33 = vld [vmem:[%s1757_s1 + $0x180] sm:$0xff] }
  0x20   :  { %303 = vmatpush1.msra.mxu1 %v107_v59  ;;  %233 = vmatprep.subr.mxu0 %v42_v60  ;;  %v155_v27 = vld [vmem:[%s1757_s1 + $0x390] sm:$0xff]  ;;  %v154_v29 = vld [vmem:[%s1757_s1 + $0x388] sm:$0xff]  ;;  %v153_v34 = vld [vmem:[%s1757_s1 + $0x380] sm:$0xff] }
  0x21   :  { %304 = vmatprep.subr.mxu1 %v106_v61  ;;  %234 = vmatpush1.msra.mxu0 %v41_v62  ;;  %v88_v35 = vld [vmem:[%s1757_s1 + $0x178] sm:$0xff]  ;;  %v87_v37 = vld [vmem:[%s1757_s1 + $0x170] sm:$0xff]  ;;  %v86_v39 = vld [vmem:[%s1757_s1 + $0x168] sm:$0xff] }
  0x22   :  { %305 = vmatpush1.msra.mxu1 %v105_v63  ;;  %235 = vmatprep.subr.mxu0 %v104_v0  ;;  %v152_v36 = vld [vmem:[%s1757_s1 + $0x378] sm:$0xff]  ;;  %v151_v38 = vld [vmem:[%s1757_s1 + $0x370] sm:$0xff]  ;;  %v150_v40 = vld [vmem:[%s1757_s1 + $0x368] sm:$0xff] }
  0x23   :  { %306 = vmatprep.subr.mxu1 %v168_v1  ;;  %236 = vmatpush2.msra.mxu0 %v103_v2  ;;  %v85_v43 = vld [vmem:[%s1757_s1 + $0x160] sm:$0xff]  ;;  %v84_v45 = vld [vmem:[%s1757_s1 + $0x158] sm:$0xff]  ;;  %v83_v48 = vld [vmem:[%s1757_s1 + $0x150] sm:$0xff] }
  0x24   :  { %307 = vmatpush2.msra.mxu1 %v167_v3  ;;  %237 = vmatprep.subr.mxu0 %v102_v4  ;;  %v149_v44 = vld [vmem:[%s1757_s1 + $0x360] sm:$0xff]  ;;  %v148_v46 = vld [vmem:[%s1757_s1 + $0x358] sm:$0xff]  ;;  %v147_v49 = vld [vmem:[%s1757_s1 + $0x350] sm:$0xff] }
  0x25   :  { %308 = vmatprep.subr.mxu1 %v166_v5  ;;  %238 = vmatpush2.msra.mxu0 %v101_v6  ;;  %v40_v47 = vld [vmem:[%s1756_s0] sm:$0xff]  ;;  %v82_v50 = vld [vmem:[%s1757_s1 + $0x148] sm:$0xff]  ;;  %v80_v56 = vld [vmem:[%s1757_s1 + $0x138] sm:$0xff] }
  0x26   :  { %309 = vmatpush2.msra.mxu1 %v165_v7  ;;  %239 = vmatprep.subr.mxu0 %v100_v8  ;;  %v146_v51 = vld [vmem:[%s1757_s1 + $0x348] sm:$0xff]  ;;  %v81_v53 = vld [vmem:[%s1757_s1 + $0x140] sm:$0xff]  ;;  %v182_v55 = vcombine.high %v40_v47, %v40_v47  ;;  %v144_v57 = vld [vmem:[%s1757_s1 + $0x338] sm:$0xff]  ;;  %v189_v62 = vrot.slane %v40_v47, %v188_v52 }
  0x27   :  { %310 = vmatprep.subr.mxu1 %v164_v9  ;;  %240 = vmatpush2.msra.mxu0 %v99_v10  ;;  %v145_v54 = vld [vmem:[%s1757_s1 + $0x340] sm:$0xff]  ;;  %v79_v58 = vld [vmem:[%s1757_s1 + $0x130] sm:$0xff]  ;;  %v78_v60 = vld [vmem:[%s1757_s1 + $0x128] sm:$0xff] }
  0x28   :  { %311 = vmatpush2.msra.mxu1 %v163_v11  ;;  %241 = vmatprep.subr.mxu0 %v98_v12  ;;  %v143_v59 = vld [vmem:[%s1757_s1 + $0x330] sm:$0xff]  ;;  %v142_v61 = vld [vmem:[%s1757_s1 + $0x328] sm:$0xff]  ;;  %v77_v63 = vld [vmem:[%s1757_s1 + $0x120] sm:$0xff]  ;;  %v196_v1 = vrot.slane %v182_v55, %v188_v52  ;;  %v197_v8 = vcombine.high %v189_v62, %v189_v62 }
  0x29   :  { %312 = vmatprep.subr.mxu1 %v162_v13  ;;  %242 = vmatpush2.msra.mxu0 %v97_v14  ;;  %v141_v0 = vld [vmem:[%s1757_s1 + $0x320] sm:$0xff]  ;;  %v76_v2 = vld [vmem:[%s1757_s1 + $0x118] sm:$0xff]  ;;  %v75_v4 = vld [vmem:[%s1757_s1 + $0x110] sm:$0xff] }
  0x2a   :  { %313 = vmatpush2.msra.mxu1 %v161_v15  ;;  %243 = vmatprep.subr.mxu0 %v96_v16  ;;  %v140_v3 = vld [vmem:[%s1757_s1 + $0x318] sm:$0xff]  ;;  %v139_v5 = vld [vmem:[%s1757_s1 + $0x310] sm:$0xff]  ;;  %v74_v6 = vld [vmem:[%s1757_s1 + $0x108] sm:$0xff]  ;;  %v198_v10 = vcombine.high %v196_v1, %v196_v1 }
  0x2b   :  { %314 = vmatprep.subr.mxu1 %v160_v17  ;;  %244 = vmatpush2.msra.mxu0 %v95_v18  ;;  %v138_v7 = vld [vmem:[%s1757_s1 + $0x308] sm:$0xff]  ;;  %v73_v9 = vld [vmem:[%s1757_s1 + $0x100] sm:$0xff] }
  0x2c   :  { %315 = vmatpush2.msra.mxu1 %v159_v19  ;;  %245 = vmatprep.subr.mxu0 %v94_v20 }
  0x2d   :  { %316 = vmatprep.subr.mxu1 %v158_v21  ;;  %246 = vmatpush2.msra.mxu0 %v93_v22 }
  0x2e   :  { %317 = vmatpush2.msra.mxu1 %v157_v23  ;;  %247 = vmatprep.subr.mxu0 %v92_v24 }
  0x2f   :  { %318 = vmatprep.subr.mxu1 %v156_v25  ;;  %248 = vmatpush2.msra.mxu0 %v91_v26 }
  0x30   :  { %319 = vmatpush2.msra.mxu1 %v155_v27  ;;  %249 = vmatprep.subr.mxu0 %v90_v28 }
  0x31   :  { %320 = vmatprep.subr.mxu1 %v154_v29  ;;  %250 = vmatpush2.msra.mxu0 %v89_v33 }
  0x32   :  { %321 = vmatpush2.msra.mxu1 %v153_v34  ;;  %251 = vmatprep.subr.mxu0 %v88_v35 }
  0x33   :  { %322 = vmatprep.subr.mxu1 %v152_v36  ;;  %252 = vmatpush2.msra.mxu0 %v87_v37 }
  0x34   :  { %323 = vmatpush2.msra.mxu1 %v151_v38  ;;  %253 = vmatprep.subr.mxu0 %v86_v39 }
  0x35   :  { %324 = vmatprep.subr.mxu1 %v150_v40  ;;  %254 = vmatpush2.msra.mxu0 %v85_v43 }
  0x36   :  { %325 = vmatpush2.msra.mxu1 %v149_v44  ;;  %255 = vmatprep.subr.mxu0 %v84_v45 }
  0x37   :  { %326 = vmatprep.subr.mxu1 %v148_v46  ;;  %256 = vmatpush2.msra.mxu0 %v83_v48 }
  0x38   :  { %327 = vmatpush2.msra.mxu1 %v147_v49  ;;  %257 = vmatprep.subr.mxu0 %v82_v50 }
  0x39   :  { %328 = vmatprep.subr.mxu1 %v146_v51  ;;  %258 = vmatpush2.msra.mxu0 %v81_v53 }
  0x3a   :  { %329 = vmatpush2.msra.mxu1 %v145_v54  ;;  %259 = vmatprep.subr.mxu0 %v80_v56 }
  0x3b   :  { %330 = vmatprep.subr.mxu1 %v144_v57  ;;  %260 = vmatpush2.msra.mxu0 %v79_v58 }
  0x3c   :  { %331 = vmatpush2.msra.mxu1 %v143_v59  ;;  %261 = vmatprep.subr.mxu0 %v78_v60 }
  0x3d   :  { %332 = vmatprep.subr.mxu1 %v142_v61  ;;  %262 = vmatpush2.msra.mxu0 %v77_v63 }
  0x3e   :  { %333 = vmatpush2.msra.mxu1 %v141_v0  ;;  %263 = vmatprep.subr.mxu0 %v76_v2 }
  0x3f   :  { %334 = vmatprep.subr.mxu1 %v140_v3 }
  0x40   :  { %19 = vsyncpa [#allocation5], 0  ;;  %264 = vmatpush2.msra.mxu0 %v75_v4  ;;  %335 = vmatpush2.msra.mxu1 %v139_v5  ;;  %v137_v11 = vld [vmem:[%s1757_s1 + $0x300] sm:$0xff]  ;;  %v378_v12 = vld [vmem:[%s1759_s3 + $0xf8] sm:$0xff]  ;;  %s879_s1 = smov [#allocation2]   ;;  %vm714_vm0 = vcmask 74752  }
  0x41   :  { %265 = vmatprep.subr.mxu0 %v74_v6  ;;  %336 = vmatprep.subr.mxu1 %v138_v7  ;;  %v377_v13 = vld [vmem:[%s1759_s3 + $0xf0] sm:$0xff]  ;;  %v376_v14 = vld [vmem:[%s1759_s3 + $0xe8] sm:$0xff]  ;;  %v375_v15 = vld [vmem:[%s1759_s3 + $0xe0] sm:$0xff]  ;;  %s730_s30 = sshll.u32 %s879_s1, 4  ;;  %s731_s30 = int_to_ptr.vmem [resolvable:$true] %s730_s30 }
  0x42   :  { %266 = vmatpush2.msra.mxu0 %v73_v9  ;;  %267 = vmatprep.mubr.f32.mxu0 %v197_v8  ;;  %v374_v16 = vld [vmem:[%s1759_s3 + $0xd8] sm:$0xff]  ;;  %v373_v17 = vld [vmem:[%s1759_s3 + $0xd0] sm:$0xff]  ;;  %v372_v18 = vld [vmem:[%s1759_s3 + $0xc8] sm:$0xff]  ;;  %p839_p1 = scmp.lt.s32.totalorder %s731_s30, %s731_s30 }
  0x43   :  { %337 = vmatpush2.msra.mxu1 %v137_v11  ;;  %338 = vmatprep.mubr.f32.mxu1 %v198_v10  ;;  %v371_v19 = vld [vmem:[%s1759_s3 + $0xc0] sm:$0xff]  ;;  %v370_v20 = vld [vmem:[%s1759_s3 + $0xb8] sm:$0xff]  ;;  %v369_v21 = vld [vmem:[%s1759_s3 + $0xb0] sm:$0xff] }
  0x44   :  { %268 = vmatmul.mubr.f32.vlgmr.msra.gmra.mxu0 %v189_v62  ;;  %339 = vmatmul.mubr.f32.vlgmr.msra.gmra.mxu1 %v196_v1  ;;  %v368_v22 = vld [vmem:[%s1759_s3 + $0xa8] sm:$0xff]  ;;  %v367_v23 = vld [vmem:[%s1759_s3 + $0xa0] sm:$0xff]  ;;  %v366_v24 = vld [vmem:[%s1759_s3 + $0x98] sm:$0xff] }
  0x45   :  { %423 = vmatprep.subr.mxu0 %v378_v12  ;;  %v365_v25 = vld [vmem:[%s1759_s3 + $0x90] sm:$0xff]  ;;  %v364_v26 = vld [vmem:[%s1759_s3 + $0x88] sm:$0xff]  ;;  %v363_v27 = vld [vmem:[%s1759_s3 + $0x80] sm:$0xff] }
  0x46   :  { %424 = vmatpush1.msra.mxu0 %v377_v13  ;;  %v362_v28 = vld [vmem:[%s1759_s3 + $0x78] sm:$0xff]  ;;  %v361_v29 = vld [vmem:[%s1759_s3 + $0x70] sm:$0xff]  ;;  %v360_v30 = vld [vmem:[%s1759_s3 + $0x68] sm:$0xff] }
  0x47   :  { %425 = vmatprep.subr.mxu0 %v376_v14  ;;  %v359_v31 = vld [vmem:[%s1759_s3 + $0x60] sm:$0xff]  ;;  %v358_v32 = vld [vmem:[%s1759_s3 + $0x58] sm:$0xff]  ;;  %v357_v33 = vld [vmem:[%s1759_s3 + $0x50] sm:$0xff] }
  0x48   :  { %426 = vmatpush1.msra.mxu0 %v375_v15  ;;  %v356_v34 = vld [vmem:[%s1759_s3 + $0x48] sm:$0xff]  ;;  %v355_v35 = vld [vmem:[%s1759_s3 + $0x40] sm:$0xff]  ;;  %v354_v36 = vld [vmem:[%s1759_s3 + $0x38] sm:$0xff] }
  0x49   :  { %427 = vmatprep.subr.mxu0 %v374_v16  ;;  %v353_v37 = vld [vmem:[%s1759_s3 + $0x30] sm:$0xff]  ;;  %v352_v38 = vld [vmem:[%s1759_s3 + $0x28] sm:$0xff]  ;;  %v351_v39 = vld [vmem:[%s1759_s3 + $0x20] sm:$0xff] }
  0x4a   :  { %428 = vmatpush1.msra.mxu0 %v373_v17  ;;  %v350_v40 = vld [vmem:[%s1759_s3 + $0x18] sm:$0xff]  ;;  %v349_v42 = vld [vmem:[%s1759_s3 + $0x10] sm:$0xff]  ;;  %v348_v43 = vld [vmem:[%s1759_s3 + $0x8] sm:$0xff] }
  0x4b   :  { %429 = vmatprep.subr.mxu0 %v372_v18  ;;  %v347_v44 = vld [vmem:[%s1759_s3] sm:$0xff]  ;;  %v410_v45 = vld [vmem:[%s1759_s3 + $0x1f8] sm:$0xff]  ;;  %v409_v46 = vld [vmem:[%s1759_s3 + $0x1f0] sm:$0xff] }
  0x4c   :  { %430 = vmatpush1.msra.mxu0 %v371_v19  ;;  %v408_v47 = vld [vmem:[%s1759_s3 + $0x1e8] sm:$0xff]  ;;  %v407_v48 = vld [vmem:[%s1759_s3 + $0x1e0] sm:$0xff]  ;;  %v406_v49 = vld [vmem:[%s1759_s3 + $0x1d8] sm:$0xff] }
  0x4d   :  { %431 = vmatprep.subr.mxu0 %v370_v20  ;;  %v405_v50 = vld [vmem:[%s1759_s3 + $0x1d0] sm:$0xff]  ;;  %v404_v51 = vld [vmem:[%s1759_s3 + $0x1c8] sm:$0xff]  ;;  %v403_v52 = vld [vmem:[%s1759_s3 + $0x1c0] sm:$0xff] }
  0x4e   :  { %432 = vmatpush1.msra.mxu0 %v369_v21  ;;  %v402_v53 = vld [vmem:[%s1759_s3 + $0x1b8] sm:$0xff]  ;;  %v401_v54 = vld [vmem:[%s1759_s3 + $0x1b0] sm:$0xff]  ;;  %v400_v55 = vld [vmem:[%s1759_s3 + $0x1a8] sm:$0xff] }
  0x4f   :  { %433 = vmatprep.subr.mxu0 %v368_v22  ;;  %v399_v56 = vld [vmem:[%s1759_s3 + $0x1a0] sm:$0xff]  ;;  %v398_v57 = vld [vmem:[%s1759_s3 + $0x198] sm:$0xff]  ;;  %v397_v58 = vld [vmem:[%s1759_s3 + $0x190] sm:$0xff] }
  0x50   :  { %434 = vmatpush1.msra.mxu0 %v367_v23  ;;  %v396_v59 = vld [vmem:[%s1759_s3 + $0x188] sm:$0xff]  ;;  %v395_v60 = vld [vmem:[%s1759_s3 + $0x180] sm:$0xff]  ;;  %v394_v61 = vld [vmem:[%s1759_s3 + $0x178] sm:$0xff] }
  0x51   :  { %435 = vmatprep.subr.mxu0 %v366_v24  ;;  %v393_v62 = vld [vmem:[%s1759_s3 + $0x170] sm:$0xff]  ;;  %v392_v63 = vld [vmem:[%s1759_s3 + $0x168] sm:$0xff]  ;;  %v391_v0 = vld [vmem:[%s1759_s3 + $0x160] sm:$0xff] }
  0x52   :  { %436 = vmatpush1.msra.mxu0 %v365_v25  ;;  %v390_v1 = vld [vmem:[%s1759_s3 + $0x158] sm:$0xff]  ;;  %v389_v2 = vld [vmem:[%s1759_s3 + $0x150] sm:$0xff]  ;;  %v388_v3 = vld [vmem:[%s1759_s3 + $0x148] sm:$0xff] }
  0x53   :  { %437 = vmatprep.subr.mxu0 %v364_v26  ;;  %v387_v4 = vld [vmem:[%s1759_s3 + $0x140] sm:$0xff]  ;;  %v386_v5 = vld [vmem:[%s1759_s3 + $0x138] sm:$0xff]  ;;  %v385_v6 = vld [vmem:[%s1759_s3 + $0x130] sm:$0xff] }
  0x54   :  { %438 = vmatpush1.msra.mxu0 %v363_v27  ;;  %v384_v7 = vld [vmem:[%s1759_s3 + $0x128] sm:$0xff]  ;;  %v383_v8 = vld [vmem:[%s1759_s3 + $0x120] sm:$0xff]  ;;  %v382_v9 = vld [vmem:[%s1759_s3 + $0x118] sm:$0xff] }
  0x55   :  { %439 = vmatprep.subr.mxu0 %v362_v28  ;;  %v381_v10 = vld [vmem:[%s1759_s3 + $0x110] sm:$0xff]  ;;  %v380_v11 = vld [vmem:[%s1759_s3 + $0x108] sm:$0xff]  ;;  %v379_v12 = vld [vmem:[%s1759_s3 + $0x100] sm:$0xff] }
  0x56   :  { %440 = vmatpush1.msra.mxu0 %v361_v29  ;;  %v527_v13 = vld [vmem:[%s1761_s5 + $0xf8] sm:$0xff]  ;;  %v526_v15 = vld [vmem:[%s1761_s5 + $0xf0] sm:$0xff]  ;;  %v525_v17 = vld [vmem:[%s1761_s5 + $0xe8] sm:$0xff] }
  0x57   :  { %441 = vmatprep.subr.mxu0 %v360_v30  ;;  %v511_v14 = vld [vmem:[%s1761_s5 + $0x78] sm:$0xff]  ;;  %758 = vmatprep.subr.mxu1 %v527_v13  ;;  %v510_v16 = vld [vmem:[%s1761_s5 + $0x70] sm:$0xff]  ;;  %v509_v18 = vld [vmem:[%s1761_s5 + $0x68] sm:$0xff] }
  0x58   :  { %442 = vmatpush1.msra.mxu0 %v359_v31  ;;  %759 = vmatpush3.msra.mxu1 %v511_v14  ;;  %v524_v19 = vld [vmem:[%s1761_s5 + $0xe0] sm:$0xff]  ;;  %v523_v21 = vld [vmem:[%s1761_s5 + $0xd8] sm:$0xff]  ;;  %v522_v23 = vld [vmem:[%s1761_s5 + $0xd0] sm:$0xff] }
  0x59   :  { %443 = vmatprep.subr.mxu0 %v358_v32  ;;  %760 = vmatprep.subr.mxu1 %v526_v15  ;;  %v508_v20 = vld [vmem:[%s1761_s5 + $0x60] sm:$0xff]  ;;  %v507_v22 = vld [vmem:[%s1761_s5 + $0x58] sm:$0xff]  ;;  %v506_v24 = vld [vmem:[%s1761_s5 + $0x50] sm:$0xff] }
  0x5a   :  { %444 = vmatpush1.msra.mxu0 %v357_v33  ;;  %761 = vmatpush3.msra.mxu1 %v510_v16  ;;  %v521_v25 = vld [vmem:[%s1761_s5 + $0xc8] sm:$0xff]  ;;  %v520_v27 = vld [vmem:[%s1761_s5 + $0xc0] sm:$0xff]  ;;  %v519_v29 = vld [vmem:[%s1761_s5 + $0xb8] sm:$0xff] }
  0x5b   :  { %445 = vmatprep.subr.mxu0 %v356_v34  ;;  %762 = vmatprep.subr.mxu1 %v525_v17  ;;  %v505_v26 = vld [vmem:[%s1761_s5 + $0x48] sm:$0xff]  ;;  %v504_v28 = vld [vmem:[%s1761_s5 + $0x40] sm:$0xff]  ;;  %v503_v30 = vld [vmem:[%s1761_s5 + $0x38] sm:$0xff] }
  0x5c   :  { %446 = vmatpush1.msra.mxu0 %v355_v35  ;;  %763 = vmatpush3.msra.mxu1 %v509_v18  ;;  %v518_v31 = vld [vmem:[%s1761_s5 + $0xb0] sm:$0xff]  ;;  %v517_v33 = vld [vmem:[%s1761_s5 + $0xa8] sm:$0xff]  ;;  %v516_v35 = vld [vmem:[%s1761_s5 + $0xa0] sm:$0xff] }
  0x5d   :  { %447 = vmatprep.subr.mxu0 %v354_v36  ;;  %764 = vmatprep.subr.mxu1 %v524_v19  ;;  %v502_v32 = vld [vmem:[%s1761_s5 + $0x30] sm:$0xff]  ;;  %v501_v34 = vld [vmem:[%s1761_s5 + $0x28] sm:$0xff]  ;;  %v500_v36 = vld [vmem:[%s1761_s5 + $0x20] sm:$0xff] }
  0x5e   :  { %448 = vmatpush1.msra.mxu0 %v353_v37  ;;  %765 = vmatpush3.msra.mxu1 %v508_v20  ;;  %v515_v37 = vld [vmem:[%s1761_s5 + $0x98] sm:$0xff]  ;;  %v631_v15 = vld [vmem:[%s1763_s7 + $0xd0] sm:$0xff]  ;;  %v630_v17 = vld [vmem:[%s1763_s7 + $0xc8] sm:$0xff] }
  0x5f   :  { %449 = vmatprep.subr.mxu0 %v352_v38  ;;  %766 = vmatprep.subr.mxu1 %v523_v21  ;;  %v173_v38 = vsub.s32 0, %v1252_v41  ;;  %v632_v13 = vld [vmem:[%s1763_s7 + $0xd8] sm:$0xff]  ;;  %v615_v16 = vld [vmem:[%s1763_s7 + $0x50] sm:$0xff]  ;;  %v614_v18 = vld [vmem:[%s1763_s7 + $0x48] sm:$0xff] }
  0x60   :  { %450 = vmatpush1.msra.mxu0 %v351_v39  ;;  %767 = vmatpush3.msra.mxu1 %v507_v22  ;;  %v169_v39 = vld [vmem:[%s1758_s2] sm:$0x3]  ;;  %v616_v14 = vld [vmem:[%s1763_s7 + $0x58] sm:$0xff] }
  0x61   :  { %451 = vmatprep.subr.mxu0 %v350_v40  ;;  %768 = vmatprep.subr.mxu1 %v522_v23  ;;  %v177_v40 = vsub.s32 1, %v1252_v41  ;;  %v514_v41 = vld [vmem:[%s1761_s5 + $0x90] sm:$0xff]  ;;  %v629_v19 = vld [vmem:[%s1763_s7 + $0xc0] sm:$0xff]  ;;  %v628_v21 = vld [vmem:[%s1763_s7 + $0xb8] sm:$0xff] }
  0x62   :  { %452 = vmatpush1.msra.mxu0 %v349_v42  ;;  %769 = vmatpush3.msra.mxu1 %v506_v24  ;;  %v174_v42 = vrot.slane %v169_v39, %v173_v38  ;;  %v613_v20 = vld [vmem:[%s1763_s7 + $0x40] sm:$0xff]  ;;  %v612_v22 = vld [vmem:[%s1763_s7 + $0x38] sm:$0xff]  ;;  %v627_v23 = vld [vmem:[%s1763_s7 + $0xb0] sm:$0xff] }
  0x63   :  { %453 = vmatprep.subr.mxu0 %v348_v43  ;;  %770 = vmatprep.subr.mxu1 %v521_v25  ;;  %v178_v43 = vrot.slane %v169_v39, %v177_v40  ;;  %v611_v24 = vld [vmem:[%s1763_s7 + $0x30] sm:$0xff]  ;;  %v626_v25 = vld [vmem:[%s1763_s7 + $0xa8] sm:$0xff]  ;;  %v756_v39 = vld [vmem:[%s1762_s6] ss:$0 sm:$0xff] }
  0x64   :  { %454 = vmatpush1.msra.mxu0 %v347_v44  ;;  %771 = vmatpush3.msra.mxu1 %v505_v26  ;;  %v610_v26 = vld [vmem:[%s1763_s7 + $0x28] sm:$0xff] }
  0x65   :  { %455 = vmatprep.subr.mxu0 %v410_v45  ;;  %772 = vmatprep.subr.mxu1 %v520_v27  ;;  %v625_v27 = vld [vmem:[%s1763_s7 + $0xa0] sm:$0xff] }
  0x66   :  { %456 = vmatpush2.msra.mxu0 %v409_v46  ;;  %773 = vmatpush3.msra.mxu1 %v504_v28  ;;  %v609_v28 = vld [vmem:[%s1763_s7 + $0x20] sm:$0xff] }
  0x67   :  { %457 = vmatprep.subr.mxu0 %v408_v47  ;;  %774 = vmatprep.subr.mxu1 %v519_v29  ;;  %v624_v29 = vld [vmem:[%s1763_s7 + $0x98] sm:$0xff] }
  0x68   :  { %458 = vmatpush2.msra.mxu0 %v407_v48  ;;  %775 = vmatpush3.msra.mxu1 %v503_v30  ;;  %v608_v30 = vld [vmem:[%s1763_s7 + $0x18] sm:$0xff] }
  0x69   :  { %459 = vmatprep.subr.mxu0 %v406_v49  ;;  %776 = vmatprep.subr.mxu1 %v518_v31  ;;  %v623_v31 = vld [vmem:[%s1763_s7 + $0x90] sm:$0xff] }
  0x6a   :  { %460 = vmatpush2.msra.mxu0 %v405_v50  ;;  %777 = vmatpush3.msra.mxu1 %v502_v32  ;;  %v607_v32 = vld [vmem:[%s1763_s7 + $0x10] sm:$0xff] }
  0x6b   :  { %461 = vmatprep.subr.mxu0 %v404_v51  ;;  %778 = vmatprep.subr.mxu1 %v517_v33  ;;  %v622_v33 = vld [vmem:[%s1763_s7 + $0x88] sm:$0xff] }
  0x6c   :  { %462 = vmatpush2.msra.mxu0 %v403_v52  ;;  %779 = vmatpush3.msra.mxu1 %v501_v34  ;;  %v606_v34 = vld [vmem:[%s1763_s7 + $0x8] sm:$0xff] }
  0x6d   :  { %463 = vmatprep.subr.mxu0 %v402_v53  ;;  %780 = vmatprep.subr.mxu1 %v516_v35  ;;  %v621_v35 = vld [vmem:[%s1763_s7 + $0x80] sm:$0xff] }
  0x6e   :  { %464 = vmatpush2.msra.mxu0 %v401_v54  ;;  %781 = vmatpush3.msra.mxu1 %v500_v36  ;;  %v499_v54 = vld [vmem:[%s1761_s5 + $0x18] sm:$0xff]  ;;  %v605_v36 = vld [vmem:[%s1763_s7] sm:$0xff] }
  0x6f   :  { %465 = vmatprep.subr.mxu0 %v400_v55  ;;  %782 = vmatprep.subr.mxu1 %v515_v37  ;;  %v498_v55 = vld [vmem:[%s1761_s5 + $0x10] sm:$0xff] }
  0x70   :  { %466 = vmatpush2.msra.mxu0 %v399_v56  ;;  %783 = vmatpush3.msra.mxu1 %v499_v54  ;;  %v513_v56 = vld [vmem:[%s1761_s5 + $0x88] sm:$0xff] }
  0x71   :  { %467 = vmatprep.subr.mxu0 %v398_v57  ;;  %784 = vmatprep.subr.mxu1 %v514_v41  ;;  %v497_v57 = vld [vmem:[%s1761_s5 + $0x8] sm:$0xff] }
  0x72   :  { %468 = vmatpush2.msra.mxu0 %v397_v58  ;;  %785 = vmatpush3.msra.mxu1 %v498_v55  ;;  %v512_v58 = vld [vmem:[%s1761_s5 + $0x80] sm:$0xff] }
  0x73   :  { %469 = vmatprep.subr.mxu0 %v396_v59  ;;  %786 = vmatprep.subr.mxu1 %v513_v56  ;;  %v496_v59 = vld [vmem:[%s1761_s5] sm:$0xff] }
  0x74   :  { %470 = vmatpush2.msra.mxu0 %v395_v60  ;;  %787 = vmatpush3.msra.mxu1 %v497_v57  ;;  %v636_v60 = vld [vmem:[%s1763_s7 + $0xf8] sm:$0xff] }
  0x75   :  { %471 = vmatprep.subr.mxu0 %v394_v61  ;;  %788 = vmatprep.subr.mxu1 %v512_v58  ;;  %v411_v61 = vld [vmem:[%s1760_s4] sm:$0x3] }
  0x76   :  { %472 = vmatpush2.msra.mxu0 %v393_v62  ;;  %789 = vmatpush3.msra.mxu1 %v496_v59  ;;  %v416_v62 = vrot.slane %v411_v61, %v173_v38 }
  0x77   :  { %473 = vmatprep.subr.mxu0 %v392_v63  ;;  %793 = vmatprep.subr.mxu1 %v636_v60  ;;  %v420_v63 = vrot.slane %v411_v61, %v177_v40 }
  0x78   :  { %474 = vmatpush2.msra.mxu0 %v391_v0 }
  0x79   :  { %475 = vmatprep.subr.mxu0 %v390_v1 }
  0x7a   :  { %476 = vmatpush2.msra.mxu0 %v389_v2 }
  0x7b   :  { %477 = vmatprep.subr.mxu0 %v388_v3 }
  0x7c   :  { %478 = vmatpush2.msra.mxu0 %v387_v4 }
  0x7d   :  { %479 = vmatprep.subr.mxu0 %v386_v5 }
  0x7e   :  { %480 = vmatpush2.msra.mxu0 %v385_v6  ;;  %v620_v6 = vld [vmem:[%s1763_s7 + $0x78] sm:$0xff] }
  0x7f   :  { %481 = vmatprep.subr.mxu0 %v384_v7  ;;  %v635_v7 = vld [vmem:[%s1763_s7 + $0xf0] sm:$0xff] }
  0x80   :  { %482 = vmatpush2.msra.mxu0 %v383_v8  ;;  %v619_v8 = vld [vmem:[%s1763_s7 + $0x70] sm:$0xff] }
  0x81   :  { %483 = vmatprep.subr.mxu0 %v382_v9  ;;  %v634_v9 = vld [vmem:[%s1763_s7 + $0xe8] sm:$0xff] }
  0x82   :  { %484 = vmatpush2.msra.mxu0 %v381_v10  ;;  %v618_v10 = vld [vmem:[%s1763_s7 + $0x68] sm:$0xff] }
  0x83   :  { %485 = vmatprep.subr.mxu0 %v380_v11  ;;  %v633_v11 = vld [vmem:[%s1763_s7 + $0xe0] sm:$0xff] }
  0x84   :  { %486 = vmatpush2.msra.mxu0 %v379_v12  ;;  %v617_v12 = vld [vmem:[%s1763_s7 + $0x60] sm:$0xff]  ;;  %s834_s7 = scalar_lea.vmem %s731_s30, 32 }
  0x85   :  { %p835_p0 = scmp.ne.s32.totalorder %s731_s30, %s834_s7  ;;  %p840_p2 = scmp.lt.s32.totalorder %s834_s7, %s834_s7 }
  0x87   :  { %p841_p3 = por %p840_p2, %p839_p1 }
  0x89   :  { %p842_p4 = pnand %p841_p3, %p835_p0 }
 0x104   :  { %v269_v44 = vpop.f32.mrf.mxu0  ;;  %v340_v45 = vpop.f32.mrf.mxu1 }
 0x105   :  { %v270_v46 = vadd.f32 %v269_v44, %v174_v42 }
 0x106   :  { %v271_v47 = vpop.f32.mrf.mxu0  ;;  %v342_v50 = vpop.f32.mrf.mxu1 }
 0x107   :  { %v272_v48 = vadd.f32 %v271_v47, %v178_v43  ;;  %v341_v49 = vadd.f32 %v340_v45, %v270_v46 }
 0x109   :  { %v343_v51 = vadd.f32 %v342_v50, %v272_v48  ;;  %v345_v53 = vmax.f32 %v341_v49, 0.0 }
 0x10b   :  { %v346_v52 = vmax.f32 %v343_v51, 0.0 }
 0x10d   :  { %487 = vmatprep.mubr.f32.mxu0 %v346_v52 }
 0x10e   :  { %488 = vmatmul.mubr.f32.vlgmr.msra.gmra.mxu0 %v345_v53 }
 0x1ce   :  { %v489_v0 = vpop.f32.mrf.mxu0 }
 0x1cf   :  { %v1635_v1 = vadd.f32 %v489_v0, %v416_v62 }
 0x1d0   :  { %v491_v2 = vpop.f32.mrf.mxu0 }
 0x1d1   :  { %v492_v3 = vadd.f32 %v491_v2, %v420_v63  ;;  %v494_v5 = vmax.f32 %v1635_v1, 0.0 }
 0x1d3   :  { %v495_v4 = vmax.f32 %v492_v3, 0.0 }
 0x1d5   :  { %599 = vmatprep.mubr.f32.mxu1 %v495_v4 }
 0x1d6   :  { %600 = vmatmul.mubr.f32.vlgmr.msra.gmra.mxu1 %v494_v5 }
 0x1d7   :  { %794 = vmatpush3.msra.mxu1 %v620_v6  ;;  %708 = vmatprep.mubr.f32.mxu1 %v495_v4 }
 0x1d8   :  { %795 = vmatprep.subr.mxu1 %v635_v7 }
 0x1d9   :  { %796 = vmatpush3.msra.mxu1 %v619_v8 }
 0x1da   :  { %797 = vmatprep.subr.mxu1 %v634_v9 }
 0x1db   :  { %798 = vmatpush3.msra.mxu1 %v618_v10 }
 0x1dc   :  { %799 = vmatprep.subr.mxu1 %v633_v11 }
 0x1dd   :  { %800 = vmatpush3.msra.mxu1 %v617_v12 }
 0x1de   :  { %801 = vmatprep.subr.mxu1 %v632_v13 }
 0x1df   :  { %802 = vmatpush3.msra.mxu1 %v616_v14 }
 0x1e0   :  { %803 = vmatprep.subr.mxu1 %v631_v15 }
 0x1e1   :  { %804 = vmatpush3.msra.mxu1 %v615_v16 }
 0x1e2   :  { %805 = vmatprep.subr.mxu1 %v630_v17 }
 0x1e3   :  { %806 = vmatpush3.msra.mxu1 %v614_v18 }
 0x1e4   :  { %807 = vmatprep.subr.mxu1 %v629_v19 }
 0x1e5   :  { %808 = vmatpush3.msra.mxu1 %v613_v20 }
 0x1e6   :  { %809 = vmatprep.subr.mxu1 %v628_v21 }
 0x1e7   :  { %810 = vmatpush3.msra.mxu1 %v612_v22 }
 0x1e8   :  { %811 = vmatprep.subr.mxu1 %v627_v23 }
 0x1e9   :  { %812 = vmatpush3.msra.mxu1 %v611_v24 }
 0x1ea   :  { %813 = vmatprep.subr.mxu1 %v626_v25 }
 0x1eb   :  { %814 = vmatpush3.msra.mxu1 %v610_v26 }
 0x1ec   :  { %815 = vmatprep.subr.mxu1 %v625_v27 }
 0x1ed   :  { %816 = vmatpush3.msra.mxu1 %v609_v28 }
 0x1ee   :  { %817 = vmatprep.subr.mxu1 %v624_v29 }
 0x1ef   :  { %818 = vmatpush3.msra.mxu1 %v608_v30 }
 0x1f0   :  { %819 = vmatprep.subr.mxu1 %v623_v31 }
 0x1f1   :  { %820 = vmatpush3.msra.mxu1 %v607_v32 }
 0x1f2   :  { %821 = vmatprep.subr.mxu1 %v622_v33 }
 0x1f3   :  { %822 = vmatpush3.msra.mxu1 %v606_v34 }
 0x1f4   :  { %823 = vmatprep.subr.mxu1 %v621_v35 }
 0x1f5   :  { %824 = vmatpush3.msra.mxu1 %v605_v36 }
 0x1f6   :  { %709 = vmatmul.mubr.f32.vlgmr.msra.gmra.mxu1 %v494_v5 }
 0x296   :  { %v790_v37 = vpop.f32.mrf.mxu1 }
 0x298   :  { %v791_v38 = vpop.f32.mrf.mxu1 }
 0x299   :  { %v792_v40 = vadd.f32 %v791_v38, %v790_v37 }
 0x29b   :  { %v602_v42 = vadd.f32 %v792_v40, %v756_v39 }
 0x29d   :  { %715 = vst.msk [vmem:[#allocation2] sm:$0x3] %vm714_vm0, %v602_v42 }
 0x29e   :  { %845 = shalt.err (!%p842_p4)
}
 0x29f   :  { %733 = dma.vmem_to_hbm [thread:$0]  %s731_s30, 32, %s1766_s10, [#allocation3]   ;;  %v757_v44 = vld [vmem:[%s1764_s8] ss:$0 sm:$0xff] }
 0x2a0   :  { %s880_s16 = smov [#allocation4]  }
 0x2a1   :  { %s740_s17 = sshll.u32 %s880_s16, 4  ;;  %s741_s17 = int_to_ptr.vmem [resolvable:$true] %s740_s17 }
 0x2a2   :  { %s854_s18 = scalar_lea.vmem %s741_s17, 32  ;;  %p859_p6 = scmp.lt.s32.totalorder %s741_s17, %s741_s17 }
 0x2a3   :  { %p855_p5 = scmp.ne.s32.totalorder %s741_s17, %s854_s18  ;;  %p860_p7 = scmp.lt.s32.totalorder %s854_s18, %s854_s18 }
 0x2a5   :  { %p861_p8 = por %p860_p7, %p859_p6 }
 0x2a7   :  { %p862_p9 = pnand %p861_p8, %p855_p5 }
 0x2b6   :  { %v825_v43 = vpop.f32.mrf.mxu1 }
 0x2b8   :  { %v826_v45 = vpop.f32.mrf.mxu1 }
 0x2b9   :  { %v827_v46 = vadd.f32 %v826_v45, %v825_v43 }
 0x2bb   :  { %v711_v47 = vadd.f32 %v827_v46, %v757_v44 }
 0x2bd   :  { %v717_v48 = vmul.f32 0.5, %v711_v47  ;;  %716 = vst.msk [vmem:[#allocation4] sm:$0x3] %vm714_vm0, %v711_v47 }
 0x2be   :  { %865 = shalt.err (!%p862_p9)
}
 0x2bf   :  { %743 = dma.vmem_to_hbm [thread:$0]  %s741_s17, 32, %s1767_s11, [#allocation5]   ;;  %v718_v49 = vmul.f32 1.442695, %v717_v48  ;;  %v720_v50 = vld [vmem:[%s1765_s9] sm:$0x3] }
 0x2c1   :  { %832 = vpow2.f32 %v718_v49 }
 0x2ce   :  { %v833_v51 = vpop.eup %832 }
 0x2cf   :  { %v721_v52 = vmul.f32 %v833_v51, %v720_v50 }
 0x2d1   :  { %v722_v53 = vadd.f32 %v721_v52, %v602_v42 }
 0x2d3   :  { %723 = vst.msk [vmem:[%s1768_s12] sm:$0x3] %vm714_vm0, %v722_v53 }
 0x2d4   :  { %874 = dma.done.wait [#allocation3], 32  }
 0x2d5   :  { %875 = vsyncadd [#allocation3], 4294967264 }
 0x2d6   :  { %876 = dma.done.wait [#allocation5], 32  }
 0x2d7   :  { %877 = vsyncadd [#allocation5], 4294967264 }
 0x2d8   :  { %754 = vsyncpa [#allocation3], 1 }
 0x2d9   :  { %755 = vsyncpa [#allocation5], 1 }

// kernel: beta_vae_b_forward.16
= control target key start
LH: loop header
LB: loop body
LE: loop exit
PB: predicated region body
PF: predicated region fallthrough
CT: control target
= control target key end

     0   :  { %s405_s1 = inlined_call_operand.vmem [shape: bf16[128,128], index: 1, kind: input, shape index: {}]   ;;  %s406_s0 = inlined_call_operand.vmem [shape: bf16[56,128], index: 0, kind: input, shape index: {}]   ;;  %s407_s2 = inlined_call_operand.vmem [shape: f32[1,128], index: 2, kind: input, shape index: {}]   ;;  %s408_s3 = inlined_call_operand.vmem [shape: bf16[56,128], index: 3, kind: output, shape index: {}]  }
   0x1   :  { %v322_v0 = vld [vmem:[%s405_s1 + $0x38] sm:$0xff]   ;;  %v323_v1 = vld [vmem:[%s405_s1 + $0x30] sm:$0xff]   ;;  %v324_v2 = vld [vmem:[%s405_s1 + $0x28] sm:$0xff]  }
   0x2   :  { %282 = vmatprep.subr.bf16.mxu0 %v322_v0  ;;  %306 = vmatprep.subr.bf16.mxu1 %v322_v0  ;;  %v325_v3 = vld [vmem:[%s405_s1 + $0x20] sm:$0xff]   ;;  %v331_v5 = vld [vmem:[%s406_s0 + $0x10] sm:$0xff]   ;;  %v326_v6 = vld [vmem:[%s405_s1 + $0x18] sm:$0xff]  }
   0x3   :  { %283 = vmatpush3.bf16.msra.mxu0 %v322_v0  ;;  %314 = vmatpush3.bf16.msra.mxu1 %v322_v0  ;;  %v330_v4 = vld [vmem:[%s406_s0] sm:$0xff]   ;;  %v327_v7 = vld [vmem:[%s405_s1 + $0x10] sm:$0xff]   ;;  %v328_v8 = vld [vmem:[%s405_s1 + $0x8] sm:$0xff]  }
   0x4   :  { %284 = vmatprep.subr.bf16.mxu0 %v323_v1  ;;  %307 = vmatprep.subr.bf16.mxu1 %v323_v1  ;;  %v329_v9 = vld [vmem:[%s405_s1] sm:$0xff]   ;;  %v332_v10 = vld [vmem:[%s406_s0 + $0x8] sm:$0xff]   ;;  %v333_v11 = vld [vmem:[%s406_s0 + $0x18] ss:$0 sps:$4 sm:$0xff]  }
   0x5   :  { %298 = vmatprep.mubr.bf16.mxu0 %v330_v4  ;;  %302 = vmatprep.mubr.bf16.mxu1 %v331_v5  ;;  %v226_v12 = vld [vmem:[%s407_s2] ss:$0 sm:$0xff] }
   0x7   :  { %285 = vmatpush3.bf16.msra.mxu0 %v323_v1  ;;  %315 = vmatpush3.bf16.msra.mxu1 %v323_v1 }
   0x8   :  { %286 = vmatprep.subr.bf16.mxu0 %v324_v2  ;;  %308 = vmatprep.subr.bf16.mxu1 %v324_v2 }
   0xb   :  { %287 = vmatpush3.bf16.msra.mxu0 %v324_v2  ;;  %316 = vmatpush3.bf16.msra.mxu1 %v324_v2 }
   0xc   :  { %288 = vmatprep.subr.bf16.mxu0 %v325_v3  ;;  %309 = vmatprep.subr.bf16.mxu1 %v325_v3 }
   0xf   :  { %289 = vmatpush3.bf16.msra.mxu0 %v325_v3  ;;  %317 = vmatpush3.bf16.msra.mxu1 %v325_v3 }
  0x10   :  { %290 = vmatprep.subr.bf16.mxu0 %v326_v6  ;;  %310 = vmatprep.subr.bf16.mxu1 %v326_v6 }
  0x13   :  { %291 = vmatpush3.bf16.msra.mxu0 %v326_v6  ;;  %318 = vmatpush3.bf16.msra.mxu1 %v326_v6 }
  0x14   :  { %292 = vmatprep.subr.bf16.mxu0 %v327_v7  ;;  %311 = vmatprep.subr.bf16.mxu1 %v327_v7 }
  0x17   :  { %293 = vmatpush3.bf16.msra.mxu0 %v327_v7  ;;  %319 = vmatpush3.bf16.msra.mxu1 %v327_v7 }
  0x18   :  { %294 = vmatprep.subr.bf16.mxu0 %v328_v8  ;;  %312 = vmatprep.subr.bf16.mxu1 %v328_v8 }
  0x1b   :  { %295 = vmatpush3.bf16.msra.mxu0 %v328_v8  ;;  %320 = vmatpush3.bf16.msra.mxu1 %v328_v8 }
  0x1c   :  { %296 = vmatprep.subr.bf16.mxu0 %v329_v9  ;;  %313 = vmatprep.subr.bf16.mxu1 %v329_v9 }
  0x1f   :  { %297 = vmatpush3.bf16.msra.mxu0 %v329_v9  ;;  %321 = vmatpush3.bf16.msra.mxu1 %v329_v9 }
  0x22   :  { %299 = vmatmul.mubr.bf16.vlgmr.msra.gmra.mxu0 %v332_v10  ;;  %303 = vmatmul.mubr.bf16.vlgmr.msra.gmra.mxu1 %v333_v11 }
  0xe2   :  { %v300_v13 = vpop.f32.mrf.mxu0  ;;  %v304_v14 = vpop.f32.mrf.mxu1 }
  0xe3   :  { %v174_v15 = vadd.f32 %v304_v14, %v226_v12  ;;  %v158_v18 = vadd.f32 %v300_v13, %v226_v12 }
  0xe4   :  { %v149_v16 = vpop.f32.mrf.mxu0  ;;  %v165_v17 = vpop.f32.mrf.mxu1 }
  0xe5   :  { %v185_v19 = vmax.f32 %v174_v15, 0.0  ;;  %v150_v20 = vadd.f32 %v226_v12, %v149_v16  ;;  %v166_v24 = vadd.f32 %v226_v12, %v165_v17  ;;  %v181_v28 = vmax.f32 %v158_v18, 0.0 }
  0xe6   :  { %v301_v21 = vpop.f32.mrf.mxu0  ;;  %v305_v22 = vpop.f32.mrf.mxu1 }
  0xe7   :  { %v252_v23 = vpack.c.bf16 %v185_v19, %v185_v19  ;;  %v161_v25 = vadd.f32 %v301_v21, %v226_v12  ;;  %v179_v32 = vmax.f32 %v150_v20, 0.0  ;;  %v183_v33 = vmax.f32 %v166_v24, 0.0 }
  0xe8   :  { %v152_v26 = vpop.f32.mrf.mxu0  ;;  %v168_v27 = vpop.f32.mrf.mxu1 }
  0xe9   :  { %221 = vst [vmem:[%s408_s3 + $0x18] sm:$0xf] %v252_v23  ;;  %v182_v29 = vmax.f32 %v161_v25, 0.0  ;;  %v153_v30 = vadd.f32 %v226_v12, %v152_v26  ;;  %v169_v31 = vadd.f32 %v226_v12, %v168_v27 }
  0xeb   :  { %v261_v34 = vpack.c.bf16 %v182_v29, %v181_v28  ;;  %v180_v35 = vmax.f32 %v153_v30, 0.0  ;;  %v184_v36 = vmax.f32 %v169_v31, 0.0 }
  0xed   :  { %268 = vst [vmem:[%s408_s3 + $0x8] sm:$0xff] %v261_v34   ;;  %v256_v37 = vpack.c.bf16 %v180_v35, %v179_v32  ;;  %v266_v38 = vpack.c.bf16 %v184_v36, %v183_v33 }
  0xef   :  { %257 = vst [vmem:[%s408_s3] sm:$0xff] %v256_v37   ;;  %269 = vst [vmem:[%s408_s3 + $0x10] sm:$0xff] %v266_v38  }

// kernel: beta_vae_b_forward.17
= control target key start
LH: loop header
LB: loop body
LE: loop exit
PB: predicated region body
PF: predicated region fallthrough
CT: control target
= control target key end

     0   :  { %v659_v0 = vmov 0.0   ;;  %vm660_vm0 = vmmov 0   ;;  %s835_s1 = inlined_call_operand.vmem [shape: bf16[128,128], index: 1, kind: input, shape index: {}]   ;;  %s836_s0 = inlined_call_operand.vmem [shape: bf16[168,128], index: 0, kind: input, shape index: {}]   ;;  %s837_s2 = inlined_call_operand.vmem [shape: f32[1,128], index: 2, kind: input, shape index: {}]   ;;  %s838_s3 = inlined_call_operand.vmem [shape: bf16[168,128], index: 3, kind: output, shape index: {}]  }
   0x1   :  { %562 = vmatprep.subr.bf16.mxu0 %v659_v0  ;;  %v640_v1 = vld [vmem:[%s835_s1 + $0x38] sm:$0xff]   ;;  %622 = vmatprep.subr.bf16.mxu1 %v659_v0  ;;  %v641_v2 = vld [vmem:[%s835_s1 + $0x30] sm:$0xff]   ;;  %v642_v3 = vld [vmem:[%s835_s1 + $0x28] sm:$0xff]  }
   0x2   :  { %578 = vmatprep.mubr.msk.bf16.mxu0 %vm660_vm0, %v659_v0  ;;  %602 = vmatprep.mubr.msk.bf16.mxu1 %vm660_vm0, %v659_v0  ;;  %v643_v4 = vld [vmem:[%s835_s1 + $0x20] sm:$0xff]   ;;  %v644_v5 = vld [vmem:[%s835_s1 + $0x18] sm:$0xff]   ;;  %v645_v6 = vld [vmem:[%s835_s1 + $0x10] sm:$0xff]  }
   0x3   :  { %563 = vmatpush3.bf16.msra.mxu0 %v640_v1  ;;  %630 = vmatpush3.bf16.msra.mxu1 %v640_v1  ;;  %v646_v7 = vld [vmem:[%s835_s1 + $0x8] sm:$0xff]   ;;  %v647_v8 = vld [vmem:[%s835_s1] sm:$0xff]   ;;  %v649_v10 = vld [vmem:[%s836_s0 + $0x30] sm:$0xff]  }
   0x4   :  { %564 = vmatprep.subr.bf16.mxu0 %v659_v0  ;;  %623 = vmatprep.subr.bf16.mxu1 %v659_v0  ;;  %v648_v9 = vld [vmem:[%s836_s0] sm:$0xff]   ;;  %v650_v11 = vld [vmem:[%s836_s0 + $0x8] sm:$0xff]   ;;  %v651_v12 = vld [vmem:[%s836_s0 + $0x38] sm:$0xff]  }
   0x5   :  { %v652_v13 = vld [vmem:[%s836_s0 + $0x10] sm:$0xff]   ;;  %v653_v14 = vld [vmem:[%s836_s0 + $0x40] sm:$0xff]   ;;  %v654_v15 = vld [vmem:[%s836_s0 + $0x18] sm:$0xff]  }
   0x6   :  { %v655_v16 = vld [vmem:[%s836_s0 + $0x48] sm:$0xff]   ;;  %v656_v17 = vld [vmem:[%s836_s0 + $0x20] sm:$0xff]   ;;  %v657_v18 = vld [vmem:[%s836_s0 + $0x50] ss:$0 sps:$4 sm:$0xff]  }
   0x7   :  { %565 = vmatpush3.bf16.msra.mxu0 %v641_v2  ;;  %631 = vmatpush3.bf16.msra.mxu1 %v641_v2  ;;  %v658_v19 = vld [vmem:[%s836_s0 + $0x28] sm:$0xff]   ;;  %v779_v20 = vld [vmem:[%s837_s2] ss:$0 sm:$0xff] }
   0x8   :  { %566 = vmatprep.subr.bf16.mxu0 %v659_v0  ;;  %624 = vmatprep.subr.bf16.mxu1 %v659_v0 }
   0xb   :  { %567 = vmatpush3.bf16.msra.mxu0 %v642_v3  ;;  %632 = vmatpush3.bf16.msra.mxu1 %v642_v3 }
   0xc   :  { %568 = vmatprep.subr.bf16.mxu0 %v659_v0  ;;  %625 = vmatprep.subr.bf16.mxu1 %v659_v0 }
   0xf   :  { %569 = vmatpush3.bf16.msra.mxu0 %v643_v4  ;;  %633 = vmatpush3.bf16.msra.mxu1 %v643_v4 }
  0x10   :  { %570 = vmatprep.subr.bf16.mxu0 %v659_v0  ;;  %626 = vmatprep.subr.bf16.mxu1 %v659_v0 }
  0x13   :  { %571 = vmatpush3.bf16.msra.mxu0 %v644_v5  ;;  %634 = vmatpush3.bf16.msra.mxu1 %v644_v5 }
  0x14   :  { %572 = vmatprep.subr.bf16.mxu0 %v659_v0  ;;  %627 = vmatprep.subr.bf16.mxu1 %v659_v0 }
  0x17   :  { %573 = vmatpush3.bf16.msra.mxu0 %v645_v6  ;;  %635 = vmatpush3.bf16.msra.mxu1 %v645_v6 }
  0x18   :  { %574 = vmatprep.subr.bf16.mxu0 %v659_v0  ;;  %628 = vmatprep.subr.bf16.mxu1 %v659_v0 }
  0x1b   :  { %575 = vmatpush3.bf16.msra.mxu0 %v646_v7  ;;  %636 = vmatpush3.bf16.msra.mxu1 %v646_v7 }
  0x1c   :  { %576 = vmatprep.subr.bf16.mxu0 %v659_v0  ;;  %629 = vmatprep.subr.bf16.mxu1 %v659_v0 }
  0x1f   :  { %577 = vmatpush3.bf16.msra.mxu0 %v647_v8  ;;  %637 = vmatpush3.bf16.msra.mxu1 %v647_v8 }
  0x22   :  { %579 = vmatmul.mubr.bf16.vlgmr.msra.gmra.mxu0 %v648_v9  ;;  %603 = vmatmul.mubr.bf16.vlgmr.msra.gmra.mxu1 %v649_v10 }
  0x23   :  { %582 = vmatprep.mubr.msk.bf16.mxu0 %vm660_vm0, %v659_v0  ;;  %606 = vmatprep.mubr.msk.bf16.mxu1 %vm660_vm0, %v659_v0 }
  0x2a   :  { %583 = vmatmul.mubr.bf16.gmra.mxu0 %v650_v11  ;;  %607 = vmatmul.mubr.bf16.gmra.mxu1 %v651_v12 }
  0x2b   :  { %586 = vmatprep.mubr.msk.bf16.mxu0 %vm660_vm0, %v659_v0  ;;  %610 = vmatprep.mubr.msk.bf16.mxu1 %vm660_vm0, %v659_v0 }
  0x32   :  { %587 = vmatmul.mubr.bf16.gmra.mxu0 %v652_v13  ;;  %611 = vmatmul.mubr.bf16.gmra.mxu1 %v653_v14 }
  0x33   :  { %590 = vmatprep.mubr.msk.bf16.mxu0 %vm660_vm0, %v659_v0  ;;  %614 = vmatprep.mubr.msk.bf16.mxu1 %vm660_vm0, %v659_v0 }
  0x3a   :  { %591 = vmatmul.mubr.bf16.gmra.mxu0 %v654_v15  ;;  %615 = vmatmul.mubr.bf16.gmra.mxu1 %v655_v16 }
  0x3b   :  { %594 = vmatprep.mubr.msk.bf16.mxu0 %vm660_vm0, %v659_v0  ;;  %618 = vmatprep.mubr.msk.bf16.mxu1 %vm660_vm0, %v659_v0 }
  0x42   :  { %595 = vmatmul.mubr.bf16.gmra.mxu0 %v656_v17  ;;  %619 = vmatmul.mubr.bf16.gmra.mxu1 %v657_v18 }
  0x43   :  { %598 = vmatprep.mubr.msk.bf16.mxu0 %vm660_vm0, %v659_v0 }
  0x4a   :  { %599 = vmatmul.mubr.bf16.gmra.mxu0 %v658_v19 }
  0xe2   :  { %v205_v21 = vpop.f32.mrf.mxu0  ;;  %v253_v22 = vpop.f32.mrf.mxu1 }
  0xe3   :  { %v254_v23 = vadd.f32 %v779_v20, %v253_v22  ;;  %v206_v26 = vadd.f32 %v779_v20, %v205_v21 }
  0xe4   :  { %v580_v24 = vpop.f32.mrf.mxu0  ;;  %v604_v25 = vpop.f32.mrf.mxu1 }
  0xe5   :  { %v303_v30 = vmax.f32 %v254_v23, 0.0  ;;  %v291_v34 = vmax.f32 %v206_v26, 0.0 }
  0xe6   :  { %v208_v27 = vpop.f32.mrf.mxu0  ;;  %v256_v28 = vpop.f32.mrf.mxu1 }
  0xe7   :  { %v209_v29 = vadd.f32 %v779_v20, %v208_v27  ;;  %v257_v31 = vadd.f32 %v779_v20, %v256_v28 }
  0xe8   :  { %v581_v32 = vpop.f32.mrf.mxu0  ;;  %v605_v33 = vpop.f32.mrf.mxu1 }
  0xe9   :  { %v292_v35 = vmax.f32 %v209_v29, 0.0  ;;  %v304_v36 = vmax.f32 %v257_v31, 0.0 }
  0xea   :  { %v213_v37 = vpop.f32.mrf.mxu0  ;;  %v261_v38 = vpop.f32.mrf.mxu1 }
  0xeb   :  { %v487_v39 = vpack.c.bf16 %v292_v35, %v291_v34  ;;  %v517_v40 = vpack.c.bf16 %v304_v36, %v303_v30  ;;  %v262_v41 = vadd.f32 %v779_v20, %v261_v38  ;;  %v214_v44 = vadd.f32 %v779_v20, %v213_v37 }
  0xec   :  { %v584_v42 = vpop.f32.mrf.mxu0  ;;  %v608_v43 = vpop.f32.mrf.mxu1 }
  0xed   :  { %488 = vst [vmem:[%s838_s3] sm:$0xff] %v487_v39   ;;  %539 = vst [vmem:[%s838_s3 + $0x30] sm:$0xff] %v517_v40   ;;  %v305_v48 = vmax.f32 %v262_v41, 0.0  ;;  %v293_v52 = vmax.f32 %v214_v44, 0.0 }
  0xee   :  { %v216_v45 = vpop.f32.mrf.mxu0  ;;  %v264_v46 = vpop.f32.mrf.mxu1 }
  0xef   :  { %v217_v47 = vadd.f32 %v779_v20, %v216_v45  ;;  %v265_v49 = vadd.f32 %v779_v20, %v264_v46 }
  0xf0   :  { %v585_v50 = vpop.f32.mrf.mxu0  ;;  %v609_v51 = vpop.f32.mrf.mxu1 }
  0xf1   :  { %v294_v53 = vmax.f32 %v217_v47, 0.0  ;;  %v306_v54 = vmax.f32 %v265_v49, 0.0 }
  0xf2   :  { %v221_v55 = vpop.f32.mrf.mxu0  ;;  %v269_v56 = vpop.f32.mrf.mxu1 }
  0xf3   :  { %v492_v57 = vpack.c.bf16 %v294_v53, %v293_v52  ;;  %v522_v58 = vpack.c.bf16 %v306_v54, %v305_v48  ;;  %v270_v59 = vadd.f32 %v779_v20, %v269_v56  ;;  %v222_v62 = vadd.f32 %v779_v20, %v221_v55 }
  0xf4   :  { %v588_v60 = vpop.f32.mrf.mxu0  ;;  %v612_v61 = vpop.f32.mrf.mxu1 }
  0xf5   :  { %534 = vst [vmem:[%s838_s3 + $0x8] sm:$0xff] %v492_v57   ;;  %540 = vst [vmem:[%s838_s3 + $0x38] sm:$0xff] %v522_v58   ;;  %v307_v2 = vmax.f32 %v270_v59, 0.0  ;;  %v295_v6 = vmax.f32 %v222_v62, 0.0 }
  0xf6   :  { %v224_v63 = vpop.f32.mrf.mxu0  ;;  %v272_v0 = vpop.f32.mrf.mxu1 }
  0xf7   :  { %v225_v1 = vadd.f32 %v779_v20, %v224_v63  ;;  %v273_v3 = vadd.f32 %v779_v20, %v272_v0 }
  0xf8   :  { %v589_v4 = vpop.f32.mrf.mxu0  ;;  %v613_v5 = vpop.f32.mrf.mxu1 }
  0xf9   :  { %v296_v7 = vmax.f32 %v225_v1, 0.0  ;;  %v308_v8 = vmax.f32 %v273_v3, 0.0 }
  0xfa   :  { %v229_v9 = vpop.f32.mrf.mxu0  ;;  %v277_v10 = vpop.f32.mrf.mxu1 }
  0xfb   :  { %v497_v11 = vpack.c.bf16 %v296_v7, %v295_v6  ;;  %v527_v12 = vpack.c.bf16 %v308_v8, %v307_v2  ;;  %v278_v13 = vadd.f32 %v779_v20, %v277_v10  ;;  %v230_v16 = vadd.f32 %v779_v20, %v229_v9 }
  0xfc   :  { %v592_v14 = vpop.f32.mrf.mxu0  ;;  %v616_v15 = vpop.f32.mrf.mxu1 }
  0xfd   :  { %535 = vst [vmem:[%s838_s3 + $0x10] sm:$0xff] %v497_v11   ;;  %541 = vst [vmem:[%s838_s3 + $0x40] sm:$0xff] %v527_v12   ;;  %v309_v21 = vmax.f32 %v278_v13, 0.0  ;;  %v297_v25 = vmax.f32 %v230_v16, 0.0 }
  0xfe   :  { %v232_v17 = vpop.f32.mrf.mxu0  ;;  %v280_v18 = vpop.f32.mrf.mxu1 }
  0xff   :  { %v233_v19 = vadd.f32 %v779_v20, %v232_v17  ;;  %v281_v22 = vadd.f32 %v779_v20, %v280_v18 }
 0x100   :  { %v593_v23 = vpop.f32.mrf.mxu0  ;;  %v617_v24 = vpop.f32.mrf.mxu1 }
 0x101   :  { %v298_v26 = vmax.f32 %v233_v19, 0.0  ;;  %v310_v27 = vmax.f32 %v281_v22, 0.0 }
 0x102   :  { %v237_v28 = vpop.f32.mrf.mxu0  ;;  %v285_v29 = vpop.f32.mrf.mxu1 }
 0x103   :  { %v502_v30 = vpack.c.bf16 %v298_v26, %v297_v25  ;;  %v532_v31 = vpack.c.bf16 %v310_v27, %v309_v21  ;;  %v286_v32 = vadd.f32 %v779_v20, %v285_v29  ;;  %v238_v35 = vadd.f32 %v779_v20, %v237_v28 }
 0x104   :  { %v596_v33 = vpop.f32.mrf.mxu0  ;;  %v620_v34 = vpop.f32.mrf.mxu1 }
 0x105   :  { %536 = vst [vmem:[%s838_s3 + $0x18] sm:$0xff] %v502_v30   ;;  %542 = vst [vmem:[%s838_s3 + $0x48] sm:$0xff] %v532_v31   ;;  %v311_v36 = vmax.f32 %v286_v32, 0.0  ;;  %v299_v43 = vmax.f32 %v238_v35, 0.0 }
 0x106   :  { %v240_v37 = vpop.f32.mrf.mxu0  ;;  %v288_v38 = vpop.f32.mrf.mxu1 }
 0x107   :  { %v241_v39 = vadd.f32 %v779_v20, %v240_v37  ;;  %v483_v40 = vpack.c.bf16 %v311_v36, %v311_v36 }
 0x108   :  { %v597_v41 = vpop.f32.mrf.mxu0  ;;  %v621_v42 = vpop.f32.mrf.mxu1 }
 0x109   :  { %v300_v44 = vmax.f32 %v241_v39, 0.0  ;;  %417 = vst [vmem:[%s838_s3 + $0x50] sm:$0xf] %v483_v40 }
 0x10a   :  { %v245_v45 = vpop.f32.mrf.mxu0 }
 0x10b   :  { %v507_v46 = vpack.c.bf16 %v300_v44, %v299_v43  ;;  %v246_v48 = vadd.f32 %v779_v20, %v245_v45 }
 0x10c   :  { %v600_v47 = vpop.f32.mrf.mxu0 }
 0x10d   :  { %537 = vst [vmem:[%s838_s3 + $0x20] sm:$0xff] %v507_v46   ;;  %v301_v52 = vmax.f32 %v246_v48, 0.0 }
 0x10e   :  { %v248_v49 = vpop.f32.mrf.mxu0 }
 0x10f   :  { %v249_v50 = vadd.f32 %v779_v20, %v248_v49 }
 0x110   :  { %v601_v51 = vpop.f32.mrf.mxu0 }
 0x111   :  { %v302_v53 = vmax.f32 %v249_v50, 0.0 }
 0x113   :  { %v512_v54 = vpack.c.bf16 %v302_v53, %v301_v52 }
 0x115   :  { %538 = vst [vmem:[%s838_s3 + $0x28] sm:$0xff] %v512_v54  }

// kernel: beta_vae_b_forward.18
= control target key start
LH: loop header
LB: loop body
LE: loop exit
PB: predicated region body
PF: predicated region fallthrough
CT: control target
= control target key end

     0   :  { %v1829_v0 = vmov 0.0   ;;  %vm1830_vm0 = vmmov 0   ;;  %s2265_s1 = inlined_call_operand.vmem [shape: bf16[128,128], index: 1, kind: input, shape index: {}]   ;;  %s2266_s0 = inlined_call_operand.vmem [shape: bf16[584,128], index: 0, kind: input, shape index: {}]   ;;  %s2267_s2 = inlined_call_operand.vmem [shape: f32[1,128], index: 2, kind: input, shape index: {}]   ;;  %s2268_s3 = inlined_call_operand.vmem [shape: bf16[584,128], index: 3, kind: output, shape index: {}]  }
   0x1   :  { %1602 = vmatprep.subr.bf16.mxu0 %v1829_v0  ;;  %v1784_v1 = vld [vmem:[%s2265_s1 + $0x38] sm:$0xff]   ;;  %1766 = vmatprep.subr.bf16.mxu1 %v1829_v0  ;;  %v1785_v2 = vld [vmem:[%s2265_s1 + $0x30] sm:$0xff]   ;;  %v1786_v3 = vld [vmem:[%s2265_s1 + $0x28] sm:$0xff]  }
   0x2   :  { %1618 = vmatprep.mubr.msk.bf16.mxu0 %vm1830_vm0, %v1829_v0  ;;  %1694 = vmatprep.mubr.msk.bf16.mxu1 %vm1830_vm0, %v1829_v0  ;;  %v1787_v4 = vld [vmem:[%s2265_s1 + $0x20] sm:$0xff]   ;;  %v1788_v5 = vld [vmem:[%s2265_s1 + $0x18] sm:$0xff]   ;;  %v1789_v6 = vld [vmem:[%s2265_s1 + $0x10] sm:$0xff]  }
   0x3   :  { %1603 = vmatpush3.bf16.msra.mxu0 %v1784_v1  ;;  %1774 = vmatpush3.bf16.msra.mxu1 %v1784_v1  ;;  %v1790_v7 = vld [vmem:[%s2265_s1 + $0x8] sm:$0xff]   ;;  %v1791_v8 = vld [vmem:[%s2265_s1] sm:$0xff]   ;;  %v1793_v10 = vld [vmem:[%s2266_s0 + $0x98] sm:$0xff]  }
   0x4   :  { %1604 = vmatprep.subr.bf16.mxu0 %v1829_v0  ;;  %1767 = vmatprep.subr.bf16.mxu1 %v1829_v0  ;;  %v1792_v9 = vld [vmem:[%s2266_s0] sm:$0xff]   ;;  %v1794_v11 = vld [vmem:[%s2266_s0 + $0x8] sm:$0xff]   ;;  %v1796_v13 = vld [vmem:[%s2266_s0 + $0x10] sm:$0xff]  }
   0x5   :  { %v1795_v12 = vld [vmem:[%s2266_s0 + $0xa0] sm:$0xff]   ;;  %v1797_v14 = vld [vmem:[%s2266_s0 + $0xa8] sm:$0xff]   ;;  %v1798_v15 = vld [vmem:[%s2266_s0 + $0x18] sm:$0xff]  }
   0x6   :  { %v1799_v16 = vld [vmem:[%s2266_s0 + $0xb0] sm:$0xff]   ;;  %v1800_v17 = vld [vmem:[%s2266_s0 + $0x20] sm:$0xff]   ;;  %v1801_v18 = vld [vmem:[%s2266_s0 + $0xb8] sm:$0xff]  }
   0x7   :  { %1605 = vmatpush3.bf16.msra.mxu0 %v1785_v2  ;;  %1775 = vmatpush3.bf16.msra.mxu1 %v1785_v2  ;;  %v1802_v19 = vld [vmem:[%s2266_s0 + $0x28] sm:$0xff]   ;;  %v1803_v20 = vld [vmem:[%s2266_s0 + $0xc0] sm:$0xff]   ;;  %v1804_v21 = vld [vmem:[%s2266_s0 + $0x30] sm:$0xff]  }
   0x8   :  { %1606 = vmatprep.subr.bf16.mxu0 %v1829_v0  ;;  %1768 = vmatprep.subr.bf16.mxu1 %v1829_v0  ;;  %v1805_v22 = vld [vmem:[%s2266_s0 + $0xc8] sm:$0xff]   ;;  %v1806_v23 = vld [vmem:[%s2266_s0 + $0x38] sm:$0xff]   ;;  %v1807_v24 = vld [vmem:[%s2266_s0 + $0xd0] sm:$0xff]  }
   0x9   :  { %v1808_v25 = vld [vmem:[%s2266_s0 + $0x40] sm:$0xff]   ;;  %v1809_v26 = vld [vmem:[%s2266_s0 + $0xd8] sm:$0xff]   ;;  %v1810_v27 = vld [vmem:[%s2266_s0 + $0x48] sm:$0xff]  }
   0xa   :  { %v1811_v28 = vld [vmem:[%s2266_s0 + $0xe0] sm:$0xff]   ;;  %v1812_v29 = vld [vmem:[%s2266_s0 + $0x50] sm:$0xff]   ;;  %v1813_v30 = vld [vmem:[%s2266_s0 + $0xe8] sm:$0xff]  }
   0xb   :  { %1607 = vmatpush3.bf16.msra.mxu0 %v1786_v3  ;;  %1776 = vmatpush3.bf16.msra.mxu1 %v1786_v3  ;;  %v1814_v31 = vld [vmem:[%s2266_s0 + $0x58] sm:$0xff]   ;;  %v1815_v32 = vld [vmem:[%s2266_s0 + $0xf0] sm:$0xff]   ;;  %v1816_v33 = vld [vmem:[%s2266_s0 + $0x60] sm:$0xff]  }
   0xc   :  { %1608 = vmatprep.subr.bf16.mxu0 %v1829_v0  ;;  %1769 = vmatprep.subr.bf16.mxu1 %v1829_v0  ;;  %v1817_v34 = vld [vmem:[%s2266_s0 + $0xf8] sm:$0xff]   ;;  %v1818_v35 = vld [vmem:[%s2266_s0 + $0x68] sm:$0xff]   ;;  %v1819_v36 = vld [vmem:[%s2266_s0 + $0x100] sm:$0xff]  }
   0xd   :  { %v1820_v37 = vld [vmem:[%s2266_s0 + $0x70] sm:$0xff]   ;;  %v1821_v38 = vld [vmem:[%s2266_s0 + $0x108] sm:$0xff]   ;;  %v1822_v39 = vld [vmem:[%s2266_s0 + $0x78] sm:$0xff]  }
   0xe   :  { %v1823_v40 = vld [vmem:[%s2266_s0 + $0x110] sm:$0xff]   ;;  %v1824_v41 = vld [vmem:[%s2266_s0 + $0x80] sm:$0xff]   ;;  %v1825_v42 = vld [vmem:[%s2266_s0 + $0x118] sm:$0xff]  }
   0xf   :  { %1609 = vmatpush3.bf16.msra.mxu0 %v1787_v4  ;;  %1777 = vmatpush3.bf16.msra.mxu1 %v1787_v4  ;;  %v1826_v43 = vld [vmem:[%s2266_s0 + $0x88] sm:$0xff]   ;;  %v1827_v44 = vld [vmem:[%s2266_s0 + $0x120] ss:$0 sps:$4 sm:$0xff]   ;;  %v1828_v45 = vld [vmem:[%s2266_s0 + $0x90] sm:$0xff]  }
  0x10   :  { %1610 = vmatprep.subr.bf16.mxu0 %v1829_v0  ;;  %1770 = vmatprep.subr.bf16.mxu1 %v1829_v0  ;;  %v2079_v46 = vld [vmem:[%s2267_s2] ss:$0 sm:$0xff] }
  0x13   :  { %1611 = vmatpush3.bf16.msra.mxu0 %v1788_v5  ;;  %1778 = vmatpush3.bf16.msra.mxu1 %v1788_v5 }
  0x14   :  { %1612 = vmatprep.subr.bf16.mxu0 %v1829_v0  ;;  %1771 = vmatprep.subr.bf16.mxu1 %v1829_v0 }
  0x17   :  { %1613 = vmatpush3.bf16.msra.mxu0 %v1789_v6  ;;  %1779 = vmatpush3.bf16.msra.mxu1 %v1789_v6 }
  0x18   :  { %1614 = vmatprep.subr.bf16.mxu0 %v1829_v0  ;;  %1772 = vmatprep.subr.bf16.mxu1 %v1829_v0 }
  0x1b   :  { %1615 = vmatpush3.bf16.msra.mxu0 %v1790_v7  ;;  %1780 = vmatpush3.bf16.msra.mxu1 %v1790_v7 }
  0x1c   :  { %1616 = vmatprep.subr.bf16.mxu0 %v1829_v0  ;;  %1773 = vmatprep.subr.bf16.mxu1 %v1829_v0 }
  0x1f   :  { %1617 = vmatpush3.bf16.msra.mxu0 %v1791_v8  ;;  %1781 = vmatpush3.bf16.msra.mxu1 %v1791_v8 }
  0x22   :  { %1619 = vmatmul.mubr.bf16.vlgmr.msra.gmra.mxu0 %v1792_v9  ;;  %1695 = vmatmul.mubr.bf16.vlgmr.msra.gmra.mxu1 %v1793_v10 }
  0x23   :  { %1622 = vmatprep.mubr.msk.bf16.mxu0 %vm1830_vm0, %v1829_v0  ;;  %1698 = vmatprep.mubr.msk.bf16.mxu1 %vm1830_vm0, %v1829_v0 }
  0x2a   :  { %1623 = vmatmul.mubr.bf16.gmra.mxu0 %v1794_v11  ;;  %1699 = vmatmul.mubr.bf16.gmra.mxu1 %v1795_v12 }
  0x2b   :  { %1626 = vmatprep.mubr.msk.bf16.mxu0 %vm1830_vm0, %v1829_v0  ;;  %1702 = vmatprep.mubr.msk.bf16.mxu1 %vm1830_vm0, %v1829_v0 }
  0x32   :  { %1627 = vmatmul.mubr.bf16.gmra.mxu0 %v1796_v13  ;;  %1703 = vmatmul.mubr.bf16.gmra.mxu1 %v1797_v14 }
  0x33   :  { %1630 = vmatprep.mubr.msk.bf16.mxu0 %vm1830_vm0, %v1829_v0  ;;  %1706 = vmatprep.mubr.msk.bf16.mxu1 %vm1830_vm0, %v1829_v0 }
  0x3a   :  { %1631 = vmatmul.mubr.bf16.gmra.mxu0 %v1798_v15  ;;  %1707 = vmatmul.mubr.bf16.gmra.mxu1 %v1799_v16 }
  0x3b   :  { %1634 = vmatprep.mubr.msk.bf16.mxu0 %vm1830_vm0, %v1829_v0  ;;  %1710 = vmatprep.mubr.msk.bf16.mxu1 %vm1830_vm0, %v1829_v0 }
  0x42   :  { %1635 = vmatmul.mubr.bf16.gmra.mxu0 %v1800_v17  ;;  %1711 = vmatmul.mubr.bf16.gmra.mxu1 %v1801_v18 }
  0x43   :  { %1638 = vmatprep.mubr.msk.bf16.mxu0 %vm1830_vm0, %v1829_v0  ;;  %1714 = vmatprep.mubr.msk.bf16.mxu1 %vm1830_vm0, %v1829_v0 }
  0x4a   :  { %1639 = vmatmul.mubr.bf16.gmra.mxu0 %v1802_v19  ;;  %1715 = vmatmul.mubr.bf16.gmra.mxu1 %v1803_v20 }
  0x4b   :  { %1642 = vmatprep.mubr.msk.bf16.mxu0 %vm1830_vm0, %v1829_v0  ;;  %1718 = vmatprep.mubr.msk.bf16.mxu1 %vm1830_vm0, %v1829_v0 }
  0x52   :  { %1643 = vmatmul.mubr.bf16.gmra.mxu0 %v1804_v21  ;;  %1719 = vmatmul.mubr.bf16.gmra.mxu1 %v1805_v22 }
  0x53   :  { %1646 = vmatprep.mubr.msk.bf16.mxu0 %vm1830_vm0, %v1829_v0  ;;  %1722 = vmatprep.mubr.msk.bf16.mxu1 %vm1830_vm0, %v1829_v0 }
  0x5a   :  { %1647 = vmatmul.mubr.bf16.gmra.mxu0 %v1806_v23  ;;  %1723 = vmatmul.mubr.bf16.gmra.mxu1 %v1807_v24 }
  0x5b   :  { %1650 = vmatprep.mubr.msk.bf16.mxu0 %vm1830_vm0, %v1829_v0  ;;  %1726 = vmatprep.mubr.msk.bf16.mxu1 %vm1830_vm0, %v1829_v0 }
  0x62   :  { %1651 = vmatmul.mubr.bf16.gmra.mxu0 %v1808_v25  ;;  %1727 = vmatmul.mubr.bf16.gmra.mxu1 %v1809_v26 }
  0x63   :  { %1654 = vmatprep.mubr.msk.bf16.mxu0 %vm1830_vm0, %v1829_v0  ;;  %1730 = vmatprep.mubr.msk.bf16.mxu1 %vm1830_vm0, %v1829_v0 }
  0x6a   :  { %1655 = vmatmul.mubr.bf16.gmra.mxu0 %v1810_v27  ;;  %1731 = vmatmul.mubr.bf16.gmra.mxu1 %v1811_v28 }
  0x6b   :  { %1658 = vmatprep.mubr.msk.bf16.mxu0 %vm1830_vm0, %v1829_v0  ;;  %1734 = vmatprep.mubr.msk.bf16.mxu1 %vm1830_vm0, %v1829_v0 }
  0x72   :  { %1659 = vmatmul.mubr.bf16.gmra.mxu0 %v1812_v29  ;;  %1735 = vmatmul.mubr.bf16.gmra.mxu1 %v1813_v30 }
  0x73   :  { %1662 = vmatprep.mubr.msk.bf16.mxu0 %vm1830_vm0, %v1829_v0  ;;  %1738 = vmatprep.mubr.msk.bf16.mxu1 %vm1830_vm0, %v1829_v0 }
  0x7a   :  { %1663 = vmatmul.mubr.bf16.gmra.mxu0 %v1814_v31  ;;  %1739 = vmatmul.mubr.bf16.gmra.mxu1 %v1815_v32 }
  0x7b   :  { %1666 = vmatprep.mubr.msk.bf16.mxu0 %vm1830_vm0, %v1829_v0  ;;  %1742 = vmatprep.mubr.msk.bf16.mxu1 %vm1830_vm0, %v1829_v0 }
  0x82   :  { %1667 = vmatmul.mubr.bf16.gmra.mxu0 %v1816_v33  ;;  %1743 = vmatmul.mubr.bf16.gmra.mxu1 %v1817_v34 }
  0x83   :  { %1670 = vmatprep.mubr.msk.bf16.mxu0 %vm1830_vm0, %v1829_v0  ;;  %1746 = vmatprep.mubr.msk.bf16.mxu1 %vm1830_vm0, %v1829_v0 }
  0x8a   :  { %1671 = vmatmul.mubr.bf16.gmra.mxu0 %v1818_v35  ;;  %1747 = vmatmul.mubr.bf16.gmra.mxu1 %v1819_v36 }
  0x8b   :  { %1674 = vmatprep.mubr.msk.bf16.mxu0 %vm1830_vm0, %v1829_v0  ;;  %1750 = vmatprep.mubr.msk.bf16.mxu1 %vm1830_vm0, %v1829_v0 }
  0x92   :  { %1675 = vmatmul.mubr.bf16.gmra.mxu0 %v1820_v37  ;;  %1751 = vmatmul.mubr.bf16.gmra.mxu1 %v1821_v38 }
  0x93   :  { %1678 = vmatprep.mubr.msk.bf16.mxu0 %vm1830_vm0, %v1829_v0  ;;  %1754 = vmatprep.mubr.msk.bf16.mxu1 %vm1830_vm0, %v1829_v0 }
  0x9a   :  { %1679 = vmatmul.mubr.bf16.gmra.mxu0 %v1822_v39  ;;  %1755 = vmatmul.mubr.bf16.gmra.mxu1 %v1823_v40 }
  0x9b   :  { %1682 = vmatprep.mubr.msk.bf16.mxu0 %vm1830_vm0, %v1829_v0  ;;  %1758 = vmatprep.mubr.msk.bf16.mxu1 %vm1830_vm0, %v1829_v0 }
  0xa2   :  { %1683 = vmatmul.mubr.bf16.gmra.mxu0 %v1824_v41  ;;  %1759 = vmatmul.mubr.bf16.gmra.mxu1 %v1825_v42 }
  0xa3   :  { %1686 = vmatprep.mubr.msk.bf16.mxu0 %vm1830_vm0, %v1829_v0  ;;  %1762 = vmatprep.mubr.msk.bf16.mxu1 %vm1830_vm0, %v1829_v0 }
  0xaa   :  { %1687 = vmatmul.mubr.bf16.gmra.mxu0 %v1826_v43  ;;  %1763 = vmatmul.mubr.bf16.gmra.mxu1 %v1827_v44 }
  0xab   :  { %1690 = vmatprep.mubr.msk.bf16.mxu0 %vm1830_vm0, %v1829_v0 }
  0xb2   :  { %1691 = vmatmul.mubr.bf16.gmra.mxu0 %v1828_v45 }
  0xe2   :  { %v413_v47 = vpop.f32.mrf.mxu0  ;;  %v565_v48 = vpop.f32.mrf.mxu1 }
  0xe3   :  { %v566_v49 = vadd.f32 %v2079_v46, %v565_v48  ;;  %v414_v52 = vadd.f32 %v2079_v46, %v413_v47 }
  0xe4   :  { %v1620_v50 = vpop.f32.mrf.mxu0  ;;  %v1696_v51 = vpop.f32.mrf.mxu1 }
  0xe5   :  { %v745_v56 = vmax.f32 %v566_v49, 0.0  ;;  %v707_v60 = vmax.f32 %v414_v52, 0.0 }
  0xe6   :  { %v416_v53 = vpop.f32.mrf.mxu0  ;;  %v568_v54 = vpop.f32.mrf.mxu1 }
  0xe7   :  { %v417_v55 = vadd.f32 %v2079_v46, %v416_v53  ;;  %v569_v57 = vadd.f32 %v2079_v46, %v568_v54 }
  0xe8   :  { %v1621_v58 = vpop.f32.mrf.mxu0  ;;  %v1697_v59 = vpop.f32.mrf.mxu1 }
  0xe9   :  { %v708_v61 = vmax.f32 %v417_v55, 0.0  ;;  %v746_v62 = vmax.f32 %v569_v57, 0.0 }
  0xea   :  { %v421_v63 = vpop.f32.mrf.mxu0  ;;  %v573_v0 = vpop.f32.mrf.mxu1 }
  0xeb   :  { %v1345_v1 = vpack.c.bf16 %v708_v61, %v707_v60  ;;  %v1440_v2 = vpack.c.bf16 %v746_v62, %v745_v56  ;;  %v574_v3 = vadd.f32 %v2079_v46, %v573_v0  ;;  %v422_v6 = vadd.f32 %v2079_v46, %v421_v63 }
  0xec   :  { %v1624_v4 = vpop.f32.mrf.mxu0  ;;  %v1700_v5 = vpop.f32.mrf.mxu1 }
  0xed   :  { %1346 = vst [vmem:[%s2268_s3] sm:$0xff] %v1345_v1   ;;  %1540 = vst [vmem:[%s2268_s3 + $0x98] sm:$0xff] %v1440_v2   ;;  %v747_v10 = vmax.f32 %v574_v3, 0.0  ;;  %v709_v14 = vmax.f32 %v422_v6, 0.0 }
  0xee   :  { %v424_v7 = vpop.f32.mrf.mxu0  ;;  %v576_v8 = vpop.f32.mrf.mxu1 }
  0xef   :  { %v425_v9 = vadd.f32 %v2079_v46, %v424_v7  ;;  %v577_v11 = vadd.f32 %v2079_v46, %v576_v8 }
  0xf0   :  { %v1625_v12 = vpop.f32.mrf.mxu0  ;;  %v1701_v13 = vpop.f32.mrf.mxu1 }
  0xf1   :  { %v710_v15 = vmax.f32 %v425_v9, 0.0  ;;  %v748_v16 = vmax.f32 %v577_v11, 0.0 }
  0xf2   :  { %v429_v17 = vpop.f32.mrf.mxu0  ;;  %v581_v18 = vpop.f32.mrf.mxu1 }
  0xf3   :  { %v1350_v19 = vpack.c.bf16 %v710_v15, %v709_v14  ;;  %v1445_v20 = vpack.c.bf16 %v748_v16, %v747_v10  ;;  %v582_v21 = vadd.f32 %v2079_v46, %v581_v18  ;;  %v430_v24 = vadd.f32 %v2079_v46, %v429_v17 }
  0xf4   :  { %v1628_v22 = vpop.f32.mrf.mxu0  ;;  %v1704_v23 = vpop.f32.mrf.mxu1 }
  0xf5   :  { %1522 = vst [vmem:[%s2268_s3 + $0x8] sm:$0xff] %v1350_v19   ;;  %1541 = vst [vmem:[%s2268_s3 + $0xa0] sm:$0xff] %v1445_v20   ;;  %v749_v28 = vmax.f32 %v582_v21, 0.0  ;;  %v711_v32 = vmax.f32 %v430_v24, 0.0 }
  0xf6   :  { %v432_v25 = vpop.f32.mrf.mxu0  ;;  %v584_v26 = vpop.f32.mrf.mxu1 }
  0xf7   :  { %v433_v27 = vadd.f32 %v2079_v46, %v432_v25  ;;  %v585_v29 = vadd.f32 %v2079_v46, %v584_v26 }
  0xf8   :  { %v1629_v30 = vpop.f32.mrf.mxu0  ;;  %v1705_v31 = vpop.f32.mrf.mxu1 }
  0xf9   :  { %v712_v33 = vmax.f32 %v433_v27, 0.0  ;;  %v750_v34 = vmax.f32 %v585_v29, 0.0 }
  0xfa   :  { %v437_v35 = vpop.f32.mrf.mxu0  ;;  %v589_v36 = vpop.f32.mrf.mxu1 }
  0xfb   :  { %v1355_v37 = vpack.c.bf16 %v712_v33, %v711_v32  ;;  %v1450_v38 = vpack.c.bf16 %v750_v34, %v749_v28  ;;  %v590_v39 = vadd.f32 %v2079_v46, %v589_v36  ;;  %v438_v42 = vadd.f32 %v2079_v46, %v437_v35 }
  0xfc   :  { %v1632_v40 = vpop.f32.mrf.mxu0  ;;  %v1708_v41 = vpop.f32.mrf.mxu1 }
  0xfd   :  { %1523 = vst [vmem:[%s2268_s3 + $0x10] sm:$0xff] %v1355_v37   ;;  %1542 = vst [vmem:[%s2268_s3 + $0xa8] sm:$0xff] %v1450_v38   ;;  %v751_v47 = vmax.f32 %v590_v39, 0.0  ;;  %v713_v51 = vmax.f32 %v438_v42, 0.0 }
  0xfe   :  { %v440_v43 = vpop.f32.mrf.mxu0  ;;  %v592_v44 = vpop.f32.mrf.mxu1 }
  0xff   :  { %v441_v45 = vadd.f32 %v2079_v46, %v440_v43  ;;  %v593_v48 = vadd.f32 %v2079_v46, %v592_v44 }
 0x100   :  { %v1633_v49 = vpop.f32.mrf.mxu0  ;;  %v1709_v50 = vpop.f32.mrf.mxu1 }
 0x101   :  { %v714_v52 = vmax.f32 %v441_v45, 0.0  ;;  %v752_v53 = vmax.f32 %v593_v48, 0.0 }
 0x102   :  { %v445_v54 = vpop.f32.mrf.mxu0  ;;  %v597_v55 = vpop.f32.mrf.mxu1 }
 0x103   :  { %v1360_v56 = vpack.c.bf16 %v714_v52, %v713_v51  ;;  %v1455_v57 = vpack.c.bf16 %v752_v53, %v751_v47  ;;  %v598_v58 = vadd.f32 %v2079_v46, %v597_v55  ;;  %v446_v61 = vadd.f32 %v2079_v46, %v445_v54 }
 0x104   :  { %v1636_v59 = vpop.f32.mrf.mxu0  ;;  %v1712_v60 = vpop.f32.mrf.mxu1 }
 0x105   :  { %1524 = vst [vmem:[%s2268_s3 + $0x18] sm:$0xff] %v1360_v56   ;;  %1543 = vst [vmem:[%s2268_s3 + $0xb0] sm:$0xff] %v1455_v57   ;;  %v753_v1 = vmax.f32 %v598_v58, 0.0  ;;  %v715_v5 = vmax.f32 %v446_v61, 0.0 }
 0x106   :  { %v448_v62 = vpop.f32.mrf.mxu0  ;;  %v600_v63 = vpop.f32.mrf.mxu1 }
 0x107   :  { %v449_v0 = vadd.f32 %v2079_v46, %v448_v62  ;;  %v601_v2 = vadd.f32 %v2079_v46, %v600_v63 }
 0x108   :  { %v1637_v3 = vpop.f32.mrf.mxu0  ;;  %v1713_v4 = vpop.f32.mrf.mxu1 }
 0x109   :  { %v716_v6 = vmax.f32 %v449_v0, 0.0  ;;  %v754_v7 = vmax.f32 %v601_v2, 0.0 }
 0x10a   :  { %v453_v8 = vpop.f32.mrf.mxu0  ;;  %v605_v9 = vpop.f32.mrf.mxu1 }
 0x10b   :  { %v1365_v10 = vpack.c.bf16 %v716_v6, %v715_v5  ;;  %v1460_v11 = vpack.c.bf16 %v754_v7, %v753_v1  ;;  %v606_v12 = vadd.f32 %v2079_v46, %v605_v9  ;;  %v454_v15 = vadd.f32 %v2079_v46, %v453_v8 }
 0x10c   :  { %v1640_v13 = vpop.f32.mrf.mxu0  ;;  %v1716_v14 = vpop.f32.mrf.mxu1 }
 0x10d   :  { %1525 = vst [vmem:[%s2268_s3 + $0x20] sm:$0xff] %v1365_v10   ;;  %1544 = vst [vmem:[%s2268_s3 + $0xb8] sm:$0xff] %v1460_v11   ;;  %v755_v19 = vmax.f32 %v606_v12, 0.0  ;;  %v717_v23 = vmax.f32 %v454_v15, 0.0 }
 0x10e   :  { %v456_v16 = vpop.f32.mrf.mxu0  ;;  %v608_v17 = vpop.f32.mrf.mxu1 }
 0x10f   :  { %v457_v18 = vadd.f32 %v2079_v46, %v456_v16  ;;  %v609_v20 = vadd.f32 %v2079_v46, %v608_v17 }
 0x110   :  { %v1641_v21 = vpop.f32.mrf.mxu0  ;;  %v1717_v22 = vpop.f32.mrf.mxu1 }
 0x111   :  { %v718_v24 = vmax.f32 %v457_v18, 0.0  ;;  %v756_v25 = vmax.f32 %v609_v20, 0.0 }
 0x112   :  { %v461_v26 = vpop.f32.mrf.mxu0  ;;  %v613_v27 = vpop.f32.mrf.mxu1 }
 0x113   :  { %v1370_v28 = vpack.c.bf16 %v718_v24, %v717_v23  ;;  %v1465_v29 = vpack.c.bf16 %v756_v25, %v755_v19  ;;  %v614_v30 = vadd.f32 %v2079_v46, %v613_v27  ;;  %v462_v33 = vadd.f32 %v2079_v46, %v461_v26 }
 0x114   :  { %v1644_v31 = vpop.f32.mrf.mxu0  ;;  %v1720_v32 = vpop.f32.mrf.mxu1 }
 0x115   :  { %1526 = vst [vmem:[%s2268_s3 + $0x28] sm:$0xff] %v1370_v28   ;;  %1545 = vst [vmem:[%s2268_s3 + $0xc0] sm:$0xff] %v1465_v29   ;;  %v757_v37 = vmax.f32 %v614_v30, 0.0  ;;  %v719_v41 = vmax.f32 %v462_v33, 0.0 }
 0x116   :  { %v464_v34 = vpop.f32.mrf.mxu0  ;;  %v616_v35 = vpop.f32.mrf.mxu1 }
 0x117   :  { %v465_v36 = vadd.f32 %v2079_v46, %v464_v34  ;;  %v617_v38 = vadd.f32 %v2079_v46, %v616_v35 }
 0x118   :  { %v1645_v39 = vpop.f32.mrf.mxu0  ;;  %v1721_v40 = vpop.f32.mrf.mxu1 }
 0x119   :  { %v720_v42 = vmax.f32 %v465_v36, 0.0  ;;  %v758_v43 = vmax.f32 %v617_v38, 0.0 }
 0x11a   :  { %v469_v44 = vpop.f32.mrf.mxu0  ;;  %v621_v45 = vpop.f32.mrf.mxu1 }
 0x11b   :  { %v1375_v47 = vpack.c.bf16 %v720_v42, %v719_v41  ;;  %v1470_v48 = vpack.c.bf16 %v758_v43, %v757_v37  ;;  %v622_v49 = vadd.f32 %v2079_v46, %v621_v45  ;;  %v470_v52 = vadd.f32 %v2079_v46, %v469_v44 }
 0x11c   :  { %v1648_v50 = vpop.f32.mrf.mxu0  ;;  %v1724_v51 = vpop.f32.mrf.mxu1 }
 0x11d   :  { %1527 = vst [vmem:[%s2268_s3 + $0x30] sm:$0xff] %v1375_v47   ;;  %1546 = vst [vmem:[%s2268_s3 + $0xc8] sm:$0xff] %v1470_v48   ;;  %v759_v56 = vmax.f32 %v622_v49, 0.0  ;;  %v721_v60 = vmax.f32 %v470_v52, 0.0 }
 0x11e   :  { %v472_v53 = vpop.f32.mrf.mxu0  ;;  %v624_v54 = vpop.f32.mrf.mxu1 }
 0x11f   :  { %v473_v55 = vadd.f32 %v2079_v46, %v472_v53  ;;  %v625_v57 = vadd.f32 %v2079_v46, %v624_v54 }
 0x120   :  { %v1649_v58 = vpop.f32.mrf.mxu0  ;;  %v1725_v59 = vpop.f32.mrf.mxu1 }
 0x121   :  { %v722_v61 = vmax.f32 %v473_v55, 0.0  ;;  %v760_v62 = vmax.f32 %v625_v57, 0.0 }
 0x122   :  { %v477_v63 = vpop.f32.mrf.mxu0  ;;  %v629_v0 = vpop.f32.mrf.mxu1 }
 0x123   :  { %v1380_v1 = vpack.c.bf16 %v722_v61, %v721_v60  ;;  %v1475_v2 = vpack.c.bf16 %v760_v62, %v759_v56  ;;  %v630_v3 = vadd.f32 %v2079_v46, %v629_v0  ;;  %v478_v6 = vadd.f32 %v2079_v46, %v477_v63 }
 0x124   :  { %v1652_v4 = vpop.f32.mrf.mxu0  ;;  %v1728_v5 = vpop.f32.mrf.mxu1 }
 0x125   :  { %1528 = vst [vmem:[%s2268_s3 + $0x38] sm:$0xff] %v1380_v1   ;;  %1547 = vst [vmem:[%s2268_s3 + $0xd0] sm:$0xff] %v1475_v2   ;;  %v761_v10 = vmax.f32 %v630_v3, 0.0  ;;  %v723_v14 = vmax.f32 %v478_v6, 0.0 }
 0x126   :  { %v480_v7 = vpop.f32.mrf.mxu0  ;;  %v632_v8 = vpop.f32.mrf.mxu1 }
 0x127   :  { %v481_v9 = vadd.f32 %v2079_v46, %v480_v7  ;;  %v633_v11 = vadd.f32 %v2079_v46, %v632_v8 }
 0x128   :  { %v1653_v12 = vpop.f32.mrf.mxu0  ;;  %v1729_v13 = vpop.f32.mrf.mxu1 }
 0x129   :  { %v724_v15 = vmax.f32 %v481_v9, 0.0  ;;  %v762_v16 = vmax.f32 %v633_v11, 0.0 }
 0x12a   :  { %v485_v17 = vpop.f32.mrf.mxu0  ;;  %v637_v18 = vpop.f32.mrf.mxu1 }
 0x12b   :  { %v1385_v19 = vpack.c.bf16 %v724_v15, %v723_v14  ;;  %v1480_v20 = vpack.c.bf16 %v762_v16, %v761_v10  ;;  %v638_v21 = vadd.f32 %v2079_v46, %v637_v18  ;;  %v486_v24 = vadd.f32 %v2079_v46, %v485_v17 }
 0x12c   :  { %v1656_v22 = vpop.f32.mrf.mxu0  ;;  %v1732_v23 = vpop.f32.mrf.mxu1 }
 0x12d   :  { %1529 = vst [vmem:[%s2268_s3 + $0x40] sm:$0xff] %v1385_v19   ;;  %1548 = vst [vmem:[%s2268_s3 + $0xd8] sm:$0xff] %v1480_v20   ;;  %v763_v28 = vmax.f32 %v638_v21, 0.0  ;;  %v725_v32 = vmax.f32 %v486_v24, 0.0 }
 0x12e   :  { %v488_v25 = vpop.f32.mrf.mxu0  ;;  %v640_v26 = vpop.f32.mrf.mxu1 }
 0x12f   :  { %v489_v27 = vadd.f32 %v2079_v46, %v488_v25  ;;  %v641_v29 = vadd.f32 %v2079_v46, %v640_v26 }
 0x130   :  { %v1657_v30 = vpop.f32.mrf.mxu0  ;;  %v1733_v31 = vpop.f32.mrf.mxu1 }
 0x131   :  { %v726_v33 = vmax.f32 %v489_v27, 0.0  ;;  %v764_v34 = vmax.f32 %v641_v29, 0.0 }
 0x132   :  { %v493_v35 = vpop.f32.mrf.mxu0  ;;  %v645_v36 = vpop.f32.mrf.mxu1 }
 0x133   :  { %v1390_v37 = vpack.c.bf16 %v726_v33, %v725_v32  ;;  %v1485_v38 = vpack.c.bf16 %v764_v34, %v763_v28  ;;  %v646_v39 = vadd.f32 %v2079_v46, %v645_v36  ;;  %v494_v42 = vadd.f32 %v2079_v46, %v493_v35 }
 0x134   :  { %v1660_v40 = vpop.f32.mrf.mxu0  ;;  %v1736_v41 = vpop.f32.mrf.mxu1 }
 0x135   :  { %1530 = vst [vmem:[%s2268_s3 + $0x48] sm:$0xff] %v1390_v37   ;;  %1549 = vst [vmem:[%s2268_s3 + $0xe0] sm:$0xff] %v1485_v38   ;;  %v765_v47 = vmax.f32 %v646_v39, 0.0  ;;  %v727_v51 = vmax.f32 %v494_v42, 0.0 }
 0x136   :  { %v496_v43 = vpop.f32.mrf.mxu0  ;;  %v648_v44 = vpop.f32.mrf.mxu1 }
 0x137   :  { %v497_v45 = vadd.f32 %v2079_v46, %v496_v43  ;;  %v649_v48 = vadd.f32 %v2079_v46, %v648_v44 }
 0x138   :  { %v1661_v49 = vpop.f32.mrf.mxu0  ;;  %v1737_v50 = vpop.f32.mrf.mxu1 }
 0x139   :  { %v728_v52 = vmax.f32 %v497_v45, 0.0  ;;  %v766_v53 = vmax.f32 %v649_v48, 0.0 }
 0x13a   :  { %v501_v54 = vpop.f32.mrf.mxu0  ;;  %v653_v55 = vpop.f32.mrf.mxu1 }
 0x13b   :  { %v1395_v56 = vpack.c.bf16 %v728_v52, %v727_v51  ;;  %v1490_v57 = vpack.c.bf16 %v766_v53, %v765_v47  ;;  %v654_v58 = vadd.f32 %v2079_v46, %v653_v55  ;;  %v502_v61 = vadd.f32 %v2079_v46, %v501_v54 }
 0x13c   :  { %v1664_v59 = vpop.f32.mrf.mxu0  ;;  %v1740_v60 = vpop.f32.mrf.mxu1 }
 0x13d   :  { %1531 = vst [vmem:[%s2268_s3 + $0x50] sm:$0xff] %v1395_v56   ;;  %1550 = vst [vmem:[%s2268_s3 + $0xe8] sm:$0xff] %v1490_v57   ;;  %v767_v1 = vmax.f32 %v654_v58, 0.0  ;;  %v729_v5 = vmax.f32 %v502_v61, 0.0 }
 0x13e   :  { %v504_v62 = vpop.f32.mrf.mxu0  ;;  %v656_v63 = vpop.f32.mrf.mxu1 }
 0x13f   :  { %v505_v0 = vadd.f32 %v2079_v46, %v504_v62  ;;  %v657_v2 = vadd.f32 %v2079_v46, %v656_v63 }
 0x140   :  { %v1665_v3 = vpop.f32.mrf.mxu0  ;;  %v1741_v4 = vpop.f32.mrf.mxu1 }
 0x141   :  { %v730_v6 = vmax.f32 %v505_v0, 0.0  ;;  %v768_v7 = vmax.f32 %v657_v2, 0.0 }
 0x142   :  { %v509_v8 = vpop.f32.mrf.mxu0  ;;  %v661_v9 = vpop.f32.mrf.mxu1 }
 0x143   :  { %v1400_v10 = vpack.c.bf16 %v730_v6, %v729_v5  ;;  %v1495_v11 = vpack.c.bf16 %v768_v7, %v767_v1  ;;  %v662_v12 = vadd.f32 %v2079_v46, %v661_v9  ;;  %v510_v15 = vadd.f32 %v2079_v46, %v509_v8 }
 0x144   :  { %v1668_v13 = vpop.f32.mrf.mxu0  ;;  %v1744_v14 = vpop.f32.mrf.mxu1 }
 0x145   :  { %1532 = vst [vmem:[%s2268_s3 + $0x58] sm:$0xff] %v1400_v10   ;;  %1551 = vst [vmem:[%s2268_s3 + $0xf0] sm:$0xff] %v1495_v11   ;;  %v769_v19 = vmax.f32 %v662_v12, 0.0  ;;  %v731_v23 = vmax.f32 %v510_v15, 0.0 }
 0x146   :  { %v512_v16 = vpop.f32.mrf.mxu0  ;;  %v664_v17 = vpop.f32.mrf.mxu1 }
 0x147   :  { %v513_v18 = vadd.f32 %v2079_v46, %v512_v16  ;;  %v665_v20 = vadd.f32 %v2079_v46, %v664_v17 }
 0x148   :  { %v1669_v21 = vpop.f32.mrf.mxu0  ;;  %v1745_v22 = vpop.f32.mrf.mxu1 }
 0x149   :  { %v732_v24 = vmax.f32 %v513_v18, 0.0  ;;  %v770_v25 = vmax.f32 %v665_v20, 0.0 }
 0x14a   :  { %v517_v26 = vpop.f32.mrf.mxu0  ;;  %v669_v27 = vpop.f32.mrf.mxu1 }
 0x14b   :  { %v1405_v28 = vpack.c.bf16 %v732_v24, %v731_v23  ;;  %v1500_v29 = vpack.c.bf16 %v770_v25, %v769_v19  ;;  %v670_v30 = vadd.f32 %v2079_v46, %v669_v27  ;;  %v518_v33 = vadd.f32 %v2079_v46, %v517_v26 }
 0x14c   :  { %v1672_v31 = vpop.f32.mrf.mxu0  ;;  %v1748_v32 = vpop.f32.mrf.mxu1 }
 0x14d   :  { %1533 = vst [vmem:[%s2268_s3 + $0x60] sm:$0xff] %v1405_v28   ;;  %1552 = vst [vmem:[%s2268_s3 + $0xf8] sm:$0xff] %v1500_v29   ;;  %v771_v37 = vmax.f32 %v670_v30, 0.0  ;;  %v733_v41 = vmax.f32 %v518_v33, 0.0 }
 0x14e   :  { %v520_v34 = vpop.f32.mrf.mxu0  ;;  %v672_v35 = vpop.f32.mrf.mxu1 }
 0x14f   :  { %v521_v36 = vadd.f32 %v2079_v46, %v520_v34  ;;  %v673_v38 = vadd.f32 %v2079_v46, %v672_v35 }
 0x150   :  { %v1673_v39 = vpop.f32.mrf.mxu0  ;;  %v1749_v40 = vpop.f32.mrf.mxu1 }
 0x151   :  { %v734_v42 = vmax.f32 %v521_v36, 0.0  ;;  %v772_v43 = vmax.f32 %v673_v38, 0.0 }
 0x152   :  { %v525_v44 = vpop.f32.mrf.mxu0  ;;  %v677_v45 = vpop.f32.mrf.mxu1 }
 0x153   :  { %v1410_v47 = vpack.c.bf16 %v734_v42, %v733_v41  ;;  %v1505_v48 = vpack.c.bf16 %v772_v43, %v771_v37  ;;  %v678_v49 = vadd.f32 %v2079_v46, %v677_v45  ;;  %v526_v52 = vadd.f32 %v2079_v46, %v525_v44 }
 0x154   :  { %v1676_v50 = vpop.f32.mrf.mxu0  ;;  %v1752_v51 = vpop.f32.mrf.mxu1 }
 0x155   :  { %1534 = vst [vmem:[%s2268_s3 + $0x68] sm:$0xff] %v1410_v47   ;;  %1553 = vst [vmem:[%s2268_s3 + $0x100] sm:$0xff] %v1505_v48   ;;  %v773_v56 = vmax.f32 %v678_v49, 0.0  ;;  %v735_v60 = vmax.f32 %v526_v52, 0.0 }
 0x156   :  { %v528_v53 = vpop.f32.mrf.mxu0  ;;  %v680_v54 = vpop.f32.mrf.mxu1 }
 0x157   :  { %v529_v55 = vadd.f32 %v2079_v46, %v528_v53  ;;  %v681_v57 = vadd.f32 %v2079_v46, %v680_v54 }
 0x158   :  { %v1677_v58 = vpop.f32.mrf.mxu0  ;;  %v1753_v59 = vpop.f32.mrf.mxu1 }
 0x159   :  { %v736_v61 = vmax.f32 %v529_v55, 0.0  ;;  %v774_v62 = vmax.f32 %v681_v57, 0.0 }
 0x15a   :  { %v533_v63 = vpop.f32.mrf.mxu0  ;;  %v685_v0 = vpop.f32.mrf.mxu1 }
 0x15b   :  { %v1415_v1 = vpack.c.bf16 %v736_v61, %v735_v60  ;;  %v1510_v2 = vpack.c.bf16 %v774_v62, %v773_v56  ;;  %v686_v3 = vadd.f32 %v2079_v46, %v685_v0  ;;  %v534_v6 = vadd.f32 %v2079_v46, %v533_v63 }
 0x15c   :  { %v1680_v4 = vpop.f32.mrf.mxu0  ;;  %v1756_v5 = vpop.f32.mrf.mxu1 }
 0x15d   :  { %1535 = vst [vmem:[%s2268_s3 + $0x70] sm:$0xff] %v1415_v1   ;;  %1554 = vst [vmem:[%s2268_s3 + $0x108] sm:$0xff] %v1510_v2   ;;  %v775_v10 = vmax.f32 %v686_v3, 0.0  ;;  %v737_v14 = vmax.f32 %v534_v6, 0.0 }
 0x15e   :  { %v536_v7 = vpop.f32.mrf.mxu0  ;;  %v688_v8 = vpop.f32.mrf.mxu1 }
 0x15f   :  { %v537_v9 = vadd.f32 %v2079_v46, %v536_v7  ;;  %v689_v11 = vadd.f32 %v2079_v46, %v688_v8 }
 0x160   :  { %v1681_v12 = vpop.f32.mrf.mxu0  ;;  %v1757_v13 = vpop.f32.mrf.mxu1 }
 0x161   :  { %v738_v15 = vmax.f32 %v537_v9, 0.0  ;;  %v776_v16 = vmax.f32 %v689_v11, 0.0 }
 0x162   :  { %v541_v17 = vpop.f32.mrf.mxu0  ;;  %v693_v18 = vpop.f32.mrf.mxu1 }
 0x163   :  { %v1420_v19 = vpack.c.bf16 %v738_v15, %v737_v14  ;;  %v1515_v20 = vpack.c.bf16 %v776_v16, %v775_v10  ;;  %v694_v21 = vadd.f32 %v2079_v46, %v693_v18  ;;  %v542_v24 = vadd.f32 %v2079_v46, %v541_v17 }
 0x164   :  { %v1684_v22 = vpop.f32.mrf.mxu0  ;;  %v1760_v23 = vpop.f32.mrf.mxu1 }
 0x165   :  { %1536 = vst [vmem:[%s2268_s3 + $0x78] sm:$0xff] %v1420_v19   ;;  %1555 = vst [vmem:[%s2268_s3 + $0x110] sm:$0xff] %v1515_v20   ;;  %v777_v28 = vmax.f32 %v694_v21, 0.0  ;;  %v739_v32 = vmax.f32 %v542_v24, 0.0 }
 0x166   :  { %v544_v25 = vpop.f32.mrf.mxu0  ;;  %v696_v26 = vpop.f32.mrf.mxu1 }
 0x167   :  { %v545_v27 = vadd.f32 %v2079_v46, %v544_v25  ;;  %v697_v29 = vadd.f32 %v2079_v46, %v696_v26 }
 0x168   :  { %v1685_v30 = vpop.f32.mrf.mxu0  ;;  %v1761_v31 = vpop.f32.mrf.mxu1 }
 0x169   :  { %v740_v33 = vmax.f32 %v545_v27, 0.0  ;;  %v778_v34 = vmax.f32 %v697_v29, 0.0 }
 0x16a   :  { %v549_v35 = vpop.f32.mrf.mxu0  ;;  %v701_v36 = vpop.f32.mrf.mxu1 }
 0x16b   :  { %v1425_v37 = vpack.c.bf16 %v740_v33, %v739_v32  ;;  %v1520_v38 = vpack.c.bf16 %v778_v34, %v777_v28  ;;  %v702_v39 = vadd.f32 %v2079_v46, %v701_v36  ;;  %v550_v42 = vadd.f32 %v2079_v46, %v549_v35 }
 0x16c   :  { %v1688_v40 = vpop.f32.mrf.mxu0  ;;  %v1764_v41 = vpop.f32.mrf.mxu1 }
 0x16d   :  { %1537 = vst [vmem:[%s2268_s3 + $0x80] sm:$0xff] %v1425_v37   ;;  %1556 = vst [vmem:[%s2268_s3 + $0x118] sm:$0xff] %v1520_v38   ;;  %v779_v43 = vmax.f32 %v702_v39, 0.0  ;;  %v741_v51 = vmax.f32 %v550_v42, 0.0 }
 0x16e   :  { %v552_v44 = vpop.f32.mrf.mxu0  ;;  %v704_v45 = vpop.f32.mrf.mxu1 }
 0x16f   :  { %v553_v47 = vadd.f32 %v2079_v46, %v552_v44  ;;  %v1341_v48 = vpack.c.bf16 %v779_v43, %v779_v43 }
 0x170   :  { %v1689_v49 = vpop.f32.mrf.mxu0  ;;  %v1765_v50 = vpop.f32.mrf.mxu1 }
 0x171   :  { %v742_v52 = vmax.f32 %v553_v47, 0.0  ;;  %1145 = vst [vmem:[%s2268_s3 + $0x120] sm:$0xf] %v1341_v48 }
 0x172   :  { %v557_v53 = vpop.f32.mrf.mxu0 }
 0x173   :  { %v1430_v54 = vpack.c.bf16 %v742_v52, %v741_v51  ;;  %v558_v56 = vadd.f32 %v2079_v46, %v557_v53 }
 0x174   :  { %v1692_v55 = vpop.f32.mrf.mxu0 }
 0x175   :  { %1538 = vst [vmem:[%s2268_s3 + $0x88] sm:$0xff] %v1430_v54   ;;  %v743_v60 = vmax.f32 %v558_v56, 0.0 }
 0x176   :  { %v560_v57 = vpop.f32.mrf.mxu0 }
 0x177   :  { %v561_v58 = vadd.f32 %v2079_v46, %v560_v57 }
 0x178   :  { %v1693_v59 = vpop.f32.mrf.mxu0 }
 0x179   :  { %v744_v61 = vmax.f32 %v561_v58, 0.0 }
 0x17b   :  { %v1435_v62 = vpack.c.bf16 %v744_v61, %v743_v60 }
 0x17d   :  { %1539 = vst [vmem:[%s2268_s3 + $0x90] sm:$0xff] %v1435_v62  }

// kernel: beta_vae_b_forward.19
= control target key start
LH: loop header
LB: loop body
LE: loop exit
PB: predicated region body
PF: predicated region fallthrough
CT: control target
= control target key end

     0   :  { %s1880_s12 = smov 0   ;;  %s2170_s0 = inlined_call_operand.vmem [shape: bf16[2560,128], index: 0, kind: input, shape index: {}]   ;;  %s2171_s1 = inlined_call_operand.vmem [shape: bf16[128,12], index: 1, kind: input, shape index: {}]   ;;  %s2172_s2 = inlined_call_operand.vmem [shape: f32[1,12], index: 2, kind: input, shape index: {}]   ;;  %s2173_s3 = inlined_call_operand.vmem [shape: f32[2560,12], index: 3, kind: output, shape index: {}]  }
   0x1 LB: > { %s1296_s13 = sadd.s32 4294967295, %s1858_s12   ;;  %p1300_p0 = scmp.ge.s32.totalorder %s1858_s12, 1  ;;  %s1858_s12 = sphi %s1880_s12, %s13_s12  }
   0x2   : > { %p138_p1 = scmp.lt.s32.totalorder %s1858_s12, 6 }
   0x4   : > { %p139_p2 = pnand %p1300_p0, %p138_p1 }
   0x5   : > { %s1301_s16 = sshll.u32 (!%p139_p2), %s1296_s13, 6 }
   0x6   : > { %142 = sbr.rel (%p139_p2) target bundleno = 383 (0x17f), region = 32  ;;  %p163_p3 = scmp.lt.s32.totalorder (!%p139_p2), %s1301_s16, 319 }
   0xb   : > { %v1556_v0 = vld [vmem:[%s2171_s1 + $0x38] sm:$0xff]   ;;  %v1557_v1 = vld [vmem:[%s2171_s1 + $0x30] sm:$0xff]   ;;  %s2175_s16 = smov (!%p163_p3, %s1301_s16), 319  ;;  %v1558_v2 = vld [vmem:[%s2171_s1 + $0x28] sm:$0xff]   ;;  %vm1175_vm0 = vcmask 97280  }
   0xc   : > { %1452 = vmatprep.subr.bf16.mxu0 %v1556_v0  ;;  %1532 = vmatprep.subr.bf16.mxu1 %v1556_v0  ;;  %s1302_s21 = sshll.u32 %s2175_s16, 2  ;;  %v1559_v3 = vld [vmem:[%s2171_s1 + $0x20] sm:$0xff]   ;;  %v1560_v6 = vld [vmem:[%s2171_s1 + $0x18] sm:$0xff]   ;;  %v1561_v7 = vld [vmem:[%s2171_s1 + $0x10] sm:$0xff]   ;;  %s1304_s10 = sshll.u32 %s2175_s16, 3 }
   0xd   : > { %1453 = vmatpush3.bf16.msra.mxu0 %v1556_v0  ;;  %1540 = vmatpush3.bf16.msra.mxu1 %v1556_v0  ;;  %s1903_s24 = scalar_lea.vmem %s2170_s0, %s1302_s21  ;;  %v1562_v8 = vld [vmem:[%s2171_s1 + $0x8] sm:$0xff]   ;;  %v1563_v9 = vld [vmem:[%s2171_s1] sm:$0xff]   ;;  %s1980_s14 = scalar_lea.vmem %s2173_s3, %s1304_s10 }
   0xe   : > { %1454 = vmatprep.subr.bf16.mxu0 %v1557_v1  ;;  %1533 = vmatprep.subr.bf16.mxu1 %v1557_v1  ;;  %v1564_v4 = vld [vmem:[%s1903_s24] sm:$0xff]   ;;  %v1566_v10 = vld [vmem:[%s1903_s24 + $0x8] sm:$0xff]   ;;  %v1568_v12 = vld [vmem:[%s1903_s24 + $0x10] sm:$0xff]  }
   0xf   : > { %v1565_v5 = vld [vmem:[%s1903_s24 + $0x80] sm:$0xff]   ;;  %1468 = vmatprep.mubr.bf16.mxu0 %v1564_v4  ;;  %v1567_v11 = vld [vmem:[%s1903_s24 + $0x88] sm:$0xff]   ;;  %v1569_v13 = vld [vmem:[%s1903_s24 + $0x90] sm:$0xff]  }
  0x10   : > { %1500 = vmatprep.mubr.bf16.mxu1 %v1565_v5  ;;  %v1570_v14 = vld [vmem:[%s1903_s24 + $0x18] sm:$0xff]   ;;  %v1572_v16 = vld [vmem:[%s1903_s24 + $0x20] sm:$0xff]   ;;  %v1574_v18 = vld [vmem:[%s1903_s24 + $0x28] sm:$0xff]  }
  0x11   : > { %1455 = vmatpush3.bf16.msra.mxu0 %v1557_v1  ;;  %1541 = vmatpush3.bf16.msra.mxu1 %v1557_v1  ;;  %v1571_v15 = vld [vmem:[%s1903_s24 + $0x98] sm:$0xff]   ;;  %v1573_v17 = vld [vmem:[%s1903_s24 + $0xa0] sm:$0xff]   ;;  %v1575_v19 = vld [vmem:[%s1903_s24 + $0xa8] sm:$0xff]  }
  0x12   : > { %1456 = vmatprep.subr.bf16.mxu0 %v1558_v2  ;;  %1534 = vmatprep.subr.bf16.mxu1 %v1558_v2  ;;  %v1576_v20 = vld [vmem:[%s1903_s24 + $0x30] sm:$0xff]   ;;  %v1578_v22 = vld [vmem:[%s1903_s24 + $0x38] sm:$0xff]   ;;  %v1580_v24 = vld [vmem:[%s1903_s24 + $0x40] sm:$0xff]  }
  0x13   : > { %v1577_v21 = vld [vmem:[%s1903_s24 + $0xb0] sm:$0xff]   ;;  %v1579_v23 = vld [vmem:[%s1903_s24 + $0xb8] sm:$0xff]   ;;  %v1581_v25 = vld [vmem:[%s1903_s24 + $0xc0] sm:$0xff]  }
  0x14   : > { %v1582_v26 = vld [vmem:[%s1903_s24 + $0x48] sm:$0xff]   ;;  %v1584_v28 = vld [vmem:[%s1903_s24 + $0x50] sm:$0xff]   ;;  %v1586_v30 = vld [vmem:[%s1903_s24 + $0x58] sm:$0xff]  }
  0x15   : > { %1457 = vmatpush3.bf16.msra.mxu0 %v1558_v2  ;;  %1542 = vmatpush3.bf16.msra.mxu1 %v1558_v2  ;;  %v1583_v27 = vld [vmem:[%s1903_s24 + $0xc8] sm:$0xff]   ;;  %v1585_v29 = vld [vmem:[%s1903_s24 + $0xd0] sm:$0xff]   ;;  %v1587_v31 = vld [vmem:[%s1903_s24 + $0xd8] sm:$0xff]  }
  0x16   : > { %1458 = vmatprep.subr.bf16.mxu0 %v1559_v3  ;;  %1535 = vmatprep.subr.bf16.mxu1 %v1559_v3  ;;  %v1588_v32 = vld [vmem:[%s1903_s24 + $0x60] sm:$0xff]   ;;  %v1590_v34 = vld [vmem:[%s1903_s24 + $0x68] sm:$0xff]   ;;  %v1592_v36 = vld [vmem:[%s1903_s24 + $0x70] sm:$0xff]  }
  0x17   : > { %v1589_v33 = vld [vmem:[%s1903_s24 + $0xe0] sm:$0xff]   ;;  %v1591_v35 = vld [vmem:[%s1903_s24 + $0xe8] sm:$0xff]   ;;  %v1593_v37 = vld [vmem:[%s1903_s24 + $0xf0] sm:$0xff]  }
  0x18   : > { %v1594_v38 = vld [vmem:[%s1903_s24 + $0x78] sm:$0xff]   ;;  %v1955_v40 = vld [vmem:[%s2172_s2] ss:$0 sm:$0xff] }
  0x19   : > { %1459 = vmatpush3.bf16.msra.mxu0 %v1559_v3  ;;  %1543 = vmatpush3.bf16.msra.mxu1 %v1559_v3  ;;  %v1595_v39 = vld [vmem:[%s1903_s24 + $0xf8] sm:$0xff]  }
  0x1a   : > { %1460 = vmatprep.subr.bf16.mxu0 %v1560_v6  ;;  %1536 = vmatprep.subr.bf16.mxu1 %v1560_v6 }
  0x1d   : > { %1461 = vmatpush3.bf16.msra.mxu0 %v1560_v6  ;;  %1544 = vmatpush3.bf16.msra.mxu1 %v1560_v6 }
  0x1e   : > { %1462 = vmatprep.subr.bf16.mxu0 %v1561_v7  ;;  %1537 = vmatprep.subr.bf16.mxu1 %v1561_v7 }
  0x21   : > { %1463 = vmatpush3.bf16.msra.mxu0 %v1561_v7  ;;  %1545 = vmatpush3.bf16.msra.mxu1 %v1561_v7 }
  0x22   : > { %1464 = vmatprep.subr.bf16.mxu0 %v1562_v8  ;;  %1538 = vmatprep.subr.bf16.mxu1 %v1562_v8 }
  0x25   : > { %1465 = vmatpush3.bf16.msra.mxu0 %v1562_v8  ;;  %1546 = vmatpush3.bf16.msra.mxu1 %v1562_v8 }
  0x26   : > { %1466 = vmatprep.subr.bf16.mxu0 %v1563_v9  ;;  %1539 = vmatprep.subr.bf16.mxu1 %v1563_v9 }
  0x29   : > { %1467 = vmatpush3.bf16.msra.mxu0 %v1563_v9  ;;  %1547 = vmatpush3.bf16.msra.mxu1 %v1563_v9 }
  0x2c   : > { %1469 = vmatmul.mubr.bf16.vlgmr.msra.gmra.mxu0 %v1566_v10  ;;  %1501 = vmatmul.mubr.bf16.vlgmr.msra.gmra.mxu1 %v1567_v11 }
  0x2d   : > { %1472 = vmatprep.mubr.bf16.mxu0 %v1568_v12  ;;  %1504 = vmatprep.mubr.bf16.mxu1 %v1569_v13 }
  0x34   : > { %1473 = vmatmul.mubr.bf16.gmra.mxu0 %v1570_v14  ;;  %1505 = vmatmul.mubr.bf16.gmra.mxu1 %v1571_v15 }
  0x35   : > { %1476 = vmatprep.mubr.bf16.mxu0 %v1572_v16  ;;  %1508 = vmatprep.mubr.bf16.mxu1 %v1573_v17 }
  0x3c   : > { %1477 = vmatmul.mubr.bf16.gmra.mxu0 %v1574_v18  ;;  %1509 = vmatmul.mubr.bf16.gmra.mxu1 %v1575_v19 }
  0x3d   : > { %1480 = vmatprep.mubr.bf16.mxu0 %v1576_v20  ;;  %1512 = vmatprep.mubr.bf16.mxu1 %v1577_v21 }
  0x44   : > { %1481 = vmatmul.mubr.bf16.gmra.mxu0 %v1578_v22  ;;  %1513 = vmatmul.mubr.bf16.gmra.mxu1 %v1579_v23 }
  0x45   : > { %1484 = vmatprep.mubr.bf16.mxu0 %v1580_v24  ;;  %1516 = vmatprep.mubr.bf16.mxu1 %v1581_v25 }
  0x4c   : > { %1485 = vmatmul.mubr.bf16.gmra.mxu0 %v1582_v26  ;;  %1517 = vmatmul.mubr.bf16.gmra.mxu1 %v1583_v27 }
  0x4d   : > { %1488 = vmatprep.mubr.bf16.mxu0 %v1584_v28  ;;  %1520 = vmatprep.mubr.bf16.mxu1 %v1585_v29 }
  0x54   : > { %1489 = vmatmul.mubr.bf16.gmra.mxu0 %v1586_v30  ;;  %1521 = vmatmul.mubr.bf16.gmra.mxu1 %v1587_v31 }
  0x55   : > { %1492 = vmatprep.mubr.bf16.mxu0 %v1588_v32  ;;  %1524 = vmatprep.mubr.bf16.mxu1 %v1589_v33 }
  0x5c   : > { %1493 = vmatmul.mubr.bf16.gmra.mxu0 %v1590_v34  ;;  %1525 = vmatmul.mubr.bf16.gmra.mxu1 %v1591_v35 }
  0x5d   : > { %1496 = vmatprep.mubr.bf16.mxu0 %v1592_v36  ;;  %1528 = vmatprep.mubr.bf16.mxu1 %v1593_v37 }
  0x64   : > { %1497 = vmatmul.mubr.bf16.gmra.mxu0 %v1594_v38  ;;  %1529 = vmatmul.mubr.bf16.gmra.mxu1 %v1595_v39 }
  0xec   : > { %v1470_v41 = vpop.f32.mrf.mxu0  ;;  %v1502_v42 = vpop.f32.mrf.mxu1 }
  0xed   : > { %v545_v43 = vadd.f32 %v1470_v41, %v1955_v40  ;;  %v673_v44 = vadd.f32 %v1502_v42, %v1955_v40 }
  0xee   : > { %v536_v45 = vpop.f32.mrf.mxu0  ;;  %v664_v46 = vpop.f32.mrf.mxu1 }
  0xef   : > { %v1348_v47 = vmul.f32 -1.442695, %v545_v43  ;;  %v1380_v48 = vmul.f32 -1.442695, %v673_v44  ;;  %v537_v49 = vadd.f32 %v1955_v40, %v536_v45  ;;  %v665_v50 = vadd.f32 %v1955_v40, %v664_v46 }
  0xf0   : > { %v1471_v51 = vpop.f32.mrf.mxu0  ;;  %v1503_v52 = vpop.f32.mrf.mxu1 }
  0xf1   : > { %1596 = vpow2.f32 %v1348_v47  ;;  %v1346_v53 = vmul.f32 -1.442695, %v537_v49  ;;  %v1378_v54 = vmul.f32 -1.442695, %v665_v50  ;;  %v548_v55 = vadd.f32 %v1471_v51, %v1955_v40 }
  0xf2   : > { %1598 = vpow2.f32 %v1380_v48  ;;  %v676_v56 = vadd.f32 %v1503_v52, %v1955_v40  ;;  %v539_v57 = vpop.f32.mrf.mxu0  ;;  %v667_v58 = vpop.f32.mrf.mxu1 }
  0xf3   : > { %1600 = vpow2.f32 %v1346_v53  ;;  %v1349_v59 = vmul.f32 -1.442695, %v548_v55  ;;  %v540_v60 = vadd.f32 %v1955_v40, %v539_v57  ;;  %v668_v61 = vadd.f32 %v1955_v40, %v667_v58 }
  0xf4   : > { %1602 = vpow2.f32 %v1378_v54  ;;  %v1381_v62 = vmul.f32 -1.442695, %v676_v56  ;;  %v1474_v63 = vpop.f32.mrf.mxu0  ;;  %v1506_v0 = vpop.f32.mrf.mxu1 }
  0xf5   : > { %1604 = vpow2.f32 %v1349_v59  ;;  %v1347_v1 = vmul.f32 -1.442695, %v540_v60  ;;  %v1379_v2 = vmul.f32 -1.442695, %v668_v61  ;;  %v561_v3 = vadd.f32 %v1474_v63, %v1955_v40 }
  0xf6   : > { %1606 = vpow2.f32 %v1381_v62  ;;  %v689_v4 = vadd.f32 %v1506_v0, %v1955_v40  ;;  %v552_v5 = vpop.f32.mrf.mxu0  ;;  %v680_v6 = vpop.f32.mrf.mxu1 }
  0xf7   : > { %1608 = vpow2.f32 %v1347_v1  ;;  %v1352_v7 = vmul.f32 -1.442695, %v561_v3  ;;  %v553_v8 = vadd.f32 %v1955_v40, %v552_v5  ;;  %v681_v9 = vadd.f32 %v1955_v40, %v680_v6 }
  0xf8   : > { %1610 = vpow2.f32 %v1379_v2  ;;  %v1384_v10 = vmul.f32 -1.442695, %v689_v4  ;;  %v1475_v11 = vpop.f32.mrf.mxu0  ;;  %v1507_v12 = vpop.f32.mrf.mxu1 }
  0xf9   : > { %1612 = vpow2.f32 %v1352_v7  ;;  %v1350_v13 = vmul.f32 -1.442695, %v553_v8  ;;  %v1382_v14 = vmul.f32 -1.442695, %v681_v9  ;;  %v564_v15 = vadd.f32 %v1475_v11, %v1955_v40 }
  0xfa   : > { %1614 = vpow2.f32 %v1384_v10  ;;  %v692_v16 = vadd.f32 %v1507_v12, %v1955_v40  ;;  %v555_v17 = vpop.f32.mrf.mxu0  ;;  %v683_v18 = vpop.f32.mrf.mxu1 }
  0xfb   : > { %1616 = vpow2.f32 %v1350_v13  ;;  %v1353_v19 = vmul.f32 -1.442695, %v564_v15  ;;  %v556_v20 = vadd.f32 %v1955_v40, %v555_v17  ;;  %v684_v21 = vadd.f32 %v1955_v40, %v683_v18 }
  0xfc   : > { %1618 = vpow2.f32 %v1382_v14  ;;  %v1385_v22 = vmul.f32 -1.442695, %v692_v16  ;;  %v1478_v23 = vpop.f32.mrf.mxu0  ;;  %v1510_v24 = vpop.f32.mrf.mxu1 }
  0xfd   : > { %1620 = vpow2.f32 %v1353_v19  ;;  %v1351_v25 = vmul.f32 -1.442695, %v556_v20  ;;  %v1383_v26 = vmul.f32 -1.442695, %v684_v21  ;;  %v577_v58 = vadd.f32 %v1478_v23, %v1955_v40 }
  0xfe   : > { %v1597_v27 = vpop.eup %1596  ;;  %1622 = vpow2.f32 %v1385_v22  ;;  %v568_v28 = vpop.f32.mrf.mxu0  ;;  %v705_v62 = vadd.f32 %v1510_v24, %v1955_v40 }
  0xff   : > { %v696_v29 = vpop.f32.mrf.mxu1  ;;  %v1599_v30 = vpop.eup %1598  ;;  %v985_v31 = vadd.f32 1.0, %v1597_v27  ;;  %1624 = vpow2.f32 %v1351_v25  ;;  %v569_v1 = vadd.f32 %v1955_v40, %v568_v28  ;;  %v1356_v8 = vmul.f32 -1.442695, %v577_v58 }
 0x100   : > { %v1601_v32 = vpop.eup %1600  ;;  %v1017_v33 = vadd.f32 1.0, %v1599_v30  ;;  %1626 = vpow2.f32 %v1383_v26  ;;  %v1479_v34 = vpop.f32.mrf.mxu0  ;;  %v697_v4 = vadd.f32 %v1955_v40, %v696_v29  ;;  %v1388_v13 = vmul.f32 -1.442695, %v705_v62 }
 0x101   : > { %v1603_v35 = vpop.eup %1602  ;;  %1628 = vrcp.f32 %v985_v31  ;;  %v983_v36 = vadd.f32 1.0, %v1601_v32  ;;  %v1511_v37 = vpop.f32.mrf.mxu1  ;;  %v580_v9 = vadd.f32 %v1479_v34, %v1955_v40  ;;  %v1354_v16 = vmul.f32 -1.442695, %v569_v1 }
 0x102   : > { %v1605_v38 = vpop.eup %1604  ;;  %1630 = vrcp.f32 %v1017_v33  ;;  %v1015_v39 = vadd.f32 1.0, %v1603_v35  ;;  %v571_v45 = vpop.f32.mrf.mxu0  ;;  %v708_v14 = vadd.f32 %v1511_v37, %v1955_v40  ;;  %v1386_v19 = vmul.f32 -1.442695, %v697_v4 }
 0x103   : > { %v1607_v41 = vpop.eup %1606  ;;  %1632 = vrcp.f32 %v983_v36  ;;  %v986_v42 = vadd.f32 1.0, %v1605_v38  ;;  %v699_v48 = vpop.f32.mrf.mxu1  ;;  %v572_v17 = vadd.f32 %v1955_v40, %v571_v45  ;;  %v1357_v23 = vmul.f32 -1.442695, %v580_v9 }
 0x104   : > { %v1609_v43 = vpop.eup %1608  ;;  %1634 = vrcp.f32 %v1015_v39  ;;  %v1018_v44 = vadd.f32 1.0, %v1607_v41  ;;  %v1482_v55 = vpop.f32.mrf.mxu0  ;;  %v700_v20 = vadd.f32 %v1955_v40, %v699_v48  ;;  %v1389_v27 = vmul.f32 -1.442695, %v708_v14 }
 0x105   : > { %v1611_v46 = vpop.eup %1610  ;;  %1636 = vrcp.f32 %v986_v42  ;;  %v984_v47 = vadd.f32 1.0, %v1609_v43  ;;  %v1514_v59 = vpop.f32.mrf.mxu1  ;;  %v593_v24 = vadd.f32 %v1482_v55, %v1955_v40  ;;  %v1355_v30 = vmul.f32 -1.442695, %v572_v17 }
 0x106   : > { %v1613_v49 = vpop.eup %1612  ;;  %1638 = vrcp.f32 %v1018_v44  ;;  %v1016_v50 = vadd.f32 1.0, %v1611_v46  ;;  %v584_v5 = vpop.f32.mrf.mxu0  ;;  %v721_v28 = vadd.f32 %v1514_v59, %v1955_v40  ;;  %v1387_v33 = vmul.f32 -1.442695, %v700_v20 }
 0x107   : > { %v1615_v51 = vpop.eup %1614  ;;  %1640 = vrcp.f32 %v984_v47  ;;  %v989_v52 = vadd.f32 1.0, %v1613_v49  ;;  %v712_v10 = vpop.f32.mrf.mxu1  ;;  %v585_v31 = vadd.f32 %v1955_v40, %v584_v5  ;;  %v1360_v37 = vmul.f32 -1.442695, %v593_v24 }
 0x108   : > { %v1617_v53 = vpop.eup %1616  ;;  %1642 = vrcp.f32 %v1016_v50  ;;  %v1021_v54 = vadd.f32 1.0, %v1615_v51  ;;  %v1483_v21 = vpop.f32.mrf.mxu0  ;;  %v713_v34 = vadd.f32 %v1955_v40, %v712_v10  ;;  %v1392_v42 = vmul.f32 -1.442695, %v721_v28 }
 0x109   : > { %v1619_v56 = vpop.eup %1618  ;;  %1644 = vrcp.f32 %v989_v52  ;;  %v987_v57 = vadd.f32 1.0, %v1617_v53  ;;  %v1515_v25 = vpop.f32.mrf.mxu1  ;;  %v596_v38 = vadd.f32 %v1483_v21, %v1955_v40  ;;  %v1358_v45 = vmul.f32 -1.442695, %v585_v31 }
 0x10a   : > { %v1621_v60 = vpop.eup %1620  ;;  %1646 = vrcp.f32 %v1021_v54  ;;  %v1019_v61 = vadd.f32 1.0, %v1619_v56  ;;  %v587_v35 = vpop.f32.mrf.mxu0  ;;  %v724_v43 = vadd.f32 %v1515_v25, %v1955_v40  ;;  %v1390_v48 = vmul.f32 -1.442695, %v713_v34 }
 0x10b   : > { %v1623_v63 = vpop.eup %1622  ;;  %1648 = vrcp.f32 %v987_v57  ;;  %v990_v0 = vadd.f32 1.0, %v1621_v60  ;;  %v715_v39 = vpop.f32.mrf.mxu1  ;;  %v588_v46 = vadd.f32 %v1955_v40, %v587_v35  ;;  %v1361_v52 = vmul.f32 -1.442695, %v596_v38 }
 0x10c   : > { %v1625_v2 = vpop.eup %1624  ;;  %1650 = vrcp.f32 %v1019_v61  ;;  %v1022_v3 = vadd.f32 1.0, %v1623_v63  ;;  %v716_v49 = vadd.f32 %v1955_v40, %v715_v39  ;;  %v2015_v50 = vpop.f32.mrf.mxu0  ;;  %v1393_v55 = vmul.f32 -1.442695, %v724_v43 }
 0x10d   : > { %v1627_v6 = vpop.eup %1626  ;;  %1652 = vrcp.f32 %v990_v0  ;;  %v988_v7 = vadd.f32 1.0, %v1625_v2  ;;  %v2019_v53 = vpop.f32.mrf.mxu1  ;;  %v1359_v57 = vmul.f32 -1.442695, %v588_v46 }
 0x10e   : > { %v1629_v11 = vpop.eup %1628  ;;  %1654 = vrcp.f32 %v1022_v3  ;;  %v1020_v12 = vadd.f32 1.0, %v1627_v6  ;;  %v1391_v59 = vmul.f32 -1.442695, %v716_v49  ;;  %v600_v60 = vpop.f32.mrf.mxu0  ;;  %v737_v31 = vadd.f32 %v2019_v53, %v1955_v40 }
 0x10f   : > { %v1631_v15 = vpop.eup %1630  ;;  %1178 = vst.msk [vmem:[%s1980_s14 + $0x10] sm:$0xff] %vm1175_vm0, %v1629_v11  ;;  %1656 = vrcp.f32 %v988_v7  ;;  %v728_v62 = vpop.f32.mrf.mxu1  ;;  %v601_v34 = vadd.f32 %v1955_v40, %v600_v60 }
 0x110   : > { %v1633_v18 = vpop.eup %1632  ;;  %1210 = vst.msk [vmem:[%s1980_s14 + $0x110] sm:$0xff] %vm1175_vm0, %v1631_v15  ;;  %1658 = vrcp.f32 %v1020_v12  ;;  %v1487_v4 = vpop.f32.mrf.mxu0 }
 0x111   : > { %v1635_v22 = vpop.eup %1634  ;;  %1176 = vst.msk [vmem:[%s1980_s14] sm:$0xff] %vm1175_vm0, %v1633_v18  ;;  %1660 = vpow2.f32 %v1356_v8  ;;  %v1519_v7 = vpop.f32.mrf.mxu1  ;;  %v612_v43 = vadd.f32 %v1487_v4, %v1955_v40 }
 0x112   : > { %v1637_v26 = vpop.eup %1636  ;;  %1208 = vst.msk [vmem:[%s1980_s14 + $0x100] sm:$0xff] %vm1175_vm0, %v1635_v22  ;;  %1662 = vpow2.f32 %v1388_v13  ;;  %v603_v14 = vpop.f32.mrf.mxu0 }
 0x113   : > { %v1639_v29 = vpop.eup %1638  ;;  %1179 = vst.msk [vmem:[%s1980_s14 + $0x18] sm:$0xff] %vm1175_vm0, %v1637_v26  ;;  %1664 = vpow2.f32 %v1354_v16  ;;  %v731_v17 = vpop.f32.mrf.mxu1 }
 0x114   : > { %v1641_v32 = vpop.eup %1640  ;;  %1211 = vst.msk [vmem:[%s1980_s14 + $0x118] sm:$0xff] %vm1175_vm0, %v1639_v29  ;;  %1666 = vpow2.f32 %v1386_v19  ;;  %v1490_v24 = vpop.f32.mrf.mxu0 }
 0x115   : > { %v1643_v36 = vpop.eup %1642  ;;  %1177 = vst.msk [vmem:[%s1980_s14 + $0x8] sm:$0xff] %vm1175_vm0, %v1641_v32  ;;  %1668 = vpow2.f32 %v1357_v23  ;;  %v1522_v28 = vpop.f32.mrf.mxu1 }
 0x116   : > { %v1645_v41 = vpop.eup %1644  ;;  %1209 = vst.msk [vmem:[%s1980_s14 + $0x108] sm:$0xff] %vm1175_vm0, %v1643_v36  ;;  %1670 = vpow2.f32 %v1389_v27  ;;  %v609_v27 = vadd.f32 %v2015_v50, %v1955_v40  ;;  %v616_v38 = vpop.f32.mrf.mxu0  ;;  %v1362_v50 = vmul.f32 -1.442695, %v601_v34 }
 0x117   : > { %v1647_v44 = vpop.eup %1646  ;;  %1182 = vst.msk [vmem:[%s1980_s14 + $0x30] sm:$0xff] %vm1175_vm0, %v1645_v41  ;;  %1672 = vpow2.f32 %v1355_v30 }
 0x118   : > { %v1649_v47 = vpop.eup %1648  ;;  %1214 = vst.msk [vmem:[%s1980_s14 + $0x130] sm:$0xff] %vm1175_vm0, %v1647_v44  ;;  %1674 = vpow2.f32 %v1387_v33  ;;  %v744_v44 = vpop.f32.mrf.mxu1 }
 0x119   : > { %v1651_v51 = vpop.eup %1650  ;;  %1180 = vst.msk [vmem:[%s1980_s14 + $0x20] sm:$0xff] %vm1175_vm0, %v1649_v47  ;;  %1676 = vpow2.f32 %v1360_v37  ;;  %v729_v37 = vadd.f32 %v1955_v40, %v728_v62  ;;  %v1396_v47 = vmul.f32 -1.442695, %v737_v31  ;;  %v753_v62 = vadd.f32 %v1522_v28, %v1955_v40 }
 0x11a   : > { %v1653_v54 = vpop.eup %1652  ;;  %1212 = vst.msk [vmem:[%s1980_s14 + $0x120] sm:$0xff] %vm1175_vm0, %v1651_v51  ;;  %1678 = vpow2.f32 %v1392_v42  ;;  %v1364_v42 = vmul.f32 -1.442695, %v609_v27  ;;  %v604_v51 = vadd.f32 %v1955_v40, %v603_v14  ;;  %v745_v4 = vadd.f32 %v1955_v40, %v744_v44 }
 0x11b   : > { %v1655_v56 = vpop.eup %1654  ;;  %1183 = vst.msk [vmem:[%s1980_s14 + $0x38] sm:$0xff] %vm1175_vm0, %v1653_v54  ;;  %1680 = vpow2.f32 %v1358_v45  ;;  %v1394_v53 = vmul.f32 -1.442695, %v729_v37  ;;  %v732_v54 = vadd.f32 %v1955_v40, %v731_v17 }
 0x11c   : > { %v1657_v58 = vpop.eup %1656  ;;  %1215 = vst.msk [vmem:[%s1980_s14 + $0x138] sm:$0xff] %vm1175_vm0, %v1655_v56  ;;  %1682 = vpow2.f32 %v1390_v48  ;;  %v740_v48 = vadd.f32 %v1519_v7, %v1955_v40  ;;  %v1398_v17 = vmul.f32 -1.442695, %v745_v4 }
 0x11d   : > { %v1659_v61 = vpop.eup %1658  ;;  %1181 = vst.msk [vmem:[%s1980_s14 + $0x28] sm:$0xff] %vm1175_vm0, %v1657_v58  ;;  %1684 = vpow2.f32 %v1361_v52  ;;  %v625_v58 = vadd.f32 %v1490_v24, %v1955_v40 }
 0x11e   : > { %v1661_v63 = vpop.eup %1660  ;;  %1213 = vst.msk [vmem:[%s1980_s14 + $0x128] sm:$0xff] %vm1175_vm0, %v1659_v61  ;;  %1686 = vpow2.f32 %v1393_v55  ;;  %v1491_v55 = vpop.f32.mrf.mxu0  ;;  %v1397_v61 = vmul.f32 -1.442695, %v740_v48 }
 0x11f   : > { %v1663_v0 = vpop.eup %1662  ;;  %v993_v1 = vadd.f32 1.0, %v1661_v63  ;;  %1688 = vpow2.f32 %v1359_v57  ;;  %v1365_v57 = vmul.f32 -1.442695, %v612_v43  ;;  %v1368_v7 = vmul.f32 -1.442695, %v625_v58 }
 0x120   : > { %v1665_v2 = vpop.eup %1664  ;;  %v1025_v3 = vadd.f32 1.0, %v1663_v0  ;;  %1690 = vpow2.f32 %v1391_v59  ;;  %v1523_v59 = vpop.f32.mrf.mxu1  ;;  %v1363_v0 = vmul.f32 -1.442695, %v604_v51 }
 0x121   : > { %v1667_v5 = vpop.eup %1666  ;;  %1692 = vrcp.f32 %v993_v1  ;;  %v991_v6 = vadd.f32 1.0, %v1665_v2  ;;  %v617_v1 = vadd.f32 %v1955_v40, %v616_v38 }
 0x122   : > { %v1669_v8 = vpop.eup %1668  ;;  %1694 = vrcp.f32 %v1025_v3  ;;  %v1023_v9 = vadd.f32 1.0, %v1667_v5  ;;  %v1395_v3 = vmul.f32 -1.442695, %v732_v54  ;;  %v619_v5 = vpop.f32.mrf.mxu0 }
 0x123   : > { %v1671_v10 = vpop.eup %1670  ;;  %1696 = vrcp.f32 %v991_v6  ;;  %v994_v11 = vadd.f32 1.0, %v1669_v8  ;;  %v628_v8 = vadd.f32 %v1491_v55, %v1955_v40  ;;  %v1366_v14 = vmul.f32 -1.442695, %v617_v1 }
 0x124   : > { %v1673_v12 = vpop.eup %1672  ;;  %1698 = vrcp.f32 %v1023_v9  ;;  %v1026_v13 = vadd.f32 1.0, %v1671_v10  ;;  %v747_v9 = vpop.f32.mrf.mxu1 }
 0x125   : > { %v1675_v15 = vpop.eup %1674  ;;  %1700 = vrcp.f32 %v994_v11  ;;  %v992_v16 = vadd.f32 1.0, %v1673_v12  ;;  %v1400_v11 = vmul.f32 -1.442695, %v753_v62  ;;  %v756_v12 = vadd.f32 %v1523_v59, %v1955_v40 }
 0x126   : > { %v1677_v18 = vpop.eup %1676  ;;  %1702 = vrcp.f32 %v1026_v13  ;;  %v1024_v19 = vadd.f32 1.0, %v1675_v15  ;;  %v620_v15 = vadd.f32 %v1955_v40, %v619_v5 }
 0x127   : > { %v1679_v20 = vpop.eup %1678  ;;  %1704 = vrcp.f32 %v992_v16  ;;  %v997_v21 = vadd.f32 1.0, %v1677_v18  ;;  %v748_v18 = vadd.f32 %v1955_v40, %v747_v9  ;;  %v1401_v24 = vmul.f32 -1.442695, %v756_v12 }
 0x128   : > { %v1681_v22 = vpop.eup %1680  ;;  %1706 = vrcp.f32 %v1024_v19  ;;  %v1029_v23 = vadd.f32 1.0, %v1679_v20  ;;  %v2069_v19 = vpop.f32.mrf.mxu0 }
 0x129   : > { %v1683_v25 = vpop.eup %1682  ;;  %1708 = vrcp.f32 %v997_v21  ;;  %v995_v26 = vadd.f32 1.0, %v1681_v22  ;;  %v1369_v21 = vmul.f32 -1.442695, %v628_v8  ;;  %v2073_v22 = vpop.f32.mrf.mxu1  ;;  %v1399_v28 = vmul.f32 -1.442695, %v748_v18 }
 0x12a   : > { %v1685_v29 = vpop.eup %1684  ;;  %1710 = vrcp.f32 %v1029_v23  ;;  %v1027_v30 = vadd.f32 1.0, %v1683_v25  ;;  %v769_v1 = vadd.f32 %v2073_v22, %v1955_v40 }
 0x12b   : > { %v1687_v32 = vpop.eup %1686  ;;  %1712 = vrcp.f32 %v995_v26  ;;  %v998_v33 = vadd.f32 1.0, %v1685_v29  ;;  %v1367_v26 = vmul.f32 -1.442695, %v620_v15  ;;  %v632_v29 = vpop.f32.mrf.mxu0 }
 0x12c   : > { %v1689_v35 = vpop.eup %1688  ;;  %1714 = vrcp.f32 %v1027_v30  ;;  %v1030_v36 = vadd.f32 1.0, %v1687_v32  ;;  %v760_v31 = vpop.f32.mrf.mxu1  ;;  %v633_v4 = vadd.f32 %v1955_v40, %v632_v29 }
 0x12d   : > { %v1691_v39 = vpop.eup %1690  ;;  %1716 = vrcp.f32 %v998_v33  ;;  %v996_v41 = vadd.f32 1.0, %v1689_v35  ;;  %v1495_v37 = vpop.f32.mrf.mxu0 }
 0x12e   : > { %v1693_v45 = vpop.eup %1692  ;;  %1718 = vrcp.f32 %v1030_v36  ;;  %v1028_v46 = vadd.f32 1.0, %v1691_v39  ;;  %v644_v12 = vadd.f32 %v1495_v37, %v1955_v40 }
 0x12f   : > { %v1695_v49 = vpop.eup %1694  ;;  %1186 = vst.msk [vmem:[%s1980_s14 + $0x50] sm:$0xff] %vm1175_vm0, %v1693_v45  ;;  %1720 = vrcp.f32 %v996_v41  ;;  %v1527_v41 = vpop.f32.mrf.mxu1 }
 0x130   : > { %v1697_v52 = vpop.eup %1696  ;;  %1218 = vst.msk [vmem:[%s1980_s14 + $0x150] sm:$0xff] %vm1175_vm0, %v1695_v49  ;;  %1722 = vrcp.f32 %v1028_v46  ;;  %v635_v48 = vpop.f32.mrf.mxu0 }
 0x131   : > { %v1699_v56 = vpop.eup %1698  ;;  %1184 = vst.msk [vmem:[%s1980_s14 + $0x40] sm:$0xff] %vm1175_vm0, %v1697_v52  ;;  %1724 = vpow2.f32 %v1364_v42  ;;  %v763_v51 = vpop.f32.mrf.mxu1 }
 0x132   : > { %v1701_v60 = vpop.eup %1700  ;;  %1216 = vst.msk [vmem:[%s1980_s14 + $0x140] sm:$0xff] %vm1175_vm0, %v1699_v56  ;;  %1726 = vpow2.f32 %v1396_v47  ;;  %v1498_v58 = vpop.f32.mrf.mxu0 }
 0x133   : > { %v1703_v63 = vpop.eup %1702  ;;  %1187 = vst.msk [vmem:[%s1980_s14 + $0x58] sm:$0xff] %vm1175_vm0, %v1701_v60  ;;  %1728 = vpow2.f32 %v1362_v50  ;;  %v1530_v62 = vpop.f32.mrf.mxu1 }
 0x134   : > { %v1705_v2 = vpop.eup %1704  ;;  %1219 = vst.msk [vmem:[%s1980_s14 + $0x158] sm:$0xff] %vm1175_vm0, %v1703_v63  ;;  %1730 = vpow2.f32 %v1394_v53  ;;  %v648_v8 = vpop.f32.mrf.mxu0 }
 0x135   : > { %v1707_v6 = vpop.eup %1706  ;;  %1185 = vst.msk [vmem:[%s1980_s14 + $0x48] sm:$0xff] %vm1175_vm0, %v1705_v2  ;;  %1732 = vpow2.f32 %v1365_v57 }
 0x136   : > { %v1709_v10 = vpop.eup %1708  ;;  %1217 = vst.msk [vmem:[%s1980_s14 + $0x148] sm:$0xff] %vm1175_vm0, %v1707_v6  ;;  %1734 = vpow2.f32 %v1397_v61  ;;  %v641_v61 = vadd.f32 %v2069_v19, %v1955_v40  ;;  %v1370_v19 = vmul.f32 -1.442695, %v633_v4 }
 0x137   : > { %v1711_v13 = vpop.eup %1710  ;;  %1190 = vst.msk [vmem:[%s1980_s14 + $0x70] sm:$0xff] %vm1175_vm0, %v1709_v10  ;;  %1736 = vpow2.f32 %v1363_v0 }
 0x138   : > { %v1713_v16 = vpop.eup %1712  ;;  %1222 = vst.msk [vmem:[%s1980_s14 + $0x170] sm:$0xff] %vm1175_vm0, %v1711_v13  ;;  %1738 = vpow2.f32 %v1395_v3  ;;  %v776_v13 = vpop.f32.mrf.mxu1 }
 0x139   : > { %v1715_v20 = vpop.eup %1714  ;;  %1188 = vst.msk [vmem:[%s1980_s14 + $0x60] sm:$0xff] %vm1175_vm0, %v1713_v16  ;;  %1740 = vpow2.f32 %v1368_v7  ;;  %v761_v7 = vadd.f32 %v1955_v40, %v760_v31  ;;  %v1404_v16 = vmul.f32 -1.442695, %v769_v1  ;;  %v785_v31 = vadd.f32 %v1530_v62, %v1955_v40 }
 0x13a   : > { %v1717_v23 = vpop.eup %1716  ;;  %1220 = vst.msk [vmem:[%s1980_s14 + $0x160] sm:$0xff] %vm1175_vm0, %v1715_v20  ;;  %1742 = vpow2.f32 %v1400_v11  ;;  %v1372_v11 = vmul.f32 -1.442695, %v641_v61  ;;  %v636_v20 = vadd.f32 %v1955_v40, %v635_v48  ;;  %v777_v37 = vadd.f32 %v1955_v40, %v776_v13 }
 0x13b   : > { %v1719_v25 = vpop.eup %1718  ;;  %1191 = vst.msk [vmem:[%s1980_s14 + $0x78] sm:$0xff] %vm1175_vm0, %v1717_v23  ;;  %1744 = vpow2.f32 %v1366_v14  ;;  %v1402_v22 = vmul.f32 -1.442695, %v761_v7  ;;  %v764_v23 = vadd.f32 %v1955_v40, %v763_v51 }
 0x13c   : > { %v1721_v27 = vpop.eup %1720  ;;  %1223 = vst.msk [vmem:[%s1980_s14 + $0x178] sm:$0xff] %vm1175_vm0, %v1719_v25  ;;  %1746 = vpow2.f32 %v1398_v17  ;;  %v772_v17 = vadd.f32 %v1527_v41, %v1955_v40  ;;  %v1406_v51 = vmul.f32 -1.442695, %v777_v37 }
 0x13d   : > { %v1723_v30 = vpop.eup %1722  ;;  %1189 = vst.msk [vmem:[%s1980_s14 + $0x68] sm:$0xff] %vm1175_vm0, %v1721_v27  ;;  %1748 = vpow2.f32 %v1369_v21  ;;  %v657_v27 = vadd.f32 %v1498_v58, %v1955_v40 }
 0x13e   : > { %v1725_v32 = vpop.eup %1724  ;;  %1221 = vst.msk [vmem:[%s1980_s14 + $0x168] sm:$0xff] %vm1175_vm0, %v1723_v30  ;;  %1750 = vpow2.f32 %v1401_v24  ;;  %v1499_v24 = vpop.f32.mrf.mxu0  ;;  %v1405_v30 = vmul.f32 -1.442695, %v772_v17 }
 0x13f   : > { %v1727_v33 = vpop.eup %1726  ;;  %v1001_v34 = vadd.f32 1.0, %v1725_v32  ;;  %1752 = vpow2.f32 %v1367_v26  ;;  %v1373_v26 = vmul.f32 -1.442695, %v644_v12  ;;  %v1376_v41 = vmul.f32 -1.442695, %v657_v27 }
 0x140   : > { %v1729_v35 = vpop.eup %1728  ;;  %v1033_v36 = vadd.f32 1.0, %v1727_v33  ;;  %1754 = vpow2.f32 %v1399_v28  ;;  %v1531_v28 = vpop.f32.mrf.mxu1  ;;  %v1371_v33 = vmul.f32 -1.442695, %v636_v20 }
 0x141   : > { %v1731_v38 = vpop.eup %1730  ;;  %1756 = vrcp.f32 %v1001_v34  ;;  %v999_v39 = vadd.f32 1.0, %v1729_v35  ;;  %v649_v34 = vadd.f32 %v1955_v40, %v648_v8 }
 0x142   : > { %v1733_v42 = vpop.eup %1732  ;;  %1758 = vrcp.f32 %v1033_v36  ;;  %v1031_v43 = vadd.f32 1.0, %v1731_v38  ;;  %v1403_v36 = vmul.f32 -1.442695, %v764_v23  ;;  %v651_v38 = vpop.f32.mrf.mxu0 }
 0x143   : > { %v1735_v44 = vpop.eup %1734  ;;  %1760 = vrcp.f32 %v999_v39  ;;  %v1002_v45 = vadd.f32 1.0, %v1733_v42  ;;  %v660_v42 = vadd.f32 %v1499_v24, %v1955_v40  ;;  %v1374_v48 = vmul.f32 -1.442695, %v649_v34 }
 0x144   : > { %v1737_v46 = vpop.eup %1736  ;;  %1762 = vrcp.f32 %v1031_v43  ;;  %v1034_v47 = vadd.f32 1.0, %v1735_v44  ;;  %v779_v43 = vpop.f32.mrf.mxu1 }
 0x145   : > { %v1739_v49 = vpop.eup %1738  ;;  %1764 = vrcp.f32 %v1002_v45  ;;  %v1000_v50 = vadd.f32 1.0, %v1737_v46  ;;  %v1408_v45 = vmul.f32 -1.442695, %v785_v31  ;;  %v788_v46 = vadd.f32 %v1531_v28, %v1955_v40 }
 0x146   : > { %v1741_v52 = vpop.eup %1740  ;;  %1766 = vrcp.f32 %v1034_v47  ;;  %v1032_v53 = vadd.f32 1.0, %v1739_v49  ;;  %v652_v49 = vadd.f32 %v1955_v40, %v651_v38 }
 0x147   : > { %v1743_v54 = vpop.eup %1742  ;;  %1768 = vrcp.f32 %v1000_v50  ;;  %v1005_v55 = vadd.f32 1.0, %v1741_v52  ;;  %v780_v52 = vadd.f32 %v1955_v40, %v779_v43 }
 0x148   : > { %v1745_v56 = vpop.eup %1744  ;;  %1770 = vrcp.f32 %v1032_v53  ;;  %v1037_v57 = vadd.f32 1.0, %v1743_v54  ;;  %v1377_v54 = vmul.f32 -1.442695, %v660_v42  ;;  %v1375_v58 = vmul.f32 -1.442695, %v652_v49 }
 0x149   : > { %v1747_v59 = vpop.eup %1746  ;;  %1772 = vrcp.f32 %v1005_v55  ;;  %v1003_v60 = vadd.f32 1.0, %v1745_v56  ;;  %v1409_v56 = vmul.f32 -1.442695, %v788_v46  ;;  %v1407_v40 = vmul.f32 -1.442695, %v780_v52 }
 0x14a   : > { %v1749_v63 = vpop.eup %1748  ;;  %1774 = vrcp.f32 %v1037_v57  ;;  %v1035_v0 = vadd.f32 1.0, %v1747_v59 }
 0x14b   : > { %v1751_v2 = vpop.eup %1750  ;;  %1776 = vrcp.f32 %v1003_v60  ;;  %v1006_v3 = vadd.f32 1.0, %v1749_v63 }
 0x14c   : > { %v1753_v5 = vpop.eup %1752  ;;  %1778 = vrcp.f32 %v1035_v0  ;;  %v1038_v6 = vadd.f32 1.0, %v1751_v2 }
 0x14d   : > { %v1755_v9 = vpop.eup %1754  ;;  %1780 = vrcp.f32 %v1006_v3  ;;  %v1004_v10 = vadd.f32 1.0, %v1753_v5 }
 0x14e   : > { %v1757_v14 = vpop.eup %1756  ;;  %1782 = vrcp.f32 %v1038_v6  ;;  %v1036_v15 = vadd.f32 1.0, %v1755_v9 }
 0x14f   : > { %v1759_v18 = vpop.eup %1758  ;;  %1194 = vst.msk [vmem:[%s1980_s14 + $0x90] sm:$0xff] %vm1175_vm0, %v1757_v14  ;;  %1784 = vrcp.f32 %v1004_v10 }
 0x150   : > { %v1761_v21 = vpop.eup %1760  ;;  %1226 = vst.msk [vmem:[%s1980_s14 + $0x190] sm:$0xff] %vm1175_vm0, %v1759_v18  ;;  %1786 = vrcp.f32 %v1036_v15 }
 0x151   : > { %v1763_v25 = vpop.eup %1762  ;;  %1192 = vst.msk [vmem:[%s1980_s14 + $0x80] sm:$0xff] %vm1175_vm0, %v1761_v21  ;;  %1788 = vpow2.f32 %v1372_v11 }
 0x152   : > { %v1765_v29 = vpop.eup %1764  ;;  %1224 = vst.msk [vmem:[%s1980_s14 + $0x180] sm:$0xff] %vm1175_vm0, %v1763_v25  ;;  %1790 = vpow2.f32 %v1404_v16 }
 0x153   : > { %v1767_v32 = vpop.eup %1766  ;;  %1195 = vst.msk [vmem:[%s1980_s14 + $0x98] sm:$0xff] %vm1175_vm0, %v1765_v29  ;;  %1792 = vpow2.f32 %v1370_v19 }
 0x154   : > { %v1769_v35 = vpop.eup %1768  ;;  %1227 = vst.msk [vmem:[%s1980_s14 + $0x198] sm:$0xff] %vm1175_vm0, %v1767_v32  ;;  %1794 = vpow2.f32 %v1402_v22 }
 0x155   : > { %v1771_v39 = vpop.eup %1770  ;;  %1193 = vst.msk [vmem:[%s1980_s14 + $0x88] sm:$0xff] %vm1175_vm0, %v1769_v35  ;;  %1796 = vpow2.f32 %v1373_v26 }
 0x156   : > { %v1773_v44 = vpop.eup %1772  ;;  %1225 = vst.msk [vmem:[%s1980_s14 + $0x188] sm:$0xff] %vm1175_vm0, %v1771_v39  ;;  %1798 = vpow2.f32 %v1405_v30 }
 0x157   : > { %v1775_v47 = vpop.eup %1774  ;;  %1198 = vst.msk [vmem:[%s1980_s14 + $0xb0] sm:$0xff] %vm1175_vm0, %v1773_v44  ;;  %1800 = vpow2.f32 %v1371_v33 }
 0x158   : > { %v1777_v50 = vpop.eup %1776  ;;  %1230 = vst.msk [vmem:[%s1980_s14 + $0x1b0] sm:$0xff] %vm1175_vm0, %v1775_v47  ;;  %1802 = vpow2.f32 %v1403_v36 }
 0x159   : > { %v1779_v53 = vpop.eup %1778  ;;  %1196 = vst.msk [vmem:[%s1980_s14 + $0xa0] sm:$0xff] %vm1175_vm0, %v1777_v50  ;;  %1804 = vpow2.f32 %v1376_v41 }
 0x15a   : > { %v1781_v55 = vpop.eup %1780  ;;  %1228 = vst.msk [vmem:[%s1980_s14 + $0x1a0] sm:$0xff] %vm1175_vm0, %v1779_v53  ;;  %1806 = vpow2.f32 %v1408_v45 }
 0x15b   : > { %v1783_v57 = vpop.eup %1782  ;;  %1199 = vst.msk [vmem:[%s1980_s14 + $0xb8] sm:$0xff] %vm1175_vm0, %v1781_v55  ;;  %1808 = vpow2.f32 %v1374_v48 }
 0x15c   : > { %v1785_v59 = vpop.eup %1784  ;;  %1231 = vst.msk [vmem:[%s1980_s14 + $0x1b8] sm:$0xff] %vm1175_vm0, %v1783_v57  ;;  %1810 = vpow2.f32 %v1406_v51 }
 0x15d   : > { %v1787_v60 = vpop.eup %1786  ;;  %1197 = vst.msk [vmem:[%s1980_s14 + $0xa8] sm:$0xff] %vm1175_vm0, %v1785_v59  ;;  %1812 = vpow2.f32 %v1377_v54 }
 0x15e   : > { %v1789_v61 = vpop.eup %1788  ;;  %1229 = vst.msk [vmem:[%s1980_s14 + $0x1a8] sm:$0xff] %vm1175_vm0, %v1787_v60  ;;  %1814 = vpow2.f32 %v1409_v56 }
 0x15f   : > { %v1791_v62 = vpop.eup %1790  ;;  %v1009_v63 = vadd.f32 1.0, %v1789_v61  ;;  %1816 = vpow2.f32 %v1375_v58 }
 0x160   : > { %v1793_v0 = vpop.eup %1792  ;;  %v1041_v1 = vadd.f32 1.0, %v1791_v62  ;;  %1818 = vpow2.f32 %v1407_v40 }
 0x161   : > { %v1795_v2 = vpop.eup %1794  ;;  %1820 = vrcp.f32 %v1009_v63  ;;  %v1007_v3 = vadd.f32 1.0, %v1793_v0 }
 0x162   : > { %v1797_v4 = vpop.eup %1796  ;;  %1822 = vrcp.f32 %v1041_v1  ;;  %v1039_v5 = vadd.f32 1.0, %v1795_v2 }
 0x163   : > { %v1799_v6 = vpop.eup %1798  ;;  %1824 = vrcp.f32 %v1007_v3  ;;  %v1010_v7 = vadd.f32 1.0, %v1797_v4 }
 0x164   : > { %v1801_v8 = vpop.eup %1800  ;;  %1826 = vrcp.f32 %v1039_v5  ;;  %v1042_v9 = vadd.f32 1.0, %v1799_v6 }
 0x165   : > { %v1803_v10 = vpop.eup %1802  ;;  %1828 = vrcp.f32 %v1010_v7  ;;  %v1008_v11 = vadd.f32 1.0, %v1801_v8 }
 0x166   : > { %v1805_v12 = vpop.eup %1804  ;;  %1830 = vrcp.f32 %v1042_v9  ;;  %v1040_v13 = vadd.f32 1.0, %v1803_v10 }
 0x167   : > { %v1807_v14 = vpop.eup %1806  ;;  %1832 = vrcp.f32 %v1008_v11  ;;  %v1013_v15 = vadd.f32 1.0, %v1805_v12 }
 0x168   : > { %v1809_v16 = vpop.eup %1808  ;;  %1834 = vrcp.f32 %v1040_v13  ;;  %v1045_v17 = vadd.f32 1.0, %v1807_v14 }
 0x169   : > { %v1811_v18 = vpop.eup %1810  ;;  %1836 = vrcp.f32 %v1013_v15  ;;  %v1011_v19 = vadd.f32 1.0, %v1809_v16 }
 0x16a   : > { %v1813_v20 = vpop.eup %1812  ;;  %1838 = vrcp.f32 %v1045_v17  ;;  %v1043_v21 = vadd.f32 1.0, %v1811_v18 }
 0x16b   : > { %v1815_v22 = vpop.eup %1814  ;;  %1840 = vrcp.f32 %v1011_v19  ;;  %v1014_v23 = vadd.f32 1.0, %v1813_v20 }
 0x16c   : > { %v1817_v24 = vpop.eup %1816  ;;  %1842 = vrcp.f32 %v1043_v21  ;;  %v1046_v25 = vadd.f32 1.0, %v1815_v22 }
 0x16d   : > { %v1819_v26 = vpop.eup %1818  ;;  %1844 = vrcp.f32 %v1014_v23  ;;  %v1012_v27 = vadd.f32 1.0, %v1817_v24 }
 0x16e   : > { %v1821_v28 = vpop.eup %1820  ;;  %1846 = vrcp.f32 %v1046_v25  ;;  %v1044_v29 = vadd.f32 1.0, %v1819_v26 }
 0x16f   : > { %v1823_v30 = vpop.eup %1822  ;;  %1202 = vst.msk [vmem:[%s1980_s14 + $0xd0] sm:$0xff] %vm1175_vm0, %v1821_v28  ;;  %1848 = vrcp.f32 %v1012_v27 }
 0x170   : > { %v1825_v31 = vpop.eup %1824  ;;  %1234 = vst.msk [vmem:[%s1980_s14 + $0x1d0] sm:$0xff] %vm1175_vm0, %v1823_v30  ;;  %1850 = vrcp.f32 %v1044_v29 }
 0x171   : > { %v1827_v32 = vpop.eup %1826  ;;  %1200 = vst.msk [vmem:[%s1980_s14 + $0xc0] sm:$0xff] %vm1175_vm0, %v1825_v31 }
 0x172   : > { %v1829_v33 = vpop.eup %1828  ;;  %1232 = vst.msk [vmem:[%s1980_s14 + $0x1c0] sm:$0xff] %vm1175_vm0, %v1827_v32 }
 0x173   : > { %v1831_v34 = vpop.eup %1830  ;;  %1203 = vst.msk [vmem:[%s1980_s14 + $0xd8] sm:$0xff] %vm1175_vm0, %v1829_v33 }
 0x174   : > { %v1833_v35 = vpop.eup %1832  ;;  %1235 = vst.msk [vmem:[%s1980_s14 + $0x1d8] sm:$0xff] %vm1175_vm0, %v1831_v34 }
 0x175   : > { %v1835_v36 = vpop.eup %1834  ;;  %1201 = vst.msk [vmem:[%s1980_s14 + $0xc8] sm:$0xff] %vm1175_vm0, %v1833_v35 }
 0x176   : > { %v1837_v37 = vpop.eup %1836  ;;  %1233 = vst.msk [vmem:[%s1980_s14 + $0x1c8] sm:$0xff] %vm1175_vm0, %v1835_v36 }
 0x177   : > { %v1839_v38 = vpop.eup %1838  ;;  %1206 = vst.msk [vmem:[%s1980_s14 + $0xf0] sm:$0xff] %vm1175_vm0, %v1837_v37 }
 0x178   : > { %v1841_v39 = vpop.eup %1840  ;;  %1238 = vst.msk [vmem:[%s1980_s14 + $0x1f0] sm:$0xff] %vm1175_vm0, %v1839_v38 }
 0x179   : > { %v1843_v41 = vpop.eup %1842  ;;  %1204 = vst.msk [vmem:[%s1980_s14 + $0xe0] sm:$0xff] %vm1175_vm0, %v1841_v39 }
 0x17a   : > { %v1845_v42 = vpop.eup %1844  ;;  %1236 = vst.msk [vmem:[%s1980_s14 + $0x1e0] sm:$0xff] %vm1175_vm0, %v1843_v41 }
 0x17b   : > { %v1847_v43 = vpop.eup %1846  ;;  %1207 = vst.msk [vmem:[%s1980_s14 + $0xf8] sm:$0xff] %vm1175_vm0, %v1845_v42 }
 0x17c   : > { %v1849_v44 = vpop.eup %1848  ;;  %1239 = vst.msk [vmem:[%s1980_s14 + $0x1f8] sm:$0xff] %vm1175_vm0, %v1847_v43 }
 0x17d   : > { %v1851_v45 = vpop.eup %1850  ;;  %1205 = vst.msk [vmem:[%s1980_s14 + $0xe8] sm:$0xff] %vm1175_vm0, %v1849_v44 }
 0x17e   : > { %1237 = vst.msk [vmem:[%s1980_s14 + $0x1e8] sm:$0xff] %vm1175_vm0, %v1851_v45 }
 0x17f PF: > { %s13_s12 = sadd.s32 1, %s1858_s12  }
 0x180   : > { %p10_p4 = scmp.ge.s32.totalorder %s13_s12, 7  }
 0x182   :  { %12 = sbr.rel (!%p10_p4) target bundleno = 1 (0x1), region = 62 }

</bundles_post_ra>
